<compile_context>
chip_gen: v6e
topology: v6e:2x2x1
jax: 0.10.0
libtpu: 0.0.40
codegen_flags: <defaults>
</compile_context>

<pallas_src>
import functools
import math

import jax
import jax.numpy as jnp
from jax import lax
from jax.experimental import pallas as pl
from jax.experimental.pallas import tpu as pltpu

# --- model hyper-parameters (from GNNNet.__init__) ---
C_IN = 13            # SplineConv in_channels
C_OUT = 64           # SplineConv out_channels
DIM = 3              # pseudo-coordinate dimensionality
KS = 5               # kernel_size per dimension
DEGREE = 1           # linear (open) B-spline
K = KS ** DIM        # 125 spline weight matrices
K_PAD = 128          # lane-aligned spline-basis width
N_CLASSES = 3        # Linear(64, 3)
BN_EPS = 1e-5
NORM_EPS = 1e-12


def _gnn_kernel(n_nodes, n_graphs, c_group,
                bcoef_ref, src_ref, dst_ref,
                x_ref, w_spline_ref, w_root_ref, bias_ref,
                inv_deg_ref, batch_ref, inv_cnt_ref, lin_w_ref, lin_b_ref,
                o_ref, agg_ref):
    e_tile = bcoef_ref.shape[0]
    gw = c_group * C_OUT
    n_groups = w_spline_ref.shape[1] // gw

    @pl.when(pl.program_id(0) == 0)
    def _init():
        agg_ref[...] = jnp.zeros_like(agg_ref)

    # ---- gather x_j = x[src]: exact 0/1 mask built in-kernel (bf16), MXU matmul ----
    src = src_ref[...]                                              # (TE, 1) i32
    gmask = jnp.where(
        lax.broadcasted_iota(jnp.int32, (e_tile, n_nodes), 1) == src,
        1.0, 0.0).astype(jnp.bfloat16)                              # (TE, N)
    x_src = jnp.dot(gmask, x_ref[...].astype(jnp.bfloat16),
                    preferred_element_type=jnp.float32)             # (TE, C_IN) f32

    # ---- spline messages: widened MXU chunks, no VMEM scratch round-trip ----------
    #   t[e, cl*64+o] = sum_k bcoef[e,k] * W[c, k, o]   (c = g*c_group + cl)
    #   msg[e, o]    += x_src[e, c] * t[e, cl*64+o]     (VPU FMA, hides under MXU)
    bco = bcoef_ref[...]                                            # (TE, 128) bf16
    msg = jnp.zeros((e_tile, C_OUT), jnp.float32)
    for g in range(n_groups):                                       # static unroll
        t = jnp.dot(bco, w_spline_ref[:, g * gw:(g + 1) * gw],
                    preferred_element_type=jnp.float32)             # (TE, gw) f32
        for cl in range(c_group):
            c = g * c_group + cl
            if c < C_IN:                                            # skip zero-pad chans
                msg = msg + x_src[:, c:c + 1] * t[:, cl * C_OUT:(cl + 1) * C_OUT]

    # ---- scatter-add messages to destination nodes (mean scaling applied later) ---
    dst = dst_ref[...]                                              # (1, TE) i32
    smask = jnp.where(
        lax.broadcasted_iota(jnp.int32, (n_nodes, e_tile), 0) == dst,
        1.0, 0.0).astype(jnp.bfloat16)                              # (N, TE)
    agg_ref[...] += jnp.dot(smask, msg.astype(jnp.bfloat16),
                            preferred_element_type=jnp.float32)     # (N, C_OUT)

    # ---- last edge tile: node update, ELU, pool, (BN-folded) linear, normalize ----
    @pl.when(pl.program_id(0) == pl.num_programs(0) - 1)
    def _finalize():
        x = x_ref[...]
        node = (agg_ref[...] * inv_deg_ref[...]                     # mean aggregation
                + jnp.dot(x, w_root_ref[...],
                          preferred_element_type=jnp.float32)
                + bias_ref[...])
        # ELU(alpha=1); exp evaluated on clamped arg so the dead branch is finite.
        node = jnp.where(node > 0, node, jnp.exp(jnp.minimum(node, 0.0)) - 1.0)

        # global_mean_pool: exact 0/1 mask (f32) + f32 1/count row scale
        batch = batch_ref[...]                                      # (1, N) i32
        pmask = jnp.where(
            lax.broadcasted_iota(jnp.int32, (n_graphs, n_nodes), 0) == batch,
            1.0, 0.0)                                               # (G, N) f32
        pooled = jnp.dot(pmask, node,
                         preferred_element_type=jnp.float32) * inv_cnt_ref[...]

        # BatchNorm folded into lin_w / lin_b in the wrapper; Dropout = identity.
        out = jnp.dot(pooled, lin_w_ref[...],
                      preferred_element_type=jnp.float32) + lin_b_ref[...]

        # F.normalize: out / max(||out||, eps)  ==  out * rsqrt(max(||out||^2, eps^2))
        sq = jnp.sum(out * out, axis=1, keepdims=True)
        o_ref[...] = out * lax.rsqrt(jnp.maximum(sq, NORM_EPS * NORM_EPS))


def spline_basis_dense(pseudo):
    """Open linear B-spline basis as a dense (E, K_PAD) coefficient matrix.

    Matches torch_spline_conv for pseudo in [0, 1): v = u * (ks - degree); for each of
    the (degree+1)^dim = 8 offsets, basis = prod_d (frac or 1-frac) and the flat index
    is sum_d ((floor(v_d)+k_d) % ks) * ks^d.  Columns 125..127 are zero padding.
    TODO(synk): cross-check the pseudo == 1.0 upper-boundary wrap vs torch_spline_conv.
    """
    E = pseudo.shape[0]
    v = pseudo.astype(jnp.float32) * (KS - DEGREE)
    f = jnp.floor(v)
    frac = v - f
    f = f.astype(jnp.int32)
    kr = jnp.arange(K, dtype=jnp.int32)
    coef = jnp.zeros((E, K), jnp.float32)
    for s in range((DEGREE + 1) ** DIM):
        b = jnp.ones((E,), jnp.float32)
        wi = jnp.zeros((E,), jnp.int32)
        off = 1
        for d in range(DIM):
            kmod = (s // ((DEGREE + 1) ** d)) % (DEGREE + 1)
            b = b * (frac[:, d] if kmod == 1 else (1.0 - frac[:, d]))
            wi = wi + ((f[:, d] + kmod) % KS) * off
            off *= KS
        coef = coef + (wi[:, None] == kr[None, :]).astype(jnp.float32) * b[:, None]
    return jnp.pad(coef, ((0, 0), (0, K_PAD - K)))


def init_params(key):
    k1, k2, k3, k4 = jax.random.split(key, 4)
    return dict(
        w_spline=jax.random.normal(k1, (C_IN, K, C_OUT), jnp.float32) * 0.05,
        w_root=jax.random.normal(k2, (C_IN, C_OUT), jnp.float32) * 0.05,
        bias=jnp.zeros((1, C_OUT), jnp.float32),
        # BatchNorm(64) inference stats
        gamma=jnp.ones((1, C_OUT), jnp.float32),
        beta=jnp.zeros((1, C_OUT), jnp.float32),
        run_mean=jnp.zeros((1, C_OUT), jnp.float32),
        run_var=jnp.ones((1, C_OUT), jnp.float32),
        lin_w=jax.random.normal(k3, (C_OUT, N_CLASSES), jnp.float32) * 0.1,
        lin_b=jax.random.normal(k4, (1, N_CLASSES), jnp.float32) * 0.1,
    )


def _vmem_tile_bytes(shape, dtype):
    """Bytes a 2-D block occupies in VMEM after (sublane, 128-lane) padding."""
    item = jnp.dtype(dtype).itemsize
    sub = 8 * (4 // item)                          # sub-32-bit packs along sublanes
    r = -(-shape[0] // sub) * sub
    c = -(-shape[1] // 128) * 128
    return r * c * item


def gnn_forward(batch, x, edge_index, pseudo, params, num_graphs, *,
                edge_tile=512, channel_group=2):
    """channel_group=2 -> 128-wide MXU chunks (v5e sweet spot, fits vregs at TE=256);
    channel_group=4 -> 256-wide chunks (full column use on v6e/v7x 2x256x256 MXU)."""
    N = x.shape[0]
    E = edge_index.shape[1]
    src = edge_index[0].astype(jnp.int32)
    dst = edge_index[1].astype(jnp.int32)

    # ---------------- JAX glue: basis, degrees, graph sizes, param folding ----------
    bcoef = spline_basis_dense(pseudo)                                  # (E, 128) f32

    deg = jnp.zeros((N,), jnp.float32).at[dst].add(1.0)                 # mean aggr
    inv_deg = (1.0 / jnp.maximum(deg, 1.0)).reshape(N, 1)
    cnt = jnp.zeros((num_graphs,), jnp.float32).at[batch].add(1.0)
    inv_cnt = (1.0 / jnp.maximum(cnt, 1.0)).reshape(num_graphs, 1)

    # Fold BatchNorm (running stats, inference) into the Linear head (exact algebra).
    bn_scale = params["gamma"] / jnp.sqrt(params["run_var"] + BN_EPS)   # (1, 64)
    bn_shift = params["beta"] - params["run_mean"] * bn_scale
    lin_w_f = params["lin_w"] * bn_scale.reshape(C_OUT, 1)              # (64, 3)
    lin_b_f = bn_shift @ params["lin_w"] + params["lin_b"]              # (1, 3)

    # Spline weights widened for the MXU: W_wide[k, c*64 + o] = w_spline[c, k, o],
    # K padded 125->128 and channels padded 13->ceil(13/g)*g (zero pad => exact).
    cg = max(1, min(int(channel_group), C_IN))
    n_groups = pl.cdiv(C_IN, cg)
    c_pad = n_groups * cg
    w = jnp.transpose(params["w_spline"], (1, 0, 2))                    # (K, 13, 64)
    w = jnp.pad(w, ((0, K_PAD - K), (0, c_pad - C_IN), (0, 0)))
    w_sp = w.reshape(K_PAD, c_pad * C_OUT).astype(jnp.bfloat16)

    # ------------- pad edges to a multiple of the (128-aligned) edge tile -----------
    te = max(128, (edge_tile // 128) * 128)
    e_pad = pl.cdiv(E, te) * te
    n_tiles = e_pad // te
    # Padded edge rows get an all-zero basis row, so they contribute exactly nothing
    # even though their src/dst indices alias node 0.
    bcoef = jnp.pad(bcoef, ((0, e_pad - E), (0, 0))).astype(jnp.bfloat16)
    src2 = jnp.pad(src, (0, e_pad - E)).reshape(e_pad, 1)
    dst2 = jnp.pad(dst, (0, e_pad - E)).reshape(1, e_pad)
    batch2 = batch.astype(jnp.int32).reshape(1, N)

    operands = (bcoef, src2, dst2, x, w_sp, params["w_root"], params["bias"],
                inv_deg, batch2, inv_cnt, lin_w_f, lin_b_f)

    # ------------------------------- cost estimate ----------------------------------
    bytes_accessed = sum(math.prod(a.shape) * a.dtype.itemsize for a in operands)
    bytes_accessed += num_graphs * N_CLASSES * 4
    flops = 2 * (e_pad * N * C_IN                     # gather matmul
                 + e_pad * K_PAD * c_pad * C_OUT      # widened spline chunks
                 + e_pad * C_IN * C_OUT               # per-channel VPU weighted sum
                 + N * e_pad * C_OUT                  # scatter matmul
                 + N * C_IN * C_OUT                   # root weight
                 + num_graphs * N * C_OUT             # global mean pool
                 + num_graphs * C_OUT * N_CLASSES)    # linear head

    # ----------------------- VMEM budget (generation-aware) -------------------------
    tile_bytes = 2 * (_vmem_tile_bytes((te, K_PAD), jnp.bfloat16)       # double-buffered
                      + _vmem_tile_bytes((te, 1), jnp.int32)
                      + _vmem_tile_bytes((1, te), jnp.int32))
    inv_bytes = (_vmem_tile_bytes((N, C_IN), jnp.float32)               # single-buffered
                 + _vmem_tile_bytes((K_PAD, c_pad * C_OUT), jnp.bfloat16)
                 + _vmem_tile_bytes((C_IN, C_OUT), jnp.float32)
                 + _vmem_tile_bytes((1, C_OUT), jnp.float32)
                 + _vmem_tile_bytes((N, 1), jnp.float32)
                 + _vmem_tile_bytes((1, N), jnp.int32)
                 + _vmem_tile_bytes((num_graphs, 1), jnp.float32)
                 + _vmem_tile_bytes((C_OUT, N_CLASSES), jnp.float32)
                 + _vmem_tile_bytes((1, N_CLASSES), jnp.float32))
    scratch_bytes = _vmem_tile_bytes((N, C_OUT), jnp.float32)
    transient_bytes = (_vmem_tile_bytes((te, cg * C_OUT), jnp.float32)  # chunk t
                       + 2 * _vmem_tile_bytes((te, C_OUT), jnp.float32) # msg + x_src
                       + 2 * _vmem_tile_bytes((te, max(N, 128)), jnp.bfloat16))  # masks
    need = (tile_bytes + inv_bytes + scratch_bytes + transient_bytes
            + _vmem_tile_bytes((num_graphs, N_CLASSES), jnp.float32))
    try:
        vmem_cap = int(pltpu.get_tpu_info().vmem_capacity_bytes)
    except Exception:
        vmem_cap = 64 * 1024 * 1024                  # v7x per-TC capacity (safe floor)
    vmem_limit = int(min(vmem_cap, max(16 * 1024 * 1024, 2 * need)))

    # --------------------------------- pallas_call -----------------------------------
    def build(single_buffer_invariants):
        if single_buffer_invariants:
            def invariant(shape):                    # grid-invariant: 1 buffer, 1 DMA
                return pl.BlockSpec(shape, lambda i: (0, 0),
                                    pipeline_mode=pl.Buffered(1))
        else:
            def invariant(shape):
                return pl.BlockSpec(shape, lambda i: (0, 0))

        grid_spec = pltpu.PrefetchScalarGridSpec(
            num_scalar_prefetch=0,
            grid=(n_tiles,),
            in_specs=[
                pl.BlockSpec((te, K_PAD), lambda i: (i, 0)),      # bcoef (edge tile)
                pl.BlockSpec((te, 1), lambda i: (i, 0)),          # src indices
                pl.BlockSpec((1, te), lambda i: (0, i)),          # dst indices
                invariant((N, C_IN)),                             # x (resident)
                invariant((K_PAD, c_pad * C_OUT)),                # widened spline W
                invariant((C_IN, C_OUT)),                         # root weight
                invariant((1, C_OUT)),                            # conv bias
                invariant((N, 1)),                                # 1/deg (f32)
                invariant((1, N)),                                # batch ids
                invariant((num_graphs, 1)),                       # 1/count (f32)
                invariant((C_OUT, N_CLASSES)),                    # BN-folded W
                invariant((1, N_CLASSES)),                        # BN-folded b
            ],
            out_specs=pl.BlockSpec((num_graphs, N_CLASSES), lambda i: (0, 0)),
            scratch_shapes=[pltpu.VMEM((N, C_OUT), jnp.float32)], # node accumulator
        )
        return pl.pallas_call(
            functools.partial(_gnn_kernel, N, num_graphs, cg),
            out_shape=jax.ShapeDtypeStruct((num_graphs, N_CLASSES), jnp.float32),
            grid_spec=grid_spec,
            compiler_params=pltpu.CompilerParams(
                dimension_semantics=("arbitrary",),
                vmem_limit_bytes=vmem_limit,
            ),
            cost_estimate=pl.CostEstimate(
                flops=int(flops),
                transcendentals=int(N * C_OUT + num_graphs),
                bytes_accessed=int(bytes_accessed),
            ),
        )

    try:
        return build(True)(*operands)
    except Exception:
        # TODO(synk): drop this fallback once pl.Buffered(1) single-buffering is
        # confirmed on the deployed jax/libtpu; it only changes VMEM footprint.
        return build(False)(*operands)


if __name__ == "__main__":
    key = jax.random.PRNGKey(0)
    kx, ke, kp, kw = jax.random.split(key, 4)

    N, E, G = 12, 200, 2
    x = jax.random.normal(kx, (N, C_IN), jnp.float32)
    edge_index = jax.random.randint(ke, (2, E), 0, N, dtype=jnp.int32)
    pseudo = jax.random.uniform(kp, (E, DIM), dtype=jnp.float32)     # in [0, 1)
    batch = jnp.concatenate([jnp.zeros((N // 2,), jnp.int32),
                             jnp.ones((N - N // 2,), jnp.int32)])

    params = init_params(kw)

    # edge_tile=128 => 2 edge tiles, exercising the pipelined accumulate path.
    out = gnn_forward(batch, x, edge_index, pseudo, params, G,
                      edge_tile=128, channel_group=2)
    jax.block_until_ready(out)
    assert out.shape == (G, N_CLASSES)
    assert bool(jnp.all(jnp.isfinite(out)))
    print("KERNEL_OK")
</pallas_src>

<mosaic_0001>
module attributes {stable_mosaic.version = 11 : i64} {
  func.func @_gnn_kernel(%arg0: i32, %arg1: memref<128x128xbf16, #tpu.memory_space<vmem>>, %arg2: memref<128x1xi32, #tpu.memory_space<vmem>>, %arg3: memref<1x128xi32, #tpu.memory_space<vmem>>, %arg4: memref<12x13xf32, #tpu.memory_space<vmem>>, %arg5: memref<128x896xbf16, #tpu.memory_space<vmem>>, %arg6: memref<13x64xf32, #tpu.memory_space<vmem>>, %arg7: memref<1x64xf32, #tpu.memory_space<vmem>>, %arg8: memref<12x1xf32, #tpu.memory_space<vmem>>, %arg9: memref<1x12xi32, #tpu.memory_space<vmem>>, %arg10: memref<2x1xf32, #tpu.memory_space<vmem>>, %arg11: memref<64x3xf32, #tpu.memory_space<vmem>>, %arg12: memref<1x3xf32, #tpu.memory_space<vmem>>, %arg13: memref<2x3xf32, #tpu.memory_space<vmem>>, %arg14: memref<12x64xf32, #tpu.memory_space<vmem>>) attributes {dimension_semantics = [#tpu.dimension_semantics<arbitrary>], iteration_bounds = array<i64: 2>, scalar_prefetch = 0 : i64, scratch_operands = 1 : i64, tpu.core_type = #tpu.core_type<tc>, window_params = [{transform_indices = @transform_0, window_bounds = array<i64: 128, 128>}, {transform_indices = @transform_1, window_bounds = array<i64: 128, 1>}, {transform_indices = @transform_2, window_bounds = array<i64: 1, 128>}, {pipeline_mode = #tpu.pipeline_mode<synchronous>, transform_indices = @transform_3, window_bounds = array<i64: 12, 13>}, {pipeline_mode = #tpu.pipeline_mode<synchronous>, transform_indices = @transform_4, window_bounds = array<i64: 128, 896>}, {pipeline_mode = #tpu.pipeline_mode<synchronous>, transform_indices = @transform_5, window_bounds = array<i64: 13, 64>}, {pipeline_mode = #tpu.pipeline_mode<synchronous>, transform_indices = @transform_6, window_bounds = array<i64: 1, 64>}, {pipeline_mode = #tpu.pipeline_mode<synchronous>, transform_indices = @transform_7, window_bounds = array<i64: 12, 1>}, {pipeline_mode = #tpu.pipeline_mode<synchronous>, transform_indices = @transform_8, window_bounds = array<i64: 1, 12>}, {pipeline_mode = #tpu.pipeline_mode<synchronous>, transform_indices = @transform_9, window_bounds = array<i64: 2, 1>}, {pipeline_mode = #tpu.pipeline_mode<synchronous>, transform_indices = @transform_10, window_bounds = array<i64: 64, 3>}, {pipeline_mode = #tpu.pipeline_mode<synchronous>, transform_indices = @transform_11, window_bounds = array<i64: 1, 3>}, {pipeline_mode = #tpu.pipeline_mode<synchronous>, transform_indices = @transform_12, window_bounds = array<i64: 2, 3>}]} {
    %c0_i32 = arith.constant 0 : i32
    %0 = arith.cmpi eq, %arg0, %c0_i32 : i32
    %1 = arith.extui %0 : i1 to i32
    %c0_i32_0 = arith.constant 0 : i32
    %2 = arith.cmpi ne, %1, %c0_i32_0 : i32
    scf.if %2 {
      %cst_34 = arith.constant 0.000000e+00 : f32
      %111 = vector.broadcast %cst_34 : f32 to vector<12x64xf32>
      %c0_35 = arith.constant 0 : index
      %c0_36 = arith.constant 0 : index
      %112 = vector.load %arg14[%c0_35, %c0_36] : memref<12x64xf32, #tpu.memory_space<vmem>>, vector<12x64xf32>
      tpu.vector_store %arg14[%c0_35, %c0_36], %111 {strides = array<i32>} : memref<12x64xf32, #tpu.memory_space<vmem>>, vector<12x64xf32>,
    } else {
    }
    %c0 = arith.constant 0 : index
    %c0_1 = arith.constant 0 : index
    %3 = vector.load %arg2[%c0, %c0_1] : memref<128x1xi32, #tpu.memory_space<vmem>>, vector<128x1xi32>
    %4 = tpu.iota {dimensions = array<i32: 1>} : vector<128x12xi32>
    %5 = vector.broadcast %3 : vector<128x1xi32> to vector<128x12xi32>
    %6 = arith.cmpi eq, %4, %5 : vector<128x12xi32>
    %cst = arith.constant 1.000000e+00 : f32
    %cst_2 = arith.constant 0.000000e+00 : f32
    %7 = vector.broadcast %cst : f32 to vector<128x12xf32>
    %8 = vector.broadcast %cst_2 : f32 to vector<128x12xf32>
    %9 = arith.select %6, %7, %8 : vector<128x12xi1>, vector<128x12xf32>
    %10 = arith.truncf %9 : vector<128x12xf32> to vector<128x12xbf16>
    %c0_3 = arith.constant 0 : index
    %c0_4 = arith.constant 0 : index
    %11 = vector.load %arg4[%c0_3, %c0_4] : memref<12x13xf32, #tpu.memory_space<vmem>>, vector<12x13xf32>
    %12 = arith.truncf %11 : vector<12x13xf32> to vector<12x13xbf16>
    %cst_5 = arith.constant dense<0.000000e+00> : vector<128x13xf32>
    %13 = tpu.matmul %10, %12, %cst_5 {dimension_numbers = #tpu.dot_dimension_numbers<[1], [0], [0], [1], [0, 0, 1, 1], [], []>} : vector<128x12xbf16>, vector<12x13xbf16>, vector<128x13xf32> -> vector<128x13xf32>
    %c0_6 = arith.constant 0 : index
    %c0_7 = arith.constant 0 : index
    %14 = vector.load %arg1[%c0_6, %c0_7] : memref<128x128xbf16, #tpu.memory_space<vmem>>, vector<128x128xbf16>
    %cst_8 = arith.constant 0.000000e+00 : f32
    %15 = vector.broadcast %cst_8 : f32 to vector<128x64xf32>
    %c0_9 = arith.constant 0 : index
    %c0_10 = arith.constant 0 : index
    %16 = vector.load %arg5[%c0_9, %c0_10] : memref<128x896xbf16, #tpu.memory_space<vmem>>, vector<128x128xbf16>
    %cst_11 = arith.constant dense<0.000000e+00> : vector<128x128xf32>
    %17 = tpu.matmul %14, %16, %cst_11 {dimension_numbers = #tpu.dot_dimension_numbers<[1], [0], [0], [1], [0, 0, 1, 1], [], []>} : vector<128x128xbf16>, vector<128x128xbf16>, vector<128x128xf32> -> vector<128x128xf32>
    %18 = vector.extract_strided_slice %13 {offsets = [0, 0], sizes = [128, 1], strides = [1, 1]} : vector<128x13xf32> to vector<128x1xf32>
    %19 = vector.extract_strided_slice %17 {offsets = [0, 0], sizes = [128, 64], strides = [1, 1]} : vector<128x128xf32> to vector<128x64xf32>
    %20 = vector.broadcast %18 : vector<128x1xf32> to vector<128x64xf32>
    %21 = arith.mulf %20, %19 : vector<128x64xf32>
    %22 = arith.addf %15, %21 : vector<128x64xf32>
    %23 = vector.extract_strided_slice %13 {offsets = [0, 1], sizes = [128, 1], strides = [1, 1]} : vector<128x13xf32> to vector<128x1xf32>
    %24 = vector.extract_strided_slice %17 {offsets = [0, 64], sizes = [128, 64], strides = [1, 1]} : vector<128x128xf32> to vector<128x64xf32>
    %25 = vector.broadcast %23 : vector<128x1xf32> to vector<128x64xf32>
    %26 = arith.mulf %25, %24 : vector<128x64xf32>
    %27 = arith.addf %22, %26 : vector<128x64xf32>
    %c0_12 = arith.constant 0 : index
    %c128 = arith.constant 128 : index
    %28 = vector.load %arg5[%c0_12, %c128] : memref<128x896xbf16, #tpu.memory_space<vmem>>, vector<128x128xbf16>
    %cst_13 = arith.constant dense<0.000000e+00> : vector<128x128xf32>
    %29 = tpu.matmul %14, %28, %cst_13 {dimension_numbers = #tpu.dot_dimension_numbers<[1], [0], [0], [1], [0, 0, 1, 1], [], []>} : vector<128x128xbf16>, vector<128x128xbf16>, vector<128x128xf32> -> vector<128x128xf32>
    %30 = vector.extract_strided_slice %13 {offsets = [0, 2], sizes = [128, 1], strides = [1, 1]} : vector<128x13xf32> to vector<128x1xf32>
    %31 = vector.extract_strided_slice %29 {offsets = [0, 0], sizes = [128, 64], strides = [1, 1]} : vector<128x128xf32> to vector<128x64xf32>
    %32 = vector.broadcast %30 : vector<128x1xf32> to vector<128x64xf32>
    %33 = arith.mulf %32, %31 : vector<128x64xf32>
    %34 = arith.addf %27, %33 : vector<128x64xf32>
    %35 = vector.extract_strided_slice %13 {offsets = [0, 3], sizes = [128, 1], strides = [1, 1]} : vector<128x13xf32> to vector<128x1xf32>
    %36 = vector.extract_strided_slice %29 {offsets = [0, 64], sizes = [128, 64], strides = [1, 1]} : vector<128x128xf32> to vector<128x64xf32>
    %37 = vector.broadcast %35 : vector<128x1xf32> to vector<128x64xf32>
    %38 = arith.mulf %37, %36 : vector<128x64xf32>
    %39 = arith.addf %34, %38 : vector<128x64xf32>
    %c0_14 = arith.constant 0 : index
    %c256 = arith.constant 256 : index
    %40 = vector.load %arg5[%c0_14, %c256] : memref<128x896xbf16, #tpu.memory_space<vmem>>, vector<128x128xbf16>
    %cst_15 = arith.constant dense<0.000000e+00> : vector<128x128xf32>
    %41 = tpu.matmul %14, %40, %cst_15 {dimension_numbers = #tpu.dot_dimension_numbers<[1], [0], [0], [1], [0, 0, 1, 1], [], []>} : vector<128x128xbf16>, vector<128x128xbf16>, vector<128x128xf32> -> vector<128x128xf32>
    %42 = vector.extract_strided_slice %13 {offsets = [0, 4], sizes = [128, 1], strides = [1, 1]} : vector<128x13xf32> to vector<128x1xf32>
    %43 = vector.extract_strided_slice %41 {offsets = [0, 0], sizes = [128, 64], strides = [1, 1]} : vector<128x128xf32> to vector<128x64xf32>
    %44 = vector.broadcast %42 : vector<128x1xf32> to vector<128x64xf32>
    %45 = arith.mulf %44, %43 : vector<128x64xf32>
    %46 = arith.addf %39, %45 : vector<128x64xf32>
    %47 = vector.extract_strided_slice %13 {offsets = [0, 5], sizes = [128, 1], strides = [1, 1]} : vector<128x13xf32> to vector<128x1xf32>
    %48 = vector.extract_strided_slice %41 {offsets = [0, 64], sizes = [128, 64], strides = [1, 1]} : vector<128x128xf32> to vector<128x64xf32>
    %49 = vector.broadcast %47 : vector<128x1xf32> to vector<128x64xf32>
    %50 = arith.mulf %49, %48 : vector<128x64xf32>
    %51 = arith.addf %46, %50 : vector<128x64xf32>
    %c0_16 = arith.constant 0 : index
    %c384 = arith.constant 384 : index
    %52 = vector.load %arg5[%c0_16, %c384] : memref<128x896xbf16, #tpu.memory_space<vmem>>, vector<128x128xbf16>
    %cst_17 = arith.constant dense<0.000000e+00> : vector<128x128xf32>
    %53 = tpu.matmul %14, %52, %cst_17 {dimension_numbers = #tpu.dot_dimension_numbers<[1], [0], [0], [1], [0, 0, 1, 1], [], []>} : vector<128x128xbf16>, vector<128x128xbf16>, vector<128x128xf32> -> vector<128x128xf32>
    %54 = vector.extract_strided_slice %13 {offsets = [0, 6], sizes = [128, 1], strides = [1, 1]} : vector<128x13xf32> to vector<128x1xf32>
    %55 = vector.extract_strided_slice %53 {offsets = [0, 0], sizes = [128, 64], strides = [1, 1]} : vector<128x128xf32> to vector<128x64xf32>
    %56 = vector.broadcast %54 : vector<128x1xf32> to vector<128x64xf32>
    %57 = arith.mulf %56, %55 : vector<128x64xf32>
    %58 = arith.addf %51, %57 : vector<128x64xf32>
    %59 = vector.extract_strided_slice %13 {offsets = [0, 7], sizes = [128, 1], strides = [1, 1]} : vector<128x13xf32> to vector<128x1xf32>
    %60 = vector.extract_strided_slice %53 {offsets = [0, 64], sizes = [128, 64], strides = [1, 1]} : vector<128x128xf32> to vector<128x64xf32>
    %61 = vector.broadcast %59 : vector<128x1xf32> to vector<128x64xf32>
    %62 = arith.mulf %61, %60 : vector<128x64xf32>
    %63 = arith.addf %58, %62 : vector<128x64xf32>
    %c0_18 = arith.constant 0 : index
    %c512 = arith.constant 512 : index
    %64 = vector.load %arg5[%c0_18, %c512] : memref<128x896xbf16, #tpu.memory_space<vmem>>, vector<128x128xbf16>
    %cst_19 = arith.constant dense<0.000000e+00> : vector<128x128xf32>
    %65 = tpu.matmul %14, %64, %cst_19 {dimension_numbers = #tpu.dot_dimension_numbers<[1], [0], [0], [1], [0, 0, 1, 1], [], []>} : vector<128x128xbf16>, vector<128x128xbf16>, vector<128x128xf32> -> vector<128x128xf32>
    %66 = vector.extract_strided_slice %13 {offsets = [0, 8], sizes = [128, 1], strides = [1, 1]} : vector<128x13xf32> to vector<128x1xf32>
    %67 = vector.extract_strided_slice %65 {offsets = [0, 0], sizes = [128, 64], strides = [1, 1]} : vector<128x128xf32> to vector<128x64xf32>
    %68 = vector.broadcast %66 : vector<128x1xf32> to vector<128x64xf32>
    %69 = arith.mulf %68, %67 : vector<128x64xf32>
    %70 = arith.addf %63, %69 : vector<128x64xf32>
    %71 = vector.extract_strided_slice %13 {offsets = [0, 9], sizes = [128, 1], strides = [1, 1]} : vector<128x13xf32> to vector<128x1xf32>
    %72 = vector.extract_strided_slice %65 {offsets = [0, 64], sizes = [128, 64], strides = [1, 1]} : vector<128x128xf32> to vector<128x64xf32>
    %73 = vector.broadcast %71 : vector<128x1xf32> to vector<128x64xf32>
    %74 = arith.mulf %73, %72 : vector<128x64xf32>
    %75 = arith.addf %70, %74 : vector<128x64xf32>
    %c0_20 = arith.constant 0 : index
    %c640 = arith.constant 640 : index
    %76 = vector.load %arg5[%c0_20, %c640] : memref<128x896xbf16, #tpu.memory_space<vmem>>, vector<128x128xbf16>
    %cst_21 = arith.constant dense<0.000000e+00> : vector<128x128xf32>
    %77 = tpu.matmul %14, %76, %cst_21 {dimension_numbers = #tpu.dot_dimension_numbers<[1], [0], [0], [1], [0, 0, 1, 1], [], []>} : vector<128x128xbf16>, vector<128x128xbf16>, vector<128x128xf32> -> vector<128x128xf32>
    %78 = vector.extract_strided_slice %13 {offsets = [0, 10], sizes = [128, 1], strides = [1, 1]} : vector<128x13xf32> to vector<128x1xf32>
    %79 = vector.extract_strided_slice %77 {offsets = [0, 0], sizes = [128, 64], strides = [1, 1]} : vector<128x128xf32> to vector<128x64xf32>
    %80 = vector.broadcast %78 : vector<128x1xf32> to vector<128x64xf32>
    %81 = arith.mulf %80, %79 : vector<128x64xf32>
    %82 = arith.addf %75, %81 : vector<128x64xf32>
    %83 = vector.extract_strided_slice %13 {offsets = [0, 11], sizes = [128, 1], strides = [1, 1]} : vector<128x13xf32> to vector<128x1xf32>
    %84 = vector.extract_strided_slice %77 {offsets = [0, 64], sizes = [128, 64], strides = [1, 1]} : vector<128x128xf32> to vector<128x64xf32>
    %85 = vector.broadcast %83 : vector<128x1xf32> to vector<128x64xf32>
    %86 = arith.mulf %85, %84 : vector<128x64xf32>
    %87 = arith.addf %82, %86 : vector<128x64xf32>
    %c0_22 = arith.constant 0 : index
    %c768 = arith.constant 768 : index
    %88 = vector.load %arg5[%c0_22, %c768] : memref<128x896xbf16, #tpu.memory_space<vmem>>, vector<128x128xbf16>
    %cst_23 = arith.constant dense<0.000000e+00> : vector<128x128xf32>
    %89 = tpu.matmul %14, %88, %cst_23 {dimension_numbers = #tpu.dot_dimension_numbers<[1], [0], [0], [1], [0, 0, 1, 1], [], []>} : vector<128x128xbf16>, vector<128x128xbf16>, vector<128x128xf32> -> vector<128x128xf32>
    %90 = vector.extract_strided_slice %13 {offsets = [0, 12], sizes = [128, 1], strides = [1, 1]} : vector<128x13xf32> to vector<128x1xf32>
    %91 = vector.extract_strided_slice %89 {offsets = [0, 0], sizes = [128, 64], strides = [1, 1]} : vector<128x128xf32> to vector<128x64xf32>
    %92 = vector.broadcast %90 : vector<128x1xf32> to vector<128x64xf32>
    %93 = arith.mulf %92, %91 : vector<128x64xf32>
    %94 = arith.addf %87, %93 : vector<128x64xf32>
    %c0_24 = arith.constant 0 : index
    %c0_25 = arith.constant 0 : index
    %95 = vector.load %arg3[%c0_24, %c0_25] : memref<1x128xi32, #tpu.memory_space<vmem>>, vector<1x128xi32>
    %96 = tpu.iota {dimensions = array<i32: 0>} : vector<12x128xi32>
    %97 = vector.broadcast %95 : vector<1x128xi32> to vector<12x128xi32>
    %98 = arith.cmpi eq, %96, %97 : vector<12x128xi32>
    %cst_26 = arith.constant 1.000000e+00 : f32
    %cst_27 = arith.constant 0.000000e+00 : f32
    %99 = vector.broadcast %cst_26 : f32 to vector<12x128xf32>
    %100 = vector.broadcast %cst_27 : f32 to vector<12x128xf32>
    %101 = arith.select %98, %99, %100 : vector<12x128xi1>, vector<12x128xf32>
    %102 = arith.truncf %101 : vector<12x128xf32> to vector<12x128xbf16>
    %c0_28 = arith.constant 0 : index
    %c0_29 = arith.constant 0 : index
    %103 = vector.load %arg14[%c0_28, %c0_29] : memref<12x64xf32, #tpu.memory_space<vmem>>, vector<12x64xf32>
    %104 = arith.truncf %94 : vector<128x64xf32> to vector<128x64xbf16>
    %cst_30 = arith.constant dense<0.000000e+00> : vector<12x64xf32>
    %105 = tpu.matmul %102, %104, %cst_30 {dimension_numbers = #tpu.dot_dimension_numbers<[1], [0], [0], [1], [0, 0, 1, 1], [], []>} : vector<12x128xbf16>, vector<128x64xbf16>, vector<12x64xf32> -> vector<12x64xf32>
    %106 = arith.addf %103, %105 : vector<12x64xf32>
    %c0_31 = arith.constant 0 : index
    %c0_32 = arith.constant 0 : index
    %107 = vector.load %arg14[%c0_31, %c0_32] : memref<12x64xf32, #tpu.memory_space<vmem>>, vector<12x64xf32>
    tpu.vector_store %arg14[%c0_31, %c0_32], %106 {strides = array<i32>} : memref<12x64xf32, #tpu.memory_space<vmem>>, vector<12x64xf32>,
    %c1_i32 = arith.constant 1 : i32
    %108 = arith.cmpi eq, %arg0, %c1_i32 : i32
    %109 = arith.extui %108 : i1 to i32
    %c0_i32_33 = arith.constant 0 : i32
    %110 = arith.cmpi ne, %109, %c0_i32_33 : i32
    scf.if %110 {
      %c0_34 = arith.constant 0 : index
      %c0_35 = arith.constant 0 : index
      %111 = vector.load %arg4[%c0_34, %c0_35] : memref<12x13xf32, #tpu.memory_space<vmem>>, vector<12x13xf32>
      %c0_36 = arith.constant 0 : index
      %c0_37 = arith.constant 0 : index
      %112 = vector.load %arg14[%c0_36, %c0_37] : memref<12x64xf32, #tpu.memory_space<vmem>>, vector<12x64xf32>
      %c0_38 = arith.constant 0 : index
      %c0_39 = arith.constant 0 : index
      %113 = vector.load %arg8[%c0_38, %c0_39] : memref<12x1xf32, #tpu.memory_space<vmem>>, vector<12x1xf32>
      %114 = vector.broadcast %113 : vector<12x1xf32> to vector<12x64xf32>
      %115 = arith.mulf %112, %114 : vector<12x64xf32>
      %c0_40 = arith.constant 0 : index
      %c0_41 = arith.constant 0 : index
      %116 = vector.load %arg6[%c0_40, %c0_41] : memref<13x64xf32, #tpu.memory_space<vmem>>, vector<13x64xf32>
      %cst_42 = arith.constant dense<0.000000e+00> : vector<12x64xf32>
      %117 = tpu.matmul %111, %116, %cst_42 {dimension_numbers = #tpu.dot_dimension_numbers<[1], [0], [0], [1], [0, 0, 1, 1], [], []>} : vector<12x13xf32>, vector<13x64xf32>, vector<12x64xf32> -> vector<12x64xf32>
      %118 = arith.addf %115, %117 : vector<12x64xf32>
      %c0_43 = arith.constant 0 : index
      %c0_44 = arith.constant 0 : index
      %119 = vector.load %arg7[%c0_43, %c0_44] : memref<1x64xf32, #tpu.memory_space<vmem>>, vector<1x64xf32>
      %120 = vector.broadcast %119 : vector<1x64xf32> to vector<12x64xf32>
      %121 = arith.addf %118, %120 : vector<12x64xf32>
      %cst_45 = arith.constant 0.000000e+00 : f32
      %122 = vector.broadcast %cst_45 : f32 to vector<12x64xf32>
      %123 = arith.cmpf ogt, %121, %122 : vector<12x64xf32>
      %cst_46 = arith.constant 0.000000e+00 : f32
      %124 = vector.broadcast %cst_46 : f32 to vector<12x64xf32>
      %125 = arith.minimumf %121, %124 : vector<12x64xf32>
      %126 = math.exp %125 : vector<12x64xf32>
      %cst_47 = arith.constant 1.000000e+00 : f32
      %127 = vector.broadcast %cst_47 : f32 to vector<12x64xf32>
      %128 = arith.subf %126, %127 : vector<12x64xf32>
      %129 = arith.select %123, %121, %128 : vector<12x64xi1>, vector<12x64xf32>
      %c0_48 = arith.constant 0 : index
      %c0_49 = arith.constant 0 : index
      %130 = vector.load %arg9[%c0_48, %c0_49] : memref<1x12xi32, #tpu.memory_space<vmem>>, vector<1x12xi32>
      %131 = tpu.iota {dimensions = array<i32: 0>} : vector<2x12xi32>
      %132 = vector.broadcast %130 : vector<1x12xi32> to vector<2x12xi32>
      %133 = arith.cmpi eq, %131, %132 : vector<2x12xi32>
      %cst_50 = arith.constant 1.000000e+00 : f32
      %cst_51 = arith.constant 0.000000e+00 : f32
      %134 = vector.broadcast %cst_50 : f32 to vector<2x12xf32>
      %135 = vector.broadcast %cst_51 : f32 to vector<2x12xf32>
      %136 = arith.select %133, %134, %135 : vector<2x12xi1>, vector<2x12xf32>
      %cst_52 = arith.constant dense<0.000000e+00> : vector<2x64xf32>
      %137 = tpu.matmul %136, %129, %cst_52 {dimension_numbers = #tpu.dot_dimension_numbers<[1], [0], [0], [1], [0, 0, 1, 1], [], []>} : vector<2x12xf32>, vector<12x64xf32>, vector<2x64xf32> -> vector<2x64xf32>
      %c0_53 = arith.constant 0 : index
      %c0_54 = arith.constant 0 : index
      %138 = vector.load %arg10[%c0_53, %c0_54] : memref<2x1xf32, #tpu.memory_space<vmem>>, vector<2x1xf32>
      %139 = vector.broadcast %138 : vector<2x1xf32> to vector<2x64xf32>
      %140 = arith.mulf %137, %139 : vector<2x64xf32>
      %c0_55 = arith.constant 0 : index
      %c0_56 = arith.constant 0 : index
      %141 = vector.load %arg11[%c0_55, %c0_56] : memref<64x3xf32, #tpu.memory_space<vmem>>, vector<64x3xf32>
      %cst_57 = arith.constant dense<0.000000e+00> : vector<2x3xf32>
      %142 = tpu.matmul %140, %141, %cst_57 {dimension_numbers = #tpu.dot_dimension_numbers<[1], [0], [0], [1], [0, 0, 1, 1], [], []>} : vector<2x64xf32>, vector<64x3xf32>, vector<2x3xf32> -> vector<2x3xf32>
      %c0_58 = arith.constant 0 : index
      %c0_59 = arith.constant 0 : index
      %143 = vector.load %arg12[%c0_58, %c0_59] : memref<1x3xf32, #tpu.memory_space<vmem>>, vector<1x3xf32>
      %144 = vector.broadcast %143 : vector<1x3xf32> to vector<2x3xf32>
      %145 = arith.addf %142, %144 : vector<2x3xf32>
      %146 = arith.mulf %145, %145 : vector<2x3xf32>
      %cst_60 = arith.constant dense<0.000000e+00> : vector<2xf32>
      %147 = vector.multi_reduction <add>, %146, %cst_60 [1] : vector<2x3xf32> to vector<2xf32>
      %148 = vector.shape_cast %147 : vector<2xf32> to vector<2x1xf32>
      %cst_61 = arith.constant 1.000000e-24 : f32
      %149 = vector.broadcast %cst_61 : f32 to vector<2x1xf32>
      %150 = arith.maximumf %148, %149 : vector<2x1xf32>
      %151 = math.rsqrt %150 : vector<2x1xf32>
      %152 = vector.broadcast %151 : vector<2x1xf32> to vector<2x3xf32>
      %153 = arith.mulf %145, %152 : vector<2x3xf32>
      %c0_62 = arith.constant 0 : index
      %c0_63 = arith.constant 0 : index
      %154 = vector.load %arg13[%c0_62, %c0_63] : memref<2x3xf32, #tpu.memory_space<vmem>>, vector<2x3xf32>
      tpu.vector_store %arg13[%c0_62, %c0_63], %153 {strides = array<i32>} : memref<2x3xf32, #tpu.memory_space<vmem>>, vector<2x3xf32>,
    } else {
    }
    return
  }
  func.func @transform_0(%arg0: i32) -> (i32, i32) {
    %c0_i32 = arith.constant 0 : i32
    %c0_i32_0 = arith.constant 0 : i32
    return %arg0, %c0_i32 : i32, i32
  }
  func.func @transform_1(%arg0: i32) -> (i32, i32) {
    %c0_i32 = arith.constant 0 : i32
    %c0_i32_0 = arith.constant 0 : i32
    return %arg0, %c0_i32 : i32, i32
  }
  func.func @transform_2(%arg0: i32) -> (i32, i32) {
    %c0_i32 = arith.constant 0 : i32
    %c0_i32_0 = arith.constant 0 : i32
    return %c0_i32, %arg0 : i32, i32
  }
  func.func @transform_3(%arg0: i32) -> (i32, i32) {
    %c0_i32 = arith.constant 0 : i32
    %c0_i32_0 = arith.constant 0 : i32
    %c0_i32_1 = arith.constant 0 : i32
    return %c0_i32, %c0_i32_0 : i32, i32
  }
  func.func @transform_4(%arg0: i32) -> (i32, i32) {
    %c0_i32 = arith.constant 0 : i32
    %c0_i32_0 = arith.constant 0 : i32
    %c0_i32_1 = arith.constant 0 : i32
    return %c0_i32, %c0_i32_0 : i32, i32
  }
  func.func @transform_5(%arg0: i32) -> (i32, i32) {
    %c0_i32 = arith.constant 0 : i32
    %c0_i32_0 = arith.constant 0 : i32
    %c0_i32_1 = arith.constant 0 : i32
    return %c0_i32, %c0_i32_0 : i32, i32
  }
  func.func @transform_6(%arg0: i32) -> (i32, i32) {
    %c0_i32 = arith.constant 0 : i32
    %c0_i32_0 = arith.constant 0 : i32
    %c0_i32_1 = arith.constant 0 : i32
    return %c0_i32, %c0_i32_0 : i32, i32
  }
  func.func @transform_7(%arg0: i32) -> (i32, i32) {
    %c0_i32 = arith.constant 0 : i32
    %c0_i32_0 = arith.constant 0 : i32
    %c0_i32_1 = arith.constant 0 : i32
    return %c0_i32, %c0_i32_0 : i32, i32
  }
  func.func @transform_8(%arg0: i32) -> (i32, i32) {
    %c0_i32 = arith.constant 0 : i32
    %c0_i32_0 = arith.constant 0 : i32
    %c0_i32_1 = arith.constant 0 : i32
    return %c0_i32, %c0_i32_0 : i32, i32
  }
  func.func @transform_9(%arg0: i32) -> (i32, i32) {
    %c0_i32 = arith.constant 0 : i32
    %c0_i32_0 = arith.constant 0 : i32
    %c0_i32_1 = arith.constant 0 : i32
    return %c0_i32, %c0_i32_0 : i32, i32
  }
  func.func @transform_10(%arg0: i32) -> (i32, i32) {
    %c0_i32 = arith.constant 0 : i32
    %c0_i32_0 = arith.constant 0 : i32
    %c0_i32_1 = arith.constant 0 : i32
    return %c0_i32, %c0_i32_0 : i32, i32
  }
  func.func @transform_11(%arg0: i32) -> (i32, i32) {
    %c0_i32 = arith.constant 0 : i32
    %c0_i32_0 = arith.constant 0 : i32
    %c0_i32_1 = arith.constant 0 : i32
    return %c0_i32, %c0_i32_0 : i32, i32
  }
  func.func @transform_12(%arg0: i32) -> (i32, i32) {
    %c0_i32 = arith.constant 0 : i32
    %c0_i32_0 = arith.constant 0 : i32
    %c0_i32_1 = arith.constant 0 : i32
    return %c0_i32, %c0_i32_0 : i32, i32
  }
}

module attributes {stable_mosaic.version = 11 : i64} {
  func.func @_gnn_kernel(%arg0: i32, %arg1: memref<128x128xbf16, #tpu.memory_space<vmem>>, %arg2: memref<128x1xi32, #tpu.memory_space<vmem>>, %arg3: memref<1x128xi32, #tpu.memory_space<vmem>>, %arg4: memref<12x13xf32, #tpu.memory_space<vmem>>, %arg5: memref<128x896xbf16, #tpu.memory_space<vmem>>, %arg6: memref<13x64xf32, #tpu.memory_space<vmem>>, %arg7: memref<1x64xf32, #tpu.memory_space<vmem>>, %arg8: memref<12x1xf32, #tpu.memory_space<vmem>>, %arg9: memref<1x12xi32, #tpu.memory_space<vmem>>, %arg10: memref<2x1xf32, #tpu.memory_space<vmem>>, %arg11: memref<64x3xf32, #tpu.memory_space<vmem>>, %arg12: memref<1x3xf32, #tpu.memory_space<vmem>>, %arg13: memref<2x3xf32, #tpu.memory_space<vmem>>, %arg14: memref<12x64xf32, #tpu.memory_space<vmem>>) attributes {dimension_semantics = [#tpu.dimension_semantics<arbitrary>], iteration_bounds = array<i64: 2>, scalar_prefetch = 0 : i64, scratch_operands = 1 : i64, tpu.core_type = #tpu.core_type<tc>, window_params = [{transform_indices = @transform_0, window_bounds = array<i64: 128, 128>}, {transform_indices = @transform_1, window_bounds = array<i64: 128, 1>}, {transform_indices = @transform_2, window_bounds = array<i64: 1, 128>}, {pipeline_mode = #tpu.pipeline_mode<synchronous>, transform_indices = @transform_3, window_bounds = array<i64: 12, 13>}, {pipeline_mode = #tpu.pipeline_mode<synchronous>, transform_indices = @transform_4, window_bounds = array<i64: 128, 896>}, {pipeline_mode = #tpu.pipeline_mode<synchronous>, transform_indices = @transform_5, window_bounds = array<i64: 13, 64>}, {pipeline_mode = #tpu.pipeline_mode<synchronous>, transform_indices = @transform_6, window_bounds = array<i64: 1, 64>}, {pipeline_mode = #tpu.pipeline_mode<synchronous>, transform_indices = @transform_7, window_bounds = array<i64: 12, 1>}, {pipeline_mode = #tpu.pipeline_mode<synchronous>, transform_indices = @transform_8, window_bounds = array<i64: 1, 12>}, {pipeline_mode = #tpu.pipeline_mode<synchronous>, transform_indices = @transform_9, window_bounds = array<i64: 2, 1>}, {pipeline_mode = #tpu.pipeline_mode<synchronous>, transform_indices = @transform_10, window_bounds = array<i64: 64, 3>}, {pipeline_mode = #tpu.pipeline_mode<synchronous>, transform_indices = @transform_11, window_bounds = array<i64: 1, 3>}, {pipeline_mode = #tpu.pipeline_mode<synchronous>, transform_indices = @transform_12, window_bounds = array<i64: 2, 3>}]} {
    %c0_i32 = arith.constant 0 : i32
    %0 = arith.cmpi eq, %arg0, %c0_i32 : i32
    %1 = arith.extui %0 : i1 to i32
    %c0_i32_0 = arith.constant 0 : i32
    %2 = arith.cmpi ne, %1, %c0_i32_0 : i32
    scf.if %2 {
      %cst_34 = arith.constant 0.000000e+00 : f32
      %111 = vector.broadcast %cst_34 : f32 to vector<12x64xf32>
      %c0_35 = arith.constant 0 : index
      %c0_36 = arith.constant 0 : index
      %112 = vector.load %arg14[%c0_35, %c0_36] : memref<12x64xf32, #tpu.memory_space<vmem>>, vector<12x64xf32>
      tpu.vector_store %arg14[%c0_35, %c0_36], %111 {strides = array<i32>} : memref<12x64xf32, #tpu.memory_space<vmem>>, vector<12x64xf32>,
    } else {
    }
    %c0 = arith.constant 0 : index
    %c0_1 = arith.constant 0 : index
    %3 = vector.load %arg2[%c0, %c0_1] : memref<128x1xi32, #tpu.memory_space<vmem>>, vector<128x1xi32>
    %4 = tpu.iota {dimensions = array<i32: 1>} : vector<128x12xi32>
    %5 = vector.broadcast %3 : vector<128x1xi32> to vector<128x12xi32>
    %6 = arith.cmpi eq, %4, %5 : vector<128x12xi32>
    %cst = arith.constant 1.000000e+00 : f32
    %cst_2 = arith.constant 0.000000e+00 : f32
    %7 = vector.broadcast %cst : f32 to vector<128x12xf32>
    %8 = vector.broadcast %cst_2 : f32 to vector<128x12xf32>
    %9 = arith.select %6, %7, %8 : vector<128x12xi1>, vector<128x12xf32>
    %10 = arith.truncf %9 : vector<128x12xf32> to vector<128x12xbf16>
    %c0_3 = arith.constant 0 : index
    %c0_4 = arith.constant 0 : index
    %11 = vector.load %arg4[%c0_3, %c0_4] : memref<12x13xf32, #tpu.memory_space<vmem>>, vector<12x13xf32>
    %12 = arith.truncf %11 : vector<12x13xf32> to vector<12x13xbf16>
    %cst_5 = arith.constant dense<0.000000e+00> : vector<128x13xf32>
    %13 = tpu.matmul %10, %12, %cst_5 {dimension_numbers = #tpu.dot_dimension_numbers<[1], [0], [0], [1], [0, 0, 1, 1], [], []>} : vector<128x12xbf16>, vector<12x13xbf16>, vector<128x13xf32> -> vector<128x13xf32>
    %c0_6 = arith.constant 0 : index
    %c0_7 = arith.constant 0 : index
    %14 = vector.load %arg1[%c0_6, %c0_7] : memref<128x128xbf16, #tpu.memory_space<vmem>>, vector<128x128xbf16>
    %cst_8 = arith.constant 0.000000e+00 : f32
    %15 = vector.broadcast %cst_8 : f32 to vector<128x64xf32>
    %c0_9 = arith.constant 0 : index
    %c0_10 = arith.constant 0 : index
    %16 = vector.load %arg5[%c0_9, %c0_10] : memref<128x896xbf16, #tpu.memory_space<vmem>>, vector<128x128xbf16>
    %cst_11 = arith.constant dense<0.000000e+00> : vector<128x128xf32>
    %17 = tpu.matmul %14, %16, %cst_11 {dimension_numbers = #tpu.dot_dimension_numbers<[1], [0], [0], [1], [0, 0, 1, 1], [], []>} : vector<128x128xbf16>, vector<128x128xbf16>, vector<128x128xf32> -> vector<128x128xf32>
    %18 = vector.extract_strided_slice %13 {offsets = [0, 0], sizes = [128, 1], strides = [1, 1]} : vector<128x13xf32> to vector<128x1xf32>
    %19 = vector.extract_strided_slice %17 {offsets = [0, 0], sizes = [128, 64], strides = [1, 1]} : vector<128x128xf32> to vector<128x64xf32>
    %20 = vector.broadcast %18 : vector<128x1xf32> to vector<128x64xf32>
    %21 = arith.mulf %20, %19 : vector<128x64xf32>
    %22 = arith.addf %15, %21 : vector<128x64xf32>
    %23 = vector.extract_strided_slice %13 {offsets = [0, 1], sizes = [128, 1], strides = [1, 1]} : vector<128x13xf32> to vector<128x1xf32>
    %24 = vector.extract_strided_slice %17 {offsets = [0, 64], sizes = [128, 64], strides = [1, 1]} : vector<128x128xf32> to vector<128x64xf32>
    %25 = vector.broadcast %23 : vector<128x1xf32> to vector<128x64xf32>
    %26 = arith.mulf %25, %24 : vector<128x64xf32>
    %27 = arith.addf %22, %26 : vector<128x64xf32>
    %c0_12 = arith.constant 0 : index
    %c128 = arith.constant 128 : index
    %28 = vector.load %arg5[%c0_12, %c128] : memref<128x896xbf16, #tpu.memory_space<vmem>>, vector<128x128xbf16>
    %cst_13 = arith.constant dense<0.000000e+00> : vector<128x128xf32>
    %29 = tpu.matmul %14, %28, %cst_13 {dimension_numbers = #tpu.dot_dimension_numbers<[1], [0], [0], [1], [0, 0, 1, 1], [], []>} : vector<128x128xbf16>, vector<128x128xbf16>, vector<128x128xf32> -> vector<128x128xf32>
    %30 = vector.extract_strided_slice %13 {offsets = [0, 2], sizes = [128, 1], strides = [1, 1]} : vector<128x13xf32> to vector<128x1xf32>
    %31 = vector.extract_strided_slice %29 {offsets = [0, 0], sizes = [128, 64], strides = [1, 1]} : vector<128x128xf32> to vector<128x64xf32>
    %32 = vector.broadcast %30 : vector<128x1xf32> to vector<128x64xf32>
    %33 = arith.mulf %32, %31 : vector<128x64xf32>
    %34 = arith.addf %27, %33 : vector<128x64xf32>
    %35 = vector.extract_strided_slice %13 {offsets = [0, 3], sizes = [128, 1], strides = [1, 1]} : vector<128x13xf32> to vector<128x1xf32>
    %36 = vector.extract_strided_slice %29 {offsets = [0, 64], sizes = [128, 64], strides = [1, 1]} : vector<128x128xf32> to vector<128x64xf32>
    %37 = vector.broadcast %35 : vector<128x1xf32> to vector<128x64xf32>
    %38 = arith.mulf %37, %36 : vector<128x64xf32>
    %39 = arith.addf %34, %38 : vector<128x64xf32>
    %c0_14 = arith.constant 0 : index
    %c256 = arith.constant 256 : index
    %40 = vector.load %arg5[%c0_14, %c256] : memref<128x896xbf16, #tpu.memory_space<vmem>>, vector<128x128xbf16>
    %cst_15 = arith.constant dense<0.000000e+00> : vector<128x128xf32>
    %41 = tpu.matmul %14, %40, %cst_15 {dimension_numbers = #tpu.dot_dimension_numbers<[1], [0], [0], [1], [0, 0, 1, 1], [], []>} : vector<128x128xbf16>, vector<128x128xbf16>, vector<128x128xf32> -> vector<128x128xf32>
    %42 = vector.extract_strided_slice %13 {offsets = [0, 4], sizes = [128, 1], strides = [1, 1]} : vector<128x13xf32> to vector<128x1xf32>
    %43 = vector.extract_strided_slice %41 {offsets = [0, 0], sizes = [128, 64], strides = [1, 1]} : vector<128x128xf32> to vector<128x64xf32>
    %44 = vector.broadcast %42 : vector<128x1xf32> to vector<128x64xf32>
    %45 = arith.mulf %44, %43 : vector<128x64xf32>
    %46 = arith.addf %39, %45 : vector<128x64xf32>
    %47 = vector.extract_strided_slice %13 {offsets = [0, 5], sizes = [128, 1], strides = [1, 1]} : vector<128x13xf32> to vector<128x1xf32>
    %48 = vector.extract_strided_slice %41 {offsets = [0, 64], sizes = [128, 64], strides = [1, 1]} : vector<128x128xf32> to vector<128x64xf32>
    %49 = vector.broadcast %47 : vector<128x1xf32> to vector<128x64xf32>
    %50 = arith.mulf %49, %48 : vector<128x64xf32>
    %51 = arith.addf %46, %50 : vector<128x64xf32>
    %c0_16 = arith.constant 0 : index
    %c384 = arith.constant 384 : index
    %52 = vector.load %arg5[%c0_16, %c384] : memref<128x896xbf16, #tpu.memory_space<vmem>>, vector<128x128xbf16>
    %cst_17 = arith.constant dense<0.000000e+00> : vector<128x128xf32>
    %53 = tpu.matmul %14, %52, %cst_17 {dimension_numbers = #tpu.dot_dimension_numbers<[1], [0], [0], [1], [0, 0, 1, 1], [], []>} : vector<128x128xbf16>, vector<128x128xbf16>, vector<128x128xf32> -> vector<128x128xf32>
    %54 = vector.extract_strided_slice %13 {offsets = [0, 6], sizes = [128, 1], strides = [1, 1]} : vector<128x13xf32> to vector<128x1xf32>
    %55 = vector.extract_strided_slice %53 {offsets = [0, 0], sizes = [128, 64], strides = [1, 1]} : vector<128x128xf32> to vector<128x64xf32>
    %56 = vector.broadcast %54 : vector<128x1xf32> to vector<128x64xf32>
    %57 = arith.mulf %56, %55 : vector<128x64xf32>
    %58 = arith.addf %51, %57 : vector<128x64xf32>
    %59 = vector.extract_strided_slice %13 {offsets = [0, 7], sizes = [128, 1], strides = [1, 1]} : vector<128x13xf32> to vector<128x1xf32>
    %60 = vector.extract_strided_slice %53 {offsets = [0, 64], sizes = [128, 64], strides = [1, 1]} : vector<128x128xf32> to vector<128x64xf32>
    %61 = vector.broadcast %59 : vector<128x1xf32> to vector<128x64xf32>
    %62 = arith.mulf %61, %60 : vector<128x64xf32>
    %63 = arith.addf %58, %62 : vector<128x64xf32>
    %c0_18 = arith.constant 0 : index
    %c512 = arith.constant 512 : index
    %64 = vector.load %arg5[%c0_18, %c512] : memref<128x896xbf16, #tpu.memory_space<vmem>>, vector<128x128xbf16>
    %cst_19 = arith.constant dense<0.000000e+00> : vector<128x128xf32>
    %65 = tpu.matmul %14, %64, %cst_19 {dimension_numbers = #tpu.dot_dimension_numbers<[1], [0], [0], [1], [0, 0, 1, 1], [], []>} : vector<128x128xbf16>, vector<128x128xbf16>, vector<128x128xf32> -> vector<128x128xf32>
    %66 = vector.extract_strided_slice %13 {offsets = [0, 8], sizes = [128, 1], strides = [1, 1]} : vector<128x13xf32> to vector<128x1xf32>
    %67 = vector.extract_strided_slice %65 {offsets = [0, 0], sizes = [128, 64], strides = [1, 1]} : vector<128x128xf32> to vector<128x64xf32>
    %68 = vector.broadcast %66 : vector<128x1xf32> to vector<128x64xf32>
    %69 = arith.mulf %68, %67 : vector<128x64xf32>
    %70 = arith.addf %63, %69 : vector<128x64xf32>
    %71 = vector.extract_strided_slice %13 {offsets = [0, 9], sizes = [128, 1], strides = [1, 1]} : vector<128x13xf32> to vector<128x1xf32>
    %72 = vector.extract_strided_slice %65 {offsets = [0, 64], sizes = [128, 64], strides = [1, 1]} : vector<128x128xf32> to vector<128x64xf32>
    %73 = vector.broadcast %71 : vector<128x1xf32> to vector<128x64xf32>
    %74 = arith.mulf %73, %72 : vector<128x64xf32>
    %75 = arith.addf %70, %74 : vector<128x64xf32>
    %c0_20 = arith.constant 0 : index
    %c640 = arith.constant 640 : index
    %76 = vector.load %arg5[%c0_20, %c640] : memref<128x896xbf16, #tpu.memory_space<vmem>>, vector<128x128xbf16>
    %cst_21 = arith.constant dense<0.000000e+00> : vector<128x128xf32>
    %77 = tpu.matmul %14, %76, %cst_21 {dimension_numbers = #tpu.dot_dimension_numbers<[1], [0], [0], [1], [0, 0, 1, 1], [], []>} : vector<128x128xbf16>, vector<128x128xbf16>, vector<128x128xf32> -> vector<128x128xf32>
    %78 = vector.extract_strided_slice %13 {offsets = [0, 10], sizes = [128, 1], strides = [1, 1]} : vector<128x13xf32> to vector<128x1xf32>
    %79 = vector.extract_strided_slice %77 {offsets = [0, 0], sizes = [128, 64], strides = [1, 1]} : vector<128x128xf32> to vector<128x64xf32>
    %80 = vector.broadcast %78 : vector<128x1xf32> to vector<128x64xf32>
    %81 = arith.mulf %80, %79 : vector<128x64xf32>
    %82 = arith.addf %75, %81 : vector<128x64xf32>
    %83 = vector.extract_strided_slice %13 {offsets = [0, 11], sizes = [128, 1], strides = [1, 1]} : vector<128x13xf32> to vector<128x1xf32>
    %84 = vector.extract_strided_slice %77 {offsets = [0, 64], sizes = [128, 64], strides = [1, 1]} : vector<128x128xf32> to vector<128x64xf32>
    %85 = vector.broadcast %83 : vector<128x1xf32> to vector<128x64xf32>
    %86 = arith.mulf %85, %84 : vector<128x64xf32>
    %87 = arith.addf %82, %86 : vector<128x64xf32>
    %c0_22 = arith.constant 0 : index
    %c768 = arith.constant 768 : index
    %88 = vector.load %arg5[%c0_22, %c768] : memref<128x896xbf16, #tpu.memory_space<vmem>>, vector<128x128xbf16>
    %cst_23 = arith.constant dense<0.000000e+00> : vector<128x128xf32>
    %89 = tpu.matmul %14, %88, %cst_23 {dimension_numbers = #tpu.dot_dimension_numbers<[1], [0], [0], [1], [0, 0, 1, 1], [], []>} : vector<128x128xbf16>, vector<128x128xbf16>, vector<128x128xf32> -> vector<128x128xf32>
    %90 = vector.extract_strided_slice %13 {offsets = [0, 12], sizes = [128, 1], strides = [1, 1]} : vector<128x13xf32> to vector<128x1xf32>
    %91 = vector.extract_strided_slice %89 {offsets = [0, 0], sizes = [128, 64], strides = [1, 1]} : vector<128x128xf32> to vector<128x64xf32>
    %92 = vector.broadcast %90 : vector<128x1xf32> to vector<128x64xf32>
    %93 = arith.mulf %92, %91 : vector<128x64xf32>
    %94 = arith.addf %87, %93 : vector<128x64xf32>
    %c0_24 = arith.constant 0 : index
    %c0_25 = arith.constant 0 : index
    %95 = vector.load %arg3[%c0_24, %c0_25] : memref<1x128xi32, #tpu.memory_space<vmem>>, vector<1x128xi32>
    %96 = tpu.iota {dimensions = array<i32: 0>} : vector<12x128xi32>
    %97 = vector.broadcast %95 : vector<1x128xi32> to vector<12x128xi32>
    %98 = arith.cmpi eq, %96, %97 : vector<12x128xi32>
    %cst_26 = arith.constant 1.000000e+00 : f32
    %cst_27 = arith.constant 0.000000e+00 : f32
    %99 = vector.broadcast %cst_26 : f32 to vector<12x128xf32>
    %100 = vector.broadcast %cst_27 : f32 to vector<12x128xf32>
    %101 = arith.select %98, %99, %100 : vector<12x128xi1>, vector<12x128xf32>
    %102 = arith.truncf %101 : vector<12x128xf32> to vector<12x128xbf16>
    %c0_28 = arith.constant 0 : index
    %c0_29 = arith.constant 0 : index
    %103 = vector.load %arg14[%c0_28, %c0_29] : memref<12x64xf32, #tpu.memory_space<vmem>>, vector<12x64xf32>
    %104 = arith.truncf %94 : vector<128x64xf32> to vector<128x64xbf16>
    %cst_30 = arith.constant dense<0.000000e+00> : vector<12x64xf32>
    %105 = tpu.matmul %102, %104, %cst_30 {dimension_numbers = #tpu.dot_dimension_numbers<[1], [0], [0], [1], [0, 0, 1, 1], [], []>} : vector<12x128xbf16>, vector<128x64xbf16>, vector<12x64xf32> -> vector<12x64xf32>
    %106 = arith.addf %103, %105 : vector<12x64xf32>
    %c0_31 = arith.constant 0 : index
    %c0_32 = arith.constant 0 : index
    %107 = vector.load %arg14[%c0_31, %c0_32] : memref<12x64xf32, #tpu.memory_space<vmem>>, vector<12x64xf32>
    tpu.vector_store %arg14[%c0_31, %c0_32], %106 {strides = array<i32>} : memref<12x64xf32, #tpu.memory_space<vmem>>, vector<12x64xf32>,
    %c1_i32 = arith.constant 1 : i32
    %108 = arith.cmpi eq, %arg0, %c1_i32 : i32
    %109 = arith.extui %108 : i1 to i32
    %c0_i32_33 = arith.constant 0 : i32
    %110 = arith.cmpi ne, %109, %c0_i32_33 : i32
    scf.if %110 {
      %c0_34 = arith.constant 0 : index
      %c0_35 = arith.constant 0 : index
      %111 = vector.load %arg4[%c0_34, %c0_35] : memref<12x13xf32, #tpu.memory_space<vmem>>, vector<12x13xf32>
      %c0_36 = arith.constant 0 : index
      %c0_37 = arith.constant 0 : index
      %112 = vector.load %arg14[%c0_36, %c0_37] : memref<12x64xf32, #tpu.memory_space<vmem>>, vector<12x64xf32>
      %c0_38 = arith.constant 0 : index
      %c0_39 = arith.constant 0 : index
      %113 = vector.load %arg8[%c0_38, %c0_39] : memref<12x1xf32, #tpu.memory_space<vmem>>, vector<12x1xf32>
      %114 = vector.broadcast %113 : vector<12x1xf32> to vector<12x64xf32>
      %115 = arith.mulf %112, %114 : vector<12x64xf32>
      %c0_40 = arith.constant 0 : index
      %c0_41 = arith.constant 0 : index
      %116 = vector.load %arg6[%c0_40, %c0_41] : memref<13x64xf32, #tpu.memory_space<vmem>>, vector<13x64xf32>
      %cst_42 = arith.constant dense<0.000000e+00> : vector<12x64xf32>
      %117 = tpu.matmul %111, %116, %cst_42 {dimension_numbers = #tpu.dot_dimension_numbers<[1], [0], [0], [1], [0, 0, 1, 1], [], []>} : vector<12x13xf32>, vector<13x64xf32>, vector<12x64xf32> -> vector<12x64xf32>
      %118 = arith.addf %115, %117 : vector<12x64xf32>
      %c0_43 = arith.constant 0 : index
      %c0_44 = arith.constant 0 : index
      %119 = vector.load %arg7[%c0_43, %c0_44] : memref<1x64xf32, #tpu.memory_space<vmem>>, vector<1x64xf32>
      %120 = vector.broadcast %119 : vector<1x64xf32> to vector<12x64xf32>
      %121 = arith.addf %118, %120 : vector<12x64xf32>
      %cst_45 = arith.constant 0.000000e+00 : f32
      %122 = vector.broadcast %cst_45 : f32 to vector<12x64xf32>
      %123 = arith.cmpf ogt, %121, %122 : vector<12x64xf32>
      %cst_46 = arith.constant 0.000000e+00 : f32
      %124 = vector.broadcast %cst_46 : f32 to vector<12x64xf32>
      %125 = arith.minimumf %121, %124 : vector<12x64xf32>
      %126 = math.exp %125 : vector<12x64xf32>
      %cst_47 = arith.constant 1.000000e+00 : f32
      %127 = vector.broadcast %cst_47 : f32 to vector<12x64xf32>
      %128 = arith.subf %126, %127 : vector<12x64xf32>
      %129 = arith.select %123, %121, %128 : vector<12x64xi1>, vector<12x64xf32>
      %c0_48 = arith.constant 0 : index
      %c0_49 = arith.constant 0 : index
      %130 = vector.load %arg9[%c0_48, %c0_49] : memref<1x12xi32, #tpu.memory_space<vmem>>, vector<1x12xi32>
      %131 = tpu.iota {dimensions = array<i32: 0>} : vector<2x12xi32>
      %132 = vector.broadcast %130 : vector<1x12xi32> to vector<2x12xi32>
      %133 = arith.cmpi eq, %131, %132 : vector<2x12xi32>
      %cst_50 = arith.constant 1.000000e+00 : f32
      %cst_51 = arith.constant 0.000000e+00 : f32
      %134 = vector.broadcast %cst_50 : f32 to vector<2x12xf32>
      %135 = vector.broadcast %cst_51 : f32 to vector<2x12xf32>
      %136 = arith.select %133, %134, %135 : vector<2x12xi1>, vector<2x12xf32>
      %cst_52 = arith.constant dense<0.000000e+00> : vector<2x64xf32>
      %137 = tpu.matmul %136, %129, %cst_52 {dimension_numbers = #tpu.dot_dimension_numbers<[1], [0], [0], [1], [0, 0, 1, 1], [], []>} : vector<2x12xf32>, vector<12x64xf32>, vector<2x64xf32> -> vector<2x64xf32>
      %c0_53 = arith.constant 0 : index
      %c0_54 = arith.constant 0 : index
      %138 = vector.load %arg10[%c0_53, %c0_54] : memref<2x1xf32, #tpu.memory_space<vmem>>, vector<2x1xf32>
      %139 = vector.broadcast %138 : vector<2x1xf32> to vector<2x64xf32>
      %140 = arith.mulf %137, %139 : vector<2x64xf32>
      %c0_55 = arith.constant 0 : index
      %c0_56 = arith.constant 0 : index
      %141 = vector.load %arg11[%c0_55, %c0_56] : memref<64x3xf32, #tpu.memory_space<vmem>>, vector<64x3xf32>
      %cst_57 = arith.constant dense<0.000000e+00> : vector<2x3xf32>
      %142 = tpu.matmul %140, %141, %cst_57 {dimension_numbers = #tpu.dot_dimension_numbers<[1], [0], [0], [1], [0, 0, 1, 1], [], []>} : vector<2x64xf32>, vector<64x3xf32>, vector<2x3xf32> -> vector<2x3xf32>
      %c0_58 = arith.constant 0 : index
      %c0_59 = arith.constant 0 : index
      %143 = vector.load %arg12[%c0_58, %c0_59] : memref<1x3xf32, #tpu.memory_space<vmem>>, vector<1x3xf32>
      %144 = vector.broadcast %143 : vector<1x3xf32> to vector<2x3xf32>
      %145 = arith.addf %142, %144 : vector<2x3xf32>
      %146 = arith.mulf %145, %145 : vector<2x3xf32>
      %cst_60 = arith.constant dense<0.000000e+00> : vector<2xf32>
      %147 = vector.multi_reduction <add>, %146, %cst_60 [1] : vector<2x3xf32> to vector<2xf32>
      %148 = vector.shape_cast %147 : vector<2xf32> to vector<2x1xf32>
      %cst_61 = arith.constant 1.000000e-24 : f32
      %149 = vector.broadcast %cst_61 : f32 to vector<2x1xf32>
      %150 = arith.maximumf %148, %149 : vector<2x1xf32>
      %151 = math.rsqrt %150 : vector<2x1xf32>
      %152 = vector.broadcast %151 : vector<2x1xf32> to vector<2x3xf32>
      %153 = arith.mulf %145, %152 : vector<2x3xf32>
      %c0_62 = arith.constant 0 : index
      %c0_63 = arith.constant 0 : index
      %154 = vector.load %arg13[%c0_62, %c0_63] : memref<2x3xf32, #tpu.memory_space<vmem>>, vector<2x3xf32>
      tpu.vector_store %arg13[%c0_62, %c0_63], %153 {strides = array<i32>} : memref<2x3xf32, #tpu.memory_space<vmem>>, vector<2x3xf32>,
    } else {
    }
    return
  }
  func.func @transform_0(%arg0: i32) -> (i32, i32) {
    %c0_i32 = arith.constant 0 : i32
    %c0_i32_0 = arith.constant 0 : i32
    return %arg0, %c0_i32 : i32, i32
  }
  func.func @transform_1(%arg0: i32) -> (i32, i32) {
    %c0_i32 = arith.constant 0 : i32
    %c0_i32_0 = arith.constant 0 : i32
    return %arg0, %c0_i32 : i32, i32
  }
  func.func @transform_2(%arg0: i32) -> (i32, i32) {
    %c0_i32 = arith.constant 0 : i32
    %c0_i32_0 = arith.constant 0 : i32
    return %c0_i32, %arg0 : i32, i32
  }
  func.func @transform_3(%arg0: i32) -> (i32, i32) {
    %c0_i32 = arith.constant 0 : i32
    %c0_i32_0 = arith.constant 0 : i32
    %c0_i32_1 = arith.constant 0 : i32
    return %c0_i32, %c0_i32_0 : i32, i32
  }
  func.func @transform_4(%arg0: i32) -> (i32, i32) {
    %c0_i32 = arith.constant 0 : i32
    %c0_i32_0 = arith.constant 0 : i32
    %c0_i32_1 = arith.constant 0 : i32
    return %c0_i32, %c0_i32_0 : i32, i32
  }
  func.func @transform_5(%arg0: i32) -> (i32, i32) {
    %c0_i32 = arith.constant 0 : i32
    %c0_i32_0 = arith.constant 0 : i32
    %c0_i32_1 = arith.constant 0 : i32
    return %c0_i32, %c0_i32_0 : i32, i32
  }
  func.func @transform_6(%arg0: i32) -> (i32, i32) {
    %c0_i32 = arith.constant 0 : i32
    %c0_i32_0 = arith.constant 0 : i32
    %c0_i32_1 = arith.constant 0 : i32
    return %c0_i32, %c0_i32_0 : i32, i32
  }
  func.func @transform_7(%arg0: i32) -> (i32, i32) {
    %c0_i32 = arith.constant 0 : i32
    %c0_i32_0 = arith.constant 0 : i32
    %c0_i32_1 = arith.constant 0 : i32
    return %c0_i32, %c0_i32_0 : i32, i32
  }
  func.func @transform_8(%arg0: i32) -> (i32, i32) {
    %c0_i32 = arith.constant 0 : i32
    %c0_i32_0 = arith.constant 0 : i32
    %c0_i32_1 = arith.constant 0 : i32
    return %c0_i32, %c0_i32_0 : i32, i32
  }
  func.func @transform_9(%arg0: i32) -> (i32, i32) {
    %c0_i32 = arith.constant 0 : i32
    %c0_i32_0 = arith.constant 0 : i32
    %c0_i32_1 = arith.constant 0 : i32
    return %c0_i32, %c0_i32_0 : i32, i32
  }
  func.func @transform_10(%arg0: i32) -> (i32, i32) {
    %c0_i32 = arith.constant 0 : i32
    %c0_i32_0 = arith.constant 0 : i32
    %c0_i32_1 = arith.constant 0 : i32
    return %c0_i32, %c0_i32_0 : i32, i32
  }
  func.func @transform_11(%arg0: i32) -> (i32, i32) {
    %c0_i32 = arith.constant 0 : i32
    %c0_i32_0 = arith.constant 0 : i32
    %c0_i32_1 = arith.constant 0 : i32
    return %c0_i32, %c0_i32_0 : i32, i32
  }
  func.func @transform_12(%arg0: i32) -> (i32, i32) {
    %c0_i32 = arith.constant 0 : i32
    %c0_i32_0 = arith.constant 0 : i32
    %c0_i32_1 = arith.constant 0 : i32
    return %c0_i32, %c0_i32_0 : i32, i32
  }
}

</mosaic_0001>

<bundles_post_ra>
// kernel: tpu_custom_call.1
= control target key start
LH: loop header
LB: loop body
LE: loop exit
PB: predicated region body
PF: predicated region fallthrough
CT: control target
= control target key end

     0   :  { %17 = vsyncpa [#allocation4], 0  ;;  %s6982_s0 = inlined_call_operand.vmem [shape: bf16[256,128], index: 0, kind: input, shape index: {}]   ;;  %s6983_s1 = inlined_call_operand.vmem [shape: s32[256,1], index: 1, kind: input, shape index: {}]   ;;  %s6984_s2 = inlined_call_operand.vmem [shape: s32[1,256], index: 2, kind: input, shape index: {}]   ;;  %s6985_s3 = inlined_call_operand.vmem [shape: f32[12,13], index: 3, kind: input, shape index: {}]   ;;  %s6986_s4 = inlined_call_operand.hbm [shape: bf16[128,896], index: 4, kind: input, shape index: {}]   ;;  %s6987_s5 = inlined_call_operand.vmem [shape: f32[13,64], index: 5, kind: input, shape index: {}]   ;;  %s6988_s6 = inlined_call_operand.vmem [shape: f32[1,64], index: 6, kind: input, shape index: {}]   ;;  %s6989_s7 = inlined_call_operand.vmem [shape: f32[12,1], index: 7, kind: input, shape index: {}]   ;;  %s6990_s8 = inlined_call_operand.vmem [shape: s32[1,12], index: 8, kind: input, shape index: {}]   ;;  %s6991_s9 = inlined_call_operand.vmem [shape: f32[2,1], index: 9, kind: input, shape index: {}]   ;;  %s6992_s10 = inlined_call_operand.vmem [shape: f32[64,3], index: 10, kind: input, shape index: {}]   ;;  %s6993_s11 = inlined_call_operand.vmem [shape: f32[1,3], index: 11, kind: input, shape index: {}]   ;;  %s6994_s12 = inlined_call_operand.hbm [shape: f32[2,3], index: 12, kind: output, shape index: {}]  }
   0x1   :  { %18 = vsyncpa [#allocation5], 0  ;;  %s5009_s21 = smov 0  }
   0x2 LB: > { %s5015_s22 = sadd.s32 4294967295, %s4917_s21   ;;  %p4007_p0 = scmp.ge.s32.totalorder %s4917_s21, 1  ;;  %s4917_s21 = sphi %s5009_s21, %s24_s21  }
   0x3   : > { %p317_p1 = scmp.lt.s32.totalorder %s4917_s21, 3  ;;  %s4919_s23 = smov [#allocation3]  }
   0x4   : > { %s332_s24 = sshll.u32 %s4919_s23, 4  ;;  %p4562_p4 = scmp.eq.s32.totalorder %s5015_s22, 0  ;;  %s333_s24 = int_to_ptr.vmem [resolvable:$true] %s332_s24 }
   0x5   : > { %p5020_p3 = pnand %p4007_p0, %p317_p1  ;;  %s4864_s26 = scalar_lea.vmem %s333_s24, 7168 }
   0x6   : > { %p4865_p8 = scmp.ne.s32.totalorder %s333_s24, %s4864_s26  ;;  %p4872_p11 = scmp.lt.s32.totalorder %s333_s24, %s333_s24 }
   0x7   : > { %p4558_p5 = pneg %p5020_p3  ;;  %p4873_p12 = scmp.lt.s32.totalorder %s4864_s26, %s4864_s26 }
   0x9   : > { %p4559_p6 = pnand %p4562_p4, %p4558_p5  ;;  %p4874_p13 = por %p4873_p12, %p4872_p11 }
   0xb   : > { %p4855_p7 = pneg %p4559_p6 }
   0xd   : > { %p4867_p9 = pnand %p4865_p8, %p4855_p7 }
   0xf   : > { %p4868_p10 = pneg %p4867_p9 }
  0x11   : > { %p4875_p2 = pnand %p4874_p13, %p4868_p10 }
  0x13   : > { %4878 = shalt.err (!%p4875_p2)
}
  0x14   : > { %s4920_s27 = smov 448   ;;  %s4921_s28 = smov 28  }
  0x15   : > { %4561 = dma.hbm_to_vmem [thread:$0]  (!%p4559_p6), %s6986_s4, 7168, %s333_s24, [#allocation4], %s4920_s27, %s4920_s27, %s4921_s28  }
  0x16   : > { %393 = sbr.rel (%p5020_p3) target bundleno = 2246 (0x8c6), region = 68 }
  0x1b   : > { %4908 = dma.done.wait (%p4562_p4), [#allocation4], 7168  }
  0x1c   : > { %4910 = vsyncadd (%p4562_p4), [#allocation4], 4294960128  ;;  %s4012_s13 = sshll.u32 %s5015_s22, 4  ;;  %p450_p0 = scmp.lt.s32.totalorder %s5015_s22, 1 }
  0x1d   : > { %p439_p1 = scmp.lt.s32.totalorder %s4012_s13, 31  ;;  %p7128_p2 = scmp.ne.s32.totalorder %s5015_s22, 0 }
  0x1e   : > { %s5041_s14 = scalar_select %p450_p0, %s5015_s22, 1 }
  0x1f   : > { %s7614_s13 = smov (!%p439_p1, %s4012_s13), 31  ;;  %457 = sbr.rel (%p7128_p2) target bundleno = 39 (0x27), region = 76 }
  0x20   : > { %s452_s17 = scalar_lea.vmem %s6984_s2, %s5041_s14  ;;  %s4013_s18 = sshll.u32 %s7614_s13, 2 }
  0x21   : > { %s4015_s19 = sshll.u32 %s7614_s13, 3  ;;  %s5050_s24 = scalar_lea.vmem %s6982_s0, %s4013_s18 }
  0x22   : > { %s5055_s27 = scalar_lea.vmem %s6983_s1, %s4015_s19 }
  0x24   : > { %vm458_vm0 = vcmask 523264   ;;  %vm460_vm1 = vcmask 519168   ;;  %v4922_v0 = vmov 0.0  }
  0x25   : > { %459 = vst.msk [vmem:[#allocation2] sm:$0xff] %vm458_vm0, %v4922_v0 }
  0x26   : > { %461 = vst.msk [vmem:[#allocation2 + $0x8] sm:$0xf] %vm460_vm1, %v4922_v0 }
  0x27 PF: > { %v464_v1 = vld [vmem:[%s5055_s27 + $0x10] sm:$0xff]  ;;  %v462_v2 = vld [vmem:[%s5055_s27] sm:$0xff]  ;;  %v7012_v3 = vmov 0   ;;  %v465_v4 = vld [vmem:[%s5055_s27 + $0x18] sm:$0xff]  ;;  %vm596_vm2 = vcmask 1045504   ;;  %v7014_v40 = vmov 1   ;;  %v6995_v56 = vlaneseq }
  0x28   : > { %4600 = vset.pattern.permute.xlu1 %v7012_v3  ;;  %4599 = vset.pattern.permute.xlu0 %v7012_v3  ;;  %v463_v5 = vld [vmem:[%s5055_s27 + $0x8] sm:$0xff]  ;;  %v466_v7 = vld [vmem:[%s5055_s27 + $0x20] sm:$0xff]  ;;  %v469_v12 = vld [vmem:[%s5055_s27 + $0x38] sm:$0xff]  ;;  %vm571_vm7 = vcmask 97280   ;;  %v6996_v62 = vmov 0.0   ;;  %s4935_s15 = smov 64  }
  0x29   : > { %487 = vperm.xlu1 %4600, %v464_v1   ;;  %481 = vperm.xlu0 %4599, %v462_v2   ;;  %v467_v6 = vld [vmem:[%s5055_s27 + $0x28] sm:$0xff]  ;;  %v568_v8 = vld [vmem:[%s6985_s3] sm:$0xff]  ;;  %v468_v13 = vld [vmem:[%s5055_s27 + $0x30] sm:$0xff]  ;;  %v5129_v57 = vand.u32 127, %v6995_v56  ;;  %p4092_p3 = scmp.ne.s32.totalorder %s5015_s22, 1 }
  0x2a   : > { %v569_v9 = vld [vmem:[%s6985_s3 + $0x8] sm:$0xf]  ;;  %v470_v15 = vld [vmem:[%s5055_s27 + $0x40] sm:$0xff]  ;;  %v473_v16 = vld [vmem:[%s5055_s27 + $0x58] sm:$0xff] }
  0x2b   : > { %v570_v10 = vpack.c.bf16 %v569_v9, %v568_v8  ;;  %v471_v14 = vld [vmem:[%s5055_s27 + $0x48] sm:$0xff]  ;;  %v472_v17 = vld [vmem:[%s5055_s27 + $0x50] sm:$0xff]  ;;  %v474_v19 = vld [vmem:[%s5055_s27 + $0x60] sm:$0xff] }
  0x2c   : > { %v475_v18 = vld [vmem:[%s5055_s27 + $0x68] sm:$0xff]  ;;  %v477_v20 = vld [vmem:[%s5055_s27 + $0x78] sm:$0xff]  ;;  %v476_v21 = vld [vmem:[%s5055_s27 + $0x70] sm:$0xff] }
  0x2d   : > { %490 = vperm.xlu1 %4600, %v465_v4   ;;  %484 = vperm.xlu0 %4599, %v463_v5   ;;  %v598_v11 = vsel %vm596_vm2, %v570_v10, 0  ;;  %v4774_v22 = vld [vmem:[#allocation3 + $0x188] ss:$28 sps:$4 sm:$0xff]   ;;  %v4775_v23 = vld [vmem:[#allocation3 + $0x150] ss:$28 sps:$4 sm:$0xff]   ;;  %v5091_v33 = vld [vmem:[%s5050_s24 + $0x8] sm:$0xff]  }
  0x2e   : > { %4549 = vmatprep.subr.msk.bf16.mxu0 %vm596_vm2, %v570_v10  ;;  %v5083_v24 = vld [vmem:[#allocation3 + $0x18c] ss:$28 sps:$4 sm:$0xff]   ;;  %4272 = vmatprep.subr.bf16.mxu1 %v4774_v22  ;;  %v5087_v25 = vld [vmem:[%s5050_s24] sm:$0xff]   ;;  %v4777_v27 = vld [vmem:[#allocation3 + $0xe0] ss:$28 sps:$4 sm:$0xff]  }
  0x2f   : > { %4255 = vmatpush3.bf16.msra.mxu0 %v598_v11  ;;  %4273 = vmatpush3.bf16.msra.mxu1 %v4774_v22  ;;  %v4776_v26 = vld [vmem:[#allocation3 + $0x118] ss:$28 sps:$4 sm:$0xff]   ;;  %v4778_v28 = vld [vmem:[#allocation3 + $0xa8] ss:$28 sps:$4 sm:$0xff]   ;;  %v4780_v29 = vld [vmem:[#allocation3 + $0x70] ss:$28 sps:$4 sm:$0xff]  }
  0x30   : > { %4304 = vmatprep.subr.bf16.mxu0 %v5083_v24  ;;  %4274 = vmatprep.subr.bf16.mxu1 %v4775_v23  ;;  %v4782_v30 = vld [vmem:[#allocation3 + $0x38] ss:$28 sps:$4 sm:$0xff]   ;;  %v4784_v31 = vld [vmem:[#allocation3] ss:$28 sps:$4 sm:$0xff]   ;;  %v4788_v32 = vld [vmem:[#allocation3 + $0x190] ss:$28 sps:$4 sm:$0xff]  }
  0x31   : > { %496 = vperm.xlu1 %4600, %v467_v6   ;;  %493 = vperm.xlu0 %4599, %v466_v7   ;;  %v5094_v34 = vld [vmem:[%s5050_s24 + $0x10] sm:$0xff]   ;;  %v4790_v35 = vld [vmem:[#allocation3 + $0x158] ss:$28 sps:$4 sm:$0xff]   ;;  %v5099_v37 = vld [vmem:[%s5050_s24 + $0x18] sm:$0xff]  }
  0x32   : > { %4288 = vmatprep.mubr.bf16.mxu1 %v5087_v25  ;;  %v4794_v36 = vld [vmem:[#allocation3 + $0x120] ss:$28 sps:$4 sm:$0xff]   ;;  %v5102_v38 = vld [vmem:[%s5050_s24 + $0x20] sm:$0xff]   ;;  %v4796_v39 = vld [vmem:[#allocation3 + $0xe8] ss:$28 sps:$4 sm:$0xff]  }
  0x33   : > { %4275 = vmatpush3.bf16.msra.mxu1 %v4775_v23  ;;  %v4800_v41 = vld [vmem:[#allocation3 + $0xb0] ss:$28 sps:$4 sm:$0xff]   ;;  %v5108_v42 = vld [vmem:[%s5050_s24 + $0x28] sm:$0xff]   ;;  %v5111_v43 = vld [vmem:[%s5050_s24 + $0x30] sm:$0xff]  }
  0x34   : > { %4276 = vmatprep.subr.bf16.mxu1 %v4776_v26  ;;  %v4802_v44 = vld [vmem:[#allocation3 + $0x78] ss:$28 sps:$4 sm:$0xff]   ;;  %v4806_v45 = vld [vmem:[#allocation3 + $0x40] ss:$28 sps:$4 sm:$0xff]   ;;  %v5116_v46 = vld [vmem:[%s5050_s24 + $0x38] sm:$0xff]  }
  0x35   : > { %502 = vperm.xlu1 %4600, %v469_v12   ;;  %499 = vperm.xlu0 %4599, %v468_v13   ;;  %v4808_v47 = vld [vmem:[#allocation3 + $0x8] ss:$28 sps:$4 sm:$0xff]   ;;  %v4810_v48 = vld [vmem:[#allocation3 + $0x198] ss:$28 sps:$4 sm:$0xff]   ;;  %v4812_v49 = vld [vmem:[#allocation3 + $0x160] ss:$28 sps:$4 sm:$0xff]  }
  0x36   : > { %v4814_v50 = vld [vmem:[#allocation3 + $0x128] ss:$28 sps:$4 sm:$0xff]   ;;  %v4816_v51 = vld [vmem:[#allocation3 + $0xf0] ss:$28 sps:$4 sm:$0xff]   ;;  %v4818_v52 = vld [vmem:[#allocation3 + $0xb8] ss:$28 sps:$4 sm:$0xff]  }
  0x37   : > { %4277 = vmatpush3.bf16.msra.mxu1 %v4776_v26  ;;  %v4819_v53 = vld [vmem:[#allocation3 + $0x80] ss:$28 sps:$4 sm:$0xff]   ;;  %v4820_v54 = vld [vmem:[#allocation3 + $0x48] ss:$28 sps:$4 sm:$0xff]   ;;  %v4821_v55 = vld [vmem:[#allocation3 + $0x10] ss:$28 sps:$4 sm:$0xff]  }
  0x38   : > { %4278 = vmatprep.subr.bf16.mxu1 %v4777_v27  ;;  %v4781_v8 = vld [vmem:[#allocation3 + $0x154] ss:$28 sps:$4 sm:$0xff]  }
  0x39   : > { %508 = vperm.xlu1 %4600, %v471_v14   ;;  %505 = vperm.xlu0 %4599, %v470_v15   ;;  %v4783_v14 = vld [vmem:[#allocation3 + $0x11c] ss:$28 sps:$4 sm:$0xff]  }
  0x3b   : > { %4279 = vmatpush3.bf16.msra.mxu1 %v4777_v27  ;;  %v4789_v27 = vld [vmem:[#allocation3 + $0xac] ss:$28 sps:$4 sm:$0xff]  }
  0x3c   : > { %4280 = vmatprep.subr.bf16.mxu1 %v4778_v28 }
  0x3d   : > { %514 = vperm.xlu1 %4600, %v473_v16   ;;  %511 = vperm.xlu0 %4599, %v472_v17  }
  0x3f   : > { %4281 = vmatpush3.bf16.msra.mxu1 %v4778_v28 }
  0x40   : > { %4282 = vmatprep.subr.bf16.mxu1 %v4780_v29 }
  0x41   : > { %520 = vperm.xlu1 %4600, %v475_v18   ;;  %517 = vperm.xlu0 %4599, %v474_v19  }
  0x43   : > { %4283 = vmatpush3.bf16.msra.mxu1 %v4780_v29 }
  0x44   : > { %4284 = vmatprep.subr.bf16.mxu1 %v4782_v30 }
  0x45   : > { %526 = vperm.xlu1 %4600, %v477_v20   ;;  %523 = vperm.xlu0 %4599, %v476_v21   ;;  %v4786_v20 = vld [vmem:[#allocation3 + $0xe4] ss:$28 sps:$4 sm:$0xff]  }
  0x47   : > { %4285 = vmatpush3.bf16.msra.mxu1 %v4782_v30 }
  0x48   : > { %4286 = vmatprep.subr.bf16.mxu1 %v4784_v31 }
  0x49   : > { %4601 = vset.pattern.permute.xlu1 %v7014_v40 }
  0x4b   : > { %4287 = vmatpush3.bf16.msra.mxu1 %v4784_v31 }
  0x4c   : > { %4336 = vmatprep.subr.bf16.mxu1 %v4788_v32 }
  0x4e   : > { %4289 = vmatmul.mubr.bf16.vlgmr.msra.gmra.mxu1 %v5091_v33 }
  0x4f   : > { %4337 = vmatpush3.bf16.msra.mxu1 %v4788_v32  ;;  %4292 = vmatprep.mubr.bf16.mxu1 %v5094_v34 }
  0x50   : > { %4338 = vmatprep.subr.bf16.mxu1 %v4790_v35 }
  0x53   : > { %4339 = vmatpush3.bf16.msra.mxu1 %v4790_v35  ;;  %v4792_v35 = vld [vmem:[#allocation3 + $0x74] ss:$28 sps:$4 sm:$0xff]  }
  0x54   : > { %4340 = vmatprep.subr.bf16.mxu1 %v4794_v36 }
  0x56   : > { %4293 = vmatmul.mubr.bf16.gmra.mxu1 %v5099_v37 }
  0x57   : > { %4341 = vmatpush3.bf16.msra.mxu1 %v4794_v36  ;;  %4296 = vmatprep.mubr.bf16.mxu1 %v5102_v38 }
  0x58   : > { %4342 = vmatprep.subr.bf16.mxu1 %v4796_v39 }
  0x5b   : > { %4343 = vmatpush3.bf16.msra.mxu1 %v4796_v39 }
  0x5c   : > { %4344 = vmatprep.subr.bf16.mxu1 %v4800_v41 }
  0x5e   : > { %4297 = vmatmul.mubr.bf16.gmra.mxu1 %v5108_v42 }
  0x5f   : > { %4345 = vmatpush3.bf16.msra.mxu1 %v4800_v41  ;;  %4300 = vmatprep.mubr.bf16.mxu1 %v5111_v43 }
  0x60   : > { %4346 = vmatprep.subr.bf16.mxu1 %v4802_v44 }
  0x63   : > { %4347 = vmatpush3.bf16.msra.mxu1 %v4802_v44 }
  0x64   : > { %4348 = vmatprep.subr.bf16.mxu1 %v4806_v45 }
  0x66   : > { %4301 = vmatmul.mubr.bf16.gmra.mxu1 %v5116_v46 }
  0x67   : > { %4349 = vmatpush3.bf16.msra.mxu1 %v4806_v45  ;;  %4352 = vmatprep.mubr.bf16.mxu1 %v5087_v25 }
  0x68   : > { %4350 = vmatprep.subr.bf16.mxu1 %v4808_v47 }
  0x6b   : > { %4351 = vmatpush3.bf16.msra.mxu1 %v4808_v47  ;;  %v4795_v47 = vld [vmem:[#allocation3 + $0x3c] ss:$28 sps:$4 sm:$0xff]  }
  0x6c   : > { %4400 = vmatprep.subr.bf16.mxu1 %v4810_v48 }
  0x6e   : > { %4353 = vmatmul.mubr.bf16.vlgmr.msra.gmra.mxu1 %v5091_v33 }
  0x6f   : > { %4401 = vmatpush3.bf16.msra.mxu1 %v4810_v48  ;;  %4356 = vmatprep.mubr.bf16.mxu1 %v5094_v34 }
  0x70   : > { %4402 = vmatprep.subr.bf16.mxu1 %v4812_v49 }
  0x73   : > { %4403 = vmatpush3.bf16.msra.mxu1 %v4812_v49 }
  0x74   : > { %4404 = vmatprep.subr.bf16.mxu1 %v4814_v50 }
  0x76   : > { %4357 = vmatmul.mubr.bf16.gmra.mxu1 %v5099_v37 }
  0x77   : > { %4405 = vmatpush3.bf16.msra.mxu1 %v4814_v50  ;;  %4360 = vmatprep.mubr.bf16.mxu1 %v5102_v38 }
  0x78   : > { %4406 = vmatprep.subr.bf16.mxu1 %v4816_v51 }
  0x7b   : > { %4407 = vmatpush3.bf16.msra.mxu1 %v4816_v51  ;;  %v4798_v51 = vld [vmem:[#allocation3 + $0x4] ss:$28 sps:$4 sm:$0xff]  }
  0x7c   : > { %4408 = vmatprep.subr.bf16.mxu1 %v4818_v52 }
  0x7e   : > { %4361 = vmatmul.mubr.bf16.gmra.mxu1 %v5108_v42 }
  0x7f   : > { %4409 = vmatpush3.bf16.msra.mxu1 %v4818_v52  ;;  %4364 = vmatprep.mubr.bf16.mxu1 %v5111_v43  ;;  %v4801_v52 = vld [vmem:[#allocation3 + $0x194] ss:$28 sps:$4 sm:$0xff]  }
  0x80   : > { %4410 = vmatprep.subr.bf16.mxu1 %v4819_v53 }
  0x83   : > { %4411 = vmatpush3.bf16.msra.mxu1 %v4819_v53  ;;  %v4804_v53 = vld [vmem:[#allocation3 + $0x15c] ss:$28 sps:$4 sm:$0xff]  }
  0x84   : > { %4412 = vmatprep.subr.bf16.mxu1 %v4820_v54 }
  0x86   : > { %4365 = vmatmul.mubr.bf16.gmra.mxu1 %v5116_v46 }
  0x87   : > { %4413 = vmatpush3.bf16.msra.mxu1 %v4820_v54  ;;  %4416 = vmatprep.mubr.bf16.mxu1 %v5087_v25  ;;  %v4807_v54 = vld [vmem:[#allocation3 + $0x124] ss:$28 sps:$4 sm:$0xff]  }
  0x88   : > { %4414 = vmatprep.subr.bf16.mxu1 %v4821_v55 }
  0x8b   : > { %4415 = vmatpush3.bf16.msra.mxu1 %v4821_v55  ;;  %v4809_v55 = vld [vmem:[#allocation3 + $0xec] ss:$28 sps:$4 sm:$0xff]  }
  0x8e   : > { %4417 = vmatmul.mubr.bf16.vlgmr.msra.gmra.mxu1 %v5091_v33 }
  0x8f   : > { %4420 = vmatprep.mubr.bf16.mxu1 %v5094_v34 }
  0x96   : > { %4421 = vmatmul.mubr.bf16.gmra.mxu1 %v5099_v37 }
  0x97   : > { %4424 = vmatprep.mubr.bf16.mxu1 %v5102_v38 }
  0x9e   : > { %4425 = vmatmul.mubr.bf16.gmra.mxu1 %v5108_v42 }
  0x9f   : > { %4428 = vmatprep.mubr.bf16.mxu1 %v5111_v43 }
  0xa4   : > { %v488_v58 = vpop.permute.xlu1 %487  ;;  %v482_v59 = vpop.permute.xlu0 %481 }
  0xa5   : > { %vm530_vm3 = vcmp.eq.s32.totalorder %v5129_v57, %v488_v58  ;;  %vm528_vm4 = vcmp.eq.s32.totalorder %v5129_v57, %v482_v59  ;;  %v4813_v58 = vld [vmem:[#allocation3 + $0x7c] ss:$28 sps:$4 sm:$0xff]   ;;  %v4815_v59 = vld [vmem:[#allocation3 + $0x44] ss:$28 sps:$4 sm:$0xff]  }
  0xa6   : > { %v546_v63 = vsel %vm530_vm3, 1.0, %v6996_v62  ;;  %v544_v1 = vsel %vm528_vm4, 1.0, %v6996_v62  ;;  %4429 = vmatmul.mubr.bf16.gmra.mxu1 %v5116_v46  ;;  %vm4938_vm4 = vmmov 0  }
  0xa7   : > { %4480 = vmatprep.mubr.bf16.mxu1 %v5087_v25 }
  0xa8   : > { %v491_v60 = vpop.permute.xlu1 %490  ;;  %v485_v61 = vpop.permute.xlu0 %484 }
  0xa9   : > { %vm531_vm5 = vcmp.eq.s32.totalorder %v5129_v57, %v491_v60  ;;  %vm529_vm6 = vcmp.eq.s32.totalorder %v5129_v57, %v485_v61  ;;  %v4817_v60 = vld [vmem:[#allocation3 + $0xc] ss:$28 sps:$4 sm:$0xff]   ;;  %v4822_v61 = vld [vmem:[#allocation3 + $0x19c] ss:$28 sps:$4 sm:$0xff]  }
  0xaa   : > { %v547_v0 = vsel %vm531_vm5, 1.0, %v6996_v62  ;;  %v545_v2 = vsel %vm529_vm6, 1.0, %v6996_v62 }
  0xab   : > { %v561_v4 = vpack.c.bf16 %v547_v0, %v546_v63  ;;  %v560_v5 = vpack.c.bf16 %v545_v2, %v544_v1  ;;  %v4823_v63 = vld [vmem:[#allocation3 + $0x164] ss:$28 sps:$4 sm:$0xff]   ;;  %v4824_v0 = vld [vmem:[#allocation3 + $0x12c] ss:$28 sps:$4 sm:$0xff]   ;;  %v4825_v1 = vld [vmem:[#allocation3 + $0xf4] ss:$28 sps:$4 sm:$0xff]  }
  0xac   : > { %v497_v6 = vpop.permute.xlu1 %496  ;;  %v494_v7 = vpop.permute.xlu0 %493  ;;  %v4826_v2 = vld [vmem:[#allocation3 + $0xbc] ss:$28 sps:$4 sm:$0xff]  }
  0xad   : > { %vm533_vm8 = vcmp.eq.s32.totalorder %v5129_v57, %v497_v6  ;;  %vm532_vm9 = vcmp.eq.s32.totalorder %v5129_v57, %v494_v7  ;;  %4256 = vmatprep.mubr.msk.bf16.mxu0 %vm571_vm7, %v560_v5  ;;  %v7016_v7 = vmov 2  }
  0xae   : > { %v549_v9 = vsel %vm533_vm8, 1.0, %v6996_v62  ;;  %v548_v10 = vsel %vm532_vm9, 1.0, %v6996_v62  ;;  %4257 = vmatmul.mubr.msk.bf16.vlgmr.msra.gmra.mxu0 %vm571_vm7, %v561_v4  ;;  %v4827_v4 = vld [vmem:[#allocation3 + $0x84] ss:$28 sps:$4 sm:$0xff]   ;;  %vm3602_vm9 = vcmask 523264  }
  0xaf   : > { %v562_v11 = vpack.c.bf16 %v549_v9, %v548_v10  ;;  %4305 = vmatpush3.bf16.msra.mxu0 %v5083_v24  ;;  %v7018_v9 = vmov 3   ;;  %v7010_v10 = vmov 4  }
  0xb0   : > { %v503_v12 = vpop.permute.xlu1 %502  ;;  %v500_v13 = vpop.permute.xlu0 %499  ;;  %4306 = vmatprep.subr.bf16.mxu0 %v4781_v8 }
  0xb1   : > { %vm535_vm10 = vcmp.eq.s32.totalorder %v5129_v57, %v503_v12  ;;  %vm534_vm11 = vcmp.eq.s32.totalorder %v5129_v57, %v500_v13  ;;  %4260 = vmatprep.mubr.msk.bf16.mxu0 %vm571_vm7, %v562_v11  ;;  %v7004_v11 = vmov 5   ;;  %v7000_v12 = vmov 6  }
  0xb2   : > { %v551_v15 = vsel %vm535_vm10, 1.0, %v6996_v62  ;;  %v550_v16 = vsel %vm534_vm11, 1.0, %v6996_v62  ;;  %vm3604_vm10 = vcmask 519168  }
  0xb3   : > { %v563_v17 = vpack.c.bf16 %v551_v15, %v550_v16  ;;  %4307 = vmatpush3.bf16.msra.mxu0 %v4781_v8  ;;  %v4829_v8 = vld [vmem:[#allocation3 + $0x14] ss:$28 sps:$4 sm:$0xff]  }
  0xb4   : > { %v509_v18 = vpop.permute.xlu1 %508  ;;  %v506_v19 = vpop.permute.xlu0 %505  ;;  %4308 = vmatprep.subr.bf16.mxu0 %v4783_v14 }
  0xb5   : > { %vm537_vm12 = vcmp.eq.s32.totalorder %v5129_v57, %v509_v18  ;;  %vm536_vm13 = vcmp.eq.s32.totalorder %v5129_v57, %v506_v19  ;;  %v7002_v18 = vmov 9  }
  0xb6   : > { %v553_v21 = vsel %vm537_vm12, 1.0, %v6996_v62  ;;  %v552_v22 = vsel %vm536_vm13, 1.0, %v6996_v62  ;;  %4261 = vmatmul.mubr.msk.bf16.gmra.mxu0 %vm571_vm7, %v563_v17 }
  0xb7   : > { %v564_v23 = vpack.c.bf16 %v553_v21, %v552_v22  ;;  %4309 = vmatpush3.bf16.msra.mxu0 %v4783_v14 }
  0xb8   : > { %v515_v24 = vpop.permute.xlu1 %514  ;;  %v512_v26 = vpop.permute.xlu0 %511  ;;  %4310 = vmatprep.subr.bf16.mxu0 %v4786_v20 }
  0xb9   : > { %vm539_vm14 = vcmp.eq.s32.totalorder %v5129_v57, %v515_v24  ;;  %vm538_vm15 = vcmp.eq.s32.totalorder %v5129_v57, %v512_v26  ;;  %4264 = vmatprep.mubr.msk.bf16.mxu0 %vm571_vm7, %v564_v23 }
  0xba   : > { %v555_v28 = vsel %vm539_vm14, 1.0, %v6996_v62  ;;  %v554_v29 = vsel %vm538_vm15, 1.0, %v6996_v62 }
  0xbb   : > { %v565_v30 = vpack.c.bf16 %v555_v28, %v554_v29  ;;  %4311 = vmatpush3.bf16.msra.mxu0 %v4786_v20 }
  0xbc   : > { %v521_v31 = vpop.permute.xlu1 %520  ;;  %v518_v32 = vpop.permute.xlu0 %517  ;;  %4312 = vmatprep.subr.bf16.mxu0 %v4789_v27 }
  0xbd   : > { %vm541_vm0 = vcmp.eq.s32.totalorder %v5129_v57, %v521_v31  ;;  %vm540_vm1 = vcmp.eq.s32.totalorder %v5129_v57, %v518_v32 }
  0xbe   : > { %v557_v36 = vsel %vm541_vm0, 1.0, %v6996_v62  ;;  %v556_v39 = vsel %vm540_vm1, 1.0, %v6996_v62  ;;  %4265 = vmatmul.mubr.msk.bf16.gmra.mxu0 %vm571_vm7, %v565_v30 }
  0xbf   : > { %v566_v41 = vpack.c.bf16 %v557_v36, %v556_v39  ;;  %4313 = vmatpush3.bf16.msra.mxu0 %v4789_v27 }
  0xc0   : > { %v527_v44 = vpop.permute.xlu1 %526  ;;  %v524_v45 = vpop.permute.xlu0 %523  ;;  %4314 = vmatprep.subr.bf16.mxu0 %v4792_v35 }
  0xc1   : > { %vm543_vm2 = vcmp.eq.s32.totalorder %v5129_v57, %v527_v44  ;;  %vm542_vm3 = vcmp.eq.s32.totalorder %v5129_v57, %v524_v45  ;;  %4268 = vmatprep.mubr.msk.bf16.mxu0 %vm571_vm7, %v566_v41  ;;  %v4811_v57 = vld [vmem:[#allocation3 + $0xb4] ss:$28 sps:$4 sm:$0xff]  }
  0xc2   : > { %v559_v48 = vsel %vm543_vm2, 1.0, %v6996_v62  ;;  %v558_v49 = vsel %vm542_vm3, 1.0, %v6996_v62 }
  0xc3   : > { %v567_v50 = vpack.c.bf16 %v559_v48, %v558_v49  ;;  %4315 = vmatpush3.bf16.msra.mxu0 %v4792_v35 }
  0xc4   : > { %4316 = vmatprep.subr.bf16.mxu0 %v4795_v47 }
  0xc6   : > { %4269 = vmatmul.mubr.msk.bf16.gmra.mxu0 %vm571_vm7, %v567_v50 }
  0xc7   : > { %4317 = vmatpush3.bf16.msra.mxu0 %v4795_v47  ;;  %4320 = vmatprep.mubr.bf16.mxu0 %v5087_v25 }
  0xc8   : > { %4318 = vmatprep.subr.bf16.mxu0 %v4798_v51 }
  0xcb   : > { %4319 = vmatpush3.bf16.msra.mxu0 %v4798_v51 }
  0xcc   : > { %4368 = vmatprep.subr.bf16.mxu0 %v4801_v52 }
  0xce   : > { %4321 = vmatmul.mubr.bf16.vlgmr.msra.gmra.mxu0 %v5091_v33 }
  0xcf   : > { %4369 = vmatpush3.bf16.msra.mxu0 %v4801_v52  ;;  %4324 = vmatprep.mubr.bf16.mxu0 %v5094_v34 }
  0xd0   : > { %4370 = vmatprep.subr.bf16.mxu0 %v4804_v53 }
  0xd3   : > { %4371 = vmatpush3.bf16.msra.mxu0 %v4804_v53 }
  0xd4   : > { %4372 = vmatprep.subr.bf16.mxu0 %v4807_v54 }
  0xd6   : > { %4325 = vmatmul.mubr.bf16.gmra.mxu0 %v5099_v37 }
  0xd7   : > { %4373 = vmatpush3.bf16.msra.mxu0 %v4807_v54  ;;  %4328 = vmatprep.mubr.bf16.mxu0 %v5102_v38 }
  0xd8   : > { %4374 = vmatprep.subr.bf16.mxu0 %v4809_v55 }
  0xdb   : > { %4375 = vmatpush3.bf16.msra.mxu0 %v4809_v55 }
  0xdc   : > { %4376 = vmatprep.subr.bf16.mxu0 %v4811_v57 }
  0xde   : > { %4329 = vmatmul.mubr.bf16.gmra.mxu0 %v5108_v42 }
  0xdf   : > { %4377 = vmatpush3.bf16.msra.mxu0 %v4811_v57  ;;  %4332 = vmatprep.mubr.bf16.mxu0 %v5111_v43 }
  0xe0   : > { %4378 = vmatprep.subr.bf16.mxu0 %v4813_v58 }
  0xe3   : > { %4379 = vmatpush3.bf16.msra.mxu0 %v4813_v58 }
  0xe4   : > { %4380 = vmatprep.subr.bf16.mxu0 %v4815_v59 }
  0xe6   : > { %4333 = vmatmul.mubr.bf16.gmra.mxu0 %v5116_v46 }
  0xe7   : > { %4381 = vmatpush3.bf16.msra.mxu0 %v4815_v59  ;;  %4384 = vmatprep.mubr.bf16.mxu0 %v5087_v25 }
  0xe8   : > { %4382 = vmatprep.subr.bf16.mxu0 %v4817_v60 }
  0xeb   : > { %4383 = vmatpush3.bf16.msra.mxu0 %v4817_v60 }
  0xec   : > { %4432 = vmatprep.subr.bf16.mxu0 %v4822_v61 }
  0xee   : > { %4385 = vmatmul.mubr.bf16.vlgmr.msra.gmra.mxu0 %v5091_v33 }
  0xef   : > { %4388 = vmatprep.mubr.bf16.mxu0 %v5094_v34  ;;  %4433 = vmatpush3.bf16.msra.mxu0 %v4822_v61 }
  0xf0   : > { %4434 = vmatprep.subr.bf16.mxu0 %v4823_v63 }
  0xf3   : > { %4435 = vmatpush3.bf16.msra.mxu0 %v4823_v63 }
  0xf4   : > { %4436 = vmatprep.subr.bf16.mxu0 %v4824_v0 }
  0xf6   : > { %4389 = vmatmul.mubr.bf16.gmra.mxu0 %v5099_v37 }
  0xf7   : > { %4392 = vmatprep.mubr.bf16.mxu0 %v5102_v38  ;;  %4437 = vmatpush3.bf16.msra.mxu0 %v4824_v0 }
  0xf8   : > { %4438 = vmatprep.subr.bf16.mxu0 %v4825_v1 }
  0xfb   : > { %4439 = vmatpush3.bf16.msra.mxu0 %v4825_v1 }
  0xfc   : > { %4440 = vmatprep.subr.bf16.mxu0 %v4826_v2 }
  0xfe   : > { %4393 = vmatmul.mubr.bf16.gmra.mxu0 %v5108_v42 }
  0xff   : > { %4396 = vmatprep.mubr.bf16.mxu0 %v5111_v43  ;;  %4441 = vmatpush3.bf16.msra.mxu0 %v4826_v2 }
 0x100   : > { %4442 = vmatprep.subr.bf16.mxu0 %v4827_v4 }
 0x103   : > { %4443 = vmatpush3.bf16.msra.mxu0 %v4827_v4 }
 0x106   : > { %4397 = vmatmul.mubr.bf16.gmra.mxu0 %v5116_v46 }
 0x107   : > { %4448 = vmatprep.mubr.bf16.mxu0 %v5087_v25  ;;  %v4828_v25 = vld [vmem:[#allocation3 + $0x4c] ss:$28 sps:$4 sm:$0xff]  }
 0x108   : > { %4444 = vmatprep.subr.bf16.mxu0 %v4828_v25 }
 0x109   : > { %4445 = vmatpush3.bf16.msra.mxu0 %v4828_v25 }
 0x10a   : > { %4446 = vmatprep.subr.bf16.mxu0 %v4829_v8 }
 0x10d   : > { %4447 = vmatpush3.bf16.msra.mxu0 %v4829_v8 }
 0x10e   : > { %4496 = vmatprep.subr.bf16.mxu0 %v6996_v62 }
 0x110   : > { %4449 = vmatmul.mubr.bf16.vlgmr.msra.gmra.mxu0 %v5091_v33  ;;  %v7006_v33 = vmov 7  }
 0x111   : > { %4452 = vmatprep.mubr.bf16.mxu0 %v5094_v34 }
 0x118   : > { %4453 = vmatmul.mubr.bf16.gmra.mxu0 %v5099_v37  ;;  %v6998_v37 = vmov 8  }
 0x119   : > { %4456 = vmatprep.mubr.bf16.mxu0 %v5102_v38 }
 0x120   : > { %4457 = vmatmul.mubr.bf16.gmra.mxu0 %v5108_v42 }
 0x121   : > { %4460 = vmatprep.mubr.bf16.mxu0 %v5111_v43 }
 0x128   : > { %4461 = vmatmul.mubr.bf16.gmra.mxu0 %v5116_v46 }
 0x16e   : > { %v5197_v5 = vpop.f32.mrf.mxu0 }
 0x16f   : > { %7129 = vst [vmem:[#allocation9_spill] sm:$0xff] %v5197_v5  ;;  %1043 = vperm.xlu1 %4601, %v5197_v5   ;;  %934 = vperm.xlu0 %4599, %v5197_v5  }
 0x170   : > { %v5201_v6 = vpop.f32.mrf.mxu0 }
 0x172   : > { %v5227_v34 = vpop.f32.mrf.mxu0 }
 0x173   : > { %4602 = vset.pattern.permute.xlu1 %v7016_v7  ;;  %924 = vperm.xlu0 %4599, %v5201_v6   ;;  %7130 = vst [vmem:[#allocation10_spill] sm:$0xff] %v5227_v34 }
 0x174   : > { %1364 = vperm.xlu1 %4602, %v5197_v5   ;;  %v5248_v38 = vpop.f32.mrf.mxu0 }
 0x175   : > { %7131 = vst [vmem:[#allocation11_spill] sm:$0xff] %v5248_v38 }
 0x176   : > { %v5262_v42 = vpop.f32.mrf.mxu0 }
 0x177   : > { %4609 = vset.pattern.permute.xlu0 %v7014_v40  ;;  %7132 = vst [vmem:[#allocation12_spill] sm:$0xff] %v5262_v42 }
 0x178   : > { %4603 = vset.pattern.permute.xlu1 %v7018_v9  ;;  %1035 = vperm.xlu0 %4609, %v5201_v6   ;;  %v5280_v43 = vpop.f32.mrf.mxu0 }
 0x179   : > { %1460 = vperm.xlu1 %4603, %v5197_v5  }
 0x17a   : > { %v5298_v46 = vpop.f32.mrf.mxu0 }
 0x17b   : > { %7133 = vst [vmem:[#allocation13_spill] sm:$0xff] %v5298_v46 }
 0x17c   : > { %4611 = vset.pattern.permute.xlu0 %v7018_v9  ;;  %v5316_v13 = vpop.f32.mrf.mxu0 }
 0x17d   : > { %4604 = vset.pattern.permute.xlu1 %v7010_v10  ;;  %1452 = vperm.xlu0 %4611, %v5201_v6   ;;  %7134 = vst [vmem:[#allocation14_spill] sm:$0xff] %v5316_v13 }
 0x17e   : > { %1781 = vperm.xlu1 %4604, %v5197_v5   ;;  %v5352_v24 = vpop.f32.mrf.mxu0 }
 0x17f   : > { %7140 = vst [vmem:[#allocation20_spill] sm:$0xff] %v5352_v24 }
 0x180   : > { %v5386_v36 = vpop.f32.mrf.mxu0 }
 0x181   : > { %4613 = vset.pattern.permute.xlu0 %v7004_v11  ;;  %7144 = vst [vmem:[#allocation24_spill] sm:$0xff] %v5386_v36 }
 0x182   : > { %4605 = vset.pattern.permute.xlu1 %v7004_v11  ;;  %1869 = vperm.xlu0 %4613, %v5201_v6   ;;  %v5428_v53 = vpop.f32.mrf.mxu0 }
 0x183   : > { %1877 = vperm.xlu1 %4605, %v5197_v5   ;;  %7154 = vst [vmem:[#allocation34_spill] sm:$0xff] %v5428_v53 }
 0x184   : > { %v5462_v0 = vpop.f32.mrf.mxu0 }
 0x185   : > { %7163 = vst [vmem:[#allocation43_spill] sm:$0xff] %v5462_v0 }
 0x186   : > { %4615 = vset.pattern.permute.xlu0 %v7006_v33 }
 0x187   : > { %4606 = vset.pattern.permute.xlu1 %v7000_v12  ;;  %2286 = vperm.xlu0 %4615, %v5201_v6  }
 0x188   : > { %2198 = vperm.xlu1 %4606, %v5197_v5  }
 0x18b   : > { %4618 = vset.pattern.permute.xlu0 %v7014_v40 }
 0x18c   : > { %4607 = vset.pattern.permute.xlu1 %v7006_v33  ;;  %1047 = vperm.xlu0 %4618, %v5227_v34  }
 0x18d   : > { %2294 = vperm.xlu1 %4607, %v5197_v5  }
 0x190   : > { %4620 = vset.pattern.permute.xlu0 %v7018_v9 }
 0x191   : > { %4608 = vset.pattern.permute.xlu1 %v6998_v37  ;;  %1464 = vperm.xlu0 %4620, %v5227_v34  }
 0x192   : > { %2615 = vperm.xlu1 %4608, %v5197_v5  }
 0x195   : > { %4622 = vset.pattern.permute.xlu0 %v7004_v11 }
 0x196   : > { %4610 = vset.pattern.permute.xlu1 %v7016_v7  ;;  %1881 = vperm.xlu0 %4622, %v5227_v34  }
 0x197   : > { %1356 = vperm.xlu1 %4610, %v5201_v6  }
 0x19a   : > { %4624 = vset.pattern.permute.xlu0 %v7006_v33 }
 0x19b   : > { %4612 = vset.pattern.permute.xlu1 %v7010_v10  ;;  %2298 = vperm.xlu0 %4624, %v5227_v34  }
 0x19c   : > { %1773 = vperm.xlu1 %4612, %v5201_v6  }
 0x19f   : > { %4628 = vset.pattern.permute.xlu0 %v7016_v7 }
 0x1a0   : > { %4614 = vset.pattern.permute.xlu1 %v7000_v12  ;;  %1360 = vperm.xlu0 %4628, %v5248_v38  }
 0x1a1   : > { %2190 = vperm.xlu1 %4614, %v5201_v6  }
 0x1a4   : > { %4630 = vset.pattern.permute.xlu0 %v7010_v10 }
 0x1a5   : > { %4616 = vset.pattern.permute.xlu1 %v6998_v37  ;;  %1777 = vperm.xlu0 %4630, %v5248_v38  }
 0x1a6   : > { %2607 = vperm.xlu1 %4616, %v5201_v6  }
 0x1a9   : > { %4632 = vset.pattern.permute.xlu0 %v7000_v12 }
 0x1aa   : > { %4617 = vset.pattern.permute.xlu1 %v7012_v3  ;;  %2194 = vperm.xlu0 %4632, %v5248_v38  }
 0x1ab   : > { %939 = vperm.xlu1 %4617, %v5227_v34  }
 0x1ae   : > { %4634 = vset.pattern.permute.xlu0 %v7012_v3 }
 0x1af   : > { %4619 = vset.pattern.permute.xlu1 %v7016_v7  ;;  %954 = vperm.xlu0 %4634, %v5262_v42  }
 0x1b0   : > { %1368 = vperm.xlu1 %4619, %v5227_v34  }
 0x1b3   : > { %4636 = vset.pattern.permute.xlu0 %v7016_v7 }
 0x1b4   : > { %4621 = vset.pattern.permute.xlu1 %v7010_v10  ;;  %1380 = vperm.xlu0 %4636, %v5262_v42  }
 0x1b5   : > { %1785 = vperm.xlu1 %4621, %v5227_v34  }
 0x1b8   : > { %4638 = vset.pattern.permute.xlu0 %v7010_v10 }
 0x1b9   : > { %4623 = vset.pattern.permute.xlu1 %v7000_v12  ;;  %1797 = vperm.xlu0 %4638, %v5262_v42  }
 0x1ba   : > { %2202 = vperm.xlu1 %4623, %v5227_v34  }
 0x1bd   : > { %4640 = vset.pattern.permute.xlu0 %v7000_v12 }
 0x1be   : > { %4625 = vset.pattern.permute.xlu1 %v6998_v37  ;;  %2214 = vperm.xlu0 %4640, %v5262_v42  }
 0x1bf   : > { %2619 = vperm.xlu1 %4625, %v5227_v34  }
 0x1c2   : > { %4643 = vset.pattern.permute.xlu0 %v7012_v3 }
 0x1c3   : > { %4626 = vset.pattern.permute.xlu1 %v7012_v3  ;;  %944 = vperm.xlu0 %4643, %v5280_v43  }
 0x1c4   : > { %929 = vperm.xlu1 %4626, %v5248_v38  }
 0x1c7   : > { %4645 = vset.pattern.permute.xlu0 %v7016_v7 }
 0x1c8   : > { %4627 = vset.pattern.permute.xlu1 %v7014_v40  ;;  %1372 = vperm.xlu0 %4645, %v5280_v43  }
 0x1c9   : > { %1039 = vperm.xlu1 %4627, %v5248_v38  }
 0x1cc   : > { %4647 = vset.pattern.permute.xlu0 %v7010_v10 }
 0x1cd   : > { %4629 = vset.pattern.permute.xlu1 %v7018_v9  ;;  %1789 = vperm.xlu0 %4647, %v5280_v43  }
 0x1ce   : > { %1456 = vperm.xlu1 %4629, %v5248_v38  }
 0x1d1   : > { %4649 = vset.pattern.permute.xlu0 %v7000_v12 }
 0x1d2   : > { %4631 = vset.pattern.permute.xlu1 %v7004_v11  ;;  %2206 = vperm.xlu0 %4649, %v5280_v43  }
 0x1d3   : > { %1873 = vperm.xlu1 %4631, %v5248_v38  }
 0x1d6   : > { %4652 = vset.pattern.permute.xlu0 %v7014_v40 }
 0x1d7   : > { %4633 = vset.pattern.permute.xlu1 %v7006_v33  ;;  %1063 = vperm.xlu0 %4652, %v5298_v46  }
 0x1d8   : > { %2290 = vperm.xlu1 %4633, %v5248_v38   ;;  %v7197_v38 = vmov 1  }
 0x1db   : > { %4654 = vset.pattern.permute.xlu0 %v7018_v9 }
 0x1dc   : > { %4635 = vset.pattern.permute.xlu1 %v7014_v40  ;;  %1480 = vperm.xlu0 %4654, %v5298_v46  }
 0x1dd   : > { %1059 = vperm.xlu1 %4635, %v5262_v42  }
 0x1e0   : > { %4656 = vset.pattern.permute.xlu0 %v7004_v11 }
 0x1e1   : > { %4637 = vset.pattern.permute.xlu1 %v7018_v9  ;;  %1897 = vperm.xlu0 %4656, %v5298_v46  }
 0x1e2   : > { %1476 = vperm.xlu1 %4637, %v5262_v42  }
 0x1e5   : > { %4658 = vset.pattern.permute.xlu0 %v7006_v33 }
 0x1e6   : > { %4639 = vset.pattern.permute.xlu1 %v7004_v11  ;;  %2314 = vperm.xlu0 %4658, %v5298_v46  }
 0x1e7   : > { %1893 = vperm.xlu1 %4639, %v5262_v42  }
 0x1ea   : > { %v5318_v14 = vpop.permute.xlu1 %1043  ;;  %4660 = vset.pattern.permute.xlu0 %v7014_v40  ;;  %v5321_v15 = vpop.permute.xlu0 %934 }
 0x1eb   : > { %7135 = vst [vmem:[#allocation15_spill] sm:$0xff] %v5321_v15  ;;  %4641 = vset.pattern.permute.xlu1 %v7006_v33  ;;  %1055 = vperm.xlu0 %4660, %v5316_v13  }
 0x1ec   : > { %2310 = vperm.xlu1 %4641, %v5262_v42  }
 0x1ee   : > { %v5326_v16 = vpop.permute.xlu0 %924 }
 0x1ef   : > { %7136 = vst [vmem:[#allocation16_spill] sm:$0xff] %v5326_v16  ;;  %v5328_v17 = vpop.permute.xlu1 %1364  ;;  %4662 = vset.pattern.permute.xlu0 %v7018_v9 }
 0x1f0   : > { %7137 = vst [vmem:[#allocation17_spill] sm:$0xff] %v5328_v17  ;;  %4642 = vset.pattern.permute.xlu1 %v7002_v18  ;;  %1472 = vperm.xlu0 %4662, %v5316_v13   ;;  %v7181_v17 = vmov 2  }
 0x1f1   : > { %2727 = vperm.xlu1 %4642, %v5262_v42  }
 0x1f3   : > { %v5334_v19 = vpop.permute.xlu0 %1035 }
 0x1f4   : > { %v5336_v20 = vpop.permute.xlu1 %1460  ;;  %4664 = vset.pattern.permute.xlu0 %v7004_v11 }
 0x1f5   : > { %4644 = vset.pattern.permute.xlu1 %v7014_v40  ;;  %1889 = vperm.xlu0 %4664, %v5316_v13  }
 0x1f6   : > { %1051 = vperm.xlu1 %4644, %v5280_v43  }
 0x1f8   : > { %v5342_v21 = vpop.permute.xlu0 %1452 }
 0x1f9   : > { %v5344_v22 = vpop.permute.xlu1 %1781  ;;  %4666 = vset.pattern.permute.xlu0 %v7006_v33 }
 0x1fa   : > { %7138 = vst [vmem:[#allocation18_spill] sm:$0xff] %v5344_v22  ;;  %4646 = vset.pattern.permute.xlu1 %v7018_v9  ;;  %2306 = vperm.xlu0 %4666, %v5316_v13  }
 0x1fb   : > { %1468 = vperm.xlu1 %4646, %v5280_v43  }
 0x1fd   : > { %v5350_v23 = vpop.permute.xlu0 %1869 }
 0x1fe   : > { %7139 = vst [vmem:[#allocation19_spill] sm:$0xff] %v5350_v23  ;;  %v5354_v26 = vpop.permute.xlu1 %1877  ;;  %4668 = vset.pattern.permute.xlu0 %v7012_v3 }
 0x1ff   : > { %4648 = vset.pattern.permute.xlu1 %v7004_v11  ;;  %974 = vperm.xlu0 %4668, %v5352_v24  }
 0x200   : > { %1885 = vperm.xlu1 %4648, %v5280_v43  }
 0x202   : > { %v5360_v27 = vpop.permute.xlu0 %2286 }
 0x203   : > { %7141 = vst [vmem:[#allocation21_spill] sm:$0xff] %v5360_v27  ;;  %v5362_v28 = vpop.permute.xlu1 %2198  ;;  %4670 = vset.pattern.permute.xlu0 %v7016_v7 }
 0x204   : > { %7142 = vst [vmem:[#allocation22_spill] sm:$0xff] %v5362_v28  ;;  %4650 = vset.pattern.permute.xlu1 %v7006_v33  ;;  %1396 = vperm.xlu0 %4670, %v5352_v24   ;;  %v7176_v28 = vmov 9  }
 0x205   : > { %2302 = vperm.xlu1 %4650, %v5280_v43  }
 0x207   : > { %v5368_v29 = vpop.permute.xlu0 %1047 }
 0x208   : > { %v5370_v30 = vpop.permute.xlu1 %2294  ;;  %4672 = vset.pattern.permute.xlu0 %v7010_v10 }
 0x209   : > { %4651 = vset.pattern.permute.xlu1 %v7012_v3  ;;  %1813 = vperm.xlu0 %4672, %v5352_v24  }
 0x20a   : > { %959 = vperm.xlu1 %4651, %v5298_v46  }
 0x20c   : > { %v5376_v31 = vpop.permute.xlu0 %1464 }
 0x20d   : > { %v5378_v32 = vpop.permute.xlu1 %2615  ;;  %4674 = vset.pattern.permute.xlu0 %v7000_v12 }
 0x20e   : > { %7143 = vst [vmem:[#allocation23_spill] sm:$0xff] %v5378_v32  ;;  %4653 = vset.pattern.permute.xlu1 %v7016_v7  ;;  %2230 = vperm.xlu0 %4674, %v5352_v24  }
 0x20f   : > { %1384 = vperm.xlu1 %4653, %v5298_v46  }
 0x211   : > { %v5384_v35 = vpop.permute.xlu0 %1881 }
 0x212   : > { %v5388_v39 = vpop.permute.xlu1 %1356  ;;  %4678 = vset.pattern.permute.xlu0 %v7012_v3 }
 0x213   : > { %7145 = vst [vmem:[#allocation25_spill] sm:$0xff] %v5388_v39  ;;  %4655 = vset.pattern.permute.xlu1 %v7010_v10  ;;  %964 = vperm.xlu0 %4678, %v5386_v36  }
 0x214   : > { %1801 = vperm.xlu1 %4655, %v5298_v46  }
 0x216   : > { %v5394_v41 = vpop.permute.xlu0 %2298 }
 0x217   : > { %v5396_v44 = vpop.permute.xlu1 %1773  ;;  %4680 = vset.pattern.permute.xlu0 %v7016_v7 }
 0x218   : > { %7146 = vst [vmem:[#allocation26_spill] sm:$0xff] %v5396_v44  ;;  %4657 = vset.pattern.permute.xlu1 %v7000_v12  ;;  %1388 = vperm.xlu0 %4680, %v5386_v36  }
 0x219   : > { %2218 = vperm.xlu1 %4657, %v5298_v46  }
 0x21b   : > { %v5402_v45 = vpop.permute.xlu0 %1360 }
 0x21c   : > { %7147 = vst [vmem:[#allocation27_spill] sm:$0xff] %v5402_v45  ;;  %v5404_v47 = vpop.permute.xlu1 %2190  ;;  %4682 = vset.pattern.permute.xlu0 %v7010_v10 }
 0x21d   : > { %7148 = vst [vmem:[#allocation28_spill] sm:$0xff] %v5404_v47  ;;  %4659 = vset.pattern.permute.xlu1 %v7012_v3  ;;  %1805 = vperm.xlu0 %4682, %v5386_v36  }
 0x21e   : > { %949 = vperm.xlu1 %4659, %v5316_v13  }
 0x220   : > { %v5410_v48 = vpop.permute.xlu0 %1777 }
 0x221   : > { %7149 = vst [vmem:[#allocation29_spill] sm:$0xff] %v5410_v48  ;;  %v5412_v49 = vpop.permute.xlu1 %2607  ;;  %4684 = vset.pattern.permute.xlu0 %v7000_v12  ;;  %v7177_v48 = vmov 0  }
 0x222   : > { %7150 = vst [vmem:[#allocation30_spill] sm:$0xff] %v5412_v49  ;;  %4661 = vset.pattern.permute.xlu1 %v7016_v7  ;;  %2222 = vperm.xlu0 %4684, %v5386_v36   ;;  %v7171_v49 = vmov 5  }
 0x223   : > { %1376 = vperm.xlu1 %4661, %v5316_v13  }
 0x225   : > { %v5418_v50 = vpop.permute.xlu0 %2194 }
 0x226   : > { %7151 = vst [vmem:[#allocation31_spill] sm:$0xff] %v5418_v50  ;;  %v5420_v51 = vpop.permute.xlu1 %939  ;;  %4686 = vset.pattern.permute.xlu0 %v7002_v18 }
 0x227   : > { %7152 = vst [vmem:[#allocation32_spill] sm:$0xff] %v5420_v51  ;;  %4663 = vset.pattern.permute.xlu1 %v7010_v10  ;;  %2735 = vperm.xlu0 %4686, %v5386_v36  }
 0x228   : > { %1793 = vperm.xlu1 %4663, %v5316_v13  }
 0x22a   : > { %v5426_v52 = vpop.permute.xlu0 %954 }
 0x22b   : > { %7153 = vst [vmem:[#allocation33_spill] sm:$0xff] %v5426_v52  ;;  %v5430_v54 = vpop.permute.xlu1 %1368  ;;  %4688 = vset.pattern.permute.xlu0 %v7014_v40 }
 0x22c   : > { %7155 = vst [vmem:[#allocation35_spill] sm:$0xff] %v5430_v54  ;;  %4665 = vset.pattern.permute.xlu1 %v7000_v12  ;;  %1079 = vperm.xlu0 %4688, %v5428_v53  }
 0x22d   : > { %2210 = vperm.xlu1 %4665, %v5316_v13  }
 0x22f   : > { %v5436_v55 = vpop.permute.xlu0 %1380 }
 0x230   : > { %7156 = vst [vmem:[#allocation36_spill] sm:$0xff] %v5436_v55  ;;  %v5438_v57 = vpop.permute.xlu1 %1785  ;;  %4690 = vset.pattern.permute.xlu0 %v7018_v9 }
 0x231   : > { %7157 = vst [vmem:[#allocation37_spill] sm:$0xff] %v5438_v57  ;;  %4667 = vset.pattern.permute.xlu1 %v6998_v37  ;;  %1496 = vperm.xlu0 %4690, %v5428_v53   ;;  %v7008_v37 = vmov 11   ;;  %v5539_v57 = vpop.f32.mrf.mxu1 }
 0x232   : > { %2627 = vperm.xlu1 %4667, %v5316_v13   ;;  %7178 = vst [vmem:[#allocation52_spill] sm:$0xff] %v5539_v57 }
 0x233   : > { %v5549_v16 = vpop.f32.mrf.mxu1 }
 0x234   : > { %v5444_v58 = vpop.permute.xlu0 %1797  ;;  %7180 = vst [vmem:[#allocation54_spill] sm:$0xff] %v5549_v16 }
 0x235   : > { %7158 = vst [vmem:[#allocation38_spill] sm:$0xff] %v5444_v58  ;;  %v5446_v59 = vpop.permute.xlu1 %2202  ;;  %4692 = vset.pattern.permute.xlu0 %v7004_v11  ;;  %v5558_v15 = vpop.f32.mrf.mxu1 }
 0x236   : > { %7159 = vst [vmem:[#allocation39_spill] sm:$0xff] %v5446_v59  ;;  %4669 = vset.pattern.permute.xlu1 %v7014_v40  ;;  %1913 = vperm.xlu0 %4692, %v5428_v53   ;;  %7183 = vst [vmem:[#allocation56_spill] sm:$0xff] %v5558_v15 }
 0x237   : > { %1075 = vperm.xlu1 %4669, %v5352_v24   ;;  %v5568_v58 = vpop.f32.mrf.mxu1 }
 0x238   : > { %7186 = vst [vmem:[#allocation59_spill] sm:$0xff] %v5568_v58 }
 0x239   : > { %v5452_v60 = vpop.permute.xlu0 %2214 }
 0x23a   : > { %7160 = vst [vmem:[#allocation40_spill] sm:$0xff] %v5452_v60  ;;  %v5454_v61 = vpop.permute.xlu1 %2619  ;;  %4694 = vset.pattern.permute.xlu0 %v7006_v33 }
 0x23b   : > { %7161 = vst [vmem:[#allocation41_spill] sm:$0xff] %v5454_v61  ;;  %4671 = vset.pattern.permute.xlu1 %v7018_v9  ;;  %2330 = vperm.xlu0 %4694, %v5428_v53   ;;  %v7174_v61 = vmov 7  }
 0x23c   : > { %1492 = vperm.xlu1 %4671, %v5352_v24  }
 0x23e   : > { %v5460_v63 = vpop.permute.xlu0 %944 }
 0x23f   : > { %7162 = vst [vmem:[#allocation42_spill] sm:$0xff] %v5460_v63  ;;  %v5464_v1 = vpop.permute.xlu1 %929  ;;  %4697 = vset.pattern.permute.xlu0 %v7014_v40 }
 0x240   : > { %7164 = vst [vmem:[#allocation44_spill] sm:$0xff] %v5464_v1  ;;  %4673 = vset.pattern.permute.xlu1 %v7004_v11  ;;  %1071 = vperm.xlu0 %4697, %v5462_v0  }
 0x241   : > { %1909 = vperm.xlu1 %4673, %v5352_v24  }
 0x243   : > { %v5470_v2 = vpop.permute.xlu0 %1372 }
 0x244   : > { %7165 = vst [vmem:[#allocation45_spill] sm:$0xff] %v5470_v2  ;;  %v5472_v4 = vpop.permute.xlu1 %1039  ;;  %4699 = vset.pattern.permute.xlu0 %v7018_v9 }
 0x245   : > { %4675 = vset.pattern.permute.xlu1 %v7006_v33  ;;  %1488 = vperm.xlu0 %4699, %v5462_v0  }
 0x246   : > { %2326 = vperm.xlu1 %4675, %v5352_v24  }
 0x248   : > { %v5478_v25 = vpop.permute.xlu0 %1789 }
 0x249   : > { %7166 = vst [vmem:[#allocation46_spill] sm:$0xff] %v5478_v25  ;;  %v5480_v8 = vpop.permute.xlu1 %1456  ;;  %4701 = vset.pattern.permute.xlu0 %v7004_v11  ;;  %v5580_v25 = vpop.f32.mrf.mxu1 }
 0x24a   : > { %4676 = vset.pattern.permute.xlu1 %v7002_v18  ;;  %1905 = vperm.xlu0 %4701, %v5462_v0   ;;  %v5496_v18 = vpop.f32.mrf.mxu0  ;;  %7189 = vst [vmem:[#allocation62_spill] sm:$0xff] %v5580_v25 }
 0x24b   : > { %2743 = vperm.xlu1 %4676, %v5352_v24  }
 0x24c   : > { %v5527_v47 = vpop.f32.mrf.mxu0 }
 0x24d   : > { %v5486_v56 = vpop.permute.xlu0 %2206 }
 0x24e   : > { %7167 = vst [vmem:[#allocation47_spill] sm:$0xff] %v5486_v56  ;;  %v5488_v62 = vpop.permute.xlu1 %1873  ;;  %4703 = vset.pattern.permute.xlu0 %v7006_v33  ;;  %v5535_v44 = vpop.f32.mrf.mxu0 }
 0x24f   : > { %4677 = vset.pattern.permute.xlu1 %v7008_v37  ;;  %2322 = vperm.xlu0 %4703, %v5462_v0  }
 0x250   : > { %3160 = vperm.xlu1 %4677, %v5352_v24   ;;  %v5544_v39 = vpop.f32.mrf.mxu0  ;;  %v5591_v24 = vpop.f32.mrf.mxu1 }
 0x251   : > { %7193 = vst [vmem:[#allocation66_spill] sm:$0xff] %v5591_v24 }
 0x252   : > { %v5494_v12 = vpop.permute.xlu0 %1063  ;;  %v5553_v1 = vpop.f32.mrf.mxu0 }
 0x253   : > { %v5498_v11 = vpop.permute.xlu1 %2290  ;;  %4705 = vset.pattern.permute.xlu0 %v7012_v3  ;;  %7182 = vst [vmem:[#allocation55_spill] sm:$0xff] %v5553_v1 }
 0x254   : > { %4679 = vset.pattern.permute.xlu1 %v7014_v40  ;;  %994 = vperm.xlu0 %4705, %v5496_v18   ;;  %v7170_v40 = vmov 4   ;;  %v5563_v60 = vpop.f32.mrf.mxu0 }
 0x255   : > { %1067 = vperm.xlu1 %4679, %v5386_v36   ;;  %7185 = vst [vmem:[#allocation58_spill] sm:$0xff] %v5563_v60 }
 0x256   : > { %v5572_v52 = vpop.f32.mrf.mxu0 }
 0x257   : > { %v5504_v33 = vpop.permute.xlu0 %1480  ;;  %7187 = vst [vmem:[#allocation60_spill] sm:$0xff] %v5572_v52 }
 0x258   : > { %v5506_v37 = vpop.permute.xlu1 %1059  ;;  %4707 = vset.pattern.permute.xlu0 %v7016_v7  ;;  %v5582_v2 = vpop.f32.mrf.mxu0 }
 0x259   : > { %7168 = vst [vmem:[#allocation48_spill] sm:$0xff] %v5506_v37  ;;  %4681 = vset.pattern.permute.xlu1 %v7018_v9  ;;  %1412 = vperm.xlu0 %4707, %v5496_v18   ;;  %v7173_v9 = vmov 6   ;;  %7190 = vst [vmem:[#allocation63_spill] sm:$0xff] %v5582_v2  ;;  %v7239_v37 = vmov 11  }
 0x25a   : > { %1484 = vperm.xlu1 %4681, %v5386_v36   ;;  %v5594_v5 = vpop.f32.mrf.mxu0 }
 0x25b   : > { %7194 = vst [vmem:[#allocation67_spill] sm:$0xff] %v5594_v5 }
 0x25c   : > { %v5512_v10 = vpop.permute.xlu0 %1897  ;;  %v5605_v34 = vpop.f32.mrf.mxu0 }
 0x25d   : > { %v5514_v3 = vpop.permute.xlu1 %1476  ;;  %4709 = vset.pattern.permute.xlu0 %v7170_v40  ;;  %7199 = vst [vmem:[#allocation71_spill] sm:$0xff] %v5605_v34 }
 0x25e   : > { %7169 = vst [vmem:[#allocation49_spill] sm:$0xff] %v5514_v3  ;;  %4683 = vset.pattern.permute.xlu1 %v7171_v49  ;;  %1829 = vperm.xlu0 %4709, %v5496_v18  }
 0x25f   : > { %1901 = vperm.xlu1 %4683, %v5386_v36  }
 0x261   : > { %v5520_v32 = vpop.permute.xlu0 %2314 }
 0x262   : > { %v5522_v7 = vpop.permute.xlu1 %1893  ;;  %4711 = vset.pattern.permute.xlu0 %v7173_v9 }
 0x263   : > { %7172 = vst [vmem:[#allocation50_spill] sm:$0xff] %v5522_v7  ;;  %4685 = vset.pattern.permute.xlu1 %v7174_v61  ;;  %2246 = vperm.xlu0 %4711, %v5496_v18  }
 0x264   : > { %2318 = vperm.xlu1 %4685, %v5386_v36  }
 0x266   : > { %v5530_v50 = vpop.permute.xlu0 %1055 }
 0x267   : > { %v5532_v59 = vpop.permute.xlu1 %2310  ;;  %4713 = vset.pattern.permute.xlu0 %v7176_v28 }
 0x268   : > { %7175 = vst [vmem:[#allocation51_spill] sm:$0xff] %v5532_v59  ;;  %4687 = vset.pattern.permute.xlu1 %v7177_v48  ;;  %2759 = vperm.xlu0 %4713, %v5496_v18  }
 0x269   : > { %979 = vperm.xlu1 %4687, %v5428_v53  }
 0x26b   : > { %v5542_v22 = vpop.permute.xlu0 %1472 }
 0x26c   : > { %v5546_v45 = vpop.permute.xlu1 %2727  ;;  %4715 = vset.pattern.permute.xlu0 %v7177_v48 }
 0x26d   : > { %7179 = vst [vmem:[#allocation53_spill] sm:$0xff] %v5546_v45  ;;  %4689 = vset.pattern.permute.xlu1 %v7181_v17  ;;  %984 = vperm.xlu0 %4715, %v5527_v47  }
 0x26e   : > { %1400 = vperm.xlu1 %4689, %v5428_v53  }
 0x270   : > { %v5556_v54 = vpop.permute.xlu0 %1889 }
 0x271   : > { %v5560_v51 = vpop.permute.xlu1 %1051  ;;  %4717 = vset.pattern.permute.xlu0 %v7181_v17 }
 0x272   : > { %7184 = vst [vmem:[#allocation57_spill] sm:$0xff] %v5560_v51  ;;  %4691 = vset.pattern.permute.xlu1 %v7170_v40  ;;  %1404 = vperm.xlu0 %4717, %v5527_v47  }
 0x273   : > { %1817 = vperm.xlu1 %4691, %v5428_v53  }
 0x275   : > { %v5570_v55 = vpop.permute.xlu0 %2306 }
 0x276   : > { %v5574_v56 = vpop.permute.xlu1 %1468  ;;  %4719 = vset.pattern.permute.xlu0 %v7170_v40 }
 0x277   : > { %7188 = vst [vmem:[#allocation61_spill] sm:$0xff] %v5574_v56  ;;  %4693 = vset.pattern.permute.xlu1 %v7173_v9  ;;  %1821 = vperm.xlu0 %4719, %v5527_v47  }
 0x278   : > { %2234 = vperm.xlu1 %4693, %v5428_v53  }
 0x27a   : > { %v5584_v63 = vpop.permute.xlu0 %974 }
 0x27b   : > { %7191 = vst [vmem:[#allocation64_spill] sm:$0xff] %v5584_v63  ;;  %v5586_v45 = vpop.permute.xlu1 %1885  ;;  %4721 = vset.pattern.permute.xlu0 %v7173_v9  ;;  %v5601_v63 = vpop.f32.mrf.mxu1 }
 0x27c   : > { %7192 = vst [vmem:[#allocation65_spill] sm:$0xff] %v5586_v45  ;;  %4695 = vset.pattern.permute.xlu1 %v7176_v28  ;;  %2238 = vperm.xlu0 %4721, %v5527_v47   ;;  %7198 = vst [vmem:[#allocation70_spill] sm:$0xff] %v5601_v63 }
 0x27d   : > { %2747 = vperm.xlu1 %4695, %v5428_v53   ;;  %v5610_v36 = vpop.f32.mrf.mxu1 }
 0x27e   : > { %7201 = vst [vmem:[#allocation73_spill] sm:$0xff] %v5610_v36 }
 0x27f   : > { %v5596_v42 = vpop.permute.xlu0 %1396  ;;  %v5620_v45 = vpop.f32.mrf.mxu1 }
 0x280   : > { %7195 = vst [vmem:[#allocation68_spill] sm:$0xff] %v5596_v42  ;;  %v5598_v13 = vpop.permute.xlu1 %2302  ;;  %4725 = vset.pattern.permute.xlu0 %v7197_v38  ;;  %v7203_v42 = vmov 3   ;;  %7205 = vst [vmem:[#allocation76_spill] sm:$0xff] %v5620_v45 }
 0x281   : > { %7196 = vst [vmem:[#allocation69_spill] sm:$0xff] %v5598_v13  ;;  %4696 = vset.pattern.permute.xlu1 %v7177_v48  ;;  %1095 = vperm.xlu0 %4725, %v5535_v44   ;;  %v5615_v13 = vpop.f32.mrf.mxu0 }
 0x282   : > { %969 = vperm.xlu1 %4696, %v5462_v0   ;;  %7204 = vst [vmem:[#allocation75_spill] sm:$0xff] %v5615_v13 }
 0x283   : > { %v5624_v34 = vpop.f32.mrf.mxu0 }
 0x284   : > { %v5608_v46 = vpop.permute.xlu0 %1813  ;;  %7207 = vst [vmem:[#allocation78_spill] sm:$0xff] %v5624_v34 }
 0x285   : > { %7200 = vst [vmem:[#allocation72_spill] sm:$0xff] %v5608_v46  ;;  %v5612_v53 = vpop.permute.xlu1 %959  ;;  %4727 = vset.pattern.permute.xlu0 %v7203_v42  ;;  %v5634_v51 = vpop.f32.mrf.mxu0 }
 0x286   : > { %7202 = vst [vmem:[#allocation74_spill] sm:$0xff] %v5612_v53  ;;  %4698 = vset.pattern.permute.xlu1 %v7181_v17  ;;  %1512 = vperm.xlu0 %4727, %v5535_v44   ;;  %v5632_v53 = vpop.f32.mrf.mxu1  ;;  %7210 = vst [vmem:[#allocation81_spill] sm:$0xff] %v5634_v51 }
 0x287   : > { %1392 = vperm.xlu1 %4698, %v5462_v0   ;;  %7209 = vst [vmem:[#allocation80_spill] sm:$0xff] %v5632_v53 }
 0x289   : > { %v5622_v56 = vpop.permute.xlu0 %2230 }
 0x28a   : > { %7206 = vst [vmem:[#allocation77_spill] sm:$0xff] %v5622_v56  ;;  %v5626_v46 = vpop.permute.xlu1 %1384  ;;  %4729 = vset.pattern.permute.xlu0 %v7171_v49  ;;  %v5643_v56 = vpop.f32.mrf.mxu1 }
 0x28b   : > { %7208 = vst [vmem:[#allocation79_spill] sm:$0xff] %v5626_v46  ;;  %4700 = vset.pattern.permute.xlu1 %v7170_v40  ;;  %1929 = vperm.xlu0 %4729, %v5535_v44   ;;  %7213 = vst [vmem:[#allocation84_spill] sm:$0xff] %v5643_v56  ;;  %v5646_v46 = vpop.f32.mrf.mxu0 }
 0x28c   : > { %1809 = vperm.xlu1 %4700, %v5462_v0   ;;  %7214 = vst [vmem:[#allocation85_spill] sm:$0xff] %v5646_v46 }
 0x28e   : > { %v5636_v24 = vpop.permute.xlu0 %964 }
 0x28f   : > { %7211 = vst [vmem:[#allocation82_spill] sm:$0xff] %v5636_v24  ;;  %v5638_v45 = vpop.permute.xlu1 %1801  ;;  %4731 = vset.pattern.permute.xlu0 %v7174_v61  ;;  %v5653_v24 = vpop.f32.mrf.mxu1 }
 0x290   : > { %7212 = vst [vmem:[#allocation83_spill] sm:$0xff] %v5638_v45  ;;  %4702 = vset.pattern.permute.xlu1 %v7173_v9  ;;  %2346 = vperm.xlu0 %4731, %v5535_v44   ;;  %7217 = vst [vmem:[#allocation88_spill] sm:$0xff] %v5653_v24  ;;  %v5657_v45 = vpop.f32.mrf.mxu0 }
 0x291   : > { %2226 = vperm.xlu1 %4702, %v5462_v0   ;;  %7218 = vst [vmem:[#allocation89_spill] sm:$0xff] %v5657_v45  ;;  %v5662_v7 = vpop.f32.mrf.mxu1 }
 0x292   : > { %7220 = vst [vmem:[#allocation91_spill] sm:$0xff] %v5662_v7 }
 0x293   : > { %v5648_v59 = vpop.permute.xlu0 %1388 }
 0x294   : > { %7215 = vst [vmem:[#allocation86_spill] sm:$0xff] %v5648_v59  ;;  %v5650_v53 = vpop.permute.xlu1 %2218  ;;  %4734 = vset.pattern.permute.xlu0 %v7197_v38  ;;  %v5667_v59 = vpop.f32.mrf.mxu0 }
 0x295   : > { %7216 = vst [vmem:[#allocation87_spill] sm:$0xff] %v5650_v53  ;;  %4704 = vset.pattern.permute.xlu1 %v7176_v28  ;;  %1087 = vperm.xlu0 %4734, %v5544_v39   ;;  %7222 = vst [vmem:[#allocation93_spill] sm:$0xff] %v5667_v59  ;;  %v5672_v53 = vpop.f32.mrf.mxu1 }
 0x296   : > { %2739 = vperm.xlu1 %4704, %v5462_v0   ;;  %7223 = vst [vmem:[#allocation94_spill] sm:$0xff] %v5672_v53  ;;  %v5676_v0 = vpop.f32.mrf.mxu0 }
 0x297   : > { %7225 = vst [vmem:[#allocation96_spill] sm:$0xff] %v5676_v0 }
 0x298   : > { %v5660_v51 = vpop.permute.xlu0 %1805  ;;  %v5686_v7 = vpop.f32.mrf.mxu0 }
 0x299   : > { %7219 = vst [vmem:[#allocation90_spill] sm:$0xff] %v5660_v51  ;;  %v5664_v46 = vpop.permute.xlu1 %949  ;;  %4736 = vset.pattern.permute.xlu0 %v7203_v42  ;;  %7228 = vst [vmem:[#allocation99_spill] sm:$0xff] %v5686_v7  ;;  %v1101_v7 = vmul.f32 %v5558_v15, %v5368_v29 }
 0x29a   : > { %7221 = vst [vmem:[#allocation92_spill] sm:$0xff] %v5664_v46  ;;  %4706 = vset.pattern.permute.xlu1 %v7197_v38  ;;  %1504 = vperm.xlu0 %4736, %v5544_v39   ;;  %v5684_v46 = vpop.f32.mrf.mxu1 }
 0x29b   : > { %1091 = vperm.xlu1 %4706, %v5496_v18   ;;  %7227 = vst [vmem:[#allocation98_spill] sm:$0xff] %v5684_v46 }
 0x29d   : > { %v5674_v5 = vpop.permute.xlu0 %2222 }
 0x29e   : > { %7224 = vst [vmem:[#allocation95_spill] sm:$0xff] %v5674_v5  ;;  %v5678_v51 = vpop.permute.xlu1 %1376  ;;  %4738 = vset.pattern.permute.xlu0 %v7171_v49  ;;  %v5698_v5 = vpop.f32.mrf.mxu0 }
 0x29f   : > { %7226 = vst [vmem:[#allocation97_spill] sm:$0xff] %v5678_v51  ;;  %4708 = vset.pattern.permute.xlu1 %v7203_v42  ;;  %1921 = vperm.xlu0 %4738, %v5544_v39   ;;  %v5695_v51 = vpop.f32.mrf.mxu1  ;;  %7232 = vst [vmem:[#allocation103_spill] sm:$0xff] %v5698_v5 }
 0x2a0   : > { %1508 = vperm.xlu1 %4708, %v5496_v18   ;;  %7231 = vst [vmem:[#allocation102_spill] sm:$0xff] %v5695_v51 }
 0x2a2   : > { %v5688_v3 = vpop.permute.xlu0 %2735 }
 0x2a3   : > { %7229 = vst [vmem:[#allocation100_spill] sm:$0xff] %v5688_v3  ;;  %v5690_v53 = vpop.permute.xlu1 %1793  ;;  %4740 = vset.pattern.permute.xlu0 %v7174_v61  ;;  %v5705_v3 = vpop.f32.mrf.mxu1 }
 0x2a4   : > { %7230 = vst [vmem:[#allocation101_spill] sm:$0xff] %v5690_v53  ;;  %4710 = vset.pattern.permute.xlu1 %v7171_v49  ;;  %2338 = vperm.xlu0 %4740, %v5544_v39   ;;  %7234 = vst [vmem:[#allocation105_spill] sm:$0xff] %v5705_v3  ;;  %v5709_v53 = vpop.f32.mrf.mxu0 }
 0x2a5   : > { %1925 = vperm.xlu1 %4710, %v5496_v18   ;;  %7235 = vst [vmem:[#allocation106_spill] sm:$0xff] %v5709_v53  ;;  %v5716_v5 = vpop.f32.mrf.mxu1  ;;  %v1518_v53 = vmul.f32 %v5572_v52, %v5376_v31 }
 0x2a6   : > { %7236 = vst [vmem:[#allocation107_spill] sm:$0xff] %v5716_v5  ;;  %v5721_v25 = vpop.f32.mrf.mxu0 }
 0x2a7   : > { %v5700_v0 = vpop.permute.xlu0 %1079  ;;  %7238 = vst [vmem:[#allocation109_spill] sm:$0xff] %v5721_v25  ;;  %v5727_v27 = vpop.f32.mrf.mxu1 }
 0x2a8   : > { %v5702_v46 = vpop.permute.xlu1 %2210  ;;  %4741 = vset.pattern.permute.xlu0 %v7176_v28  ;;  %7240 = vst [vmem:[#allocation110_spill] sm:$0xff] %v5727_v27  ;;  %v5732_v15 = vpop.f32.mrf.mxu0 }
 0x2a9   : > { %7233 = vst [vmem:[#allocation104_spill] sm:$0xff] %v5702_v46  ;;  %4712 = vset.pattern.permute.xlu1 %v7174_v61  ;;  %2755 = vperm.xlu0 %4741, %v5544_v39   ;;  %7241 = vst [vmem:[#allocation111_spill] sm:$0xff] %v5732_v15 }
 0x2aa   : > { %2342 = vperm.xlu1 %4712, %v5496_v18   ;;  %v5739_v23 = vpop.f32.mrf.mxu0 }
 0x2ab   : > { %7242 = vst [vmem:[#allocation112_spill] sm:$0xff] %v5739_v23 }
 0x2ac   : > { %v5714_v51 = vpop.permute.xlu0 %1496 }
 0x2ad   : > { %v5718_v46 = vpop.permute.xlu1 %2627  ;;  %1136 = vrot.lane.b32.xlu0 %v1101_v7, %s4935_s15  ;;  %v1935_v7 = vmul.f32 %v5727_v27, %v5384_v35 }
 0x2ae   : > { %7237 = vst [vmem:[#allocation108_spill] sm:$0xff] %v5718_v46  ;;  %4714 = vset.pattern.permute.xlu1 %v7239_v37 }
 0x2af   : > { %3176 = vperm.xlu1 %4714, %v5496_v18  }
 0x2b1   : > { %1553 = vrot.lane.b32.xlu0 %v1518_v53, %s4935_s15  ;;  %v5730_v29 = vpop.permute.xlu0 %1913  ;;  %v2352_v53 = vmul.f32 %v5739_v23, %v5394_v41 }
 0x2b2   : > { %v5734_v46 = vpop.permute.xlu1 %1075 }
 0x2b3   : > { %4716 = vset.pattern.permute.xlu1 %v7197_v38  ;;  %v1099_v38 = vmul.f32 %v5472_v4, %v5568_v58  ;;  %v5768_v4 = vpop.f32.mrf.mxu1 }
 0x2b4   : > { %1083 = vperm.xlu1 %4716, %v5527_v47   ;;  %7243 = vst [vmem:[#allocation113_spill] sm:$0xff] %v5768_v4 }
 0x2b5   : > { %1970 = vrot.lane.b32.xlu0 %v1935_v7, %s4935_s15 }
 0x2b6   : > { %v5743_v31 = vpop.permute.xlu0 %2330 }
 0x2b7   : > { %v5747_v52 = vpop.permute.xlu1 %1492 }
 0x2b8   : > { %4718 = vset.pattern.permute.xlu1 %v7203_v42  ;;  %v1516_v42 = vmul.f32 %v5480_v8, %v5582_v2  ;;  %v5777_v8 = vpop.f32.mrf.mxu0  ;;  %v4831_v2 = vld [vmem:[#allocation3 + $0x168] ss:$28 sps:$4 sm:$0xff]  }
 0x2b9   : > { %1500 = vperm.xlu1 %4718, %v5527_v47   ;;  %2387 = vrot.lane.b32.xlu0 %v2352_v53, %s4935_s15  ;;  %7244 = vst [vmem:[#allocation114_spill] sm:$0xff] %v5777_v8 }
 0x2bb   : > { %v5754_v35 = vpop.permute.xlu0 %1071 }
 0x2bc   : > { %v5756_v27 = vpop.permute.xlu1 %1909 }
 0x2bd   : > { %4720 = vset.pattern.permute.xlu1 %v7171_v49  ;;  %1132 = vrot.lane.b32.xlu0 %v1099_v38, %s4935_s15  ;;  %v1933_v49 = vmul.f32 %v5488_v62, %v5768_v4  ;;  %v5786_v62 = vpop.f32.mrf.mxu1  ;;  %v4830_v4 = vld [vmem:[#allocation3 + $0x1a0] ss:$28 sps:$4 sm:$0xff]  }
 0x2be   : > { %1917 = vperm.xlu1 %4720, %v5527_v47   ;;  %7246 = vst [vmem:[#allocation116_spill] sm:$0xff] %v5786_v62  ;;  %4464 = vmatprep.subr.bf16.mxu1 %v4830_v4 }
 0x2bf   : > { %4465 = vmatpush3.bf16.msra.mxu1 %v4830_v4  ;;  %v4832_v4 = vld [vmem:[#allocation3 + $0x130] ss:$28 sps:$4 sm:$0xff]  }
 0x2c0   : > { %v5763_v41 = vpop.permute.xlu0 %1488  ;;  %4466 = vmatprep.subr.bf16.mxu1 %v4831_v2 }
 0x2c1   : > { %v5765_v7 = vpop.permute.xlu1 %2326  ;;  %1549 = vrot.lane.b32.xlu0 %v1516_v42, %s4935_s15  ;;  %v2350_v42 = vmul.f32 %v5498_v11, %v5777_v8  ;;  %v5797_v11 = vpop.f32.mrf.mxu1 }
 0x2c2   : > { %4722 = vset.pattern.permute.xlu1 %v7174_v61  ;;  %7247 = vst [vmem:[#allocation117_spill] sm:$0xff] %v5797_v11 }
 0x2c3   : > { %2334 = vperm.xlu1 %4722, %v5527_v47   ;;  %4467 = vmatpush3.bf16.msra.mxu1 %v4831_v2 }
 0x2c4   : > { %4468 = vmatprep.subr.bf16.mxu1 %v4832_v4 }
 0x2c5   : > { %1966 = vrot.lane.b32.xlu0 %v1933_v49, %s4935_s15  ;;  %v5775_v53 = vpop.permute.xlu0 %1905  ;;  %v1105_v49 = vmul.f32 %v5601_v63, %v5494_v12  ;;  %v5803_v12 = vpop.f32.mrf.mxu0 }
 0x2c6   : > { %v5779_v38 = vpop.permute.xlu1 %2743  ;;  %7249 = vst [vmem:[#allocation119_spill] sm:$0xff] %v5803_v12  ;;  %v5809_v63 = vpop.f32.mrf.mxu1 }
 0x2c7   : > { %7245 = vst [vmem:[#allocation115_spill] sm:$0xff] %v5779_v38  ;;  %4723 = vset.pattern.permute.xlu1 %v7176_v28  ;;  %7250 = vst [vmem:[#allocation120_spill] sm:$0xff] %v5809_v63  ;;  %4469 = vmatpush3.bf16.msra.mxu1 %v4832_v4  ;;  %v1520_v4 = vmul.f32 %v5542_v22, %v5624_v34  ;;  %v4836_v22 = vld [vmem:[#allocation3 + $0x50] ss:$28 sps:$4 sm:$0xff]  }
 0x2c8   : > { %2751 = vperm.xlu1 %4723, %v5527_v47  }
 0x2c9   : > { %2383 = vrot.lane.b32.xlu0 %v2350_v42, %s4935_s15  ;;  %v1522_v42 = vmul.f32 %v5615_v13, %v5504_v33  ;;  %v1939_v33 = vmul.f32 %v5809_v63, %v5512_v10  ;;  %v4833_v10 = vld [vmem:[#allocation3 + $0xf8] ss:$28 sps:$4 sm:$0xff]  }
 0x2ca   : > { %v5788_v61 = vpop.permute.xlu0 %2322  ;;  %4470 = vmatprep.subr.bf16.mxu1 %v4833_v10 }
 0x2cb   : > { %v5792_v23 = vpop.permute.xlu1 %3160  ;;  %4471 = vmatpush3.bf16.msra.mxu1 %v4833_v10 }
 0x2cc   : > { %4724 = vset.pattern.permute.xlu1 %v7177_v48 }
 0x2cd   : > { %999 = vperm.xlu1 %4724, %v5535_v44   ;;  %1144 = vrot.lane.b32.xlu0 %v1105_v49, %s4935_s15  ;;  %v5811_v49 = vpop.f32.mrf.mxu0 }
 0x2ce   : > { %7251 = vst [vmem:[#allocation121_spill] sm:$0xff] %v5811_v49 }
 0x2cf   : > { %v5801_v8 = vpop.permute.xlu0 %994  ;;  %v5816_v13 = vpop.f32.mrf.mxu0 }
 0x2d0   : > { %7248 = vst [vmem:[#allocation118_spill] sm:$0xff] %v5801_v8  ;;  %v5805_v58 = vpop.permute.xlu1 %1067  ;;  %7252 = vst [vmem:[#allocation122_spill] sm:$0xff] %v5816_v13 }
 0x2d1   : > { %4726 = vset.pattern.permute.xlu1 %v7181_v17  ;;  %1561 = vrot.lane.b32.xlu0 %v1522_v42, %s4935_s15  ;;  %v2356_v42 = vmul.f32 %v5816_v13, %v5520_v32  ;;  %v4835_v13 = vld [vmem:[#allocation3 + $0x88] ss:$28 sps:$4 sm:$0xff]   ;;  %v5852_v34 = vpop.f32.mrf.mxu0 }
 0x2d2   : > { %1416 = vperm.xlu1 %4726, %v5535_v44   ;;  %7257 = vst [vmem:[#allocation127_spill] sm:$0xff] %v5852_v34 }
 0x2d4   : > { %v5818_v8 = vpop.permute.xlu0 %1412 }
 0x2d5   : > { %7253 = vst [vmem:[#allocation123_spill] sm:$0xff] %v5818_v8  ;;  %v5820_v38 = vpop.permute.xlu1 %1484  ;;  %1978 = vrot.lane.b32.xlu0 %v1939_v33, %s4935_s15  ;;  %v1103_v33 = vmul.f32 %v5530_v50, %v5610_v36  ;;  %v4834_v8 = vld [vmem:[#allocation3 + $0xc0] ss:$28 sps:$4 sm:$0xff]   ;;  %v5846_v50 = vpop.f32.mrf.mxu1 }
 0x2d6   : > { %4728 = vset.pattern.permute.xlu1 %v7170_v40  ;;  %4472 = vmatprep.subr.bf16.mxu1 %v4834_v8  ;;  %7256 = vst [vmem:[#allocation126_spill] sm:$0xff] %v5846_v50  ;;  %v1937_v10 = vmul.f32 %v5556_v54, %v5846_v50  ;;  %v4837_v54 = vld [vmem:[#allocation3 + $0x18] ss:$28 sps:$4 sm:$0xff]  }
 0x2d7   : > { %1833 = vperm.xlu1 %4728, %v5535_v44   ;;  %4473 = vmatpush3.bf16.msra.mxu1 %v4834_v8 }
 0x2d8   : > { %4474 = vmatprep.subr.bf16.mxu1 %v4835_v13 }
 0x2d9   : > { %2395 = vrot.lane.b32.xlu0 %v2356_v42, %s4935_s15  ;;  %v5828_v2 = vpop.permute.xlu0 %1829 }
 0x2da   : > { %7254 = vst [vmem:[#allocation124_spill] sm:$0xff] %v5828_v2  ;;  %v5830_v63 = vpop.permute.xlu1 %1901 }
 0x2db   : > { %4730 = vset.pattern.permute.xlu1 %v7173_v9  ;;  %4475 = vmatpush3.bf16.msra.mxu1 %v4835_v13  ;;  %v5863_v13 = vpop.f32.mrf.mxu1 }
 0x2dc   : > { %2250 = vperm.xlu1 %4730, %v5535_v44   ;;  %4476 = vmatprep.subr.bf16.mxu1 %v4836_v22  ;;  %7260 = vst [vmem:[#allocation130_spill] sm:$0xff] %v5863_v13 }
 0x2dd   : > { %1140 = vrot.lane.b32.xlu0 %v1103_v33, %s4935_s15 }
 0x2de   : > { %v5837_v32 = vpop.permute.xlu0 %2246 }
 0x2df   : > { %7255 = vst [vmem:[#allocation125_spill] sm:$0xff] %v5837_v32  ;;  %v5841_v42 = vpop.permute.xlu1 %2318  ;;  %4477 = vmatpush3.bf16.msra.mxu1 %v4836_v22 }
 0x2e0   : > { %4732 = vset.pattern.permute.xlu1 %v7176_v28  ;;  %4478 = vmatprep.subr.bf16.mxu1 %v4837_v54 }
 0x2e1   : > { %2763 = vperm.xlu1 %4732, %v5535_v44   ;;  %1557 = vrot.lane.b32.xlu0 %v1520_v4, %s4935_s15  ;;  %v2354_v4 = vmul.f32 %v5570_v55, %v5852_v34  ;;  %v5872_v55 = vpop.f32.mrf.mxu1  ;;  %v4838_v34 = vld [vmem:[%s5050_s24 + $0x8] sm:$0xff]  }
 0x2e2   : > { %7262 = vst [vmem:[#allocation132_spill] sm:$0xff] %v5872_v55 }
 0x2e3   : > { %v5850_v33 = vpop.permute.xlu0 %2759  ;;  %4479 = vmatpush3.bf16.msra.mxu1 %v4837_v54  ;;  %v5888_v54 = vpop.f32.mrf.mxu0 }
 0x2e4   : > { %v5854_v8 = vpop.permute.xlu1 %979  ;;  %7266 = vst [vmem:[#allocation136_spill] sm:$0xff] %v5888_v54 }
 0x2e5   : > { %7258 = vst [vmem:[#allocation128_spill] sm:$0xff] %v5854_v8  ;;  %4733 = vset.pattern.permute.xlu1 %v7177_v48  ;;  %1974 = vrot.lane.b32.xlu0 %v1937_v10, %s4935_s15  ;;  %v1109_v48 = vmul.f32 %v5643_v56, %v5700_v0  ;;  %v5885_v0 = vpop.f32.mrf.mxu1 }
 0x2e6   : > { %989 = vperm.xlu1 %4733, %v5544_v39   ;;  %4481 = vmatmul.mubr.bf16.vlgmr.msra.gmra.mxu1 %v4838_v34  ;;  %7265 = vst [vmem:[#allocation135_spill] sm:$0xff] %v5885_v0  ;;  %v1943_v34 = vmul.f32 %v5885_v0, %v5730_v29  ;;  %v4841_v29 = vld [vmem:[%s5050_s24 + $0x20] sm:$0xff]  }
 0x2e8   : > { %v5861_v50 = vpop.permute.xlu0 %984 }
 0x2e9   : > { %7259 = vst [vmem:[#allocation129_spill] sm:$0xff] %v5861_v50  ;;  %v5865_v36 = vpop.permute.xlu1 %1400  ;;  %2391 = vrot.lane.b32.xlu0 %v2354_v4, %s4935_s15  ;;  %v1526_v4 = vmul.f32 %v5657_v45, %v5714_v51 }
 0x2ea   : > { %7261 = vst [vmem:[#allocation131_spill] sm:$0xff] %v5865_v36  ;;  %4735 = vset.pattern.permute.xlu1 %v7181_v17  ;;  %v4839_v17 = vld [vmem:[%s5050_s24 + $0x10] sm:$0xff]  }
 0x2eb   : > { %1408 = vperm.xlu1 %4735, %v5544_v39   ;;  %4484 = vmatprep.mubr.bf16.mxu1 %v4839_v17 }
 0x2ed   : > { %1152 = vrot.lane.b32.xlu0 %v1109_v48, %s4935_s15  ;;  %v5875_v10 = vpop.permute.xlu0 %1404 }
 0x2ee   : > { %7263 = vst [vmem:[#allocation133_spill] sm:$0xff] %v5875_v10  ;;  %v5877_v22 = vpop.permute.xlu1 %1817  ;;  %v7300_v10 = vld [vmem:[#allocation106_spill] sm:$0xff] }
 0x2ef   : > { %7264 = vst [vmem:[#allocation134_spill] sm:$0xff] %v5877_v22  ;;  %4737 = vset.pattern.permute.xlu1 %v7170_v40  ;;  %v5896_v22 = vpop.f32.mrf.mxu0 }
 0x2f0   : > { %1825 = vperm.xlu1 %4737, %v5544_v39   ;;  %7269 = vst [vmem:[#allocation139_spill] sm:$0xff] %v5896_v22 }
 0x2f1   : > { %1569 = vrot.lane.b32.xlu0 %v1526_v4, %s4935_s15  ;;  %v5901_v40 = vpop.f32.mrf.mxu0  ;;  %v4840_v4 = vld [vmem:[%s5050_s24 + $0x18] sm:$0xff]  }
 0x2f2   : > { %v5890_v48 = vpop.permute.xlu0 %1821  ;;  %7270 = vst [vmem:[#allocation140_spill] sm:$0xff] %v5901_v40  ;;  %4485 = vmatmul.mubr.bf16.gmra.mxu1 %v4840_v4  ;;  %v2360_v17 = vmul.f32 %v5901_v40, %v5743_v31  ;;  %v4843_v40 = vld [vmem:[%s5050_s24 + $0x30] sm:$0xff]  }
 0x2f3   : > { %7267 = vst [vmem:[#allocation137_spill] sm:$0xff] %v5890_v48  ;;  %v5894_v51 = vpop.permute.xlu1 %2234  ;;  %4488 = vmatprep.mubr.bf16.mxu1 %v4841_v29  ;;  %v4842_v29 = vld [vmem:[%s5050_s24 + $0x28] sm:$0xff]  }
 0x2f4   : > { %7268 = vst [vmem:[#allocation138_spill] sm:$0xff] %v5894_v51  ;;  %4739 = vset.pattern.permute.xlu1 %v7173_v9  ;;  %v1107_v9 = vmul.f32 %v5754_v35, %v5653_v24  ;;  %v7296_v24 = vld [vmem:[#allocation102_spill] sm:$0xff] }
 0x2f5   : > { %2242 = vperm.xlu1 %4739, %v5544_v39   ;;  %1986 = vrot.lane.b32.xlu0 %v1943_v34, %s4935_s15  ;;  %v1100_v34 = vmul.f32 %v5539_v57, %v5318_v14  ;;  %v1517_v14 = vmul.f32 %v5553_v1, %v5336_v20  ;;  %v5930_v57 = vpop.f32.mrf.mxu1 }
 0x2f6   : > { %7273 = vst [vmem:[#allocation143_spill] sm:$0xff] %v5930_v57 }
 0x2f7   : > { %v5906_v48 = vpop.permute.xlu0 %2238 }
 0x2f8   : > { %7271 = vst [vmem:[#allocation141_spill] sm:$0xff] %v5906_v48  ;;  %v5909_v51 = vpop.permute.xlu1 %2747 }
 0x2f9   : > { %4742 = vset.pattern.permute.xlu1 %v7239_v37  ;;  %2403 = vrot.lane.b32.xlu0 %v2360_v17, %s4935_s15  ;;  %v1524_v17 = vmul.f32 %v5763_v41, %v5667_v59  ;;  %v1941_v41 = vmul.f32 %v5775_v53, %v5930_v57  ;;  %v2351_v53 = vmul.f32 %v5721_v25, %v5370_v30  ;;  %v7279_v30 = vld [vmem:[#allocation19_spill] sm:$0xff]  ;;  %v5973_v25 = vpop.f32.mrf.mxu1 }
 0x2fa   : > { %3172 = vperm.xlu1 %4742, %v5544_v39   ;;  %4489 = vmatmul.mubr.bf16.gmra.mxu1 %v4842_v29  ;;  %v4844_v29 = vld [vmem:[%s5050_s24 + $0x38] sm:$0xff]   ;;  %7281 = vst [vmem:[#allocation19_spill] sm:$0xff] %v5973_v25  ;;  %v7289_v57 = vld [vmem:[#allocation103_spill] sm:$0xff] }
 0x2fb   : > { %4492 = vmatprep.mubr.bf16.mxu1 %v4843_v40  ;;  %v5940_v40 = vpop.f32.mrf.mxu0 }
 0x2fc   : > { %v1096_v31 = vpop.permute.xlu0 %1095  ;;  %7275 = vst [vmem:[#allocation145_spill] sm:$0xff] %v5940_v40 }
 0x2fd   : > { %v5918_v4 = vpop.permute.xlu1 %969  ;;  %1148 = vrot.lane.b32.xlu0 %v1107_v9, %s4935_s15 }
 0x2fe   : > { %7272 = vst [vmem:[#allocation142_spill] sm:$0xff] %v5918_v4  ;;  %1134 = vrot.lane.b32.xlu1 %v1100_v34, %s4935_s15  ;;  %v1934_v34 = vmul.f32 %v5705_v3, %v5354_v26  ;;  %v7283_v3 = vld [vmem:[#allocation62_spill] sm:$0xff] }
 0x2ff   : > { %4743 = vset.pattern.permute.xlu1 %v7176_v28 }
 0x301   : > { %1565 = vrot.lane.b32.xlu0 %v1524_v17, %s4935_s15  ;;  %v1513_v35 = vpop.permute.xlu0 %1512  ;;  %v2358_v17 = vmul.f32 %v5788_v61, %v5940_v40  ;;  %v1515_v61 = vmul.f32 %v5342_v21, %v5563_v60  ;;  %v7280_v21 = vld [vmem:[#allocation21_spill] sm:$0xff]  ;;  %v7288_v40 = vld [vmem:[#allocation67_spill] sm:$0xff] }
 0x302   : > { %v5932_v9 = vpop.permute.xlu1 %1392  ;;  %1551 = vrot.lane.b32.xlu1 %v1517_v14, %s4935_s15  ;;  %4493 = vmatmul.mubr.bf16.gmra.mxu1 %v4844_v29  ;;  %v1098_v14 = vmul.f32 %v5334_v19, %v5549_v16  ;;  %v7284_v16 = vld [vmem:[#allocation98_spill] sm:$0xff]  ;;  %v1530_v48 = vmul.f32 %v7289_v57, %v1513_v35 }
 0x303   : > { %7274 = vst [vmem:[#allocation144_spill] sm:$0xff] %v5932_v9 }
 0x305   : > { %1982 = vrot.lane.b32.xlu0 %v1941_v41, %s4935_s15 }
 0x306   : > { %1968 = vrot.lane.b32.xlu1 %v1934_v34, %s4935_s15  ;;  %v1930_v20 = vpop.permute.xlu0 %1929 }
 0x307   : > { %v5946_v1 = vpop.permute.xlu1 %1809 }
 0x308   : > { %7276 = vst [vmem:[#allocation146_spill] sm:$0xff] %v5946_v1 }
 0x309   : > { %2399 = vrot.lane.b32.xlu0 %v2358_v17, %s4935_s15  ;;  %v1932_v17 = vmul.f32 %v7279_v30, %v5716_v5  ;;  %v7282_v5 = vld [vmem:[#allocation48_spill] sm:$0xff] }
 0x30a   : > { %2385 = vrot.lane.b32.xlu1 %v2351_v53, %s4935_s15  ;;  %v1104_v60 = vmul.f32 %v7283_v3, %v7282_v5 }
 0x30b   : > { %v2347_v26 = vpop.permute.xlu0 %2346 }
 0x30c   : > { %v5954_v41 = vpop.permute.xlu1 %2226 }
 0x30d   : > { %7277 = vst [vmem:[#allocation147_spill] sm:$0xff] %v5954_v41  ;;  %2719 = vperm.xlu0 %4741, %v5280_v43   ;;  %v1113_v41 = vmul.f32 %v7284_v16, %v1096_v31 }
 0x30e   : > { %1130 = vrot.lane.b32.xlu1 %v1098_v14, %s4935_s15  ;;  %v2349_v14 = vmul.f32 %v7280_v21, %v5732_v15  ;;  %v5986_v21 = vpop.f32.mrf.mxu0 }
 0x30f   : > { %7286 = vst [vmem:[#allocation48_spill] sm:$0xff] %v5986_v21 }
 0x310   : > { %v1088_v34 = vpop.permute.xlu0 %1087  ;;  %v5997_v31 = vpop.f32.mrf.mxu0 }
 0x311   : > { %v5960_v29 = vpop.permute.xlu1 %2739  ;;  %2703 = vperm.xlu0 %4741, %v5201_v6   ;;  %7290 = vst [vmem:[#allocation98_spill] sm:$0xff] %v5997_v31 }
 0x312   : > { %7278 = vst [vmem:[#allocation148_spill] sm:$0xff] %v5960_v29  ;;  %1547 = vrot.lane.b32.xlu1 %v1515_v61, %s4935_s15 }
 0x315   : > { %4749 = vset.pattern.permute.xlu0 %v7239_v37  ;;  %v1505_v19 = vpop.permute.xlu0 %1504 }
 0x316   : > { %v5967_v53 = vpop.permute.xlu1 %1091  ;;  %1964 = vrot.lane.b32.xlu1 %v1932_v17, %s4935_s15  ;;  %3180 = vperm.xlu0 %4749, %v5535_v44   ;;  %v5982_v17 = vpop.f32.mrf.mxu1 }
 0x317   : > { %7285 = vst [vmem:[#allocation21_spill] sm:$0xff] %v5982_v17 }
 0x318   : > { %v5995_v5 = vpop.f32.mrf.mxu1 }
 0x319   : > { %v1947_v3 = vmul.f32 %v5995_v5, %v1930_v20  ;;  %v7294_v20 = vld [vmem:[#allocation66_spill] sm:$0xff] }
 0x31a   : > { %2381 = vrot.lane.b32.xlu1 %v2349_v14, %s4935_s15  ;;  %3168 = vperm.xlu0 %4749, %v5527_v47   ;;  %v1922_v61 = vpop.permute.xlu0 %1921  ;;  %v7287_v14 = vld [vmem:[#allocation49_spill] sm:$0xff] }
 0x31b   : > { %v5977_v30 = vpop.permute.xlu1 %1508  ;;  %v1521_v1 = vmul.f32 %v7288_v40, %v7287_v14 }
 0x31e   : > { %1142 = vrot.lane.b32.xlu1 %v1104_v60, %s4935_s15  ;;  %1160 = vrot.lane.b32.xlu0 %v1113_v41, %s4935_s15  ;;  %v7291_v60 = vld [vmem:[#allocation50_spill] sm:$0xff] }
 0x31f   : > { %v2339_v15 = vpop.permute.xlu0 %2338  ;;  %v1938_v41 = vmul.f32 %v5786_v62, %v7291_v60  ;;  %v7295_v62 = vld [vmem:[#allocation57_spill] sm:$0xff] }
 0x320   : > { %v5991_v9 = vpop.permute.xlu1 %1925 }
 0x322   : > { %1559 = vrot.lane.b32.xlu1 %v1521_v1, %s4935_s15  ;;  %1577 = vrot.lane.b32.xlu0 %v1530_v48, %s4935_s15  ;;  %v6008_v1 = vpop.f32.mrf.mxu0  ;;  %v7292_v48 = vld [vmem:[#allocation51_spill] sm:$0xff] }
 0x323   : > { %v2355_v35 = vmul.f32 %v5803_v12, %v7292_v48  ;;  %v2364_v40 = vmul.f32 %v6008_v1, %v2347_v26  ;;  %v6026_v26 = vpop.f32.mrf.mxu1  ;;  %v7299_v12 = vld [vmem:[#allocation61_spill] sm:$0xff] }
 0x324   : > { %v6002_v59 = vpop.permute.xlu0 %2755 }
 0x325   : > { %v6004_v14 = vpop.permute.xlu1 %2342 }
 0x326   : > { %1976 = vrot.lane.b32.xlu1 %v1938_v41, %s4935_s15  ;;  %1994 = vrot.lane.b32.xlu0 %v1947_v3, %s4935_s15  ;;  %v1102_v41 = vmul.f32 %v7295_v62, %v7294_v20  ;;  %v1111_v3 = vmul.f32 %v1088_v34, %v7296_v24  ;;  %v6037_v62 = vpop.f32.mrf.mxu1  ;;  %v7303_v34 = vld [vmem:[#allocation65_spill] sm:$0xff] }
 0x327   : > { %7302 = vst [vmem:[#allocation51_spill] sm:$0xff] %v6037_v62 }
 0x328   : > { %v6013_v4 = vpop.permute.xlu0 %1136 }
 0x329   : > { %7293 = vst [vmem:[#allocation49_spill] sm:$0xff] %v6013_v4  ;;  %v7298_v4 = vld [vmem:[#allocation71_spill] sm:$0xff] }
 0x32a   : > { %v6015_v60 = vpop.permute.xlu1 %3176  ;;  %2393 = vrot.lane.b32.xlu1 %v2355_v35, %s4935_s15  ;;  %2411 = vrot.lane.b32.xlu0 %v2364_v40, %s4935_s15  ;;  %v1519_v35 = vmul.f32 %v7299_v12, %v7298_v4  ;;  %v1528_v40 = vmul.f32 %v1505_v19, %v7300_v10  ;;  %v6046_v12 = vpop.f32.mrf.mxu1  ;;  %v7318_v4 = vld [vmem:[#allocation13_spill] sm:$0xff] }
 0x32b   : > { %7305 = vst [vmem:[#allocation102_spill] sm:$0xff] %v6046_v12  ;;  %v7325_v12 = vld [vmem:[#allocation85_spill] sm:$0xff] }
 0x32c   : > { %v6022_v0 = vpop.permute.xlu0 %1553  ;;  %v6050_v19 = vpop.f32.mrf.mxu1 }
 0x32d   : > { %7297 = vst [vmem:[#allocation103_spill] sm:$0xff] %v6022_v0  ;;  %7306 = vst [vmem:[#allocation61_spill] sm:$0xff] %v6050_v19 }
 0x32e   : > { %1138 = vrot.lane.b32.xlu1 %v1102_v41, %s4935_s15  ;;  %1156 = vrot.lane.b32.xlu0 %v1111_v3, %s4935_s15  ;;  %v1936_v41 = vmul.f32 %v7303_v34, %v5797_v11  ;;  %v1945_v3 = vmul.f32 %v1922_v61, %v6026_v26  ;;  %v6059_v11 = vpop.f32.mrf.mxu1 }
 0x32f   : > { %v6028_v48 = vpop.permute.xlu1 %1083  ;;  %7309 = vst [vmem:[#allocation65_spill] sm:$0xff] %v6059_v11 }
 0x330   : > { %v6033_v45 = vpop.permute.xlu0 %1970  ;;  %v6069_v56 = vpop.f32.mrf.mxu1 }
 0x331   : > { %7301 = vst [vmem:[#allocation50_spill] sm:$0xff] %v6033_v45  ;;  %7312 = vst [vmem:[#allocation149_spill] sm:$0xff] %v6069_v56 }
 0x332   : > { %1555 = vrot.lane.b32.xlu1 %v1519_v35, %s4935_s15  ;;  %1573 = vrot.lane.b32.xlu0 %v1528_v40, %s4935_s15  ;;  %v6052_v35 = vpop.f32.mrf.mxu0  ;;  %v7307_v40 = vld [vmem:[#allocation69_spill] sm:$0xff] }
 0x333   : > { %v2353_v45 = vmul.f32 %v7307_v40, %v5811_v49  ;;  %v2362_v34 = vmul.f32 %v2339_v15, %v6052_v35  ;;  %v7313_v15 = vld [vmem:[#allocation34_spill] sm:$0xff]  ;;  %v7314_v49 = vld [vmem:[#allocation81_spill] sm:$0xff] }
 0x334   : > { %v6042_v0 = vpop.permute.xlu1 %1500  ;;  %v6044_v36 = vpop.permute.xlu0 %2387 }
 0x335   : > { %7304 = vst [vmem:[#allocation57_spill] sm:$0xff] %v6044_v36 }
 0x336   : > { %1972 = vrot.lane.b32.xlu1 %v1936_v41, %s4935_s15  ;;  %1990 = vrot.lane.b32.xlu0 %v1945_v3, %s4935_s15  ;;  %v7310_v41 = vld [vmem:[#allocation76_spill] sm:$0xff] }
 0x337   : > { %v1108_v3 = vmul.f32 %v7310_v41, %v5734_v46  ;;  %v7316_v46 = vld [vmem:[#allocation24_spill] sm:$0xff] }
 0x338   : > { %v6057_v61 = vpop.permute.xlu0 %1132 }
 0x339   : > { %7308 = vst [vmem:[#allocation106_spill] sm:$0xff] %v6057_v61  ;;  %v6061_v36 = vpop.permute.xlu1 %1917  ;;  %v6075_v61 = vpop.f32.mrf.mxu1 }
 0x33a   : > { %2389 = vrot.lane.b32.xlu1 %v2353_v45, %s4935_s15  ;;  %2407 = vrot.lane.b32.xlu0 %v2362_v34, %s4935_s15  ;;  %v1525_v45 = vmul.f32 %v7314_v49, %v5747_v52 }
 0x33b   : > { %v6083_v34 = vpop.f32.mrf.mxu1 }
 0x33c   : > { %v6067_v50 = vpop.permute.xlu0 %1549 }
 0x33d   : > { %7311 = vst [vmem:[#allocation69_spill] sm:$0xff] %v6067_v50  ;;  %v6093_v52 = vpop.f32.mrf.mxu1 }
 0x33e   : > { %v6071_v40 = vpop.permute.xlu1 %2334  ;;  %1150 = vrot.lane.b32.xlu1 %v1108_v3, %s4935_s15  ;;  %3164 = vperm.xlu0 %4749, %v7313_v15   ;;  %v1942_v3 = vmul.f32 %v5863_v13, %v5756_v27  ;;  %7319 = vst [vmem:[#allocation13_spill] sm:$0xff] %v6093_v52 }
 0x33f   : > { %v6103_v27 = vpop.f32.mrf.mxu1 }
 0x340   : > { %v6079_v8 = vpop.permute.xlu0 %1966 }
 0x341   : > { %7315 = vst [vmem:[#allocation34_spill] sm:$0xff] %v6079_v8 }
 0x342   : > { %1567 = vrot.lane.b32.xlu1 %v1525_v45, %s4935_s15  ;;  %3152 = vperm.xlu0 %4749, %v7316_v46   ;;  %v2359_v45 = vmul.f32 %v5888_v54, %v5765_v7  ;;  %v7323_v7 = vld [vmem:[#allocation10_spill] sm:$0xff]  ;;  %v6113_v54 = vpop.f32.mrf.mxu1 }
 0x343   : > { %v6085_v50 = vpop.permute.xlu1 %2751  ;;  %7324 = vst [vmem:[#allocation10_spill] sm:$0xff] %v6113_v54 }
 0x344   : > { %v6089_v41 = vpop.permute.xlu0 %2383  ;;  %v6119_v62 = vpop.f32.mrf.mxu1 }
 0x345   : > { %7317 = vst [vmem:[#allocation24_spill] sm:$0xff] %v6089_v41  ;;  %v7321_v41 = vld [vmem:[#allocation80_spill] sm:$0xff] }
 0x346   : > { %1984 = vrot.lane.b32.xlu1 %v1942_v3, %s4935_s15  ;;  %3148 = vperm.xlu0 %4749, %v7318_v4   ;;  %v1106_v3 = vmul.f32 %v5805_v58, %v7321_v41  ;;  %v7327_v58 = vmov 8   ;;  %v7328_v41 = vld [vmem:[#allocation11_spill] sm:$0xff]  ;;  %v6130_v52 = vpop.f32.mrf.mxu1 }
 0x347   : > { %7330 = vst [vmem:[#allocation153_spill] sm:$0xff] %v6130_v52 }
 0x348   : > { %v6097_v8 = vpop.permute.xlu1 %999  ;;  %v6099_v49 = vpop.permute.xlu0 %1144 }
 0x349   : > { %7320 = vst [vmem:[#allocation150_spill] sm:$0xff] %v6099_v49 }
 0x34a   : > { %2401 = vrot.lane.b32.xlu1 %v2359_v45, %s4935_s15  ;;  %3136 = vperm.xlu0 %4749, %v5280_v43   ;;  %v1523_v45 = vmul.f32 %v5820_v38, %v7325_v12 }
 0x34c   : > { %v6107_v13 = vpop.permute.xlu0 %1561 }
 0x34d   : > { %7322 = vst [vmem:[#allocation151_spill] sm:$0xff] %v6107_v13  ;;  %v6109_v20 = vpop.permute.xlu1 %1416 }
 0x34e   : > { %1146 = vrot.lane.b32.xlu1 %v1106_v3, %s4935_s15  ;;  %3132 = vperm.xlu0 %4749, %v7323_v7   ;;  %v1940_v3 = vmul.f32 %v5830_v63, %v5872_v55  ;;  %v6143_v63 = vpop.f32.mrf.mxu0 }
 0x34f   : > { %7332 = vst [vmem:[#allocation155_spill] sm:$0xff] %v6143_v63 }
 0x350   : > { %v6117_v49 = vpop.permute.xlu0 %1978 }
 0x351   : > { %7326 = vst [vmem:[#allocation152_spill] sm:$0xff] %v6117_v49  ;;  %v6140_v49 = vpop.f32.mrf.mxu1 }
 0x352   : > { %v6121_v32 = vpop.permute.xlu1 %1833  ;;  %1563 = vrot.lane.b32.xlu1 %v1523_v45, %s4935_s15  ;;  %4752 = vset.pattern.permute.xlu0 %v7327_v58  ;;  %v2357_v45 = vmul.f32 %v5841_v42, %v5896_v22  ;;  %v6153_v42 = vpop.f32.mrf.mxu0 }
 0x353   : > { %2611 = vperm.xlu0 %4752, %v7328_v41   ;;  %v6145_v55 = vpop.f32.mrf.mxu1  ;;  %7335 = vst [vmem:[#allocation157_spill] sm:$0xff] %v6153_v42 }
 0x354   : > { %v6128_v13 = vpop.permute.xlu0 %2395 }
 0x355   : > { %7329 = vst [vmem:[#allocation11_spill] sm:$0xff] %v6128_v13  ;;  %v6158_v22 = vpop.f32.mrf.mxu1 }
 0x356   : > { %1980 = vrot.lane.b32.xlu1 %v1940_v3, %s4935_s15  ;;  %v7333_v3 = vld [vmem:[#allocation91_spill] sm:$0xff]  ;;  %7337 = vst [vmem:[#allocation158_spill] sm:$0xff] %v6158_v22 }
 0x357   : > { %v6133_v38 = vpop.permute.xlu1 %2250  ;;  %2623 = vperm.xlu0 %4752, %v5280_v43   ;;  %v1112_v13 = vmul.f32 %v7333_v3, %v5967_v53  ;;  %v6166_v53 = vpop.f32.mrf.mxu0 }
 0x358   : > { %v6138_v12 = vpop.permute.xlu0 %1140  ;;  %7339 = vst [vmem:[#allocation160_spill] sm:$0xff] %v6166_v53 }
 0x359   : > { %7331 = vst [vmem:[#allocation154_spill] sm:$0xff] %v6138_v12 }
 0x35a   : > { %2397 = vrot.lane.b32.xlu1 %v2357_v45, %s4935_s15  ;;  %v7336_v45 = vld [vmem:[#allocation96_spill] sm:$0xff] }
 0x35b   : > { %2663 = vperm.xlu0 %4752, %v5496_v18   ;;  %v1529_v12 = vmul.f32 %v7336_v45, %v5977_v30  ;;  %v6173_v30 = vpop.f32.mrf.mxu1 }
 0x35c   : > { %v2764_v2 = vpop.permute.xlu1 %2763  ;;  %v6150_v11 = vpop.permute.xlu0 %1557 }
 0x35d   : > { %7334 = vst [vmem:[#allocation156_spill] sm:$0xff] %v6150_v11  ;;  %v2781_v19 = vmul.f32 %v6158_v22, %v2764_v2  ;;  %v6178_v2 = vpop.f32.mrf.mxu0 }
 0x35e   : > { %1158 = vrot.lane.b32.xlu1 %v1112_v13, %s4935_s15  ;;  %v1946_v13 = vmul.f32 %v5973_v25, %v5991_v9  ;;  %7341 = vst [vmem:[#allocation162_spill] sm:$0xff] %v6178_v2  ;;  %v2779_v9 = vmul.f32 %v6002_v59, %v6173_v30 }
 0x35f   : > { %2659 = vperm.xlu0 %4752, %v5544_v39  }
 0x360   : > { %v6160_v63 = vpop.permute.xlu0 %1974 }
 0x361   : > { %7338 = vst [vmem:[#allocation159_spill] sm:$0xff] %v6160_v63  ;;  %v6163_v56 = vpop.permute.xlu1 %989  ;;  %v7342_v63 = vld [vmem:[#allocation43_spill] sm:$0xff] }
 0x362   : > { %1575 = vrot.lane.b32.xlu1 %v1529_v12, %s4935_s15  ;;  %v2363_v12 = vmul.f32 %v5986_v21, %v6004_v14 }
 0x363   : > { %2828 = vrot.lane.b32.xlu0 %v2781_v19, %s4935_s15  ;;  %v6188_v19 = vpop.f32.mrf.mxu0 }
 0x364   : > { %v6171_v11 = vpop.permute.xlu0 %2391  ;;  %7344 = vst [vmem:[#allocation163_spill] sm:$0xff] %v6188_v19 }
 0x365   : > { %7340 = vst [vmem:[#allocation161_spill] sm:$0xff] %v6171_v11  ;;  %v6198_v14 = vpop.f32.mrf.mxu0 }
 0x366   : > { %v6175_v42 = vpop.permute.xlu1 %1408  ;;  %1992 = vrot.lane.b32.xlu1 %v1946_v13, %s4935_s15  ;;  %v7345_v13 = vld [vmem:[#allocation94_spill] sm:$0xff]  ;;  %7347 = vst [vmem:[#allocation165_spill] sm:$0xff] %v6198_v14 }
 0x367   : > { %2643 = vperm.xlu0 %4752, %v7342_v63   ;;  %v1110_v2 = vmul.f32 %v6028_v48, %v7345_v13  ;;  %v6207_v45 = vpop.f32.mrf.mxu0  ;;  %v1944_v48 = vmul.f32 %v6061_v36, %v5982_v17 }
 0x368   : > { %v6183_v53 = vpop.permute.xlu0 %1152  ;;  %7350 = vst [vmem:[#allocation167_spill] sm:$0xff] %v6207_v45 }
 0x369   : > { %7343 = vst [vmem:[#allocation43_spill] sm:$0xff] %v6183_v53  ;;  %v7348_v53 = vld [vmem:[#allocation99_spill] sm:$0xff] }
 0x36a   : > { %2409 = vrot.lane.b32.xlu1 %v2363_v12, %s4935_s15  ;;  %v1527_v59 = vmul.f32 %v6042_v0, %v7348_v53  ;;  %v2361_v0 = vmul.f32 %v6071_v40, %v5997_v31 }
 0x36b   : > { %v6190_v11 = vpop.permute.xlu1 %1825  ;;  %2824 = vrot.lane.b32.xlu0 %v2779_v9, %s4935_s15 }
 0x36c   : > { %v6195_v25 = vpop.permute.xlu0 %1569 }
 0x36d   : > { %7346 = vst [vmem:[#allocation164_spill] sm:$0xff] %v6195_v25 }
 0x36e   : > { %1154 = vrot.lane.b32.xlu1 %v1110_v2, %s4935_s15  ;;  %v6216_v2 = vpop.f32.mrf.mxu0 }
 0x36f   : > { %7352 = vst [vmem:[#allocation169_spill] sm:$0xff] %v6216_v2  ;;  %v7373_v2 = vld [vmem:[#allocation9_spill] sm:$0xff] }
 0x370   : > { %v6202_v21 = vpop.permute.xlu1 %2242  ;;  %v6204_v12 = vpop.permute.xlu0 %1986 }
 0x371   : > { %7349 = vst [vmem:[#allocation166_spill] sm:$0xff] %v6204_v12 }
 0x372   : > { %1571 = vrot.lane.b32.xlu1 %v1527_v59, %s4935_s15  ;;  %v6225_v59 = vpop.f32.mrf.mxu0 }
 0x373   : > { %7355 = vst [vmem:[#allocation172_spill] sm:$0xff] %v6225_v59 }
 0x374   : > { %v6211_v9 = vpop.permute.xlu0 %2403  ;;  %v6231_v17 = vpop.f32.mrf.mxu0 }
 0x375   : > { %7351 = vst [vmem:[#allocation168_spill] sm:$0xff] %v6211_v9  ;;  %v6213_v25 = vpop.permute.xlu1 %3172  ;;  %7358 = vst [vmem:[#allocation175_spill] sm:$0xff] %v6231_v17 }
 0x376   : > { %1988 = vrot.lane.b32.xlu1 %v1944_v48, %s4935_s15  ;;  %v6238_v40 = vpop.f32.mrf.mxu0 }
 0x377   : > { %7361 = vst [vmem:[#allocation178_spill] sm:$0xff] %v6238_v40 }
 0x378   : > { %v6220_v53 = vpop.permute.xlu0 %1148 }
 0x379   : > { %7353 = vst [vmem:[#allocation170_spill] sm:$0xff] %v6220_v53  ;;  %v6222_v12 = vpop.permute.xlu1 %1134 }
 0x37a   : > { %7354 = vst [vmem:[#allocation171_spill] sm:$0xff] %v6222_v12  ;;  %2405 = vrot.lane.b32.xlu1 %v2361_v0, %s4935_s15 }
 0x37c   : > { %v6227_v36 = vpop.permute.xlu0 %1565 }
 0x37d   : > { %7356 = vst [vmem:[#allocation173_spill] sm:$0xff] %v6227_v36  ;;  %v6229_v9 = vpop.permute.xlu1 %1551  ;;  %v6246_v36 = vpop.f32.mrf.mxu0 }
 0x37e   : > { %7357 = vst [vmem:[#allocation174_spill] sm:$0xff] %v6229_v9  ;;  %2731 = vperm.xlu1 %4743, %v7318_v4   ;;  %7364 = vst [vmem:[#allocation181_spill] sm:$0xff] %v6246_v36  ;;  %v7365_v9 = vld [vmem:[#allocation14_spill] sm:$0xff] }
 0x380   : > { %v6234_v48 = vpop.permute.xlu0 %1982 }
 0x381   : > { %7359 = vst [vmem:[#allocation176_spill] sm:$0xff] %v6234_v48  ;;  %v6236_v13 = vpop.permute.xlu1 %1968 }
 0x382   : > { %7360 = vst [vmem:[#allocation177_spill] sm:$0xff] %v6236_v13  ;;  %4744 = vset.pattern.permute.xlu1 %v7239_v37  ;;  %v6254_v13 = vpop.f32.mrf.mxu0 }
 0x383   : > { %3156 = vperm.xlu1 %4744, %v7342_v63  }
 0x384   : > { %v6242_v0 = vpop.permute.xlu0 %2399  ;;  %v6256_v53 = vpop.f32.mrf.mxu0 }
 0x385   : > { %7362 = vst [vmem:[#allocation179_spill] sm:$0xff] %v6242_v0  ;;  %v6244_v12 = vpop.permute.xlu1 %2385  ;;  %7367 = vst [vmem:[#allocation182_spill] sm:$0xff] %v6256_v53 }
 0x386   : > { %7363 = vst [vmem:[#allocation180_spill] sm:$0xff] %v6244_v12  ;;  %v7370_v12 = vld [vmem:[#allocation12_spill] sm:$0xff]  ;;  %v6264_v45 = vpop.f32.mrf.mxu0 }
 0x387   : > { %4745 = vset.pattern.permute.xlu1 %v7176_v28  ;;  %7371 = vst [vmem:[#allocation12_spill] sm:$0xff] %v6264_v45 }
 0x388   : > { %2723 = vperm.xlu1 %4745, %v7365_v9   ;;  %v6250_v31 = vpop.permute.xlu0 %2719 }
 0x389   : > { %v6252_v48 = vpop.permute.xlu1 %1130 }
 0x38a   : > { %7366 = vst [vmem:[#allocation14_spill] sm:$0xff] %v6252_v48 }
 0x38c   : > { %4746 = vset.pattern.permute.xlu1 %v7239_v37  ;;  %v6259_v14 = vpop.permute.xlu0 %2703 }
 0x38d   : > { %7368 = vst [vmem:[#allocation183_spill] sm:$0xff] %v6259_v14  ;;  %v6261_v0 = vpop.permute.xlu1 %1547  ;;  %3144 = vperm.xlu1 %4746, %v7370_v12  }
 0x38e   : > { %7369 = vst [vmem:[#allocation184_spill] sm:$0xff] %v6261_v0  ;;  %v1017_v0 = vmul.f32 %v7284_v16, %v6097_v8  ;;  %v1851_v8 = vmul.f32 %v5995_v5, %v6121_v32 }
 0x391   : > { %v6266_v22 = vpop.permute.xlu1 %1964  ;;  %4747 = vset.pattern.permute.xlu1 %v7176_v28  ;;  %v3181_v3 = vpop.permute.xlu0 %3180 }
 0x392   : > { %7372 = vst [vmem:[#allocation185_spill] sm:$0xff] %v6266_v22  ;;  %v3198_v48 = vmul.f32 %v6264_v45, %v3181_v3  ;;  %2711 = vperm.xlu1 %4747, %v7373_v2   ;;  %v1434_v3 = vmul.f32 %v7289_v57, %v6109_v20 }
 0x394   : > { %3245 = vrot.lane.b32.xlu0 %v3198_v48, %s4935_s15  ;;  %v7117_v48 = vmov 10  }
 0x395   : > { %v6272_v17 = vpop.permute.xlu1 %2381  ;;  %v6274_v14 = vpop.permute.xlu0 %3168 }
 0x396   : > { %7374 = vst [vmem:[#allocation9_spill] sm:$0xff] %v6272_v17  ;;  %2715 = vperm.xlu1 %4747, %v7323_v7  }
 0x398   : > { %2635 = vperm.xlu0 %4752, %v7318_v4  }
 0x399   : > { %v6280_v22 = vpop.permute.xlu1 %1142  ;;  %v1161_v40 = vpop.permute.xlu0 %1160 }
 0x39a   : > { %7375 = vst [vmem:[#allocation186_spill] sm:$0xff] %v6280_v22  ;;  %v1193_v45 = vadd.f32 %v1161_v40, %v1017_v0  ;;  %4748 = vset.pattern.permute.xlu1 %v7239_v37 }
 0x39b   : > { %3140 = vperm.xlu1 %4748, %v7365_v9  }
 0x39c   : > { %4762 = vset.pattern.permute.xlu0 %v7117_v48  ;;  %v1450_v17 = vadd.f32 %v1434_v3, %v1193_v45  ;;  %v2268_v45 = vmul.f32 %v6008_v1, %v6133_v38  ;;  %v2777_v3 = vmul.f32 %v6119_v62, %v5909_v51  ;;  %v6301_v48 = vpop.f32.mrf.mxu0  ;;  %v1015_v51 = vmul.f32 %v6163_v56, %v7296_v24 }
 0x39d   : > { %v6287_v29 = vpop.permute.xlu1 %1559  ;;  %3084 = vperm.xlu0 %4762, %v5535_v44   ;;  %v1578_v16 = vpop.permute.xlu0 %1577  ;;  %v3196_v5 = vmul.f32 %v6213_v25, %v6301_v48  ;;  %v1432_v38 = vmul.f32 %v6175_v42, %v7300_v10  ;;  %v1849_v56 = vmul.f32 %v6190_v11, %v6026_v26  ;;  %v3193_v11 = vmul.f32 %v6225_v59, %v5792_v23 }
 0x39e   : > { %7376 = vst [vmem:[#allocation187_spill] sm:$0xff] %v6287_v29  ;;  %v1610_v22 = vadd.f32 %v1578_v16, %v1450_v17 }
 0x39f   : > { %4750 = vset.pattern.permute.xlu1 %v7176_v28 }
 0x3a0   : > { %2707 = vperm.xlu1 %4750, %v7328_v41   ;;  %v1867_v57 = vadd.f32 %v1851_v8, %v1610_v22 }
 0x3a1   : > { %v6294_v20 = vpop.permute.xlu1 %1976  ;;  %3072 = vperm.xlu0 %4762, %v5527_v47   ;;  %v1995_v40 = vpop.permute.xlu0 %1994 }
 0x3a2   : > { %7377 = vst [vmem:[#allocation188_spill] sm:$0xff] %v6294_v20  ;;  %v2027_v0 = vadd.f32 %v1995_v40, %v1867_v57  ;;  %v7379_v40 = vld [vmem:[#allocation100_spill] sm:$0xff] }
 0x3a4   : > { %4751 = vset.pattern.permute.xlu1 %v7239_v37  ;;  %v2284_v28 = vadd.f32 %v2268_v45, %v2027_v0  ;;  %v2774_v45 = vmul.f32 %v7379_v40, %v6113_v54  ;;  %v7388_v54 = vmov 12  }
 0x3a5   : > { %3128 = vperm.xlu1 %4751, %v7373_v2   ;;  %v6305_v32 = vpop.permute.xlu1 %2393  ;;  %2820 = vrot.lane.b32.xlu0 %v2777_v3, %s4935_s15  ;;  %v2412_v22 = vpop.permute.xlu0 %2411  ;;  %v2266_v3 = vmul.f32 %v6202_v21, %v6052_v35  ;;  %v7380_v35 = vmov 10  }
 0x3a6   : > { %7378 = vst [vmem:[#allocation189_spill] sm:$0xff] %v6305_v32  ;;  %v6308_v17 = vadd.f32 %v2412_v22, %v2284_v28 }
 0x3a9   : > { %3120 = vperm.xlu1 %4751, %v5201_v6   ;;  %v6315_v1 = vpop.permute.xlu1 %1138  ;;  %3241 = vrot.lane.b32.xlu0 %v3196_v5, %s4935_s15  ;;  %v1157_v37 = vpop.permute.xlu0 %1156 }
 0x3aa   : > { %v1191_v16 = vadd.f32 %v1157_v37, %v1015_v51 }
 0x3ac   : > { %v1448_v8 = vadd.f32 %v1432_v38, %v1191_v16  ;;  %v7381_v16 = vld [vmem:[#allocation20_spill] sm:$0xff] }
 0x3ad   : > { %3124 = vperm.xlu1 %4751, %v7328_v41   ;;  %v6321_v57 = vpop.permute.xlu1 %1555  ;;  %3052 = vperm.xlu0 %4762, %v7318_v4   ;;  %v1574_v25 = vpop.permute.xlu0 %1573 }
 0x3ae   : > { %v1608_v24 = vadd.f32 %v1574_v25, %v1448_v8 }
 0x3b0   : > { %v1865_v0 = vadd.f32 %v1849_v56, %v1608_v24 }
 0x3b1   : > { %4753 = vset.pattern.permute.xlu1 %v7327_v58  ;;  %v6329_v10 = vpop.permute.xlu1 %1972  ;;  %2814 = vrot.lane.b32.xlu0 %v2774_v45, %s4935_s15  ;;  %v1991_v42 = vpop.permute.xlu0 %1990 }
 0x3b2   : > { %v2025_v28 = vadd.f32 %v1991_v42, %v1865_v0  ;;  %2667 = vperm.xlu1 %4753, %v5535_v44   ;;  %v7119_v0 = vmov 12  }
 0x3b4   : > { %v2282_v26 = vadd.f32 %v2266_v3, %v2025_v28  ;;  %v2780_v28 = vmul.f32 %v6140_v49, %v5850_v33 }
 0x3b5   : > { %v6337_v22 = vpop.permute.xlu1 %2389  ;;  %3235 = vrot.lane.b32.xlu0 %v3193_v11, %s4935_s15  ;;  %v2408_v5 = vpop.permute.xlu0 %2407 }
 0x3b6   : > { %v2442_v51 = vadd.f32 %v2408_v5, %v2282_v26  ;;  %2655 = vperm.xlu1 %4753, %v5527_v47  }
 0x3b9   : > { %v6341_v37 = vpop.permute.xlu1 %1150  ;;  %3040 = vperm.xlu0 %4762, %v5280_v43   ;;  %v6344_v21 = vpop.permute.xlu0 %3164 }
 0x3ba   : > { %4754 = vset.pattern.permute.xlu1 %v7380_v35 }
 0x3bb   : > { %3080 = vperm.xlu1 %4754, %v5496_v18  }
 0x3bd   : > { %v6348_v23 = vpop.permute.xlu1 %1567  ;;  %v6350_v38 = vpop.permute.xlu0 %3152 }
 0x3bf   : > { %4755 = vset.pattern.permute.xlu1 %v7327_v58 }
 0x3c0   : > { %2647 = vperm.xlu1 %4755, %v7381_v16  }
 0x3c1   : > { %v6354_v8 = vpop.permute.xlu1 %1984  ;;  %v6356_v25 = vpop.permute.xlu0 %3148 }
 0x3c4   : > { %2651 = vperm.xlu1 %4755, %v7313_v15  }
 0x3c5   : > { %v6359_v56 = vpop.permute.xlu1 %2401  ;;  %v6361_v24 = vpop.permute.xlu0 %3136 }
 0x3c6   : > { %7382 = vst [vmem:[#allocation100_spill] sm:$0xff] %v6359_v56 }
 0x3c8   : > { %4756 = vset.pattern.permute.xlu1 %v7380_v35 }
 0x3c9   : > { %3076 = vperm.xlu1 %4756, %v5544_v39   ;;  %v6365_v40 = vpop.permute.xlu1 %1146  ;;  %v6367_v45 = vpop.permute.xlu0 %3132 }
 0x3cd   : > { %4757 = vset.pattern.permute.xlu1 %v7119_v0  ;;  %v6370_v42 = vpop.permute.xlu1 %1563 }
 0x3ce   : > { %7383 = vst [vmem:[#allocation20_spill] sm:$0xff] %v6370_v42  ;;  %3501 = vperm.xlu1 %4757, %v5535_v44   ;;  %v6373_v3 = vpop.permute.xlu0 %2611 }
 0x3cf   : > { %7384 = vst [vmem:[#allocation190_spill] sm:$0xff] %v6373_v3 }
 0x3d1   : > { %v6377_v11 = vpop.permute.xlu1 %1980 }
 0x3d2   : > { %7385 = vst [vmem:[#allocation191_spill] sm:$0xff] %v6377_v11  ;;  %2826 = vrot.lane.b32.xlu1 %v2780_v28, %s4935_s15  ;;  %v6380_v26 = vpop.permute.xlu0 %2623 }
 0x3d3   : > { %4758 = vset.pattern.permute.xlu1 %v7327_v58 }
 0x3d5   : > { %v6383_v5 = vpop.permute.xlu1 %2397 }
 0x3d6   : > { %7386 = vst [vmem:[#allocation192_spill] sm:$0xff] %v6383_v5  ;;  %2639 = vperm.xlu1 %4758, %v7316_v46   ;;  %v6386_v0 = vpop.permute.xlu0 %2663 }
 0x3d9   : > { %v6388_v44 = vpop.permute.xlu1 %1158 }
 0x3da   : > { %4759 = vset.pattern.permute.xlu1 %v7380_v35  ;;  %v2660_v3 = vpop.permute.xlu0 %2659 }
 0x3db   : > { %v2683_v33 = vmul.f32 %v2660_v3, %v6173_v30  ;;  %3064 = vperm.xlu1 %4759, %v7381_v16   ;;  %v2778_v30 = vmul.f32 %v6085_v50, %v6145_v55 }
 0x3dd   : > { %v6393_v28 = vpop.permute.xlu1 %1575  ;;  %v2699_v32 = vadd.f32 %v2683_v33, %v2442_v51  ;;  %v3197_v33 = vmul.f32 %v6254_v13, %v6015_v60 }
 0x3de   : > { %v6395_v20 = vpop.permute.xlu0 %2828 }
 0x3df   : > { %3068 = vperm.xlu1 %4759, %v7313_v15  }
 0x3e1   : > { %v6398_v29 = vpop.permute.xlu1 %1992 }
 0x3e2   : > { %v6400_v5 = vpop.permute.xlu0 %2643 }
 0x3e3   : > { %7387 = vst [vmem:[#allocation193_spill] sm:$0xff] %v6400_v5  ;;  %4760 = vset.pattern.permute.xlu1 %v7388_v54 }
 0x3e4   : > { %3493 = vperm.xlu1 %4760, %v5544_v39  }
 0x3e5   : > { %v6404_v11 = vpop.permute.xlu1 %2409 }
 0x3e6   : > { %v2825_v3 = vpop.permute.xlu0 %2824 }
 0x3e7   : > { %v6408_v59 = vadd.f32 %v2825_v3, %v2699_v32  ;;  %v7389_v3 = vld [vmem:[#allocation115_spill] sm:$0xff] }
 0x3e8   : > { %2822 = vrot.lane.b32.xlu1 %v2778_v30, %s4935_s15 }
 0x3e9   : > { %v6411_v51 = vpop.permute.xlu1 %1154  ;;  %4761 = vset.pattern.permute.xlu1 %v7327_v58 }
 0x3ec   : > { %3243 = vrot.lane.b32.xlu1 %v3197_v33, %s4935_s15  ;;  %v2776_v33 = vmul.f32 %v6103_v27, %v7389_v3 }
 0x3ed   : > { %v6417_v39 = vpop.permute.xlu1 %1571 }
 0x3f0   : > { %2631 = vperm.xlu1 %4761, %v7370_v12  }
 0x3f1   : > { %v6420_v5 = vpop.permute.xlu1 %1988 }
 0x3f4   : > { %4763 = vset.pattern.permute.xlu1 %v7380_v35 }
 0x3f5   : > { %v6423_v50 = vpop.permute.xlu1 %2405  ;;  %3056 = vperm.xlu1 %4763, %v7316_v46  }
 0x3f9   : > { %v2732_v32 = vpop.permute.xlu1 %2731  ;;  %3060 = vperm.xlu1 %4763, %v7342_v63  }
 0x3fa   : > { %v2773_v58 = vmul.f32 %v6083_v34, %v2732_v32  ;;  %v3195_v32 = vmul.f32 %v6274_v14, %v6256_v53  ;;  %v6453_v14 = vpop.f32.mrf.mxu1 }
 0x3fb   : > { %7390 = vst [vmem:[#allocation115_spill] sm:$0xff] %v6453_v14 }
 0x3fc   : > { %2812 = vrot.lane.b32.xlu0 %v2773_v58, %s4935_s15 }
 0x3fd   : > { %4764 = vset.pattern.permute.xlu1 %v7388_v54 }
 0x3fe   : > { %v3157_v60 = vpop.permute.xlu1 %3156  ;;  %3485 = vperm.xlu1 %4764, %v7313_v15   ;;  %v2770_v15 = vmul.f32 %v6250_v31, %v6075_v61  ;;  %v6457_v31 = vpop.f32.mrf.mxu1 }
 0x3ff   : > { %v3192_v30 = vmul.f32 %v3157_v60, %v6246_v36  ;;  %7391 = vst [vmem:[#allocation194_spill] sm:$0xff] %v6457_v31  ;;  %v7398_v31 = vld [vmem:[#allocation53_spill] sm:$0xff] }
 0x401   : > { %3233 = vrot.lane.b32.xlu0 %v3192_v30, %s4935_s15 }
 0x402   : > { %2818 = vrot.lane.b32.xlu1 %v2776_v33, %s4935_s15  ;;  %v7392_v33 = vld [vmem:[#allocation148_spill] sm:$0xff] }
 0x403   : > { %v6436_v56 = vpop.permute.xlu1 %2723  ;;  %4765 = vset.pattern.permute.xlu1 %v7380_v35 }
 0x405   : > { %3036 = vperm.xlu0 %4762, %v7323_v7  }
 0x406   : > { %3239 = vrot.lane.b32.xlu1 %v3195_v32, %s4935_s15  ;;  %v2775_v32 = vmul.f32 %v7392_v33, %v6130_v52 }
 0x408   : > { %v3145_v58 = vpop.permute.xlu1 %3144 }
 0x409   : > { %2806 = vrot.lane.b32.xlu0 %v2770_v15, %s4935_s15  ;;  %v3189_v60 = vmul.f32 %v6188_v19, %v3145_v58  ;;  %v7394_v58 = vld [vmem:[#allocation178_spill] sm:$0xff] }
 0x40a   : > { %3048 = vperm.xlu1 %4765, %v7370_v12  }
 0x40d   : > { %v6448_v30 = vpop.permute.xlu1 %2711  ;;  %3227 = vrot.lane.b32.xlu0 %v3189_v60, %s4935_s15  ;;  %v3194_v60 = vmul.f32 %v7394_v58, %v6344_v21 }
 0x40e   : > { %4766 = vset.pattern.permute.xlu1 %v7388_v54 }
 0x40f   : > { %3473 = vperm.xlu1 %4766, %v7316_v46   ;;  %v6464_v46 = vpop.f32.mrf.mxu1 }
 0x410   : > { %7393 = vst [vmem:[#allocation148_spill] sm:$0xff] %v6464_v46  ;;  %v7401_v46 = vld [vmem:[#allocation61_spill] sm:$0xff] }
 0x411   : > { %v2716_v3 = vpop.permute.xlu1 %2715  ;;  %3024 = vperm.xlu0 %4762, %v5201_v6   ;;  %v6471_v33 = vpop.f32.mrf.mxu1 }
 0x412   : > { %7395 = vst [vmem:[#allocation195_spill] sm:$0xff] %v6471_v33  ;;  %v7399_v33 = vld [vmem:[#allocation149_spill] sm:$0xff] }
 0x413   : > { %3477 = vperm.xlu1 %4766, %v7342_v63  }
 0x415   : > { %4771 = vset.pattern.permute.xlu0 %v7388_v54 }
 0x416   : > { %v3141_v15 = vpop.permute.xlu1 %3140  ;;  %3497 = vperm.xlu0 %4771, %v5496_v18   ;;  %v6475_v18 = vpop.f32.mrf.mxu1 }
 0x417   : > { %2816 = vrot.lane.b32.xlu1 %v2775_v32, %s4935_s15  ;;  %7396 = vst [vmem:[#allocation196_spill] sm:$0xff] %v6475_v18  ;;  %v2769_v18 = vmul.f32 %v7401_v46, %v2716_v3  ;;  %v7405_v3 = vld [vmem:[#allocation118_spill] sm:$0xff]  ;;  %v7406_v46 = vld [vmem:[#allocation91_spill] sm:$0xff] }
 0x418   : > { %4767 = vset.pattern.permute.xlu1 %v7380_v35  ;;  %v6481_v21 = vpop.f32.mrf.mxu1  ;;  %v1016_v52 = vmul.f32 %v7406_v46, %v7405_v3 }
 0x419   : > { %7397 = vst [vmem:[#allocation197_spill] sm:$0xff] %v6481_v21  ;;  %v7402_v21 = vld [vmem:[#allocation175_spill] sm:$0xff] }
 0x41a   : > { %3489 = vperm.xlu0 %4771, %v5527_v47   ;;  %v6489_v14 = vpop.f32.mrf.mxu1 }
 0x41b   : > { %v2708_v63 = vpop.permute.xlu1 %2707  ;;  %3237 = vrot.lane.b32.xlu1 %v3194_v60, %s4935_s15  ;;  %v3246_v60 = vpop.permute.xlu0 %3245  ;;  %7400 = vst [vmem:[#allocation53_spill] sm:$0xff] %v6489_v14 }
 0x41c   : > { %v6499_v36 = vpop.f32.mrf.mxu1 }
 0x41d   : > { %7403 = vst [vmem:[#allocation198_spill] sm:$0xff] %v6499_v36  ;;  %v7409_v36 = vld [vmem:[#allocation96_spill] sm:$0xff] }
 0x41e   : > { %3481 = vperm.xlu0 %4771, %v7381_v16   ;;  %v2772_v16 = vmul.f32 %v7399_v33, %v7398_v31  ;;  %v7404_v31 = vld [vmem:[#allocation169_spill] sm:$0xff]  ;;  %v6507_v42 = vpop.f32.mrf.mxu1 }
 0x41f   : > { %3044 = vperm.xlu1 %4767, %v7365_v9   ;;  %v3188_v33 = vmul.f32 %v3141_v15, %v7404_v31 }
 0x420   : > { %v6477_v32 = vpop.permute.xlu1 %3128 }
 0x422   : > { %3465 = vperm.xlu0 %4771, %v7370_v12   ;;  %v6493_v12 = vpop.permute.xlu0 %2635 }
 0x423   : > { %4768 = vset.pattern.permute.xlu1 %v7388_v54 }
 0x424   : > { %v6483_v47 = vpop.permute.xlu1 %3120  ;;  %3469 = vperm.xlu1 %4768, %v7318_v4   ;;  %v3191_v4 = vmul.f32 %v6350_v38, %v7402_v21  ;;  %v1192_v38 = vadd.f32 %v6388_v44, %v1016_v52  ;;  %v7410_v21 = vld [vmem:[#allocation12_spill] sm:$0xff] }
 0x426   : > { %3449 = vperm.xlu0 %4771, %v7373_v2   ;;  %v3085_v58 = vpop.permute.xlu0 %3084 }
 0x427   : > { %v3102_v46 = vmul.f32 %v7410_v21, %v3085_v58  ;;  %v7414_v21 = vld [vmem:[#allocation124_spill] sm:$0xff] }
 0x428   : > { %v3125_v19 = vpop.permute.xlu1 %3124  ;;  %2810 = vrot.lane.b32.xlu1 %v2772_v16, %s4935_s15  ;;  %v7407_v16 = vld [vmem:[#allocation158_spill] sm:$0xff] }
 0x429   : > { %4769 = vset.pattern.permute.xlu1 %v7380_v35 }
 0x42a   : > { %2804 = vrot.lane.b32.xlu0 %v2769_v18, %s4935_s15 }
 0x42c   : > { %3231 = vrot.lane.b32.xlu1 %v3191_v4, %s4935_s15  ;;  %v7408_v4 = vld [vmem:[#allocation123_spill] sm:$0xff] }
 0x42d   : > { %v2668_v14 = vpop.permute.xlu1 %2667  ;;  %v1433_v31 = vmul.f32 %v7409_v36, %v7408_v4 }
 0x42e   : > { %v2685_v53 = vmul.f32 %v7407_v16, %v2668_v14  ;;  %3225 = vrot.lane.b32.xlu0 %v3188_v33, %s4935_s15  ;;  %v6519_v33 = vpop.f32.mrf.mxu1  ;;  %v7412_v16 = vld [vmem:[#allocation65_spill] sm:$0xff] }
 0x42f   : > { %7411 = vst [vmem:[#allocation118_spill] sm:$0xff] %v6519_v33  ;;  %v1449_v3 = vadd.f32 %v1433_v31, %v1192_v38  ;;  %v2767_v52 = vmul.f32 %v2708_v63, %v7412_v16  ;;  %v7415_v63 = vld [vmem:[#allocation19_spill] sm:$0xff]  ;;  %v7416_v38 = vld [vmem:[#allocation13_spill] sm:$0xff]  ;;  %v7478_v33 = vld [vmem:[#allocation166_spill] sm:$0xff] }
 0x430   : > { %v2701_v18 = vadd.f32 %v2685_v53, %v6308_v17  ;;  %3032 = vperm.xlu1 %4769, %v7373_v2   ;;  %v6525_v17 = vpop.f32.mrf.mxu1  ;;  %v1850_v31 = vmul.f32 %v7415_v63, %v7414_v21 }
 0x431   : > { %v6512_v15 = vpop.permute.xlu1 %2655  ;;  %v1609_v58 = vadd.f32 %v6393_v28, %v1449_v3 }
 0x432   : > { %v2861_v14 = vadd.f32 %v6395_v20, %v2701_v18  ;;  %3445 = vperm.xlu0 %4771, %v7328_v41   ;;  %v7413_v20 = vld [vmem:[#allocation160_spill] sm:$0xff] }
 0x433   : > { %v3186_v44 = vmul.f32 %v7413_v20, %v6367_v45  ;;  %v1866_v4 = vadd.f32 %v1850_v31, %v1609_v58 }
 0x434   : > { %4770 = vset.pattern.permute.xlu1 %v7388_v54  ;;  %v3118_v53 = vadd.f32 %v3102_v46, %v2861_v14  ;;  %v7418_v46 = vld [vmem:[#allocation162_spill] sm:$0xff] }
 0x435   : > { %3457 = vperm.xlu1 %4770, %v5280_v43   ;;  %v2771_v43 = vmul.f32 %v6436_v56, %v7416_v38  ;;  %v3184_v14 = vmul.f32 %v3125_v19, %v7418_v46  ;;  %v2026_v56 = vadd.f32 %v6398_v29, %v1866_v4  ;;  %v2684_v4 = vmul.f32 %v6140_v49, %v6386_v0 }
 0x436   : > { %v3081_v2 = vpop.permute.xlu1 %3080  ;;  %2800 = vrot.lane.b32.xlu0 %v2767_v52, %s4935_s15  ;;  %v3278_v36 = vadd.f32 %v3246_v60, %v3118_v53  ;;  %v6538_v60 = vpop.f32.mrf.mxu1  ;;  %v7420_v52 = vld [vmem:[#allocation125_spill] sm:$0xff]  ;;  %v7421_v53 = vld [vmem:[#allocation48_spill] sm:$0xff] }
 0x437   : > { %7417 = vst [vmem:[#allocation91_spill] sm:$0xff] %v6538_v60  ;;  %v2267_v19 = vmul.f32 %v7421_v53, %v7420_v52 }
 0x438   : > { %v6548_v3 = vpop.f32.mrf.mxu1 }
 0x439   : > { %3461 = vperm.xlu1 %4770, %v7365_v9   ;;  %v7419_v9 = vld [vmem:[#allocation167_spill] sm:$0xff]  ;;  %v2283_v58 = vadd.f32 %v2267_v19, %v2026_v56  ;;  %v7425_v19 = vld [vmem:[#allocation70_spill] sm:$0xff] }
 0x43a   : > { %3221 = vrot.lane.b32.xlu0 %v3186_v44, %s4935_s15  ;;  %v3190_v45 = vmul.f32 %v7419_v9, %v6356_v25  ;;  %v6554_v44 = vpop.f32.mrf.mxu1  ;;  %v6558_v25 = vpop.permute.xlu0 %3072 }
 0x43b   : > { %v6536_v18 = vpop.permute.xlu1 %2647  ;;  %v2443_v29 = vadd.f32 %v6404_v11, %v2283_v58  ;;  %v3101_v11 = vmul.f32 %v6254_v13, %v3081_v2  ;;  %v7427_v13 = vld [vmem:[#allocation79_spill] sm:$0xff] }
 0x43c   : > { %v4495_v31 = vpop.f32.mrf.mxu1  ;;  %v7428_v2 = vld [vmem:[#allocation75_spill] sm:$0xff] }
 0x43d   : > { %2808 = vrot.lane.b32.xlu1 %v2771_v43, %s4935_s15 }
 0x43e   : > { %3217 = vrot.lane.b32.xlu0 %v3184_v14, %s4935_s15  ;;  %4772 = vset.pattern.permute.xlu1 %v7380_v35 }
 0x43f   : > { %v6546_v28 = vpop.permute.xlu1 %2651 }
 0x441   : > { %3229 = vrot.lane.b32.xlu1 %v3190_v45, %s4935_s15  ;;  %v6570_v45 = vpop.permute.xlu0 %2820 }
 0x444   : > { %v3077_v21 = vpop.permute.xlu1 %3076 }
 0x445   : > { %v3100_v35 = vmul.f32 %v3077_v21, %v6301_v48  ;;  %3028 = vperm.xlu1 %4772, %v7328_v41   ;;  %v7422_v48 = vld [vmem:[#allocation51_spill] sm:$0xff]  ;;  %v6584_v21 = vpop.permute.xlu0 %3241 }
 0x446   : > { %v2768_v41 = vmul.f32 %v7422_v48, %v6448_v30 }
 0x447   : > { %v6561_v63 = vadd.f32 %v3100_v35, %v6408_v59  ;;  %v2700_v59 = vadd.f32 %v2684_v4, %v2443_v29  ;;  %v7430_v4 = vld [vmem:[#allocation183_spill] sm:$0xff] }
 0x449   : > { %v3502_v43 = vpop.permute.xlu1 %3501  ;;  %4773 = vset.pattern.permute.xlu1 %v7388_v54  ;;  %v7423_v54 = vld [vmem:[#allocation165_spill] sm:$0xff] }
 0x44a   : > { %v3519_v14 = vmul.f32 %v4495_v31, %v3502_v43  ;;  %3453 = vperm.xlu1 %4773, %v7323_v7   ;;  %v3187_v49 = vmul.f32 %v6361_v24, %v7423_v54  ;;  %v7424_v7 = vld [vmem:[#allocation74_spill] sm:$0xff]  ;;  %v1426_v31 = vmul.f32 %v7428_v2, %v7427_v13  ;;  %v7435_v13 = vld [vmem:[#allocation157_spill] sm:$0xff] }
 0x44b   : > { %v1009_v58 = vmul.f32 %v7425_v19, %v7424_v7  ;;  %v7429_v43 = vld [vmem:[#allocation102_spill] sm:$0xff]  ;;  %v7433_v7 = vld [vmem:[#allocation83_spill] sm:$0xff]  ;;  %v7434_v19 = vld [vmem:[#allocation120_spill] sm:$0xff]  ;;  %v3183_v2 = vmul.f32 %v6483_v47, %v7435_v13 }
 0x44c   : > { %v6572_v56 = vadd.f32 %v3519_v14, %v3278_v36  ;;  %v7426_v36 = vld [vmem:[#allocation150_spill] sm:$0xff]  ;;  %v2766_v14 = vmul.f32 %v7430_v4, %v7429_v43  ;;  %v7443_v13 = vld [vmem:[#allocation45_spill] sm:$0xff]  ;;  %v7444_v43 = vld [vmem:[#allocation11_spill] sm:$0xff] }
 0x44d   : > { %v2827_v52 = vpop.permute.xlu1 %2826  ;;  %v1185_v35 = vadd.f32 %v7426_v36, %v1009_v58  ;;  %v1843_v58 = vmul.f32 %v7434_v19, %v7433_v7  ;;  %v7439_v19 = vmov 0.0  }
 0x44e   : > { %v2860_v53 = vadd.f32 %v2827_v52, %v2700_v59  ;;  %2802 = vrot.lane.b32.xlu1 %v2768_v41, %s4935_s15  ;;  %v3053_v41 = vpop.permute.xlu0 %3052  ;;  %v7431_v52 = vld [vmem:[#allocation151_spill] sm:$0xff]  ;;  %4512 = vmatprep.mubr.msk.bf16.mxu0 %vm4938_vm4, %v7439_v19 }
 0x44f   : > { %v1442_v24 = vadd.f32 %v1426_v31, %v1185_v35  ;;  %v7436_v31 = vld [vmem:[#allocation152_spill] sm:$0xff] }
 0x450   : > { %v6578_v0 = vadd.f32 %v3101_v11, %v2860_v53  ;;  %v7432_v53 = vld [vmem:[#allocation155_spill] sm:$0xff] }
 0x451   : > { %v6582_v30 = vpop.permute.xlu1 %2639  ;;  %v1602_v11 = vadd.f32 %v7431_v52, %v1442_v24  ;;  %v7438_v52 = vld [vmem:[#allocation122_spill] sm:$0xff] }
 0x452   : > { %3223 = vrot.lane.b32.xlu1 %v3187_v49, %s4935_s15  ;;  %v3185_v49 = vmul.f32 %v7432_v53, %v6477_v32  ;;  %v6603_v36 = vpop.permute.xlu0 %2814 }
 0x456   : > { %v6590_v29 = vpop.permute.xlu1 %3064  ;;  %3441 = vperm.xlu1 %4773, %v5201_v6   ;;  %v1859_v6 = vadd.f32 %v1843_v58, %v1602_v11  ;;  %v6614_v32 = vpop.permute.xlu0 %3235  ;;  %v7440_v11 = vld [vmem:[#allocation66_spill] sm:$0xff] }
 0x458   : > { %v2019_v24 = vadd.f32 %v7436_v31, %v1859_v6  ;;  %v2677_v6 = vmul.f32 %v6083_v34, %v6493_v12  ;;  %v7442_v31 = vld [vmem:[#allocation71_spill] sm:$0xff]  ;;  %v7447_v34 = vld [vmem:[#allocation128_spill] sm:$0xff] }
 0x459   : > { %v1423_v46 = vmul.f32 %v7443_v13, %v7442_v31  ;;  %v7448_v12 = vld [vmem:[#allocation84_spill] sm:$0xff]  ;;  %v7449_v13 = vld [vmem:[#allocation94_spill] sm:$0xff]  ;;  %v7450_v31 = vld [vmem:[#allocation129_spill] sm:$0xff] }
 0x45a   : > { %v6595_v59 = vpop.permute.xlu1 %3068  ;;  %2798 = vrot.lane.b32.xlu1 %v2766_v14, %s4935_s15  ;;  %v7437_v14 = vld [vmem:[#allocation87_spill] sm:$0xff] }
 0x45b   : > { %v2260_v7 = vmul.f32 %v7438_v52, %v7437_v14 }
 0x45d   : > { %v2276_v53 = vadd.f32 %v2260_v7, %v2019_v24  ;;  %v3094_v24 = vmul.f32 %v7419_v9, %v3053_v41  ;;  %v7455_v9 = vld [vmem:[#allocation43_spill] sm:$0xff] }
 0x45e   : > { %3219 = vrot.lane.b32.xlu1 %v3185_v49, %s4935_s15  ;;  %v7441_v49 = vld [vmem:[#allocation42_spill] sm:$0xff] }
 0x45f   : > { %v6606_v35 = vpop.permute.xlu1 %3493  ;;  %v1006_v58 = vmul.f32 %v7441_v49, %v7440_v11  ;;  %v2436_v14 = vadd.f32 %v7444_v43, %v2276_v53  ;;  %v1014_v43 = vmul.f32 %v7450_v31, %v7449_v13  ;;  %v7451_v53 = vld [vmem:[#allocation117_spill] sm:$0xff]  ;;  %v7460_v31 = vld [vmem:[#allocation68_spill] sm:$0xff] }
 0x461   : > { %v1182_v47 = vadd.f32 %v6315_v1, %v1006_v58  ;;  %v2693_v48 = vadd.f32 %v2677_v6, %v2436_v14  ;;  %v1013_v58 = vmul.f32 %v7448_v12, %v7447_v34  ;;  %v7454_v6 = vld [vmem:[#allocation76_spill] sm:$0xff]  ;;  %v7458_v34 = vld [vmem:[#allocation99_spill] sm:$0xff]  ;;  %v7459_v12 = vld [vmem:[#allocation133_spill] sm:$0xff] }
 0x462   : > { %3215 = vrot.lane.b32.xlu1 %v3183_v2, %s4935_s15  ;;  %v3041_v2 = vpop.permute.xlu0 %3040 }
 0x463   : > { %v6612_v4 = vpop.permute.xlu1 %2822  ;;  %v1439_v16 = vadd.f32 %v1423_v46, %v1182_v47  ;;  %v7453_v47 = vld [vmem:[#allocation64_spill] sm:$0xff] }
 0x464   : > { %v1012_v14 = vmul.f32 %v7454_v6, %v7453_v47 }
 0x465   : > { %v1599_v1 = vadd.f32 %v6321_v57, %v1439_v16  ;;  %v7456_v16 = vld [vmem:[#allocation131_spill] sm:$0xff] }
 0x466   : > { %v1188_v13 = vadd.f32 %v6341_v37, %v1012_v14 }
 0x467   : > { %v6621_v20 = vpop.permute.xlu1 %3243 }
 0x46b   : > { %v6629_v52 = vpop.permute.xlu1 %2631 }
 0x46c   : > { %7445 = vst [vmem:[#allocation158_spill] sm:$0xff] %v6629_v52  ;;  %v7452_v52 = vld [vmem:[#allocation46_spill] sm:$0xff] }
 0x46d   : > { %v1840_v46 = vmul.f32 %v7452_v52, %v7451_v53  ;;  %v7461_v52 = vld [vmem:[#allocation81_spill] sm:$0xff] }
 0x46e   : > { %v2813_v38 = vpop.permute.xlu0 %2812  ;;  %v1429_v53 = vmul.f32 %v7461_v52, %v7460_v31  ;;  %v7466_v31 = vld [vmem:[#allocation135_spill] sm:$0xff] }
 0x46f   : > { %v2853_v7 = vadd.f32 %v2813_v38, %v2693_v48  ;;  %v1189_v38 = vadd.f32 %v7455_v9, %v1013_v58  ;;  %v1190_v48 = vadd.f32 %v6411_v51, %v1014_v43  ;;  %v1856_v57 = vadd.f32 %v1840_v46, %v1599_v1  ;;  %v7462_v43 = vld [vmem:[#allocation121_spill] sm:$0xff]  ;;  %v7463_v1 = vld [vmem:[#allocation47_spill] sm:$0xff]  ;;  %v7464_v9 = vld [vmem:[#allocation164_spill] sm:$0xff] }
 0x470   : > { %v6632_v11 = vpop.permute.xlu1 %3056  ;;  %v1445_v51 = vadd.f32 %v1429_v53, %v1188_v13  ;;  %v2257_v46 = vmul.f32 %v7463_v1, %v7462_v43  ;;  %v7470_v13 = vld [vmem:[#allocation142_spill] sm:$0xff]  ;;  %v7471_v53 = vld [vmem:[#allocation72_spill] sm:$0xff] }
 0x471   : > { %v6635_v49 = vadd.f32 %v3094_v24, %v2853_v7  ;;  %v7457_v24 = vld [vmem:[#allocation89_spill] sm:$0xff]  ;;  %v2016_v58 = vadd.f32 %v6329_v10, %v1856_v57 }
 0x472   : > { %v1430_v7 = vmul.f32 %v7457_v24, %v7456_v16  ;;  %v1605_v57 = vadd.f32 %v6348_v23, %v1445_v51  ;;  %v7474_v51 = vld [vmem:[#allocation80_spill] sm:$0xff] }
 0x473   : > { %7446 = vst [vmem:[#allocation123_spill] sm:$0xff] %v6635_v49  ;;  %v1431_v49 = vmul.f32 %v7459_v12, %v7458_v34  ;;  %v6663_v34 = vpop.permute.xlu0 %3233  ;;  %v2273_v37 = vadd.f32 %v2257_v46, %v2016_v58  ;;  %v7465_v12 = vld [vmem:[#allocation134_spill] sm:$0xff] }
 0x474   : > { %v6647_v41 = vpop.permute.xlu1 %3060  ;;  %v1446_v60 = vadd.f32 %v1430_v7, %v1189_v38  ;;  %v1847_v38 = vmul.f32 %v7466_v31, %v7465_v12  ;;  %v7469_v7 = vld [vmem:[#allocation88_spill] sm:$0xff]  ;;  %v7473_v46 = vld [vmem:[#allocation170_spill] sm:$0xff] }
 0x475   : > { %v1447_v47 = vadd.f32 %v1431_v49, %v1190_v48  ;;  %v7467_v49 = vld [vmem:[#allocation21_spill] sm:$0xff]  ;;  %v1011_v52 = vmul.f32 %v7470_v13, %v7469_v7  ;;  %v2433_v12 = vadd.f32 %v6337_v22, %v2273_v37  ;;  %v7477_v13 = vld [vmem:[#allocation144_spill] sm:$0xff]  ;;  %v3091_v22 = vmul.f32 %v3041_v2, %v7423_v54 }
 0x476   : > { %v1606_v16 = vadd.f32 %v7464_v9, %v1446_v60  ;;  %v7468_v48 = vld [vmem:[#allocation137_spill] sm:$0xff]  ;;  %v2674_v60 = vmul.f32 %v6380_v26, %v6075_v61 }
 0x477   : > { %v1607_v24 = vadd.f32 %v6417_v39, %v1447_v47  ;;  %v1848_v10 = vmul.f32 %v7468_v48, %v7467_v49  ;;  %v7472_v39 = vld [vmem:[#allocation130_spill] sm:$0xff]  ;;  %v1187_v9 = vadd.f32 %v7473_v46, %v1011_v52  ;;  %v7476_v7 = vld [vmem:[#allocation93_spill] sm:$0xff] }
 0x478   : > { %v1846_v47 = vmul.f32 %v7472_v39, %v7471_v53  ;;  %v1863_v43 = vadd.f32 %v1847_v38, %v1606_v16  ;;  %v7475_v49 = vld [vmem:[#allocation82_spill] sm:$0xff]  ;;  %v1428_v61 = vmul.f32 %v7477_v13, %v7476_v7  ;;  %v2690_v26 = vadd.f32 %v2674_v60, %v2433_v12  ;;  %v7480_v39 = vld [vmem:[#allocation141_spill] sm:$0xff] }
 0x479   : > { %v6657_v6 = vpop.permute.xlu1 %3485  ;;  %v1864_v58 = vadd.f32 %v1848_v10, %v1607_v24  ;;  %v1010_v48 = vmul.f32 %v7475_v49, %v7474_v51  ;;  %v7481_v51 = vld [vmem:[#allocation85_spill] sm:$0xff]  ;;  %v7482_v60 = vld [vmem:[#allocation86_spill] sm:$0xff] }
 0x47a   : > { %v1862_v23 = vadd.f32 %v1846_v47, %v1605_v57  ;;  %v2023_v53 = vadd.f32 %v7478_v33, %v1863_v43  ;;  %v1444_v38 = vadd.f32 %v1428_v61, %v1187_v9  ;;  %v7479_v57 = vld [vmem:[#allocation98_spill] sm:$0xff]  ;;  %v1427_v12 = vmul.f32 %v7482_v60, %v7481_v51  ;;  %v7484_v43 = vld [vmem:[#allocation140_spill] sm:$0xff]  ;;  %v7485_v9 = vld [vmem:[#allocation77_spill] sm:$0xff] }
 0x47b   : > { %v2024_v16 = vadd.f32 %v6420_v5, %v1864_v58  ;;  %v1186_v10 = vadd.f32 %v6365_v40, %v1010_v48  ;;  %v2265_v47 = vmul.f32 %v7480_v39, %v7479_v57  ;;  %v7483_v33 = vld [vmem:[#allocation138_spill] sm:$0xff]  ;;  %v7486_v40 = vld [vmem:[#allocation136_spill] sm:$0xff]  ;;  %v7487_v7 = vld [vmem:[#allocation173_spill] sm:$0xff] }
 0x47c   : > { %v2022_v46 = vadd.f32 %v6354_v8, %v1862_v23  ;;  %v2264_v5 = vmul.f32 %v7484_v43, %v7483_v33  ;;  %v2263_v49 = vmul.f32 %v7486_v40, %v7485_v9  ;;  %v1604_v13 = vadd.f32 %v7487_v7, %v1444_v38  ;;  %v7489_v57 = vld [vmem:[#allocation146_spill] sm:$0xff]  ;;  %v7490_v38 = vld [vmem:[#allocation168_spill] sm:$0xff] }
 0x47d   : > { %v2819_v14 = vpop.permute.xlu1 %2818  ;;  %v2281_v54 = vadd.f32 %v2265_v47, %v2024_v16  ;;  %v1443_v61 = vadd.f32 %v1427_v12, %v1186_v10  ;;  %v2682_v8 = vmul.f32 %v6512_v15, %v6145_v55  ;;  %v7492_v15 = vld [vmem:[#allocation100_spill] sm:$0xff]  ;;  %v7494_v43 = vld [vmem:[#allocation90_spill] sm:$0xff] }
 0x47e   : > { %v2280_v48 = vadd.f32 %v2264_v5, %v2023_v53  ;;  %v2680_v53 = vmul.f32 %v6103_v27, %v6536_v18  ;;  %v7493_v33 = vld [vmem:[#allocation132_spill] sm:$0xff]  ;;  %v7496_v40 = vld [vmem:[#allocation178_spill] sm:$0xff] }
 0x47f   : > { %v2441_v16 = vadd.f32 %v6423_v50, %v2281_v54  ;;  %v7495_v27 = vld [vmem:[#allocation176_spill] sm:$0xff]  ;;  %v3428_v54 = vpop.f32.mrf.mxu1  ;;  %v7497_v7 = vld [vmem:[#allocation182_spill] sm:$0xff] }
 0x480   : > { %v6676_v1 = vpop.permute.xlu0 %3036  ;;  %v2440_v10 = vadd.f32 %v7490_v38, %v2280_v48  ;;  %v7502_v38 = vld [vmem:[#allocation172_spill] sm:$0xff] }
 0x481   : > { %v6680_v31 = vpop.permute.xlu1 %3239  ;;  %v2698_v60 = vadd.f32 %v2682_v8, %v2441_v16  ;;  %v7501_v16 = vld [vmem:[#allocation147_spill] sm:$0xff] }
 0x483   : > { %v2858_v50 = vadd.f32 %v6612_v4, %v2698_v60  ;;  %v7498_v4 = vld [vmem:[#allocation33_spill] sm:$0xff] }
 0x484   : > { %v2807_v24 = vpop.permute.xlu0 %2806 }
 0x485   : > { %v2850_v37 = vadd.f32 %v2807_v24, %v2690_v26  ;;  %v6690_v52 = vpop.permute.xlu1 %3048  ;;  %v2279_v26 = vadd.f32 %v2263_v49, %v2022_v46  ;;  %v7488_v24 = vld [vmem:[#allocation143_spill] sm:$0xff]  ;;  %v7491_v46 = vld [vmem:[#allocation20_spill] sm:$0xff]  ;;  %v3098_v49 = vmul.f32 %v7496_v40, %v6595_v59 }
 0x486   : > { %v1603_v55 = vadd.f32 %v7491_v46, %v1443_v61  ;;  %v3277_v61 = vadd.f32 %v6621_v20, %v6578_v0  ;;  %v7503_v0 = vld [vmem:[#allocation191_spill] sm:$0xff]  ;;  %v7509_v40 = vld [vmem:[#allocation36_spill] sm:$0xff] }
 0x487   : > { %v6699_v58 = vadd.f32 %v3091_v22, %v2850_v37  ;;  %v1845_v22 = vmul.f32 %v7489_v57, %v7488_v24  ;;  %v2681_v37 = vmul.f32 %v6119_v62, %v6546_v28  ;;  %v2439_v51 = vadd.f32 %v7492_v15, %v2279_v26  ;;  %v7499_v57 = vld [vmem:[#allocation62_spill] sm:$0xff] }
 0x488   : > { %v6703_v2 = vpop.permute.xlu0 %3227  ;;  %v1844_v62 = vmul.f32 %v7494_v43, %v7493_v33  ;;  %v7504_v43 = vld [vmem:[#allocation139_spill] sm:$0xff] }
 0x489   : > { %v1861_v47 = vadd.f32 %v1845_v22, %v1604_v13  ;;  %v2697_v28 = vadd.f32 %v2681_v37, %v2440_v10  ;;  %v2696_v5 = vadd.f32 %v2680_v53, %v2439_v51  ;;  %v3099_v13 = vmul.f32 %v6558_v25, %v7497_v7  ;;  %v7500_v37 = vld [vmem:[#allocation145_spill] sm:$0xff] }
 0x48a   : > { %v6708_v23 = vpop.permute.xlu1 %3473  ;;  %v1860_v9 = vadd.f32 %v1844_v62, %v1603_v55  ;;  %v1008_v22 = vmul.f32 %v7499_v57, %v7498_v4  ;;  %v2262_v53 = vmul.f32 %v7501_v16, %v7500_v37  ;;  %v3097_v10 = vmul.f32 %v7502_v38, %v6590_v29  ;;  %v7512_v57 = vld [vmem:[#allocation10_spill] sm:$0xff] }
 0x48b   : > { %v2021_v18 = vadd.f32 %v7495_v27, %v1861_v47  ;;  %v2856_v26 = vadd.f32 %v2819_v14, %v2696_v5  ;;  %v2857_v59 = vadd.f32 %v6570_v45, %v2697_v28  ;;  %v3517_v25 = vmul.f32 %v6606_v35, %v3428_v54  ;;  %v7505_v35 = vld [vmem:[#allocation95_spill] sm:$0xff]  ;;  %v7506_v28 = vld [vmem:[#allocation186_spill] sm:$0xff]  ;;  %v7507_v5 = vld [vmem:[#allocation153_spill] sm:$0xff] }
 0x48c   : > { %v6717_v39 = vpop.permute.xlu0 %3024  ;;  %v3115_v47 = vadd.f32 %v3099_v13, %v2858_v50  ;;  %v2020_v14 = vadd.f32 %v7503_v0, %v1860_v9  ;;  %v2261_v62 = vmul.f32 %v7505_v35, %v7504_v43  ;;  %v1184_v50 = vadd.f32 %v7506_v28, %v1008_v22  ;;  %v7508_v27 = vld [vmem:[#allocation193_spill] sm:$0xff]  ;;  %v7511_v54 = vld [vmem:[#allocation179_spill] sm:$0xff] }
 0x48d   : > { %v2278_v20 = vadd.f32 %v2262_v53, %v2021_v18  ;;  %v3114_v15 = vadd.f32 %v3098_v49, %v2857_v59  ;;  %v3113_v51 = vadd.f32 %v3097_v10, %v2856_v26  ;;  %v2679_v18 = vmul.f32 %v7508_v27, %v7507_v5  ;;  %v7510_v49 = vld [vmem:[#allocation67_spill] sm:$0xff]  ;;  %v7513_v59 = vld [vmem:[#allocation192_spill] sm:$0xff]  ;;  %v7523_v5 = vld [vmem:[#allocation78_spill] sm:$0xff] }
 0x48e   : > { %v6722_v12 = vpop.permute.xlu1 %3477  ;;  %v3275_v60 = vadd.f32 %v6680_v31, %v3115_v47  ;;  %v1425_v31 = vmul.f32 %v7510_v49, %v7509_v40  ;;  %v3515_v7 = vmul.f32 %v6525_v17, %v6657_v6  ;;  %v2678_v22 = vmul.f32 %v6582_v30, %v7512_v57  ;;  %v7514_v10 = vld [vmem:[#allocation187_spill] sm:$0xff]  ;;  %v7515_v47 = vld [vmem:[#allocation181_spill] sm:$0xff]  ;;  %v7516_v30 = vld [vmem:[#allocation38_spill] sm:$0xff] }
 0x48f   : > { %v7524_v27 = vld [vmem:[#allocation97_spill] sm:$0xff]  ;;  %v7527_v49 = vld [vmem:[#allocation40_spill] sm:$0xff] }
 0x490   : > { %v1441_v4 = vadd.f32 %v1425_v31, %v1184_v50 }
 0x491   : > { %v3498_v48 = vpop.permute.xlu0 %3497 }
 0x492   : > { %v3518_v8 = vmul.f32 %v6548_v3, %v3498_v48  ;;  %v2817_v24 = vpop.permute.xlu1 %2816  ;;  %v3276_v3 = vadd.f32 %v6584_v21, %v6561_v63  ;;  %v2277_v48 = vadd.f32 %v2261_v62, %v2020_v14  ;;  %v7518_v14 = vld [vmem:[#allocation175_spill] sm:$0xff]  ;;  %v7522_v62 = vld [vmem:[#allocation188_spill] sm:$0xff] }
 0x494   : > { %v3534_v46 = vadd.f32 %v3518_v8, %v3277_v61  ;;  %v3533_v9 = vadd.f32 %v3517_v25, %v3276_v3  ;;  %v3273_v61 = vadd.f32 %v6614_v32, %v3113_v51  ;;  %v2437_v38 = vadd.f32 %v7513_v59, %v2277_v48  ;;  %v7519_v51 = vld [vmem:[#allocation73_spill] sm:$0xff] }
 0x495   : > { %v3490_v55 = vpop.permute.xlu0 %3489  ;;  %v1601_v32 = vadd.f32 %v7514_v10, %v1441_v4  ;;  %v3095_v3 = vmul.f32 %v6632_v11, %v7518_v14  ;;  %v7525_v11 = vld [vmem:[#allocation118_spill] sm:$0xff]  ;;  %v7531_v4 = vld [vmem:[#allocation156_spill] sm:$0xff] }
 0x496   : > { %v3558_v45 = vpack.c.bf16 %v6572_v56, %v3534_v46  ;;  %v3516_v33 = vmul.f32 %v3490_v55, %v6554_v44  ;;  %v3238_v29 = vpop.permute.xlu1 %3237  ;;  %v2438_v56 = vadd.f32 %v7511_v54, %v2278_v20  ;;  %v3096_v46 = vmul.f32 %v6647_v41, %v7515_v47  ;;  %v7517_v20 = vld [vmem:[#allocation116_spill] sm:$0xff] }
 0x497   : > { %v3274_v21 = vadd.f32 %v3238_v29, %v3114_v15  ;;  %v1842_v0 = vmul.f32 %v7517_v20, %v7516_v30  ;;  %v7521_v29 = vld [vmem:[#allocation154_spill] sm:$0xff]  ;;  %v7538_v47 = vld [vmem:[#allocation52_spill] sm:$0xff]  ;;  %v7539_v20 = vld [vmem:[#allocation49_spill] sm:$0xff] }
 0x498   : > { %v3532_v63 = vadd.f32 %v3516_v33, %v3275_v60  ;;  %4497 = vmatpush3.bf16.msra.mxu0 %v3558_v45  ;;  %v2695_v37 = vadd.f32 %v2679_v18, %v2438_v56  ;;  %v7520_v60 = vld [vmem:[#allocation92_spill] sm:$0xff]  ;;  %v1424_v18 = vmul.f32 %v7524_v27, %v7523_v5 }
 0x499   : > { %v3482_v44 = vpop.permute.xlu0 %3481  ;;  %4498 = vmatprep.subr.bf16.mxu0 %v7439_v19  ;;  %v3531_v16 = vadd.f32 %v3515_v7, %v3274_v21  ;;  %v1007_v45 = vmul.f32 %v7520_v60, %v7519_v51  ;;  %v7542_v60 = vld [vmem:[#allocation35_spill] sm:$0xff] }
 0x49a   : > { %v3557_v13 = vpack.c.bf16 %v3533_v9, %v3532_v63  ;;  %v3514_v26 = vmul.f32 %v6507_v42, %v3482_v44  ;;  %v6762_v8 = vpop.permute.xlu1 %3044  ;;  %v2855_v17 = vadd.f32 %v2817_v24, %v2695_v37  ;;  %v2694_v42 = vadd.f32 %v2678_v22, %v2437_v38  ;;  %v7526_v63 = vld [vmem:[#allocation91_spill] sm:$0xff]  ;;  %v7534_v37 = vld [vmem:[#allocation101_spill] sm:$0xff] }
 0x49b   : > { %v1858_v24 = vadd.f32 %v1842_v0, %v1601_v32  ;;  %v1183_v43 = vadd.f32 %v7521_v29, %v1007_v45  ;;  %v3512_v9 = vmul.f32 %v6708_v23, %v7525_v11  ;;  %v3513_v21 = vmul.f32 %v6722_v12, %v7526_v63  ;;  %v7532_v23 = vld [vmem:[#allocation189_spill] sm:$0xff]  ;;  %v7533_v12 = vld [vmem:[#allocation126_spill] sm:$0xff]  ;;  %v7543_v45 = vld [vmem:[#allocation60_spill] sm:$0xff] }
 0x49c   : > { %v3530_v53 = vadd.f32 %v3514_v26, %v3273_v61  ;;  %4499 = vmatpush3.bf16.msra.mxu0 %v3557_v13  ;;  %v3112_v55 = vadd.f32 %v3096_v46, %v2855_v17  ;;  %v2854_v33 = vadd.f32 %v6603_v36, %v2694_v42  ;;  %v7528_v36 = vld [vmem:[#allocation119_spill] sm:$0xff]  ;;  %v7529_v13 = vld [vmem:[#allocation158_spill] sm:$0xff]  ;;  %v7530_v61 = vld [vmem:[#allocation149_spill] sm:$0xff] }
 0x49d   : > { %4500 = vmatprep.subr.bf16.mxu0 %v7439_v19  ;;  %v2018_v28 = vadd.f32 %v7522_v62, %v1858_v24  ;;  %v2259_v31 = vmul.f32 %v7528_v36, %v7527_v49  ;;  %v1440_v54 = vadd.f32 %v1424_v18, %v1183_v43  ;;  %v2676_v26 = vmul.f32 %v7530_v61, %v7529_v13  ;;  %v3466_v59 = vpop.permute.xlu0 %3465  ;;  %v7535_v17 = vld [vmem:[#allocation32_spill] sm:$0xff]  ;;  %v7537_v42 = vld [vmem:[#allocation15_spill] sm:$0xff]  ;;  %v7549_v18 = vld [vmem:[#allocation54_spill] sm:$0xff] }
 0x49e   : > { %v3556_v6 = vpack.c.bf16 %v3531_v16, %v3530_v53  ;;  %v3272_v41 = vadd.f32 %v6663_v34, %v3112_v55  ;;  %v3111_v35 = vadd.f32 %v3095_v3, %v2854_v33  ;;  %v1841_v16 = vmul.f32 %v7534_v37, %v7533_v12  ;;  %v7540_v3 = vld [vmem:[#allocation171_spill] sm:$0xff]  ;;  %v7545_v43 = vld [vmem:[#allocation44_spill] sm:$0xff]  ;;  %v7553_v49 = vld [vmem:[#allocation106_spill] sm:$0xff] }
 0x49f   : > { %v6769_v25 = vpop.permute.xlu1 %3469  ;;  %v2275_v48 = vadd.f32 %v2259_v31, %v2018_v28  ;;  %v1600_v57 = vadd.f32 %v7531_v4, %v1440_v54  ;;  %v1004_v46 = vmul.f32 %v7538_v47, %v7537_v42  ;;  %v7541_v24 = vld [vmem:[#allocation163_spill] sm:$0xff]  ;;  %v1422_v33 = vmul.f32 %v7543_v45, %v7542_v60  ;;  %v7547_v28 = vld [vmem:[#allocation17_spill] sm:$0xff]  ;;  %v7550_v11 = vld [vmem:[#allocation16_spill] sm:$0xff] }
 0x4a0   : > { %4501 = vmatpush3.bf16.msra.mxu0 %v3556_v6  ;;  %v3529_v34 = vadd.f32 %v3513_v21, %v3272_v41  ;;  %v7536_v6 = vld [vmem:[#allocation56_spill] sm:$0xff]  ;;  %v3093_v51 = vmul.f32 %v7541_v24, %v6690_v52  ;;  %v7544_v29 = vld [vmem:[#allocation59_spill] sm:$0xff]  ;;  %v7556_v13 = vld [vmem:[#allocation14_spill] sm:$0xff] }
 0x4a1   : > { %4502 = vmatprep.subr.bf16.mxu0 %v7439_v19  ;;  %v2435_v22 = vadd.f32 %v7532_v23, %v2275_v48  ;;  %v1005_v10 = vmul.f32 %v7536_v6, %v7535_v17  ;;  %v1857_v32 = vadd.f32 %v1841_v16, %v1600_v57  ;;  %v1180_v55 = vadd.f32 %v7540_v3, %v1004_v46  ;;  %v6820_v5 = vpop.permute.xlu0 %3449  ;;  %v7551_v63 = vld [vmem:[#allocation127_spill] sm:$0xff]  ;;  %v7552_v21 = vld [vmem:[#allocation104_spill] sm:$0xff]  ;;  %v7557_v4 = vld [vmem:[#allocation58_spill] sm:$0xff] }
 0x4a2   : > { %v1003_v41 = vmul.f32 %v7545_v43, %v7544_v29  ;;  %v2258_v52 = vmul.f32 %v7552_v21, %v7551_v63  ;;  %v7558_v57 = vld [vmem:[#allocation25_spill] sm:$0xff]  ;;  %v7561_v6 = vld [vmem:[#allocation196_spill] sm:$0xff]  ;;  %v7563_v46 = vld [vmem:[#allocation123_spill] sm:$0xff] }
 0x4a3   : > { %v2811_v15 = vpop.permute.xlu1 %2810  ;;  %v2692_v38 = vadd.f32 %v2676_v26, %v2435_v22  ;;  %v1181_v0 = vadd.f32 %v7539_v20, %v1005_v10  ;;  %v1419_v23 = vmul.f32 %v7558_v57, %v7557_v4  ;;  %v7559_v22 = vld [vmem:[#allocation103_spill] sm:$0xff]  ;;  %v3510_v10 = vmul.f32 %v7561_v6, %v3466_v59  ;;  %v7564_v20 = vld [vmem:[#allocation161_spill] sm:$0xff]  ;;  %v7565_v3 = vld [vmem:[#allocation18_spill] sm:$0xff] }
 0x4a4   : > { %v1179_v36 = vadd.f32 %v7553_v49, %v1003_v41  ;;  %v7568_v60 = vld [vmem:[#allocation110_spill] sm:$0xff]  ;;  %v7569_v43 = vld [vmem:[#allocation13_spill] sm:$0xff]  ;;  %v7570_v41 = vld [vmem:[#allocation108_spill] sm:$0xff] }
 0x4a5   : > { %v2852_v30 = vadd.f32 %v2811_v15, %v2692_v38  ;;  %v7560_v38 = vld [vmem:[#allocation174_spill] sm:$0xff]  ;;  %v2805_v47 = vpop.permute.xlu0 %2804  ;;  %v2675_v59 = vmul.f32 %v7570_v41, %v7569_v43  ;;  %v7574_v63 = vld [vmem:[#allocation29_spill] sm:$0xff] }
 0x4a6   : > { %v7576_v49 = vld [vmem:[#allocation26_spill] sm:$0xff]  ;;  %v7579_v4 = vld [vmem:[#allocation169_spill] sm:$0xff] }
 0x4a7   : > { %v3232_v50 = vpop.permute.xlu1 %3231  ;;  %v3109_v27 = vadd.f32 %v3093_v51, %v2852_v30  ;;  %v7567_v51 = vld [vmem:[#allocation37_spill] sm:$0xff]  ;;  %v3092_v57 = vmul.f32 %v6762_v8, %v7579_v4  ;;  %v7584_v6 = vld [vmem:[#allocation34_spill] sm:$0xff]  ;;  %v7589_v8 = vld [vmem:[#allocation28_spill] sm:$0xff] }
 0x4a8   : > { %v3271_v40 = vadd.f32 %v3232_v50, %v3111_v35  ;;  %v7546_v35 = vld [vmem:[#allocation159_spill] sm:$0xff]  ;;  %v1839_v45 = vmul.f32 %v7568_v60, %v7567_v51  ;;  %v7590_v60 = vld [vmem:[#allocation57_spill] sm:$0xff] }
 0x4a9   : > { %v2017_v62 = vadd.f32 %v7546_v35, %v1857_v32  ;;  %v7548_v50 = vld [vmem:[#allocation55_spill] sm:$0xff]  ;;  %v3269_v26 = vadd.f32 %v6703_v2, %v3109_v27  ;;  %v7562_v32 = vld [vmem:[#allocation53_spill] sm:$0xff]  ;;  %v7572_v27 = vld [vmem:[#allocation184_spill] sm:$0xff] }
 0x4aa   : > { %v3528_v56 = vadd.f32 %v3512_v9, %v3271_v40  ;;  %v1421_v15 = vmul.f32 %v7548_v50, %v7547_v28  ;;  %v1002_v9 = vmul.f32 %v7550_v11, %v7549_v18  ;;  %v1438_v40 = vadd.f32 %v1422_v33, %v1181_v0 }
 0x4ab   : > { %v6792_v44 = vpop.permute.xlu1 %3032  ;;  %v3511_v42 = vmul.f32 %v7562_v32, %v6769_v25  ;;  %v3526_v33 = vadd.f32 %v3510_v10, %v3269_v26  ;;  %v7571_v25 = vld [vmem:[#allocation69_spill] sm:$0xff] }
 0x4ac   : > { %v3555_v7 = vpack.c.bf16 %v3529_v34, %v3528_v56  ;;  %v1437_v54 = vadd.f32 %v1421_v15, %v1180_v55  ;;  %v7554_v56 = vld [vmem:[#allocation63_spill] sm:$0xff]  ;;  %v1178_v61 = vadd.f32 %v7556_v13, %v1002_v9  ;;  %v1598_v12 = vadd.f32 %v7559_v22, %v1438_v40  ;;  %v7566_v55 = vld [vmem:[#allocation105_spill] sm:$0xff] }
 0x4ad   : > { %v7555_v34 = vld [vmem:[#allocation27_spill] sm:$0xff]  ;;  %v1838_v24 = vmul.f32 %v7566_v55, %v7565_v3  ;;  %v7573_v9 = vld [vmem:[#allocation113_spill] sm:$0xff] }
 0x4ae   : > { %4503 = vmatpush3.bf16.msra.mxu0 %v3555_v7  ;;  %v1420_v48 = vmul.f32 %v7555_v34, %v7554_v56  ;;  %v2274_v7 = vadd.f32 %v2258_v52, %v2017_v62  ;;  %v1597_v17 = vadd.f32 %v7560_v38, %v1437_v54  ;;  %v1435_v2 = vadd.f32 %v1419_v23, %v1178_v61  ;;  %v3226_v52 = vpop.permute.xlu0 %3225  ;;  %v7575_v40 = vld [vmem:[#allocation107_spill] sm:$0xff]  ;;  %v7577_v56 = vld [vmem:[#allocation50_spill] sm:$0xff]  ;;  %v7581_v22 = vld [vmem:[#allocation109_spill] sm:$0xff] }
 0x4af   : > { %4504 = vmatprep.subr.bf16.mxu0 %v7439_v19  ;;  %v1855_v62 = vadd.f32 %v1839_v45, %v1598_v12  ;;  %v1837_v21 = vmul.f32 %v7574_v63, %v7573_v9  ;;  %v7580_v23 = vld [vmem:[#allocation22_spill] sm:$0xff]  ;;  %v7588_v55 = vld [vmem:[#allocation111_spill] sm:$0xff] }
 0x4b0   : > { %v6801_v53 = vpop.permute.xlu1 %3457  ;;  %v1436_v37 = vadd.f32 %v1420_v48, %v1179_v36  ;;  %v2434_v0 = vadd.f32 %v7564_v20, %v2274_v7  ;;  %v1854_v50 = vadd.f32 %v1838_v24, %v1597_v17  ;;  %v1595_v18 = vadd.f32 %v7572_v27, %v1435_v2  ;;  %v7578_v7 = vld [vmem:[#allocation177_spill] sm:$0xff]  ;;  %v7587_v2 = vld [vmem:[#allocation31_spill] sm:$0xff] }
 0x4b1   : > { %v1836_v36 = vmul.f32 %v7576_v49, %v7575_v40  ;;  %v2015_v34 = vadd.f32 %v7577_v56, %v1855_v62  ;;  %v2255_v12 = vmul.f32 %v7581_v22, %v7580_v23  ;;  %v2253_v24 = vmul.f32 %v7589_v8, %v7588_v55  ;;  %v7592_v62 = vld [vmem:[#allocation197_spill] sm:$0xff]  ;;  %v7596_v63 = vld [vmem:[#allocation23_spill] sm:$0xff]  ;;  %v7599_v49 = vld [vmem:[#allocation190_spill] sm:$0xff] }
 0x4b2   : > { %v1596_v28 = vadd.f32 %v7571_v25, %v1436_v37  ;;  %v2691_v11 = vadd.f32 %v2675_v59, %v2434_v0  ;;  %v2014_v13 = vadd.f32 %v7578_v7, %v1854_v50  ;;  %v7582_v37 = vld [vmem:[#allocation39_spill] sm:$0xff]  ;;  %v7586_v0 = vld [vmem:[#allocation114_spill] sm:$0xff]  ;;  %v3508_v25 = vmul.f32 %v6801_v53, %v7592_v62  ;;  %v7594_v27 = vld [vmem:[#allocation41_spill] sm:$0xff] }
 0x4b3   : > { %v1852_v26 = vadd.f32 %v1836_v36, %v1595_v18  ;;  %v2254_v3 = vmul.f32 %v7587_v2, %v7586_v0  ;;  %v7595_v18 = vld [vmem:[#allocation61_spill] sm:$0xff]  ;;  %v7600_v53 = vld [vmem:[#allocation24_spill] sm:$0xff]  ;;  %v7603_v23 = vld [vmem:[#allocation30_spill] sm:$0xff] }
 0x4b4   : > { %v6808_v14 = vpop.permute.xlu1 %3461  ;;  %v1853_v48 = vadd.f32 %v1837_v21, %v1596_v28  ;;  %v2271_v32 = vadd.f32 %v2255_v12, %v2014_v13  ;;  %v7593_v28 = vld [vmem:[#allocation198_spill] sm:$0xff]  ;;  %v7597_v21 = vld [vmem:[#allocation51_spill] sm:$0xff]  ;;  %v7598_v40 = vld [vmem:[#allocation65_spill] sm:$0xff] }
 0x4b5   : > { %v3509_v50 = vmul.f32 %v6808_v14, %v7593_v28  ;;  %v2671_v36 = vmul.f32 %v7599_v49, %v7598_v40  ;;  %v7601_v13 = vld [vmem:[#allocation9_spill] sm:$0xff] }
 0x4b6   : > { %v2013_v10 = vadd.f32 %v7584_v6, %v1853_v48 }
 0x4b8   : > { %v2809_v31 = vpop.permute.xlu1 %2808 }
 0x4b9   : > { %v2851_v54 = vadd.f32 %v2809_v31, %v2691_v11  ;;  %v2673_v11 = vmul.f32 %v7595_v18, %v7594_v27  ;;  %v7612_v27 = vld [vmem:[#allocation194_spill] sm:$0xff] }
 0x4bb   : > { %v3108_v17 = vadd.f32 %v3092_v57, %v2851_v54  ;;  %v7602_v57 = vld [vmem:[#allocation102_spill] sm:$0xff] }
 0x4bc   : > { %v3230_v16 = vpop.permute.xlu1 %3229  ;;  %v2670_v22 = vmul.f32 %v7603_v23, %v7602_v57 }
 0x4bd   : > { %v3270_v30 = vadd.f32 %v3230_v16, %v7563_v46  ;;  %v7583_v16 = vld [vmem:[#allocation112_spill] sm:$0xff]  ;;  %v3268_v51 = vadd.f32 %v3226_v52, %v3108_v17  ;;  %v2672_v52 = vmul.f32 %v7597_v21, %v7596_v63 }
 0x4be   : > { %v2256_v38 = vmul.f32 %v7583_v16, %v7582_v37  ;;  %v7604_v37 = vld [vmem:[#allocation162_spill] sm:$0xff]  ;;  %v7605_v17 = vld [vmem:[#allocation160_spill] sm:$0xff] }
 0x4bf   : > { %v3527_v29 = vadd.f32 %v3511_v42, %v3270_v30  ;;  %v3446_v42 = vpop.permute.xlu0 %3445  ;;  %v7585_v30 = vld [vmem:[#allocation185_spill] sm:$0xff]  ;;  %v3525_v56 = vadd.f32 %v3509_v50, %v3268_v51  ;;  %v7611_v50 = vld [vmem:[#allocation195_spill] sm:$0xff] }
 0x4c0   : > { %v3029_v35 = vpop.permute.xlu1 %3028  ;;  %v2272_v31 = vadd.f32 %v2256_v38, %v2015_v34  ;;  %v2012_v20 = vadd.f32 %v7585_v30, %v1852_v26 }
 0x4c1   : > { %v3554_v15 = vpack.c.bf16 %v3527_v29, %v3526_v33  ;;  %v2270_v33 = vadd.f32 %v2254_v3, %v2013_v10  ;;  %v7591_v29 = vld [vmem:[#allocation180_spill] sm:$0xff]  ;;  %v3088_v16 = vmul.f32 %v3029_v35, %v7604_v37 }
 0x4c2   : > { %v2432_v45 = vadd.f32 %v7590_v60, %v2272_v31  ;;  %v2431_v43 = vadd.f32 %v7591_v29, %v2271_v32  ;;  %v2269_v59 = vadd.f32 %v2253_v24, %v2012_v20  ;;  %v3090_v31 = vmul.f32 %v7605_v17, %v6676_v1  ;;  %v7606_v32 = vld [vmem:[#allocation155_spill] sm:$0xff]  ;;  %v7607_v3 = vld [vmem:[#allocation148_spill] sm:$0xff]  ;;  %v7609_v1 = vld [vmem:[#allocation157_spill] sm:$0xff] }
 0x4c3   : > { %4505 = vmatpush3.bf16.msra.mxu0 %v3554_v15  ;;  %v2801_v9 = vpop.permute.xlu0 %2800  ;;  %v2430_v7 = vadd.f32 %v7600_v53, %v2270_v33  ;;  %v3089_v30 = vmul.f32 %v7606_v32, %v6792_v44  ;;  %v7608_v24 = vlaneseq  ;;  %v3087_v60 = vmul.f32 %v6717_v39, %v7609_v1  ;;  %v4089_v39 = vld [vmem:[%s452_s17] ss:$0 sm:$0xff] }
 0x4c4   : > { %4506 = vmatprep.subr.bf16.mxu0 %v7439_v19  ;;  %v2689_v34 = vadd.f32 %v2673_v11, %v2432_v45  ;;  %v2429_v14 = vadd.f32 %v7601_v13, %v2269_v59  ;;  %v2688_v26 = vadd.f32 %v2672_v52, %v2431_v43  ;;  %v7610_v45 = vld [vmem:[#allocation115_spill] sm:$0xff] }
 0x4c5   : > { %v3454_v61 = vpop.permute.xlu1 %3453  ;;  %v2687_v12 = vadd.f32 %v2671_v36, %v2430_v7  ;;  %v6892_v51 = vshrl.u32 %v7608_v24, 7  ;;  %v3506_v33 = vmul.f32 %v7610_v45, %v6820_v5  ;;  %v3549_v52 = vld [vmem:[#allocation2] sm:$0xff] }
 0x4c6   : > { %v2849_v4 = vadd.f32 %v2805_v47, %v2689_v34  ;;  %v2686_v47 = vadd.f32 %v2670_v22, %v2429_v14  ;;  %v3507_v55 = vmul.f32 %v7607_v3, %v3454_v61 }
 0x4c7   : > { %v3222_v6 = vpop.permute.xlu0 %3221  ;;  %v2847_v20 = vadd.f32 %v2801_v9, %v2687_v12  ;;  %v3539_v28 = vadd.s32 8, %v6892_v51  ;;  %vm3544_vm5 = vcmp.eq.s32.totalorder %v6892_v51, %v4089_v39 }
 0x4c8   : > { %v3106_v0 = vadd.f32 %v3090_v31, %v2849_v4 }
 0x4c9   : > { %v2803_v46 = vpop.permute.xlu1 %2802  ;;  %v3104_v2 = vadd.f32 %v3088_v16, %v2847_v20  ;;  %vm3545_vm6 = vcmp.eq.s32.totalorder %v3539_v28, %v4089_v39 }
 0x4ca   : > { %v2848_v38 = vadd.f32 %v2803_v46, %v2688_v26  ;;  %v3266_v44 = vadd.f32 %v3222_v6, %v3106_v0  ;;  %vm4090_vm8 = vmpackc.low %vm3545_vm6, %vm3544_vm5 }
 0x4cb   : > { %v3218_v43 = vpop.permute.xlu0 %3217 }
 0x4cc   : > { %v3105_v35 = vadd.f32 %v3089_v30, %v2848_v38  ;;  %v3523_v59 = vadd.f32 %v3507_v55, %v3266_v44 }
 0x4cd   : > { %v3224_v41 = vpop.permute.xlu1 %3223 }
 0x4ce   : > { %v3267_v15 = vadd.f32 %v3224_v41, %v6699_v58  ;;  %v3264_v41 = vadd.f32 %v3218_v43, %v3104_v2 }
 0x4d0   : > { %v3524_v54 = vadd.f32 %v3508_v25, %v3267_v15  ;;  %v3505_v15 = vmul.f32 %v3446_v42, %v7611_v50  ;;  %v4939_v42 = vmov 1.0|1.0  }
 0x4d1   : > { %v3442_v48 = vpop.permute.xlu1 %3441 }
 0x4d2   : > { %v3553_v58 = vpack.c.bf16 %v3525_v56, %v3524_v54  ;;  %v3504_v18 = vmul.f32 %v3442_v48, %v7612_v27  ;;  %v3521_v63 = vadd.f32 %v3505_v15, %v3264_v41  ;;  %v3550_v54 = vld [vmem:[#allocation2 + $0x8] sm:$0xf] }
 0x4d4   : > { %4507 = vmatpush3.bf16.msra.mxu0 %v3553_v58 }
 0x4d5   : > { %v2799_v10 = vpop.permute.xlu1 %2798  ;;  %4508 = vmatprep.subr.bf16.mxu0 %v7439_v19 }
 0x4d6   : > { %v2846_v8 = vadd.f32 %v2799_v10, %v2686_v47 }
 0x4d8   : > { %v3103_v61 = vadd.f32 %v3087_v60, %v2846_v8 }
 0x4d9   : > { %v3220_v46 = vpop.permute.xlu1 %3219 }
 0x4da   : > { %v3265_v29 = vadd.f32 %v3220_v46, %v3105_v35 }
 0x4dc   : > { %v3522_v62 = vadd.f32 %v3506_v33, %v3265_v29 }
 0x4dd   : > { %v3216_v25 = vpop.permute.xlu1 %3215 }
 0x4de   : > { %v3552_v11 = vpack.c.bf16 %v3523_v59, %v3522_v62  ;;  %v3263_v9 = vadd.f32 %v3216_v25, %v3103_v61 }
 0x4e0   : > { %v3520_v5 = vadd.f32 %v3504_v18, %v3263_v9  ;;  %4509 = vmatpush3.bf16.msra.mxu0 %v3552_v11 }
 0x4e1   : > { %4510 = vmatprep.subr.bf16.mxu0 %v7439_v19 }
 0x4e2   : > { %v3551_v21 = vpack.c.bf16 %v3521_v63, %v3520_v5 }
 0x4e4   : > { %4511 = vmatpush3.bf16.msra.mxu0 %v3551_v21 }
 0x4e7   : > { %4513 = vmatmul.mubr.msk.bf16.vlgmr.msra.gmra.mxu0 %vm4090_vm8, %v4939_v42 }
 0x5a7   : > { %v3593_v40 = vpop.f32.mrf.mxu0 }
 0x5a8   : > { %v3600_v49 = vadd.f32 %v3593_v40, %v3549_v52 }
 0x5a9   : > { %v4514_v36 = vpop.f32.mrf.mxu0 }
 0x5aa   : > { %3603 = vst.msk [vmem:[#allocation2] sm:$0xff] %vm3602_vm9, %v3600_v49  ;;  %3609 = sbr.rel (%p4092_p3) target bundleno = 2231 (0x8b7), region = 80 }
 0x5ab   : > { %v3596_v56 = vpop.f32.mrf.mxu0 }
 0x5ac   : > { %v3601_v34 = vadd.f32 %v3596_v56, %v3550_v54 }
 0x5ad   : > { %v4515_v19 = vpop.f32.mrf.mxu0 }
 0x5ae   : > { %3605 = vst.msk [vmem:[#allocation2 + $0x8] sm:$0xf] %vm3604_vm10, %v3601_v34 }
 0x5af   : > { %v3629_v48 = vld [vmem:[%s6987_s5 + $0x8] sm:$0x1f]  ;;  %vm3637_vm11 = vcmask 1044480   ;;  %v3628_v53 = vld [vmem:[%s6987_s5] sm:$0xff]  ;;  %vm3630_vm12 = vcmask 105472   ;;  %v4940_v26 = vmov 0  }
 0x5b0   : > { %v3610_v7 = vld [vmem:[%s6985_s3] sm:$0xff]  ;;  %4516 = vmatprep.subr.msk.mxu1 %vm3637_vm11, %v3629_v48  ;;  %v3615_v13 = vld [vmem:[%s6989_s7 + $0x8] sm:$0xf]  ;;  %4845 = vset.pattern.permute.xlu0 %v4940_v26  ;;  %v4941_v4 = vmov 0.0   ;;  %vm4942_vm13 = vmmov 0   ;;  %v3837_v23 = vld [vmem:[%s6992_s10 + $0x38] sm:$0xff] }
 0x5b1   : > { %4520 = vmatprep.mubr.msk.f32.mxu1 %vm3630_vm12, %v3610_v7  ;;  %4517 = vmatpush3.msk.msra.mxu1 %vm3637_vm11, %v3629_v48  ;;  %v3611_v14 = vld [vmem:[%s6985_s3 + $0x8] sm:$0xf]  ;;  %v3614_v58 = vld [vmem:[%s6989_s7] sm:$0xff]  ;;  %v3836_v22 = vld [vmem:[%s6992_s10 + $0x30] sm:$0xff]  ;;  %vm3749_vm14 = vcmask 1043456   ;;  %vm3919_vm2 = vcmask 17408  }
 0x5b2   : > { %4518 = vmatprep.subr.mxu1 %v3628_v53  ;;  %3623 = vperm.xlu0 %4845, %v3615_v13   ;;  %v3823_v57 = vld [vmem:[%s6991_s9] sm:$0x3]  ;;  %v3835_v12 = vld [vmem:[%s6992_s10 + $0x28] sm:$0xff]  ;;  %v3833_v16 = vld [vmem:[%s6992_s10 + $0x18] sm:$0xff] }
 0x5b3   : > { %4519 = vmatpush3.msra.mxu1 %v3628_v53  ;;  %4846 = vset.pattern.permute.xlu1 %v4940_v26  ;;  %v3834_v37 = vld [vmem:[%s6992_s10 + $0x20] sm:$0xff]  ;;  %v3832_v38 = vld [vmem:[%s6992_s10 + $0x10] sm:$0xff]  ;;  %v3831_v17 = vld [vmem:[%s6992_s10 + $0x8] sm:$0xff] }
 0x5b4   : > { %4521 = vmatmul.mubr.msk.f32.vlgmr.msra.gmra.mxu1 %vm3630_vm12, %v3611_v14  ;;  %4523 = vmatprep.subr.mxu1 %v4941_v4  ;;  %v3612_v32 = vld [vmem:[#allocation2] sm:$0xff] }
 0x5b5   : > { %4530 = vmatprep.subr.mxu0 %v4941_v4  ;;  %4527 = vmatprep.mubr.msk.f32.mxu1 %vm4942_vm13, %v4941_v4  ;;  %v3613_v6 = vld [vmem:[#allocation2 + $0x8] sm:$0xf]  ;;  %v4096_v47 = vld [vmem:[%s6988_s6] ss:$0 sm:$0xff] }
 0x5b6   : > { %3618 = vperm.xlu0 %4845, %v3614_v58   ;;  %4546 = vmatprep.mubr.msk.f32.mxu0 %vm4942_vm13, %v4941_v4  ;;  %v4099_v45 = vld [vmem:[%s6990_s8] ss:$0 sm:$0xff] }
 0x5b7   : > { %3826 = vperm.xlu1 %4846, %v3823_v57   ;;  %4531 = vmatpush3.msra.mxu0 %v3837_v23  ;;  %vm3744_vm15 = vcmp.eq.s32.totalorder %v6892_v51, %v4099_v45  ;;  %v3830_v61 = vld [vmem:[%s6992_s10] sm:$0xff] }
 0x5b8   : > { %4532 = vmatprep.subr.mxu0 %v4941_v4  ;;  %v3745_v59 = vsel %vm3744_vm15, 1.0, %v4941_v4  ;;  %v4102_v15 = vld [vmem:[%s6993_s11] ss:$0 sm:$0xff] }
 0x5b9   : > { %4533 = vmatpush3.msra.mxu0 %v3836_v22 }
 0x5ba   : > { %4534 = vmatprep.subr.mxu0 %v4941_v4 }
 0x5bb   : > { %4535 = vmatpush3.msra.mxu0 %v3835_v12 }
 0x5bc   : > { %4536 = vmatprep.subr.mxu0 %v4941_v4 }
 0x5bd   : > { %4537 = vmatpush3.msra.mxu0 %v3834_v37 }
 0x5be   : > { %4538 = vmatprep.subr.mxu0 %v4941_v4 }
 0x5bf   : > { %4539 = vmatpush3.msra.mxu0 %v3833_v16 }
 0x5c0   : > { %4540 = vmatprep.subr.mxu0 %v4941_v4 }
 0x5c1   : > { %4541 = vmatpush3.msra.mxu0 %v3832_v38 }
 0x5c2   : > { %4542 = vmatprep.subr.mxu0 %v4941_v4 }
 0x5c3   : > { %4543 = vmatpush3.msra.mxu0 %v3831_v17 }
 0x5c4   : > { %4544 = vmatprep.subr.mxu0 %v4941_v4 }
 0x5c5   : > { %4545 = vmatpush3.msra.mxu0 %v3830_v61 }
 0x62d   : > { %v3624_v31 = vpop.permute.xlu0 %3623 }
 0x62e   : > { %v3627_v30 = vmul.f32 %v3624_v31, %v3613_v6 }
 0x631   : > { %v3619_v10 = vpop.permute.xlu0 %3618 }
 0x632   : > { %v3626_v0 = vmul.f32 %v3619_v10, %v3612_v32  ;;  %v3827_v25 = vpop.permute.xlu1 %3826 }
 0x674   : > { %v4522_v20 = vpop.f32.mrf.mxu1 }
 0x675   : > { %v3717_v2 = vadd.f32 %v4522_v20, %v3627_v30 }
 0x676   : > { %v3707_v3 = vpop.f32.mrf.mxu1 }
 0x677   : > { %v3726_v55 = vadd.f32 %v4096_v47, %v3717_v2  ;;  %v3716_v8 = vadd.f32 %v3707_v3, %v3626_v0 }
 0x679   : > { %v3730_v35 = vmin.f32 %v3726_v55, 0.0  ;;  %v3725_v46 = vadd.f32 %v4096_v47, %v3716_v8  ;;  %vm3728_vm0 = vcmp.gt.f32.partialorder %v3726_v55, 0.0 }
 0x67b   : > { %v3733_v24 = vmul.f32 1.442695, %v3730_v35  ;;  %v3729_v1 = vmin.f32 %v3725_v46, 0.0  ;;  %vm3727_vm1 = vcmp.gt.f32.partialorder %v3725_v46, 0.0 }
 0x67d   : > { %4847 = vpow2.f32 %v3733_v24  ;;  %v3731_v60 = vmul.f32 1.442695, %v3729_v1 }
 0x67f   : > { %4849 = vpow2.f32 %v3731_v60 }
 0x68a   : > { %v4848_v33 = vpop.eup %4847 }
 0x68b   : > { %v4098_v44 = vadd.f32 -1.0, %v4848_v33 }
 0x68c   : > { %v4850_v29 = vpop.eup %4849 }
 0x68d   : > { %v3738_v43 = vsel %vm3728_vm0, %v3726_v55, %v4098_v44  ;;  %v4097_v41 = vadd.f32 -1.0, %v4850_v29 }
 0x68e   : > { %4524 = vmatpush3.msk.msra.mxu1 %vm3749_vm14, %v3738_v43 }
 0x68f   : > { %4525 = vmatprep.subr.mxu1 %v4941_v4  ;;  %v3737_v62 = vsel %vm3727_vm1, %v3725_v46, %v4097_v41 }
 0x690   : > { %4526 = vmatpush3.msra.mxu1 %v3737_v62 }
 0x691   : > { %4528 = vmatmul.mubr.msk.f32.vlgmr.msra.gmra.mxu1 %vm571_vm7, %v3745_v59 }
 0x751   : > { %v3819_v28 = vpop.f32.mrf.mxu1 }
 0x752   : > { %v3829_v51 = vmul.f32 %v3827_v25, %v3819_v28 }
 0x753   : > { %v4529_v50 = vpop.f32.mrf.mxu1 }
 0x754   : > { %4547 = vmatmul.mubr.msk.f32.vlgmr.msra.gmra.mxu0 %vm3602_vm9, %v3829_v51 }
 0x814   : > { %v3914_v27 = vpop.f32.mrf.mxu0 }
 0x815   : > { %v3915_v18 = vadd.f32 %v4102_v15, %v3914_v27 }
 0x816   : > { %v4548_v11 = vpop.f32.mrf.mxu0 }
 0x817   : > { %v3918_v9 = vmul.f32 %v3915_v18, %v3915_v18 }
 0x819   : > { %v3920_v39 = vsel %vm3919_vm2, %v3918_v9, 0.0 }
 0x81a   : > { %3921 = vadd.xlane.f32.xlu1 %v3920_v39 }
 0x8a3   : > { %v3922_v5 = vpop.xlane.xlu1 %3921 }
 0x8a4   : > { %v3923_v63 = vmax.f32 %v3922_v5, 1e-24 }
 0x8a6   : > { %4851 = vrsqrt.f32 %v3923_v63 }
 0x8b3   : > { %v4852_v21 = vpop.eup %4851 }
 0x8b4   : > { %v3925_v42 = vmul.f32 %v4852_v21, %v3915_v18 }
 0x8b6   : > { %3926 = vst.msk [vmem:[#allocation6] sm:$0x3] %vm3919_vm2, %v3925_v42 }
 0x8b7 PF: > { %p4564_p4 = scmp.eq.s32.totalorder %s5015_s22, 1  ;;  %s4943_s23 = smov [#allocation6]  }
 0x8b8   : > { %s3934_s24 = sshll.u32 %s4943_s23, 4  ;;  %s3935_s24 = int_to_ptr.vmem [resolvable:$true] %s3934_s24 }
 0x8b9   : > { %s4879_s25 = scalar_lea.vmem %s3935_s24, 32  ;;  %p4886_p8 = scmp.lt.s32.totalorder %s3935_s24, %s3935_s24 }
 0x8ba   : > { %p4880_p5 = scmp.ne.s32.totalorder %s3935_s24, %s4879_s25  ;;  %p4887_p9 = scmp.lt.s32.totalorder %s4879_s25, %s4879_s25 }
 0x8bc   : > { %p4881_p6 = pnand %p4880_p5, %p4564_p4  ;;  %p4888_p10 = por %p4887_p9, %p4886_p8 }
 0x8be   : > { %p4882_p7 = pneg %p4881_p6 }
 0x8c0   : > { %p4889_p11 = pnand %p4888_p10, %p4882_p7 }
 0x8c2   : > { %4892 = shalt.err (!%p4889_p11)
}
 0x8c3   : > { %4555 = dma.vmem_to_hbm [thread:$0]  (%p4564_p4), %s3935_s24, 32, %s6994_s12, [#allocation5]  }
 0x8c4   : > { %4912 = dma.done.wait (%p4564_p4), [#allocation5], 32  }
 0x8c5   : > { %4914 = vsyncadd (%p4564_p4), [#allocation5], 4294967264 }
 0x8c6 PF: > { %s24_s21 = sadd.s32 1, %s4917_s21  }
 0x8c7   : > { %p21_p12 = scmp.ge.s32.totalorder %s24_s21, 4  }
 0x8c9   :  { %23 = sbr.rel (!%p21_p12) target bundleno = 2 (0x2), region = 114 }
 0x8ce   :  { %3947 = vsyncpa [#allocation4], 1 }
 0x8cf   :  { %3949 = vsyncpa [#allocation4 + $0x1], 1 }
 0x8d0   :  { %3950 = vsyncpa [#allocation5], 1 }
 0x8d1   :  { %3952 = vsyncpa [#allocation5 + $0x1], 1 }

// kernel: tpu_custom_call.1
= control target key start
LH: loop header
LB: loop body
LE: loop exit
PB: predicated region body
PF: predicated region fallthrough
CT: control target
= control target key end

     0   :  { %17 = vsyncpa [#allocation4], 0  ;;  %s6982_s0 = inlined_call_operand.vmem [shape: bf16[256,128], index: 0, kind: input, shape index: {}]   ;;  %s6983_s1 = inlined_call_operand.vmem [shape: s32[256,1], index: 1, kind: input, shape index: {}]   ;;  %s6984_s2 = inlined_call_operand.vmem [shape: s32[1,256], index: 2, kind: input, shape index: {}]   ;;  %s6985_s3 = inlined_call_operand.vmem [shape: f32[12,13], index: 3, kind: input, shape index: {}]   ;;  %s6986_s4 = inlined_call_operand.hbm [shape: bf16[128,896], index: 4, kind: input, shape index: {}]   ;;  %s6987_s5 = inlined_call_operand.vmem [shape: f32[13,64], index: 5, kind: input, shape index: {}]   ;;  %s6988_s6 = inlined_call_operand.vmem [shape: f32[1,64], index: 6, kind: input, shape index: {}]   ;;  %s6989_s7 = inlined_call_operand.vmem [shape: f32[12,1], index: 7, kind: input, shape index: {}]   ;;  %s6990_s8 = inlined_call_operand.vmem [shape: s32[1,12], index: 8, kind: input, shape index: {}]   ;;  %s6991_s9 = inlined_call_operand.vmem [shape: f32[2,1], index: 9, kind: input, shape index: {}]   ;;  %s6992_s10 = inlined_call_operand.vmem [shape: f32[64,3], index: 10, kind: input, shape index: {}]   ;;  %s6993_s11 = inlined_call_operand.vmem [shape: f32[1,3], index: 11, kind: input, shape index: {}]   ;;  %s6994_s12 = inlined_call_operand.hbm [shape: f32[2,3], index: 12, kind: output, shape index: {}]  }
   0x1   :  { %18 = vsyncpa [#allocation5], 0  ;;  %s5009_s21 = smov 0  }
   0x2 LB: > { %s5015_s22 = sadd.s32 4294967295, %s4917_s21   ;;  %p4007_p0 = scmp.ge.s32.totalorder %s4917_s21, 1  ;;  %s4917_s21 = sphi %s5009_s21, %s24_s21  }
   0x3   : > { %p317_p1 = scmp.lt.s32.totalorder %s4917_s21, 3  ;;  %s4919_s23 = smov [#allocation3]  }
   0x4   : > { %s332_s24 = sshll.u32 %s4919_s23, 4  ;;  %p4562_p4 = scmp.eq.s32.totalorder %s5015_s22, 0  ;;  %s333_s24 = int_to_ptr.vmem [resolvable:$true] %s332_s24 }
   0x5   : > { %p5020_p3 = pnand %p4007_p0, %p317_p1  ;;  %s4864_s26 = scalar_lea.vmem %s333_s24, 7168 }
   0x6   : > { %p4865_p8 = scmp.ne.s32.totalorder %s333_s24, %s4864_s26  ;;  %p4872_p11 = scmp.lt.s32.totalorder %s333_s24, %s333_s24 }
   0x7   : > { %p4558_p5 = pneg %p5020_p3  ;;  %p4873_p12 = scmp.lt.s32.totalorder %s4864_s26, %s4864_s26 }
   0x9   : > { %p4559_p6 = pnand %p4562_p4, %p4558_p5  ;;  %p4874_p13 = por %p4873_p12, %p4872_p11 }
   0xb   : > { %p4855_p7 = pneg %p4559_p6 }
   0xd   : > { %p4867_p9 = pnand %p4865_p8, %p4855_p7 }
   0xf   : > { %p4868_p10 = pneg %p4867_p9 }
  0x11   : > { %p4875_p2 = pnand %p4874_p13, %p4868_p10 }
  0x13   : > { %4878 = shalt.err (!%p4875_p2)
}
  0x14   : > { %s4920_s27 = smov 448   ;;  %s4921_s28 = smov 28  }
  0x15   : > { %4561 = dma.hbm_to_vmem [thread:$0]  (!%p4559_p6), %s6986_s4, 7168, %s333_s24, [#allocation4], %s4920_s27, %s4920_s27, %s4921_s28  }
  0x16   : > { %393 = sbr.rel (%p5020_p3) target bundleno = 2246 (0x8c6), region = 68 }
  0x1b   : > { %4908 = dma.done.wait (%p4562_p4), [#allocation4], 7168  }
  0x1c   : > { %4910 = vsyncadd (%p4562_p4), [#allocation4], 4294960128  ;;  %s4012_s13 = sshll.u32 %s5015_s22, 4  ;;  %p450_p0 = scmp.lt.s32.totalorder %s5015_s22, 1 }
  0x1d   : > { %p439_p1 = scmp.lt.s32.totalorder %s4012_s13, 31  ;;  %p7128_p2 = scmp.ne.s32.totalorder %s5015_s22, 0 }
  0x1e   : > { %s5041_s14 = scalar_select %p450_p0, %s5015_s22, 1 }
  0x1f   : > { %s7614_s13 = smov (!%p439_p1, %s4012_s13), 31  ;;  %457 = sbr.rel (%p7128_p2) target bundleno = 39 (0x27), region = 76 }
  0x20   : > { %s452_s17 = scalar_lea.vmem %s6984_s2, %s5041_s14  ;;  %s4013_s18 = sshll.u32 %s7614_s13, 2 }
  0x21   : > { %s4015_s19 = sshll.u32 %s7614_s13, 3  ;;  %s5050_s24 = scalar_lea.vmem %s6982_s0, %s4013_s18 }
  0x22   : > { %s5055_s27 = scalar_lea.vmem %s6983_s1, %s4015_s19 }
  0x24   : > { %vm458_vm0 = vcmask 523264   ;;  %vm460_vm1 = vcmask 519168   ;;  %v4922_v0 = vmov 0.0  }
  0x25   : > { %459 = vst.msk [vmem:[#allocation2] sm:$0xff] %vm458_vm0, %v4922_v0 }
  0x26   : > { %461 = vst.msk [vmem:[#allocation2 + $0x8] sm:$0xf] %vm460_vm1, %v4922_v0 }
  0x27 PF: > { %v464_v1 = vld [vmem:[%s5055_s27 + $0x10] sm:$0xff]  ;;  %v462_v2 = vld [vmem:[%s5055_s27] sm:$0xff]  ;;  %v7012_v3 = vmov 0   ;;  %v465_v4 = vld [vmem:[%s5055_s27 + $0x18] sm:$0xff]  ;;  %vm596_vm2 = vcmask 1045504   ;;  %v7014_v40 = vmov 1   ;;  %v6995_v56 = vlaneseq }
  0x28   : > { %4600 = vset.pattern.permute.xlu1 %v7012_v3  ;;  %4599 = vset.pattern.permute.xlu0 %v7012_v3  ;;  %v463_v5 = vld [vmem:[%s5055_s27 + $0x8] sm:$0xff]  ;;  %v466_v7 = vld [vmem:[%s5055_s27 + $0x20] sm:$0xff]  ;;  %v469_v12 = vld [vmem:[%s5055_s27 + $0x38] sm:$0xff]  ;;  %vm571_vm7 = vcmask 97280   ;;  %v6996_v62 = vmov 0.0   ;;  %s4935_s15 = smov 64  }
  0x29   : > { %487 = vperm.xlu1 %4600, %v464_v1   ;;  %481 = vperm.xlu0 %4599, %v462_v2   ;;  %v467_v6 = vld [vmem:[%s5055_s27 + $0x28] sm:$0xff]  ;;  %v568_v8 = vld [vmem:[%s6985_s3] sm:$0xff]  ;;  %v468_v13 = vld [vmem:[%s5055_s27 + $0x30] sm:$0xff]  ;;  %v5129_v57 = vand.u32 127, %v6995_v56  ;;  %p4092_p3 = scmp.ne.s32.totalorder %s5015_s22, 1 }
  0x2a   : > { %v569_v9 = vld [vmem:[%s6985_s3 + $0x8] sm:$0xf]  ;;  %v470_v15 = vld [vmem:[%s5055_s27 + $0x40] sm:$0xff]  ;;  %v473_v16 = vld [vmem:[%s5055_s27 + $0x58] sm:$0xff] }
  0x2b   : > { %v570_v10 = vpack.c.bf16 %v569_v9, %v568_v8  ;;  %v471_v14 = vld [vmem:[%s5055_s27 + $0x48] sm:$0xff]  ;;  %v472_v17 = vld [vmem:[%s5055_s27 + $0x50] sm:$0xff]  ;;  %v474_v19 = vld [vmem:[%s5055_s27 + $0x60] sm:$0xff] }
  0x2c   : > { %v475_v18 = vld [vmem:[%s5055_s27 + $0x68] sm:$0xff]  ;;  %v477_v20 = vld [vmem:[%s5055_s27 + $0x78] sm:$0xff]  ;;  %v476_v21 = vld [vmem:[%s5055_s27 + $0x70] sm:$0xff] }
  0x2d   : > { %490 = vperm.xlu1 %4600, %v465_v4   ;;  %484 = vperm.xlu0 %4599, %v463_v5   ;;  %v598_v11 = vsel %vm596_vm2, %v570_v10, 0  ;;  %v4774_v22 = vld [vmem:[#allocation3 + $0x188] ss:$28 sps:$4 sm:$0xff]   ;;  %v4775_v23 = vld [vmem:[#allocation3 + $0x150] ss:$28 sps:$4 sm:$0xff]   ;;  %v5091_v33 = vld [vmem:[%s5050_s24 + $0x8] sm:$0xff]  }
  0x2e   : > { %4549 = vmatprep.subr.msk.bf16.mxu0 %vm596_vm2, %v570_v10  ;;  %v5083_v24 = vld [vmem:[#allocation3 + $0x18c] ss:$28 sps:$4 sm:$0xff]   ;;  %4272 = vmatprep.subr.bf16.mxu1 %v4774_v22  ;;  %v5087_v25 = vld [vmem:[%s5050_s24] sm:$0xff]   ;;  %v4777_v27 = vld [vmem:[#allocation3 + $0xe0] ss:$28 sps:$4 sm:$0xff]  }
  0x2f   : > { %4255 = vmatpush3.bf16.msra.mxu0 %v598_v11  ;;  %4273 = vmatpush3.bf16.msra.mxu1 %v4774_v22  ;;  %v4776_v26 = vld [vmem:[#allocation3 + $0x118] ss:$28 sps:$4 sm:$0xff]   ;;  %v4778_v28 = vld [vmem:[#allocation3 + $0xa8] ss:$28 sps:$4 sm:$0xff]   ;;  %v4780_v29 = vld [vmem:[#allocation3 + $0x70] ss:$28 sps:$4 sm:$0xff]  }
  0x30   : > { %4304 = vmatprep.subr.bf16.mxu0 %v5083_v24  ;;  %4274 = vmatprep.subr.bf16.mxu1 %v4775_v23  ;;  %v4782_v30 = vld [vmem:[#allocation3 + $0x38] ss:$28 sps:$4 sm:$0xff]   ;;  %v4784_v31 = vld [vmem:[#allocation3] ss:$28 sps:$4 sm:$0xff]   ;;  %v4788_v32 = vld [vmem:[#allocation3 + $0x190] ss:$28 sps:$4 sm:$0xff]  }
  0x31   : > { %496 = vperm.xlu1 %4600, %v467_v6   ;;  %493 = vperm.xlu0 %4599, %v466_v7   ;;  %v5094_v34 = vld [vmem:[%s5050_s24 + $0x10] sm:$0xff]   ;;  %v4790_v35 = vld [vmem:[#allocation3 + $0x158] ss:$28 sps:$4 sm:$0xff]   ;;  %v5099_v37 = vld [vmem:[%s5050_s24 + $0x18] sm:$0xff]  }
  0x32   : > { %4288 = vmatprep.mubr.bf16.mxu1 %v5087_v25  ;;  %v4794_v36 = vld [vmem:[#allocation3 + $0x120] ss:$28 sps:$4 sm:$0xff]   ;;  %v5102_v38 = vld [vmem:[%s5050_s24 + $0x20] sm:$0xff]   ;;  %v4796_v39 = vld [vmem:[#allocation3 + $0xe8] ss:$28 sps:$4 sm:$0xff]  }
  0x33   : > { %4275 = vmatpush3.bf16.msra.mxu1 %v4775_v23  ;;  %v4800_v41 = vld [vmem:[#allocation3 + $0xb0] ss:$28 sps:$4 sm:$0xff]   ;;  %v5108_v42 = vld [vmem:[%s5050_s24 + $0x28] sm:$0xff]   ;;  %v5111_v43 = vld [vmem:[%s5050_s24 + $0x30] sm:$0xff]  }
  0x34   : > { %4276 = vmatprep.subr.bf16.mxu1 %v4776_v26  ;;  %v4802_v44 = vld [vmem:[#allocation3 + $0x78] ss:$28 sps:$4 sm:$0xff]   ;;  %v4806_v45 = vld [vmem:[#allocation3 + $0x40] ss:$28 sps:$4 sm:$0xff]   ;;  %v5116_v46 = vld [vmem:[%s5050_s24 + $0x38] sm:$0xff]  }
  0x35   : > { %502 = vperm.xlu1 %4600, %v469_v12   ;;  %499 = vperm.xlu0 %4599, %v468_v13   ;;  %v4808_v47 = vld [vmem:[#allocation3 + $0x8] ss:$28 sps:$4 sm:$0xff]   ;;  %v4810_v48 = vld [vmem:[#allocation3 + $0x198] ss:$28 sps:$4 sm:$0xff]   ;;  %v4812_v49 = vld [vmem:[#allocation3 + $0x160] ss:$28 sps:$4 sm:$0xff]  }
  0x36   : > { %v4814_v50 = vld [vmem:[#allocation3 + $0x128] ss:$28 sps:$4 sm:$0xff]   ;;  %v4816_v51 = vld [vmem:[#allocation3 + $0xf0] ss:$28 sps:$4 sm:$0xff]   ;;  %v4818_v52 = vld [vmem:[#allocation3 + $0xb8] ss:$28 sps:$4 sm:$0xff]  }
  0x37   : > { %4277 = vmatpush3.bf16.msra.mxu1 %v4776_v26  ;;  %v4819_v53 = vld [vmem:[#allocation3 + $0x80] ss:$28 sps:$4 sm:$0xff]   ;;  %v4820_v54 = vld [vmem:[#allocation3 + $0x48] ss:$28 sps:$4 sm:$0xff]   ;;  %v4821_v55 = vld [vmem:[#allocation3 + $0x10] ss:$28 sps:$4 sm:$0xff]  }
  0x38   : > { %4278 = vmatprep.subr.bf16.mxu1 %v4777_v27  ;;  %v4781_v8 = vld [vmem:[#allocation3 + $0x154] ss:$28 sps:$4 sm:$0xff]  }
  0x39   : > { %508 = vperm.xlu1 %4600, %v471_v14   ;;  %505 = vperm.xlu0 %4599, %v470_v15   ;;  %v4783_v14 = vld [vmem:[#allocation3 + $0x11c] ss:$28 sps:$4 sm:$0xff]  }
  0x3b   : > { %4279 = vmatpush3.bf16.msra.mxu1 %v4777_v27  ;;  %v4789_v27 = vld [vmem:[#allocation3 + $0xac] ss:$28 sps:$4 sm:$0xff]  }
  0x3c   : > { %4280 = vmatprep.subr.bf16.mxu1 %v4778_v28 }
  0x3d   : > { %514 = vperm.xlu1 %4600, %v473_v16   ;;  %511 = vperm.xlu0 %4599, %v472_v17  }
  0x3f   : > { %4281 = vmatpush3.bf16.msra.mxu1 %v4778_v28 }
  0x40   : > { %4282 = vmatprep.subr.bf16.mxu1 %v4780_v29 }
  0x41   : > { %520 = vperm.xlu1 %4600, %v475_v18   ;;  %517 = vperm.xlu0 %4599, %v474_v19  }
  0x43   : > { %4283 = vmatpush3.bf16.msra.mxu1 %v4780_v29 }
  0x44   : > { %4284 = vmatprep.subr.bf16.mxu1 %v4782_v30 }
  0x45   : > { %526 = vperm.xlu1 %4600, %v477_v20   ;;  %523 = vperm.xlu0 %4599, %v476_v21   ;;  %v4786_v20 = vld [vmem:[#allocation3 + $0xe4] ss:$28 sps:$4 sm:$0xff]  }
  0x47   : > { %4285 = vmatpush3.bf16.msra.mxu1 %v4782_v30 }
  0x48   : > { %4286 = vmatprep.subr.bf16.mxu1 %v4784_v31 }
  0x49   : > { %4601 = vset.pattern.permute.xlu1 %v7014_v40 }
  0x4b   : > { %4287 = vmatpush3.bf16.msra.mxu1 %v4784_v31 }
  0x4c   : > { %4336 = vmatprep.subr.bf16.mxu1 %v4788_v32 }
  0x4e   : > { %4289 = vmatmul.mubr.bf16.vlgmr.msra.gmra.mxu1 %v5091_v33 }
  0x4f   : > { %4337 = vmatpush3.bf16.msra.mxu1 %v4788_v32  ;;  %4292 = vmatprep.mubr.bf16.mxu1 %v5094_v34 }
  0x50   : > { %4338 = vmatprep.subr.bf16.mxu1 %v4790_v35 }
  0x53   : > { %4339 = vmatpush3.bf16.msra.mxu1 %v4790_v35  ;;  %v4792_v35 = vld [vmem:[#allocation3 + $0x74] ss:$28 sps:$4 sm:$0xff]  }
  0x54   : > { %4340 = vmatprep.subr.bf16.mxu1 %v4794_v36 }
  0x56   : > { %4293 = vmatmul.mubr.bf16.gmra.mxu1 %v5099_v37 }
  0x57   : > { %4341 = vmatpush3.bf16.msra.mxu1 %v4794_v36  ;;  %4296 = vmatprep.mubr.bf16.mxu1 %v5102_v38 }
  0x58   : > { %4342 = vmatprep.subr.bf16.mxu1 %v4796_v39 }
  0x5b   : > { %4343 = vmatpush3.bf16.msra.mxu1 %v4796_v39 }
  0x5c   : > { %4344 = vmatprep.subr.bf16.mxu1 %v4800_v41 }
  0x5e   : > { %4297 = vmatmul.mubr.bf16.gmra.mxu1 %v5108_v42 }
  0x5f   : > { %4345 = vmatpush3.bf16.msra.mxu1 %v4800_v41  ;;  %4300 = vmatprep.mubr.bf16.mxu1 %v5111_v43 }
  0x60   : > { %4346 = vmatprep.subr.bf16.mxu1 %v4802_v44 }
  0x63   : > { %4347 = vmatpush3.bf16.msra.mxu1 %v4802_v44 }
  0x64   : > { %4348 = vmatprep.subr.bf16.mxu1 %v4806_v45 }
  0x66   : > { %4301 = vmatmul.mubr.bf16.gmra.mxu1 %v5116_v46 }
  0x67   : > { %4349 = vmatpush3.bf16.msra.mxu1 %v4806_v45  ;;  %4352 = vmatprep.mubr.bf16.mxu1 %v5087_v25 }
  0x68   : > { %4350 = vmatprep.subr.bf16.mxu1 %v4808_v47 }
  0x6b   : > { %4351 = vmatpush3.bf16.msra.mxu1 %v4808_v47  ;;  %v4795_v47 = vld [vmem:[#allocation3 + $0x3c] ss:$28 sps:$4 sm:$0xff]  }
  0x6c   : > { %4400 = vmatprep.subr.bf16.mxu1 %v4810_v48 }
  0x6e   : > { %4353 = vmatmul.mubr.bf16.vlgmr.msra.gmra.mxu1 %v5091_v33 }
  0x6f   : > { %4401 = vmatpush3.bf16.msra.mxu1 %v4810_v48  ;;  %4356 = vmatprep.mubr.bf16.mxu1 %v5094_v34 }
  0x70   : > { %4402 = vmatprep.subr.bf16.mxu1 %v4812_v49 }
  0x73   : > { %4403 = vmatpush3.bf16.msra.mxu1 %v4812_v49 }
  0x74   : > { %4404 = vmatprep.subr.bf16.mxu1 %v4814_v50 }
  0x76   : > { %4357 = vmatmul.mubr.bf16.gmra.mxu1 %v5099_v37 }
  0x77   : > { %4405 = vmatpush3.bf16.msra.mxu1 %v4814_v50  ;;  %4360 = vmatprep.mubr.bf16.mxu1 %v5102_v38 }
  0x78   : > { %4406 = vmatprep.subr.bf16.mxu1 %v4816_v51 }
  0x7b   : > { %4407 = vmatpush3.bf16.msra.mxu1 %v4816_v51  ;;  %v4798_v51 = vld [vmem:[#allocation3 + $0x4] ss:$28 sps:$4 sm:$0xff]  }
  0x7c   : > { %4408 = vmatprep.subr.bf16.mxu1 %v4818_v52 }
  0x7e   : > { %4361 = vmatmul.mubr.bf16.gmra.mxu1 %v5108_v42 }
  0x7f   : > { %4409 = vmatpush3.bf16.msra.mxu1 %v4818_v52  ;;  %4364 = vmatprep.mubr.bf16.mxu1 %v5111_v43  ;;  %v4801_v52 = vld [vmem:[#allocation3 + $0x194] ss:$28 sps:$4 sm:$0xff]  }
  0x80   : > { %4410 = vmatprep.subr.bf16.mxu1 %v4819_v53 }
  0x83   : > { %4411 = vmatpush3.bf16.msra.mxu1 %v4819_v53  ;;  %v4804_v53 = vld [vmem:[#allocation3 + $0x15c] ss:$28 sps:$4 sm:$0xff]  }
  0x84   : > { %4412 = vmatprep.subr.bf16.mxu1 %v4820_v54 }
  0x86   : > { %4365 = vmatmul.mubr.bf16.gmra.mxu1 %v5116_v46 }
  0x87   : > { %4413 = vmatpush3.bf16.msra.mxu1 %v4820_v54  ;;  %4416 = vmatprep.mubr.bf16.mxu1 %v5087_v25  ;;  %v4807_v54 = vld [vmem:[#allocation3 + $0x124] ss:$28 sps:$4 sm:$0xff]  }
  0x88   : > { %4414 = vmatprep.subr.bf16.mxu1 %v4821_v55 }
  0x8b   : > { %4415 = vmatpush3.bf16.msra.mxu1 %v4821_v55  ;;  %v4809_v55 = vld [vmem:[#allocation3 + $0xec] ss:$28 sps:$4 sm:$0xff]  }
  0x8e   : > { %4417 = vmatmul.mubr.bf16.vlgmr.msra.gmra.mxu1 %v5091_v33 }
  0x8f   : > { %4420 = vmatprep.mubr.bf16.mxu1 %v5094_v34 }
  0x96   : > { %4421 = vmatmul.mubr.bf16.gmra.mxu1 %v5099_v37 }
  0x97   : > { %4424 = vmatprep.mubr.bf16.mxu1 %v5102_v38 }
  0x9e   : > { %4425 = vmatmul.mubr.bf16.gmra.mxu1 %v5108_v42 }
  0x9f   : > { %4428 = vmatprep.mubr.bf16.mxu1 %v5111_v43 }
  0xa4   : > { %v488_v58 = vpop.permute.xlu1 %487  ;;  %v482_v59 = vpop.permute.xlu0 %481 }
  0xa5   : > { %vm530_vm3 = vcmp.eq.s32.totalorder %v5129_v57, %v488_v58  ;;  %vm528_vm4 = vcmp.eq.s32.totalorder %v5129_v57, %v482_v59  ;;  %v4813_v58 = vld [vmem:[#allocation3 + $0x7c] ss:$28 sps:$4 sm:$0xff]   ;;  %v4815_v59 = vld [vmem:[#allocation3 + $0x44] ss:$28 sps:$4 sm:$0xff]  }
  0xa6   : > { %v546_v63 = vsel %vm530_vm3, 1.0, %v6996_v62  ;;  %v544_v1 = vsel %vm528_vm4, 1.0, %v6996_v62  ;;  %4429 = vmatmul.mubr.bf16.gmra.mxu1 %v5116_v46  ;;  %vm4938_vm4 = vmmov 0  }
  0xa7   : > { %4480 = vmatprep.mubr.bf16.mxu1 %v5087_v25 }
  0xa8   : > { %v491_v60 = vpop.permute.xlu1 %490  ;;  %v485_v61 = vpop.permute.xlu0 %484 }
  0xa9   : > { %vm531_vm5 = vcmp.eq.s32.totalorder %v5129_v57, %v491_v60  ;;  %vm529_vm6 = vcmp.eq.s32.totalorder %v5129_v57, %v485_v61  ;;  %v4817_v60 = vld [vmem:[#allocation3 + $0xc] ss:$28 sps:$4 sm:$0xff]   ;;  %v4822_v61 = vld [vmem:[#allocation3 + $0x19c] ss:$28 sps:$4 sm:$0xff]  }
  0xaa   : > { %v547_v0 = vsel %vm531_vm5, 1.0, %v6996_v62  ;;  %v545_v2 = vsel %vm529_vm6, 1.0, %v6996_v62 }
  0xab   : > { %v561_v4 = vpack.c.bf16 %v547_v0, %v546_v63  ;;  %v560_v5 = vpack.c.bf16 %v545_v2, %v544_v1  ;;  %v4823_v63 = vld [vmem:[#allocation3 + $0x164] ss:$28 sps:$4 sm:$0xff]   ;;  %v4824_v0 = vld [vmem:[#allocation3 + $0x12c] ss:$28 sps:$4 sm:$0xff]   ;;  %v4825_v1 = vld [vmem:[#allocation3 + $0xf4] ss:$28 sps:$4 sm:$0xff]  }
  0xac   : > { %v497_v6 = vpop.permute.xlu1 %496  ;;  %v494_v7 = vpop.permute.xlu0 %493  ;;  %v4826_v2 = vld [vmem:[#allocation3 + $0xbc] ss:$28 sps:$4 sm:$0xff]  }
  0xad   : > { %vm533_vm8 = vcmp.eq.s32.totalorder %v5129_v57, %v497_v6  ;;  %vm532_vm9 = vcmp.eq.s32.totalorder %v5129_v57, %v494_v7  ;;  %4256 = vmatprep.mubr.msk.bf16.mxu0 %vm571_vm7, %v560_v5  ;;  %v7016_v7 = vmov 2  }
  0xae   : > { %v549_v9 = vsel %vm533_vm8, 1.0, %v6996_v62  ;;  %v548_v10 = vsel %vm532_vm9, 1.0, %v6996_v62  ;;  %4257 = vmatmul.mubr.msk.bf16.vlgmr.msra.gmra.mxu0 %vm571_vm7, %v561_v4  ;;  %v4827_v4 = vld [vmem:[#allocation3 + $0x84] ss:$28 sps:$4 sm:$0xff]   ;;  %vm3602_vm9 = vcmask 523264  }
  0xaf   : > { %v562_v11 = vpack.c.bf16 %v549_v9, %v548_v10  ;;  %4305 = vmatpush3.bf16.msra.mxu0 %v5083_v24  ;;  %v7018_v9 = vmov 3   ;;  %v7010_v10 = vmov 4  }
  0xb0   : > { %v503_v12 = vpop.permute.xlu1 %502  ;;  %v500_v13 = vpop.permute.xlu0 %499  ;;  %4306 = vmatprep.subr.bf16.mxu0 %v4781_v8 }
  0xb1   : > { %vm535_vm10 = vcmp.eq.s32.totalorder %v5129_v57, %v503_v12  ;;  %vm534_vm11 = vcmp.eq.s32.totalorder %v5129_v57, %v500_v13  ;;  %4260 = vmatprep.mubr.msk.bf16.mxu0 %vm571_vm7, %v562_v11  ;;  %v7004_v11 = vmov 5   ;;  %v7000_v12 = vmov 6  }
  0xb2   : > { %v551_v15 = vsel %vm535_vm10, 1.0, %v6996_v62  ;;  %v550_v16 = vsel %vm534_vm11, 1.0, %v6996_v62  ;;  %vm3604_vm10 = vcmask 519168  }
  0xb3   : > { %v563_v17 = vpack.c.bf16 %v551_v15, %v550_v16  ;;  %4307 = vmatpush3.bf16.msra.mxu0 %v4781_v8  ;;  %v4829_v8 = vld [vmem:[#allocation3 + $0x14] ss:$28 sps:$4 sm:$0xff]  }
  0xb4   : > { %v509_v18 = vpop.permute.xlu1 %508  ;;  %v506_v19 = vpop.permute.xlu0 %505  ;;  %4308 = vmatprep.subr.bf16.mxu0 %v4783_v14 }
  0xb5   : > { %vm537_vm12 = vcmp.eq.s32.totalorder %v5129_v57, %v509_v18  ;;  %vm536_vm13 = vcmp.eq.s32.totalorder %v5129_v57, %v506_v19  ;;  %v7002_v18 = vmov 9  }
  0xb6   : > { %v553_v21 = vsel %vm537_vm12, 1.0, %v6996_v62  ;;  %v552_v22 = vsel %vm536_vm13, 1.0, %v6996_v62  ;;  %4261 = vmatmul.mubr.msk.bf16.gmra.mxu0 %vm571_vm7, %v563_v17 }
  0xb7   : > { %v564_v23 = vpack.c.bf16 %v553_v21, %v552_v22  ;;  %4309 = vmatpush3.bf16.msra.mxu0 %v4783_v14 }
  0xb8   : > { %v515_v24 = vpop.permute.xlu1 %514  ;;  %v512_v26 = vpop.permute.xlu0 %511  ;;  %4310 = vmatprep.subr.bf16.mxu0 %v4786_v20 }
  0xb9   : > { %vm539_vm14 = vcmp.eq.s32.totalorder %v5129_v57, %v515_v24  ;;  %vm538_vm15 = vcmp.eq.s32.totalorder %v5129_v57, %v512_v26  ;;  %4264 = vmatprep.mubr.msk.bf16.mxu0 %vm571_vm7, %v564_v23 }
  0xba   : > { %v555_v28 = vsel %vm539_vm14, 1.0, %v6996_v62  ;;  %v554_v29 = vsel %vm538_vm15, 1.0, %v6996_v62 }
  0xbb   : > { %v565_v30 = vpack.c.bf16 %v555_v28, %v554_v29  ;;  %4311 = vmatpush3.bf16.msra.mxu0 %v4786_v20 }
  0xbc   : > { %v521_v31 = vpop.permute.xlu1 %520  ;;  %v518_v32 = vpop.permute.xlu0 %517  ;;  %4312 = vmatprep.subr.bf16.mxu0 %v4789_v27 }
  0xbd   : > { %vm541_vm0 = vcmp.eq.s32.totalorder %v5129_v57, %v521_v31  ;;  %vm540_vm1 = vcmp.eq.s32.totalorder %v5129_v57, %v518_v32 }
  0xbe   : > { %v557_v36 = vsel %vm541_vm0, 1.0, %v6996_v62  ;;  %v556_v39 = vsel %vm540_vm1, 1.0, %v6996_v62  ;;  %4265 = vmatmul.mubr.msk.bf16.gmra.mxu0 %vm571_vm7, %v565_v30 }
  0xbf   : > { %v566_v41 = vpack.c.bf16 %v557_v36, %v556_v39  ;;  %4313 = vmatpush3.bf16.msra.mxu0 %v4789_v27 }
  0xc0   : > { %v527_v44 = vpop.permute.xlu1 %526  ;;  %v524_v45 = vpop.permute.xlu0 %523  ;;  %4314 = vmatprep.subr.bf16.mxu0 %v4792_v35 }
  0xc1   : > { %vm543_vm2 = vcmp.eq.s32.totalorder %v5129_v57, %v527_v44  ;;  %vm542_vm3 = vcmp.eq.s32.totalorder %v5129_v57, %v524_v45  ;;  %4268 = vmatprep.mubr.msk.bf16.mxu0 %vm571_vm7, %v566_v41  ;;  %v4811_v57 = vld [vmem:[#allocation3 + $0xb4] ss:$28 sps:$4 sm:$0xff]  }
  0xc2   : > { %v559_v48 = vsel %vm543_vm2, 1.0, %v6996_v62  ;;  %v558_v49 = vsel %vm542_vm3, 1.0, %v6996_v62 }
  0xc3   : > { %v567_v50 = vpack.c.bf16 %v559_v48, %v558_v49  ;;  %4315 = vmatpush3.bf16.msra.mxu0 %v4792_v35 }
  0xc4   : > { %4316 = vmatprep.subr.bf16.mxu0 %v4795_v47 }
  0xc6   : > { %4269 = vmatmul.mubr.msk.bf16.gmra.mxu0 %vm571_vm7, %v567_v50 }
  0xc7   : > { %4317 = vmatpush3.bf16.msra.mxu0 %v4795_v47  ;;  %4320 = vmatprep.mubr.bf16.mxu0 %v5087_v25 }
  0xc8   : > { %4318 = vmatprep.subr.bf16.mxu0 %v4798_v51 }
  0xcb   : > { %4319 = vmatpush3.bf16.msra.mxu0 %v4798_v51 }
  0xcc   : > { %4368 = vmatprep.subr.bf16.mxu0 %v4801_v52 }
  0xce   : > { %4321 = vmatmul.mubr.bf16.vlgmr.msra.gmra.mxu0 %v5091_v33 }
  0xcf   : > { %4369 = vmatpush3.bf16.msra.mxu0 %v4801_v52  ;;  %4324 = vmatprep.mubr.bf16.mxu0 %v5094_v34 }
  0xd0   : > { %4370 = vmatprep.subr.bf16.mxu0 %v4804_v53 }
  0xd3   : > { %4371 = vmatpush3.bf16.msra.mxu0 %v4804_v53 }
  0xd4   : > { %4372 = vmatprep.subr.bf16.mxu0 %v4807_v54 }
  0xd6   : > { %4325 = vmatmul.mubr.bf16.gmra.mxu0 %v5099_v37 }
  0xd7   : > { %4373 = vmatpush3.bf16.msra.mxu0 %v4807_v54  ;;  %4328 = vmatprep.mubr.bf16.mxu0 %v5102_v38 }
  0xd8   : > { %4374 = vmatprep.subr.bf16.mxu0 %v4809_v55 }
  0xdb   : > { %4375 = vmatpush3.bf16.msra.mxu0 %v4809_v55 }
  0xdc   : > { %4376 = vmatprep.subr.bf16.mxu0 %v4811_v57 }
  0xde   : > { %4329 = vmatmul.mubr.bf16.gmra.mxu0 %v5108_v42 }
  0xdf   : > { %4377 = vmatpush3.bf16.msra.mxu0 %v4811_v57  ;;  %4332 = vmatprep.mubr.bf16.mxu0 %v5111_v43 }
  0xe0   : > { %4378 = vmatprep.subr.bf16.mxu0 %v4813_v58 }
  0xe3   : > { %4379 = vmatpush3.bf16.msra.mxu0 %v4813_v58 }
  0xe4   : > { %4380 = vmatprep.subr.bf16.mxu0 %v4815_v59 }
  0xe6   : > { %4333 = vmatmul.mubr.bf16.gmra.mxu0 %v5116_v46 }
  0xe7   : > { %4381 = vmatpush3.bf16.msra.mxu0 %v4815_v59  ;;  %4384 = vmatprep.mubr.bf16.mxu0 %v5087_v25 }
  0xe8   : > { %4382 = vmatprep.subr.bf16.mxu0 %v4817_v60 }
  0xeb   : > { %4383 = vmatpush3.bf16.msra.mxu0 %v4817_v60 }
  0xec   : > { %4432 = vmatprep.subr.bf16.mxu0 %v4822_v61 }
  0xee   : > { %4385 = vmatmul.mubr.bf16.vlgmr.msra.gmra.mxu0 %v5091_v33 }
  0xef   : > { %4388 = vmatprep.mubr.bf16.mxu0 %v5094_v34  ;;  %4433 = vmatpush3.bf16.msra.mxu0 %v4822_v61 }
  0xf0   : > { %4434 = vmatprep.subr.bf16.mxu0 %v4823_v63 }
  0xf3   : > { %4435 = vmatpush3.bf16.msra.mxu0 %v4823_v63 }
  0xf4   : > { %4436 = vmatprep.subr.bf16.mxu0 %v4824_v0 }
  0xf6   : > { %4389 = vmatmul.mubr.bf16.gmra.mxu0 %v5099_v37 }
  0xf7   : > { %4392 = vmatprep.mubr.bf16.mxu0 %v5102_v38  ;;  %4437 = vmatpush3.bf16.msra.mxu0 %v4824_v0 }
  0xf8   : > { %4438 = vmatprep.subr.bf16.mxu0 %v4825_v1 }
  0xfb   : > { %4439 = vmatpush3.bf16.msra.mxu0 %v4825_v1 }
  0xfc   : > { %4440 = vmatprep.subr.bf16.mxu0 %v4826_v2 }
  0xfe   : > { %4393 = vmatmul.mubr.bf16.gmra.mxu0 %v5108_v42 }
  0xff   : > { %4396 = vmatprep.mubr.bf16.mxu0 %v5111_v43  ;;  %4441 = vmatpush3.bf16.msra.mxu0 %v4826_v2 }
 0x100   : > { %4442 = vmatprep.subr.bf16.mxu0 %v4827_v4 }
 0x103   : > { %4443 = vmatpush3.bf16.msra.mxu0 %v4827_v4 }
 0x106   : > { %4397 = vmatmul.mubr.bf16.gmra.mxu0 %v5116_v46 }
 0x107   : > { %4448 = vmatprep.mubr.bf16.mxu0 %v5087_v25  ;;  %v4828_v25 = vld [vmem:[#allocation3 + $0x4c] ss:$28 sps:$4 sm:$0xff]  }
 0x108   : > { %4444 = vmatprep.subr.bf16.mxu0 %v4828_v25 }
 0x109   : > { %4445 = vmatpush3.bf16.msra.mxu0 %v4828_v25 }
 0x10a   : > { %4446 = vmatprep.subr.bf16.mxu0 %v4829_v8 }
 0x10d   : > { %4447 = vmatpush3.bf16.msra.mxu0 %v4829_v8 }
 0x10e   : > { %4496 = vmatprep.subr.bf16.mxu0 %v6996_v62 }
 0x110   : > { %4449 = vmatmul.mubr.bf16.vlgmr.msra.gmra.mxu0 %v5091_v33  ;;  %v7006_v33 = vmov 7  }
 0x111   : > { %4452 = vmatprep.mubr.bf16.mxu0 %v5094_v34 }
 0x118   : > { %4453 = vmatmul.mubr.bf16.gmra.mxu0 %v5099_v37  ;;  %v6998_v37 = vmov 8  }
 0x119   : > { %4456 = vmatprep.mubr.bf16.mxu0 %v5102_v38 }
 0x120   : > { %4457 = vmatmul.mubr.bf16.gmra.mxu0 %v5108_v42 }
 0x121   : > { %4460 = vmatprep.mubr.bf16.mxu0 %v5111_v43 }
 0x128   : > { %4461 = vmatmul.mubr.bf16.gmra.mxu0 %v5116_v46 }
 0x16e   : > { %v5197_v5 = vpop.f32.mrf.mxu0 }
 0x16f   : > { %7129 = vst [vmem:[#allocation9_spill] sm:$0xff] %v5197_v5  ;;  %1043 = vperm.xlu1 %4601, %v5197_v5   ;;  %934 = vperm.xlu0 %4599, %v5197_v5  }
 0x170   : > { %v5201_v6 = vpop.f32.mrf.mxu0 }
 0x172   : > { %v5227_v34 = vpop.f32.mrf.mxu0 }
 0x173   : > { %4602 = vset.pattern.permute.xlu1 %v7016_v7  ;;  %924 = vperm.xlu0 %4599, %v5201_v6   ;;  %7130 = vst [vmem:[#allocation10_spill] sm:$0xff] %v5227_v34 }
 0x174   : > { %1364 = vperm.xlu1 %4602, %v5197_v5   ;;  %v5248_v38 = vpop.f32.mrf.mxu0 }
 0x175   : > { %7131 = vst [vmem:[#allocation11_spill] sm:$0xff] %v5248_v38 }
 0x176   : > { %v5262_v42 = vpop.f32.mrf.mxu0 }
 0x177   : > { %4609 = vset.pattern.permute.xlu0 %v7014_v40  ;;  %7132 = vst [vmem:[#allocation12_spill] sm:$0xff] %v5262_v42 }
 0x178   : > { %4603 = vset.pattern.permute.xlu1 %v7018_v9  ;;  %1035 = vperm.xlu0 %4609, %v5201_v6   ;;  %v5280_v43 = vpop.f32.mrf.mxu0 }
 0x179   : > { %1460 = vperm.xlu1 %4603, %v5197_v5  }
 0x17a   : > { %v5298_v46 = vpop.f32.mrf.mxu0 }
 0x17b   : > { %7133 = vst [vmem:[#allocation13_spill] sm:$0xff] %v5298_v46 }
 0x17c   : > { %4611 = vset.pattern.permute.xlu0 %v7018_v9  ;;  %v5316_v13 = vpop.f32.mrf.mxu0 }
 0x17d   : > { %4604 = vset.pattern.permute.xlu1 %v7010_v10  ;;  %1452 = vperm.xlu0 %4611, %v5201_v6   ;;  %7134 = vst [vmem:[#allocation14_spill] sm:$0xff] %v5316_v13 }
 0x17e   : > { %1781 = vperm.xlu1 %4604, %v5197_v5   ;;  %v5352_v24 = vpop.f32.mrf.mxu0 }
 0x17f   : > { %7140 = vst [vmem:[#allocation20_spill] sm:$0xff] %v5352_v24 }
 0x180   : > { %v5386_v36 = vpop.f32.mrf.mxu0 }
 0x181   : > { %4613 = vset.pattern.permute.xlu0 %v7004_v11  ;;  %7144 = vst [vmem:[#allocation24_spill] sm:$0xff] %v5386_v36 }
 0x182   : > { %4605 = vset.pattern.permute.xlu1 %v7004_v11  ;;  %1869 = vperm.xlu0 %4613, %v5201_v6   ;;  %v5428_v53 = vpop.f32.mrf.mxu0 }
 0x183   : > { %1877 = vperm.xlu1 %4605, %v5197_v5   ;;  %7154 = vst [vmem:[#allocation34_spill] sm:$0xff] %v5428_v53 }
 0x184   : > { %v5462_v0 = vpop.f32.mrf.mxu0 }
 0x185   : > { %7163 = vst [vmem:[#allocation43_spill] sm:$0xff] %v5462_v0 }
 0x186   : > { %4615 = vset.pattern.permute.xlu0 %v7006_v33 }
 0x187   : > { %4606 = vset.pattern.permute.xlu1 %v7000_v12  ;;  %2286 = vperm.xlu0 %4615, %v5201_v6  }
 0x188   : > { %2198 = vperm.xlu1 %4606, %v5197_v5  }
 0x18b   : > { %4618 = vset.pattern.permute.xlu0 %v7014_v40 }
 0x18c   : > { %4607 = vset.pattern.permute.xlu1 %v7006_v33  ;;  %1047 = vperm.xlu0 %4618, %v5227_v34  }
 0x18d   : > { %2294 = vperm.xlu1 %4607, %v5197_v5  }
 0x190   : > { %4620 = vset.pattern.permute.xlu0 %v7018_v9 }
 0x191   : > { %4608 = vset.pattern.permute.xlu1 %v6998_v37  ;;  %1464 = vperm.xlu0 %4620, %v5227_v34  }
 0x192   : > { %2615 = vperm.xlu1 %4608, %v5197_v5  }
 0x195   : > { %4622 = vset.pattern.permute.xlu0 %v7004_v11 }
 0x196   : > { %4610 = vset.pattern.permute.xlu1 %v7016_v7  ;;  %1881 = vperm.xlu0 %4622, %v5227_v34  }
 0x197   : > { %1356 = vperm.xlu1 %4610, %v5201_v6  }
 0x19a   : > { %4624 = vset.pattern.permute.xlu0 %v7006_v33 }
 0x19b   : > { %4612 = vset.pattern.permute.xlu1 %v7010_v10  ;;  %2298 = vperm.xlu0 %4624, %v5227_v34  }
 0x19c   : > { %1773 = vperm.xlu1 %4612, %v5201_v6  }
 0x19f   : > { %4628 = vset.pattern.permute.xlu0 %v7016_v7 }
 0x1a0   : > { %4614 = vset.pattern.permute.xlu1 %v7000_v12  ;;  %1360 = vperm.xlu0 %4628, %v5248_v38  }
 0x1a1   : > { %2190 = vperm.xlu1 %4614, %v5201_v6  }
 0x1a4   : > { %4630 = vset.pattern.permute.xlu0 %v7010_v10 }
 0x1a5   : > { %4616 = vset.pattern.permute.xlu1 %v6998_v37  ;;  %1777 = vperm.xlu0 %4630, %v5248_v38  }
 0x1a6   : > { %2607 = vperm.xlu1 %4616, %v5201_v6  }
 0x1a9   : > { %4632 = vset.pattern.permute.xlu0 %v7000_v12 }
 0x1aa   : > { %4617 = vset.pattern.permute.xlu1 %v7012_v3  ;;  %2194 = vperm.xlu0 %4632, %v5248_v38  }
 0x1ab   : > { %939 = vperm.xlu1 %4617, %v5227_v34  }
 0x1ae   : > { %4634 = vset.pattern.permute.xlu0 %v7012_v3 }
 0x1af   : > { %4619 = vset.pattern.permute.xlu1 %v7016_v7  ;;  %954 = vperm.xlu0 %4634, %v5262_v42  }
 0x1b0   : > { %1368 = vperm.xlu1 %4619, %v5227_v34  }
 0x1b3   : > { %4636 = vset.pattern.permute.xlu0 %v7016_v7 }
 0x1b4   : > { %4621 = vset.pattern.permute.xlu1 %v7010_v10  ;;  %1380 = vperm.xlu0 %4636, %v5262_v42  }
 0x1b5   : > { %1785 = vperm.xlu1 %4621, %v5227_v34  }
 0x1b8   : > { %4638 = vset.pattern.permute.xlu0 %v7010_v10 }
 0x1b9   : > { %4623 = vset.pattern.permute.xlu1 %v7000_v12  ;;  %1797 = vperm.xlu0 %4638, %v5262_v42  }
 0x1ba   : > { %2202 = vperm.xlu1 %4623, %v5227_v34  }
 0x1bd   : > { %4640 = vset.pattern.permute.xlu0 %v7000_v12 }
 0x1be   : > { %4625 = vset.pattern.permute.xlu1 %v6998_v37  ;;  %2214 = vperm.xlu0 %4640, %v5262_v42  }
 0x1bf   : > { %2619 = vperm.xlu1 %4625, %v5227_v34  }
 0x1c2   : > { %4643 = vset.pattern.permute.xlu0 %v7012_v3 }
 0x1c3   : > { %4626 = vset.pattern.permute.xlu1 %v7012_v3  ;;  %944 = vperm.xlu0 %4643, %v5280_v43  }
 0x1c4   : > { %929 = vperm.xlu1 %4626, %v5248_v38  }
 0x1c7   : > { %4645 = vset.pattern.permute.xlu0 %v7016_v7 }
 0x1c8   : > { %4627 = vset.pattern.permute.xlu1 %v7014_v40  ;;  %1372 = vperm.xlu0 %4645, %v5280_v43  }
 0x1c9   : > { %1039 = vperm.xlu1 %4627, %v5248_v38  }
 0x1cc   : > { %4647 = vset.pattern.permute.xlu0 %v7010_v10 }
 0x1cd   : > { %4629 = vset.pattern.permute.xlu1 %v7018_v9  ;;  %1789 = vperm.xlu0 %4647, %v5280_v43  }
 0x1ce   : > { %1456 = vperm.xlu1 %4629, %v5248_v38  }
 0x1d1   : > { %4649 = vset.pattern.permute.xlu0 %v7000_v12 }
 0x1d2   : > { %4631 = vset.pattern.permute.xlu1 %v7004_v11  ;;  %2206 = vperm.xlu0 %4649, %v5280_v43  }
 0x1d3   : > { %1873 = vperm.xlu1 %4631, %v5248_v38  }
 0x1d6   : > { %4652 = vset.pattern.permute.xlu0 %v7014_v40 }
 0x1d7   : > { %4633 = vset.pattern.permute.xlu1 %v7006_v33  ;;  %1063 = vperm.xlu0 %4652, %v5298_v46  }
 0x1d8   : > { %2290 = vperm.xlu1 %4633, %v5248_v38   ;;  %v7197_v38 = vmov 1  }
 0x1db   : > { %4654 = vset.pattern.permute.xlu0 %v7018_v9 }
 0x1dc   : > { %4635 = vset.pattern.permute.xlu1 %v7014_v40  ;;  %1480 = vperm.xlu0 %4654, %v5298_v46  }
 0x1dd   : > { %1059 = vperm.xlu1 %4635, %v5262_v42  }
 0x1e0   : > { %4656 = vset.pattern.permute.xlu0 %v7004_v11 }
 0x1e1   : > { %4637 = vset.pattern.permute.xlu1 %v7018_v9  ;;  %1897 = vperm.xlu0 %4656, %v5298_v46  }
 0x1e2   : > { %1476 = vperm.xlu1 %4637, %v5262_v42  }
 0x1e5   : > { %4658 = vset.pattern.permute.xlu0 %v7006_v33 }
 0x1e6   : > { %4639 = vset.pattern.permute.xlu1 %v7004_v11  ;;  %2314 = vperm.xlu0 %4658, %v5298_v46  }
 0x1e7   : > { %1893 = vperm.xlu1 %4639, %v5262_v42  }
 0x1ea   : > { %v5318_v14 = vpop.permute.xlu1 %1043  ;;  %4660 = vset.pattern.permute.xlu0 %v7014_v40  ;;  %v5321_v15 = vpop.permute.xlu0 %934 }
 0x1eb   : > { %7135 = vst [vmem:[#allocation15_spill] sm:$0xff] %v5321_v15  ;;  %4641 = vset.pattern.permute.xlu1 %v7006_v33  ;;  %1055 = vperm.xlu0 %4660, %v5316_v13  }
 0x1ec   : > { %2310 = vperm.xlu1 %4641, %v5262_v42  }
 0x1ee   : > { %v5326_v16 = vpop.permute.xlu0 %924 }
 0x1ef   : > { %7136 = vst [vmem:[#allocation16_spill] sm:$0xff] %v5326_v16  ;;  %v5328_v17 = vpop.permute.xlu1 %1364  ;;  %4662 = vset.pattern.permute.xlu0 %v7018_v9 }
 0x1f0   : > { %7137 = vst [vmem:[#allocation17_spill] sm:$0xff] %v5328_v17  ;;  %4642 = vset.pattern.permute.xlu1 %v7002_v18  ;;  %1472 = vperm.xlu0 %4662, %v5316_v13   ;;  %v7181_v17 = vmov 2  }
 0x1f1   : > { %2727 = vperm.xlu1 %4642, %v5262_v42  }
 0x1f3   : > { %v5334_v19 = vpop.permute.xlu0 %1035 }
 0x1f4   : > { %v5336_v20 = vpop.permute.xlu1 %1460  ;;  %4664 = vset.pattern.permute.xlu0 %v7004_v11 }
 0x1f5   : > { %4644 = vset.pattern.permute.xlu1 %v7014_v40  ;;  %1889 = vperm.xlu0 %4664, %v5316_v13  }
 0x1f6   : > { %1051 = vperm.xlu1 %4644, %v5280_v43  }
 0x1f8   : > { %v5342_v21 = vpop.permute.xlu0 %1452 }
 0x1f9   : > { %v5344_v22 = vpop.permute.xlu1 %1781  ;;  %4666 = vset.pattern.permute.xlu0 %v7006_v33 }
 0x1fa   : > { %7138 = vst [vmem:[#allocation18_spill] sm:$0xff] %v5344_v22  ;;  %4646 = vset.pattern.permute.xlu1 %v7018_v9  ;;  %2306 = vperm.xlu0 %4666, %v5316_v13  }
 0x1fb   : > { %1468 = vperm.xlu1 %4646, %v5280_v43  }
 0x1fd   : > { %v5350_v23 = vpop.permute.xlu0 %1869 }
 0x1fe   : > { %7139 = vst [vmem:[#allocation19_spill] sm:$0xff] %v5350_v23  ;;  %v5354_v26 = vpop.permute.xlu1 %1877  ;;  %4668 = vset.pattern.permute.xlu0 %v7012_v3 }
 0x1ff   : > { %4648 = vset.pattern.permute.xlu1 %v7004_v11  ;;  %974 = vperm.xlu0 %4668, %v5352_v24  }
 0x200   : > { %1885 = vperm.xlu1 %4648, %v5280_v43  }
 0x202   : > { %v5360_v27 = vpop.permute.xlu0 %2286 }
 0x203   : > { %7141 = vst [vmem:[#allocation21_spill] sm:$0xff] %v5360_v27  ;;  %v5362_v28 = vpop.permute.xlu1 %2198  ;;  %4670 = vset.pattern.permute.xlu0 %v7016_v7 }
 0x204   : > { %7142 = vst [vmem:[#allocation22_spill] sm:$0xff] %v5362_v28  ;;  %4650 = vset.pattern.permute.xlu1 %v7006_v33  ;;  %1396 = vperm.xlu0 %4670, %v5352_v24   ;;  %v7176_v28 = vmov 9  }
 0x205   : > { %2302 = vperm.xlu1 %4650, %v5280_v43  }
 0x207   : > { %v5368_v29 = vpop.permute.xlu0 %1047 }
 0x208   : > { %v5370_v30 = vpop.permute.xlu1 %2294  ;;  %4672 = vset.pattern.permute.xlu0 %v7010_v10 }
 0x209   : > { %4651 = vset.pattern.permute.xlu1 %v7012_v3  ;;  %1813 = vperm.xlu0 %4672, %v5352_v24  }
 0x20a   : > { %959 = vperm.xlu1 %4651, %v5298_v46  }
 0x20c   : > { %v5376_v31 = vpop.permute.xlu0 %1464 }
 0x20d   : > { %v5378_v32 = vpop.permute.xlu1 %2615  ;;  %4674 = vset.pattern.permute.xlu0 %v7000_v12 }
 0x20e   : > { %7143 = vst [vmem:[#allocation23_spill] sm:$0xff] %v5378_v32  ;;  %4653 = vset.pattern.permute.xlu1 %v7016_v7  ;;  %2230 = vperm.xlu0 %4674, %v5352_v24  }
 0x20f   : > { %1384 = vperm.xlu1 %4653, %v5298_v46  }
 0x211   : > { %v5384_v35 = vpop.permute.xlu0 %1881 }
 0x212   : > { %v5388_v39 = vpop.permute.xlu1 %1356  ;;  %4678 = vset.pattern.permute.xlu0 %v7012_v3 }
 0x213   : > { %7145 = vst [vmem:[#allocation25_spill] sm:$0xff] %v5388_v39  ;;  %4655 = vset.pattern.permute.xlu1 %v7010_v10  ;;  %964 = vperm.xlu0 %4678, %v5386_v36  }
 0x214   : > { %1801 = vperm.xlu1 %4655, %v5298_v46  }
 0x216   : > { %v5394_v41 = vpop.permute.xlu0 %2298 }
 0x217   : > { %v5396_v44 = vpop.permute.xlu1 %1773  ;;  %4680 = vset.pattern.permute.xlu0 %v7016_v7 }
 0x218   : > { %7146 = vst [vmem:[#allocation26_spill] sm:$0xff] %v5396_v44  ;;  %4657 = vset.pattern.permute.xlu1 %v7000_v12  ;;  %1388 = vperm.xlu0 %4680, %v5386_v36  }
 0x219   : > { %2218 = vperm.xlu1 %4657, %v5298_v46  }
 0x21b   : > { %v5402_v45 = vpop.permute.xlu0 %1360 }
 0x21c   : > { %7147 = vst [vmem:[#allocation27_spill] sm:$0xff] %v5402_v45  ;;  %v5404_v47 = vpop.permute.xlu1 %2190  ;;  %4682 = vset.pattern.permute.xlu0 %v7010_v10 }
 0x21d   : > { %7148 = vst [vmem:[#allocation28_spill] sm:$0xff] %v5404_v47  ;;  %4659 = vset.pattern.permute.xlu1 %v7012_v3  ;;  %1805 = vperm.xlu0 %4682, %v5386_v36  }
 0x21e   : > { %949 = vperm.xlu1 %4659, %v5316_v13  }
 0x220   : > { %v5410_v48 = vpop.permute.xlu0 %1777 }
 0x221   : > { %7149 = vst [vmem:[#allocation29_spill] sm:$0xff] %v5410_v48  ;;  %v5412_v49 = vpop.permute.xlu1 %2607  ;;  %4684 = vset.pattern.permute.xlu0 %v7000_v12  ;;  %v7177_v48 = vmov 0  }
 0x222   : > { %7150 = vst [vmem:[#allocation30_spill] sm:$0xff] %v5412_v49  ;;  %4661 = vset.pattern.permute.xlu1 %v7016_v7  ;;  %2222 = vperm.xlu0 %4684, %v5386_v36   ;;  %v7171_v49 = vmov 5  }
 0x223   : > { %1376 = vperm.xlu1 %4661, %v5316_v13  }
 0x225   : > { %v5418_v50 = vpop.permute.xlu0 %2194 }
 0x226   : > { %7151 = vst [vmem:[#allocation31_spill] sm:$0xff] %v5418_v50  ;;  %v5420_v51 = vpop.permute.xlu1 %939  ;;  %4686 = vset.pattern.permute.xlu0 %v7002_v18 }
 0x227   : > { %7152 = vst [vmem:[#allocation32_spill] sm:$0xff] %v5420_v51  ;;  %4663 = vset.pattern.permute.xlu1 %v7010_v10  ;;  %2735 = vperm.xlu0 %4686, %v5386_v36  }
 0x228   : > { %1793 = vperm.xlu1 %4663, %v5316_v13  }
 0x22a   : > { %v5426_v52 = vpop.permute.xlu0 %954 }
 0x22b   : > { %7153 = vst [vmem:[#allocation33_spill] sm:$0xff] %v5426_v52  ;;  %v5430_v54 = vpop.permute.xlu1 %1368  ;;  %4688 = vset.pattern.permute.xlu0 %v7014_v40 }
 0x22c   : > { %7155 = vst [vmem:[#allocation35_spill] sm:$0xff] %v5430_v54  ;;  %4665 = vset.pattern.permute.xlu1 %v7000_v12  ;;  %1079 = vperm.xlu0 %4688, %v5428_v53  }
 0x22d   : > { %2210 = vperm.xlu1 %4665, %v5316_v13  }
 0x22f   : > { %v5436_v55 = vpop.permute.xlu0 %1380 }
 0x230   : > { %7156 = vst [vmem:[#allocation36_spill] sm:$0xff] %v5436_v55  ;;  %v5438_v57 = vpop.permute.xlu1 %1785  ;;  %4690 = vset.pattern.permute.xlu0 %v7018_v9 }
 0x231   : > { %7157 = vst [vmem:[#allocation37_spill] sm:$0xff] %v5438_v57  ;;  %4667 = vset.pattern.permute.xlu1 %v6998_v37  ;;  %1496 = vperm.xlu0 %4690, %v5428_v53   ;;  %v7008_v37 = vmov 11   ;;  %v5539_v57 = vpop.f32.mrf.mxu1 }
 0x232   : > { %2627 = vperm.xlu1 %4667, %v5316_v13   ;;  %7178 = vst [vmem:[#allocation52_spill] sm:$0xff] %v5539_v57 }
 0x233   : > { %v5549_v16 = vpop.f32.mrf.mxu1 }
 0x234   : > { %v5444_v58 = vpop.permute.xlu0 %1797  ;;  %7180 = vst [vmem:[#allocation54_spill] sm:$0xff] %v5549_v16 }
 0x235   : > { %7158 = vst [vmem:[#allocation38_spill] sm:$0xff] %v5444_v58  ;;  %v5446_v59 = vpop.permute.xlu1 %2202  ;;  %4692 = vset.pattern.permute.xlu0 %v7004_v11  ;;  %v5558_v15 = vpop.f32.mrf.mxu1 }
 0x236   : > { %7159 = vst [vmem:[#allocation39_spill] sm:$0xff] %v5446_v59  ;;  %4669 = vset.pattern.permute.xlu1 %v7014_v40  ;;  %1913 = vperm.xlu0 %4692, %v5428_v53   ;;  %7183 = vst [vmem:[#allocation56_spill] sm:$0xff] %v5558_v15 }
 0x237   : > { %1075 = vperm.xlu1 %4669, %v5352_v24   ;;  %v5568_v58 = vpop.f32.mrf.mxu1 }
 0x238   : > { %7186 = vst [vmem:[#allocation59_spill] sm:$0xff] %v5568_v58 }
 0x239   : > { %v5452_v60 = vpop.permute.xlu0 %2214 }
 0x23a   : > { %7160 = vst [vmem:[#allocation40_spill] sm:$0xff] %v5452_v60  ;;  %v5454_v61 = vpop.permute.xlu1 %2619  ;;  %4694 = vset.pattern.permute.xlu0 %v7006_v33 }
 0x23b   : > { %7161 = vst [vmem:[#allocation41_spill] sm:$0xff] %v5454_v61  ;;  %4671 = vset.pattern.permute.xlu1 %v7018_v9  ;;  %2330 = vperm.xlu0 %4694, %v5428_v53   ;;  %v7174_v61 = vmov 7  }
 0x23c   : > { %1492 = vperm.xlu1 %4671, %v5352_v24  }
 0x23e   : > { %v5460_v63 = vpop.permute.xlu0 %944 }
 0x23f   : > { %7162 = vst [vmem:[#allocation42_spill] sm:$0xff] %v5460_v63  ;;  %v5464_v1 = vpop.permute.xlu1 %929  ;;  %4697 = vset.pattern.permute.xlu0 %v7014_v40 }
 0x240   : > { %7164 = vst [vmem:[#allocation44_spill] sm:$0xff] %v5464_v1  ;;  %4673 = vset.pattern.permute.xlu1 %v7004_v11  ;;  %1071 = vperm.xlu0 %4697, %v5462_v0  }
 0x241   : > { %1909 = vperm.xlu1 %4673, %v5352_v24  }
 0x243   : > { %v5470_v2 = vpop.permute.xlu0 %1372 }
 0x244   : > { %7165 = vst [vmem:[#allocation45_spill] sm:$0xff] %v5470_v2  ;;  %v5472_v4 = vpop.permute.xlu1 %1039  ;;  %4699 = vset.pattern.permute.xlu0 %v7018_v9 }
 0x245   : > { %4675 = vset.pattern.permute.xlu1 %v7006_v33  ;;  %1488 = vperm.xlu0 %4699, %v5462_v0  }
 0x246   : > { %2326 = vperm.xlu1 %4675, %v5352_v24  }
 0x248   : > { %v5478_v25 = vpop.permute.xlu0 %1789 }
 0x249   : > { %7166 = vst [vmem:[#allocation46_spill] sm:$0xff] %v5478_v25  ;;  %v5480_v8 = vpop.permute.xlu1 %1456  ;;  %4701 = vset.pattern.permute.xlu0 %v7004_v11  ;;  %v5580_v25 = vpop.f32.mrf.mxu1 }
 0x24a   : > { %4676 = vset.pattern.permute.xlu1 %v7002_v18  ;;  %1905 = vperm.xlu0 %4701, %v5462_v0   ;;  %v5496_v18 = vpop.f32.mrf.mxu0  ;;  %7189 = vst [vmem:[#allocation62_spill] sm:$0xff] %v5580_v25 }
 0x24b   : > { %2743 = vperm.xlu1 %4676, %v5352_v24  }
 0x24c   : > { %v5527_v47 = vpop.f32.mrf.mxu0 }
 0x24d   : > { %v5486_v56 = vpop.permute.xlu0 %2206 }
 0x24e   : > { %7167 = vst [vmem:[#allocation47_spill] sm:$0xff] %v5486_v56  ;;  %v5488_v62 = vpop.permute.xlu1 %1873  ;;  %4703 = vset.pattern.permute.xlu0 %v7006_v33  ;;  %v5535_v44 = vpop.f32.mrf.mxu0 }
 0x24f   : > { %4677 = vset.pattern.permute.xlu1 %v7008_v37  ;;  %2322 = vperm.xlu0 %4703, %v5462_v0  }
 0x250   : > { %3160 = vperm.xlu1 %4677, %v5352_v24   ;;  %v5544_v39 = vpop.f32.mrf.mxu0  ;;  %v5591_v24 = vpop.f32.mrf.mxu1 }
 0x251   : > { %7193 = vst [vmem:[#allocation66_spill] sm:$0xff] %v5591_v24 }
 0x252   : > { %v5494_v12 = vpop.permute.xlu0 %1063  ;;  %v5553_v1 = vpop.f32.mrf.mxu0 }
 0x253   : > { %v5498_v11 = vpop.permute.xlu1 %2290  ;;  %4705 = vset.pattern.permute.xlu0 %v7012_v3  ;;  %7182 = vst [vmem:[#allocation55_spill] sm:$0xff] %v5553_v1 }
 0x254   : > { %4679 = vset.pattern.permute.xlu1 %v7014_v40  ;;  %994 = vperm.xlu0 %4705, %v5496_v18   ;;  %v7170_v40 = vmov 4   ;;  %v5563_v60 = vpop.f32.mrf.mxu0 }
 0x255   : > { %1067 = vperm.xlu1 %4679, %v5386_v36   ;;  %7185 = vst [vmem:[#allocation58_spill] sm:$0xff] %v5563_v60 }
 0x256   : > { %v5572_v52 = vpop.f32.mrf.mxu0 }
 0x257   : > { %v5504_v33 = vpop.permute.xlu0 %1480  ;;  %7187 = vst [vmem:[#allocation60_spill] sm:$0xff] %v5572_v52 }
 0x258   : > { %v5506_v37 = vpop.permute.xlu1 %1059  ;;  %4707 = vset.pattern.permute.xlu0 %v7016_v7  ;;  %v5582_v2 = vpop.f32.mrf.mxu0 }
 0x259   : > { %7168 = vst [vmem:[#allocation48_spill] sm:$0xff] %v5506_v37  ;;  %4681 = vset.pattern.permute.xlu1 %v7018_v9  ;;  %1412 = vperm.xlu0 %4707, %v5496_v18   ;;  %v7173_v9 = vmov 6   ;;  %7190 = vst [vmem:[#allocation63_spill] sm:$0xff] %v5582_v2  ;;  %v7239_v37 = vmov 11  }
 0x25a   : > { %1484 = vperm.xlu1 %4681, %v5386_v36   ;;  %v5594_v5 = vpop.f32.mrf.mxu0 }
 0x25b   : > { %7194 = vst [vmem:[#allocation67_spill] sm:$0xff] %v5594_v5 }
 0x25c   : > { %v5512_v10 = vpop.permute.xlu0 %1897  ;;  %v5605_v34 = vpop.f32.mrf.mxu0 }
 0x25d   : > { %v5514_v3 = vpop.permute.xlu1 %1476  ;;  %4709 = vset.pattern.permute.xlu0 %v7170_v40  ;;  %7199 = vst [vmem:[#allocation71_spill] sm:$0xff] %v5605_v34 }
 0x25e   : > { %7169 = vst [vmem:[#allocation49_spill] sm:$0xff] %v5514_v3  ;;  %4683 = vset.pattern.permute.xlu1 %v7171_v49  ;;  %1829 = vperm.xlu0 %4709, %v5496_v18  }
 0x25f   : > { %1901 = vperm.xlu1 %4683, %v5386_v36  }
 0x261   : > { %v5520_v32 = vpop.permute.xlu0 %2314 }
 0x262   : > { %v5522_v7 = vpop.permute.xlu1 %1893  ;;  %4711 = vset.pattern.permute.xlu0 %v7173_v9 }
 0x263   : > { %7172 = vst [vmem:[#allocation50_spill] sm:$0xff] %v5522_v7  ;;  %4685 = vset.pattern.permute.xlu1 %v7174_v61  ;;  %2246 = vperm.xlu0 %4711, %v5496_v18  }
 0x264   : > { %2318 = vperm.xlu1 %4685, %v5386_v36  }
 0x266   : > { %v5530_v50 = vpop.permute.xlu0 %1055 }
 0x267   : > { %v5532_v59 = vpop.permute.xlu1 %2310  ;;  %4713 = vset.pattern.permute.xlu0 %v7176_v28 }
 0x268   : > { %7175 = vst [vmem:[#allocation51_spill] sm:$0xff] %v5532_v59  ;;  %4687 = vset.pattern.permute.xlu1 %v7177_v48  ;;  %2759 = vperm.xlu0 %4713, %v5496_v18  }
 0x269   : > { %979 = vperm.xlu1 %4687, %v5428_v53  }
 0x26b   : > { %v5542_v22 = vpop.permute.xlu0 %1472 }
 0x26c   : > { %v5546_v45 = vpop.permute.xlu1 %2727  ;;  %4715 = vset.pattern.permute.xlu0 %v7177_v48 }
 0x26d   : > { %7179 = vst [vmem:[#allocation53_spill] sm:$0xff] %v5546_v45  ;;  %4689 = vset.pattern.permute.xlu1 %v7181_v17  ;;  %984 = vperm.xlu0 %4715, %v5527_v47  }
 0x26e   : > { %1400 = vperm.xlu1 %4689, %v5428_v53  }
 0x270   : > { %v5556_v54 = vpop.permute.xlu0 %1889 }
 0x271   : > { %v5560_v51 = vpop.permute.xlu1 %1051  ;;  %4717 = vset.pattern.permute.xlu0 %v7181_v17 }
 0x272   : > { %7184 = vst [vmem:[#allocation57_spill] sm:$0xff] %v5560_v51  ;;  %4691 = vset.pattern.permute.xlu1 %v7170_v40  ;;  %1404 = vperm.xlu0 %4717, %v5527_v47  }
 0x273   : > { %1817 = vperm.xlu1 %4691, %v5428_v53  }
 0x275   : > { %v5570_v55 = vpop.permute.xlu0 %2306 }
 0x276   : > { %v5574_v56 = vpop.permute.xlu1 %1468  ;;  %4719 = vset.pattern.permute.xlu0 %v7170_v40 }
 0x277   : > { %7188 = vst [vmem:[#allocation61_spill] sm:$0xff] %v5574_v56  ;;  %4693 = vset.pattern.permute.xlu1 %v7173_v9  ;;  %1821 = vperm.xlu0 %4719, %v5527_v47  }
 0x278   : > { %2234 = vperm.xlu1 %4693, %v5428_v53  }
 0x27a   : > { %v5584_v63 = vpop.permute.xlu0 %974 }
 0x27b   : > { %7191 = vst [vmem:[#allocation64_spill] sm:$0xff] %v5584_v63  ;;  %v5586_v45 = vpop.permute.xlu1 %1885  ;;  %4721 = vset.pattern.permute.xlu0 %v7173_v9  ;;  %v5601_v63 = vpop.f32.mrf.mxu1 }
 0x27c   : > { %7192 = vst [vmem:[#allocation65_spill] sm:$0xff] %v5586_v45  ;;  %4695 = vset.pattern.permute.xlu1 %v7176_v28  ;;  %2238 = vperm.xlu0 %4721, %v5527_v47   ;;  %7198 = vst [vmem:[#allocation70_spill] sm:$0xff] %v5601_v63 }
 0x27d   : > { %2747 = vperm.xlu1 %4695, %v5428_v53   ;;  %v5610_v36 = vpop.f32.mrf.mxu1 }
 0x27e   : > { %7201 = vst [vmem:[#allocation73_spill] sm:$0xff] %v5610_v36 }
 0x27f   : > { %v5596_v42 = vpop.permute.xlu0 %1396  ;;  %v5620_v45 = vpop.f32.mrf.mxu1 }
 0x280   : > { %7195 = vst [vmem:[#allocation68_spill] sm:$0xff] %v5596_v42  ;;  %v5598_v13 = vpop.permute.xlu1 %2302  ;;  %4725 = vset.pattern.permute.xlu0 %v7197_v38  ;;  %v7203_v42 = vmov 3   ;;  %7205 = vst [vmem:[#allocation76_spill] sm:$0xff] %v5620_v45 }
 0x281   : > { %7196 = vst [vmem:[#allocation69_spill] sm:$0xff] %v5598_v13  ;;  %4696 = vset.pattern.permute.xlu1 %v7177_v48  ;;  %1095 = vperm.xlu0 %4725, %v5535_v44   ;;  %v5615_v13 = vpop.f32.mrf.mxu0 }
 0x282   : > { %969 = vperm.xlu1 %4696, %v5462_v0   ;;  %7204 = vst [vmem:[#allocation75_spill] sm:$0xff] %v5615_v13 }
 0x283   : > { %v5624_v34 = vpop.f32.mrf.mxu0 }
 0x284   : > { %v5608_v46 = vpop.permute.xlu0 %1813  ;;  %7207 = vst [vmem:[#allocation78_spill] sm:$0xff] %v5624_v34 }
 0x285   : > { %7200 = vst [vmem:[#allocation72_spill] sm:$0xff] %v5608_v46  ;;  %v5612_v53 = vpop.permute.xlu1 %959  ;;  %4727 = vset.pattern.permute.xlu0 %v7203_v42  ;;  %v5634_v51 = vpop.f32.mrf.mxu0 }
 0x286   : > { %7202 = vst [vmem:[#allocation74_spill] sm:$0xff] %v5612_v53  ;;  %4698 = vset.pattern.permute.xlu1 %v7181_v17  ;;  %1512 = vperm.xlu0 %4727, %v5535_v44   ;;  %v5632_v53 = vpop.f32.mrf.mxu1  ;;  %7210 = vst [vmem:[#allocation81_spill] sm:$0xff] %v5634_v51 }
 0x287   : > { %1392 = vperm.xlu1 %4698, %v5462_v0   ;;  %7209 = vst [vmem:[#allocation80_spill] sm:$0xff] %v5632_v53 }
 0x289   : > { %v5622_v56 = vpop.permute.xlu0 %2230 }
 0x28a   : > { %7206 = vst [vmem:[#allocation77_spill] sm:$0xff] %v5622_v56  ;;  %v5626_v46 = vpop.permute.xlu1 %1384  ;;  %4729 = vset.pattern.permute.xlu0 %v7171_v49  ;;  %v5643_v56 = vpop.f32.mrf.mxu1 }
 0x28b   : > { %7208 = vst [vmem:[#allocation79_spill] sm:$0xff] %v5626_v46  ;;  %4700 = vset.pattern.permute.xlu1 %v7170_v40  ;;  %1929 = vperm.xlu0 %4729, %v5535_v44   ;;  %7213 = vst [vmem:[#allocation84_spill] sm:$0xff] %v5643_v56  ;;  %v5646_v46 = vpop.f32.mrf.mxu0 }
 0x28c   : > { %1809 = vperm.xlu1 %4700, %v5462_v0   ;;  %7214 = vst [vmem:[#allocation85_spill] sm:$0xff] %v5646_v46 }
 0x28e   : > { %v5636_v24 = vpop.permute.xlu0 %964 }
 0x28f   : > { %7211 = vst [vmem:[#allocation82_spill] sm:$0xff] %v5636_v24  ;;  %v5638_v45 = vpop.permute.xlu1 %1801  ;;  %4731 = vset.pattern.permute.xlu0 %v7174_v61  ;;  %v5653_v24 = vpop.f32.mrf.mxu1 }
 0x290   : > { %7212 = vst [vmem:[#allocation83_spill] sm:$0xff] %v5638_v45  ;;  %4702 = vset.pattern.permute.xlu1 %v7173_v9  ;;  %2346 = vperm.xlu0 %4731, %v5535_v44   ;;  %7217 = vst [vmem:[#allocation88_spill] sm:$0xff] %v5653_v24  ;;  %v5657_v45 = vpop.f32.mrf.mxu0 }
 0x291   : > { %2226 = vperm.xlu1 %4702, %v5462_v0   ;;  %7218 = vst [vmem:[#allocation89_spill] sm:$0xff] %v5657_v45  ;;  %v5662_v7 = vpop.f32.mrf.mxu1 }
 0x292   : > { %7220 = vst [vmem:[#allocation91_spill] sm:$0xff] %v5662_v7 }
 0x293   : > { %v5648_v59 = vpop.permute.xlu0 %1388 }
 0x294   : > { %7215 = vst [vmem:[#allocation86_spill] sm:$0xff] %v5648_v59  ;;  %v5650_v53 = vpop.permute.xlu1 %2218  ;;  %4734 = vset.pattern.permute.xlu0 %v7197_v38  ;;  %v5667_v59 = vpop.f32.mrf.mxu0 }
 0x295   : > { %7216 = vst [vmem:[#allocation87_spill] sm:$0xff] %v5650_v53  ;;  %4704 = vset.pattern.permute.xlu1 %v7176_v28  ;;  %1087 = vperm.xlu0 %4734, %v5544_v39   ;;  %7222 = vst [vmem:[#allocation93_spill] sm:$0xff] %v5667_v59  ;;  %v5672_v53 = vpop.f32.mrf.mxu1 }
 0x296   : > { %2739 = vperm.xlu1 %4704, %v5462_v0   ;;  %7223 = vst [vmem:[#allocation94_spill] sm:$0xff] %v5672_v53  ;;  %v5676_v0 = vpop.f32.mrf.mxu0 }
 0x297   : > { %7225 = vst [vmem:[#allocation96_spill] sm:$0xff] %v5676_v0 }
 0x298   : > { %v5660_v51 = vpop.permute.xlu0 %1805  ;;  %v5686_v7 = vpop.f32.mrf.mxu0 }
 0x299   : > { %7219 = vst [vmem:[#allocation90_spill] sm:$0xff] %v5660_v51  ;;  %v5664_v46 = vpop.permute.xlu1 %949  ;;  %4736 = vset.pattern.permute.xlu0 %v7203_v42  ;;  %7228 = vst [vmem:[#allocation99_spill] sm:$0xff] %v5686_v7  ;;  %v1101_v7 = vmul.f32 %v5558_v15, %v5368_v29 }
 0x29a   : > { %7221 = vst [vmem:[#allocation92_spill] sm:$0xff] %v5664_v46  ;;  %4706 = vset.pattern.permute.xlu1 %v7197_v38  ;;  %1504 = vperm.xlu0 %4736, %v5544_v39   ;;  %v5684_v46 = vpop.f32.mrf.mxu1 }
 0x29b   : > { %1091 = vperm.xlu1 %4706, %v5496_v18   ;;  %7227 = vst [vmem:[#allocation98_spill] sm:$0xff] %v5684_v46 }
 0x29d   : > { %v5674_v5 = vpop.permute.xlu0 %2222 }
 0x29e   : > { %7224 = vst [vmem:[#allocation95_spill] sm:$0xff] %v5674_v5  ;;  %v5678_v51 = vpop.permute.xlu1 %1376  ;;  %4738 = vset.pattern.permute.xlu0 %v7171_v49  ;;  %v5698_v5 = vpop.f32.mrf.mxu0 }
 0x29f   : > { %7226 = vst [vmem:[#allocation97_spill] sm:$0xff] %v5678_v51  ;;  %4708 = vset.pattern.permute.xlu1 %v7203_v42  ;;  %1921 = vperm.xlu0 %4738, %v5544_v39   ;;  %v5695_v51 = vpop.f32.mrf.mxu1  ;;  %7232 = vst [vmem:[#allocation103_spill] sm:$0xff] %v5698_v5 }
 0x2a0   : > { %1508 = vperm.xlu1 %4708, %v5496_v18   ;;  %7231 = vst [vmem:[#allocation102_spill] sm:$0xff] %v5695_v51 }
 0x2a2   : > { %v5688_v3 = vpop.permute.xlu0 %2735 }
 0x2a3   : > { %7229 = vst [vmem:[#allocation100_spill] sm:$0xff] %v5688_v3  ;;  %v5690_v53 = vpop.permute.xlu1 %1793  ;;  %4740 = vset.pattern.permute.xlu0 %v7174_v61  ;;  %v5705_v3 = vpop.f32.mrf.mxu1 }
 0x2a4   : > { %7230 = vst [vmem:[#allocation101_spill] sm:$0xff] %v5690_v53  ;;  %4710 = vset.pattern.permute.xlu1 %v7171_v49  ;;  %2338 = vperm.xlu0 %4740, %v5544_v39   ;;  %7234 = vst [vmem:[#allocation105_spill] sm:$0xff] %v5705_v3  ;;  %v5709_v53 = vpop.f32.mrf.mxu0 }
 0x2a5   : > { %1925 = vperm.xlu1 %4710, %v5496_v18   ;;  %7235 = vst [vmem:[#allocation106_spill] sm:$0xff] %v5709_v53  ;;  %v5716_v5 = vpop.f32.mrf.mxu1  ;;  %v1518_v53 = vmul.f32 %v5572_v52, %v5376_v31 }
 0x2a6   : > { %7236 = vst [vmem:[#allocation107_spill] sm:$0xff] %v5716_v5  ;;  %v5721_v25 = vpop.f32.mrf.mxu0 }
 0x2a7   : > { %v5700_v0 = vpop.permute.xlu0 %1079  ;;  %7238 = vst [vmem:[#allocation109_spill] sm:$0xff] %v5721_v25  ;;  %v5727_v27 = vpop.f32.mrf.mxu1 }
 0x2a8   : > { %v5702_v46 = vpop.permute.xlu1 %2210  ;;  %4741 = vset.pattern.permute.xlu0 %v7176_v28  ;;  %7240 = vst [vmem:[#allocation110_spill] sm:$0xff] %v5727_v27  ;;  %v5732_v15 = vpop.f32.mrf.mxu0 }
 0x2a9   : > { %7233 = vst [vmem:[#allocation104_spill] sm:$0xff] %v5702_v46  ;;  %4712 = vset.pattern.permute.xlu1 %v7174_v61  ;;  %2755 = vperm.xlu0 %4741, %v5544_v39   ;;  %7241 = vst [vmem:[#allocation111_spill] sm:$0xff] %v5732_v15 }
 0x2aa   : > { %2342 = vperm.xlu1 %4712, %v5496_v18   ;;  %v5739_v23 = vpop.f32.mrf.mxu0 }
 0x2ab   : > { %7242 = vst [vmem:[#allocation112_spill] sm:$0xff] %v5739_v23 }
 0x2ac   : > { %v5714_v51 = vpop.permute.xlu0 %1496 }
 0x2ad   : > { %v5718_v46 = vpop.permute.xlu1 %2627  ;;  %1136 = vrot.lane.b32.xlu0 %v1101_v7, %s4935_s15  ;;  %v1935_v7 = vmul.f32 %v5727_v27, %v5384_v35 }
 0x2ae   : > { %7237 = vst [vmem:[#allocation108_spill] sm:$0xff] %v5718_v46  ;;  %4714 = vset.pattern.permute.xlu1 %v7239_v37 }
 0x2af   : > { %3176 = vperm.xlu1 %4714, %v5496_v18  }
 0x2b1   : > { %1553 = vrot.lane.b32.xlu0 %v1518_v53, %s4935_s15  ;;  %v5730_v29 = vpop.permute.xlu0 %1913  ;;  %v2352_v53 = vmul.f32 %v5739_v23, %v5394_v41 }
 0x2b2   : > { %v5734_v46 = vpop.permute.xlu1 %1075 }
 0x2b3   : > { %4716 = vset.pattern.permute.xlu1 %v7197_v38  ;;  %v1099_v38 = vmul.f32 %v5472_v4, %v5568_v58  ;;  %v5768_v4 = vpop.f32.mrf.mxu1 }
 0x2b4   : > { %1083 = vperm.xlu1 %4716, %v5527_v47   ;;  %7243 = vst [vmem:[#allocation113_spill] sm:$0xff] %v5768_v4 }
 0x2b5   : > { %1970 = vrot.lane.b32.xlu0 %v1935_v7, %s4935_s15 }
 0x2b6   : > { %v5743_v31 = vpop.permute.xlu0 %2330 }
 0x2b7   : > { %v5747_v52 = vpop.permute.xlu1 %1492 }
 0x2b8   : > { %4718 = vset.pattern.permute.xlu1 %v7203_v42  ;;  %v1516_v42 = vmul.f32 %v5480_v8, %v5582_v2  ;;  %v5777_v8 = vpop.f32.mrf.mxu0  ;;  %v4831_v2 = vld [vmem:[#allocation3 + $0x168] ss:$28 sps:$4 sm:$0xff]  }
 0x2b9   : > { %1500 = vperm.xlu1 %4718, %v5527_v47   ;;  %2387 = vrot.lane.b32.xlu0 %v2352_v53, %s4935_s15  ;;  %7244 = vst [vmem:[#allocation114_spill] sm:$0xff] %v5777_v8 }
 0x2bb   : > { %v5754_v35 = vpop.permute.xlu0 %1071 }
 0x2bc   : > { %v5756_v27 = vpop.permute.xlu1 %1909 }
 0x2bd   : > { %4720 = vset.pattern.permute.xlu1 %v7171_v49  ;;  %1132 = vrot.lane.b32.xlu0 %v1099_v38, %s4935_s15  ;;  %v1933_v49 = vmul.f32 %v5488_v62, %v5768_v4  ;;  %v5786_v62 = vpop.f32.mrf.mxu1  ;;  %v4830_v4 = vld [vmem:[#allocation3 + $0x1a0] ss:$28 sps:$4 sm:$0xff]  }
 0x2be   : > { %1917 = vperm.xlu1 %4720, %v5527_v47   ;;  %7246 = vst [vmem:[#allocation116_spill] sm:$0xff] %v5786_v62  ;;  %4464 = vmatprep.subr.bf16.mxu1 %v4830_v4 }
 0x2bf   : > { %4465 = vmatpush3.bf16.msra.mxu1 %v4830_v4  ;;  %v4832_v4 = vld [vmem:[#allocation3 + $0x130] ss:$28 sps:$4 sm:$0xff]  }
 0x2c0   : > { %v5763_v41 = vpop.permute.xlu0 %1488  ;;  %4466 = vmatprep.subr.bf16.mxu1 %v4831_v2 }
 0x2c1   : > { %v5765_v7 = vpop.permute.xlu1 %2326  ;;  %1549 = vrot.lane.b32.xlu0 %v1516_v42, %s4935_s15  ;;  %v2350_v42 = vmul.f32 %v5498_v11, %v5777_v8  ;;  %v5797_v11 = vpop.f32.mrf.mxu1 }
 0x2c2   : > { %4722 = vset.pattern.permute.xlu1 %v7174_v61  ;;  %7247 = vst [vmem:[#allocation117_spill] sm:$0xff] %v5797_v11 }
 0x2c3   : > { %2334 = vperm.xlu1 %4722, %v5527_v47   ;;  %4467 = vmatpush3.bf16.msra.mxu1 %v4831_v2 }
 0x2c4   : > { %4468 = vmatprep.subr.bf16.mxu1 %v4832_v4 }
 0x2c5   : > { %1966 = vrot.lane.b32.xlu0 %v1933_v49, %s4935_s15  ;;  %v5775_v53 = vpop.permute.xlu0 %1905  ;;  %v1105_v49 = vmul.f32 %v5601_v63, %v5494_v12  ;;  %v5803_v12 = vpop.f32.mrf.mxu0 }
 0x2c6   : > { %v5779_v38 = vpop.permute.xlu1 %2743  ;;  %7249 = vst [vmem:[#allocation119_spill] sm:$0xff] %v5803_v12  ;;  %v5809_v63 = vpop.f32.mrf.mxu1 }
 0x2c7   : > { %7245 = vst [vmem:[#allocation115_spill] sm:$0xff] %v5779_v38  ;;  %4723 = vset.pattern.permute.xlu1 %v7176_v28  ;;  %7250 = vst [vmem:[#allocation120_spill] sm:$0xff] %v5809_v63  ;;  %4469 = vmatpush3.bf16.msra.mxu1 %v4832_v4  ;;  %v1520_v4 = vmul.f32 %v5542_v22, %v5624_v34  ;;  %v4836_v22 = vld [vmem:[#allocation3 + $0x50] ss:$28 sps:$4 sm:$0xff]  }
 0x2c8   : > { %2751 = vperm.xlu1 %4723, %v5527_v47  }
 0x2c9   : > { %2383 = vrot.lane.b32.xlu0 %v2350_v42, %s4935_s15  ;;  %v1522_v42 = vmul.f32 %v5615_v13, %v5504_v33  ;;  %v1939_v33 = vmul.f32 %v5809_v63, %v5512_v10  ;;  %v4833_v10 = vld [vmem:[#allocation3 + $0xf8] ss:$28 sps:$4 sm:$0xff]  }
 0x2ca   : > { %v5788_v61 = vpop.permute.xlu0 %2322  ;;  %4470 = vmatprep.subr.bf16.mxu1 %v4833_v10 }
 0x2cb   : > { %v5792_v23 = vpop.permute.xlu1 %3160  ;;  %4471 = vmatpush3.bf16.msra.mxu1 %v4833_v10 }
 0x2cc   : > { %4724 = vset.pattern.permute.xlu1 %v7177_v48 }
 0x2cd   : > { %999 = vperm.xlu1 %4724, %v5535_v44   ;;  %1144 = vrot.lane.b32.xlu0 %v1105_v49, %s4935_s15  ;;  %v5811_v49 = vpop.f32.mrf.mxu0 }
 0x2ce   : > { %7251 = vst [vmem:[#allocation121_spill] sm:$0xff] %v5811_v49 }
 0x2cf   : > { %v5801_v8 = vpop.permute.xlu0 %994  ;;  %v5816_v13 = vpop.f32.mrf.mxu0 }
 0x2d0   : > { %7248 = vst [vmem:[#allocation118_spill] sm:$0xff] %v5801_v8  ;;  %v5805_v58 = vpop.permute.xlu1 %1067  ;;  %7252 = vst [vmem:[#allocation122_spill] sm:$0xff] %v5816_v13 }
 0x2d1   : > { %4726 = vset.pattern.permute.xlu1 %v7181_v17  ;;  %1561 = vrot.lane.b32.xlu0 %v1522_v42, %s4935_s15  ;;  %v2356_v42 = vmul.f32 %v5816_v13, %v5520_v32  ;;  %v4835_v13 = vld [vmem:[#allocation3 + $0x88] ss:$28 sps:$4 sm:$0xff]   ;;  %v5852_v34 = vpop.f32.mrf.mxu0 }
 0x2d2   : > { %1416 = vperm.xlu1 %4726, %v5535_v44   ;;  %7257 = vst [vmem:[#allocation127_spill] sm:$0xff] %v5852_v34 }
 0x2d4   : > { %v5818_v8 = vpop.permute.xlu0 %1412 }
 0x2d5   : > { %7253 = vst [vmem:[#allocation123_spill] sm:$0xff] %v5818_v8  ;;  %v5820_v38 = vpop.permute.xlu1 %1484  ;;  %1978 = vrot.lane.b32.xlu0 %v1939_v33, %s4935_s15  ;;  %v1103_v33 = vmul.f32 %v5530_v50, %v5610_v36  ;;  %v4834_v8 = vld [vmem:[#allocation3 + $0xc0] ss:$28 sps:$4 sm:$0xff]   ;;  %v5846_v50 = vpop.f32.mrf.mxu1 }
 0x2d6   : > { %4728 = vset.pattern.permute.xlu1 %v7170_v40  ;;  %4472 = vmatprep.subr.bf16.mxu1 %v4834_v8  ;;  %7256 = vst [vmem:[#allocation126_spill] sm:$0xff] %v5846_v50  ;;  %v1937_v10 = vmul.f32 %v5556_v54, %v5846_v50  ;;  %v4837_v54 = vld [vmem:[#allocation3 + $0x18] ss:$28 sps:$4 sm:$0xff]  }
 0x2d7   : > { %1833 = vperm.xlu1 %4728, %v5535_v44   ;;  %4473 = vmatpush3.bf16.msra.mxu1 %v4834_v8 }
 0x2d8   : > { %4474 = vmatprep.subr.bf16.mxu1 %v4835_v13 }
 0x2d9   : > { %2395 = vrot.lane.b32.xlu0 %v2356_v42, %s4935_s15  ;;  %v5828_v2 = vpop.permute.xlu0 %1829 }
 0x2da   : > { %7254 = vst [vmem:[#allocation124_spill] sm:$0xff] %v5828_v2  ;;  %v5830_v63 = vpop.permute.xlu1 %1901 }
 0x2db   : > { %4730 = vset.pattern.permute.xlu1 %v7173_v9  ;;  %4475 = vmatpush3.bf16.msra.mxu1 %v4835_v13  ;;  %v5863_v13 = vpop.f32.mrf.mxu1 }
 0x2dc   : > { %2250 = vperm.xlu1 %4730, %v5535_v44   ;;  %4476 = vmatprep.subr.bf16.mxu1 %v4836_v22  ;;  %7260 = vst [vmem:[#allocation130_spill] sm:$0xff] %v5863_v13 }
 0x2dd   : > { %1140 = vrot.lane.b32.xlu0 %v1103_v33, %s4935_s15 }
 0x2de   : > { %v5837_v32 = vpop.permute.xlu0 %2246 }
 0x2df   : > { %7255 = vst [vmem:[#allocation125_spill] sm:$0xff] %v5837_v32  ;;  %v5841_v42 = vpop.permute.xlu1 %2318  ;;  %4477 = vmatpush3.bf16.msra.mxu1 %v4836_v22 }
 0x2e0   : > { %4732 = vset.pattern.permute.xlu1 %v7176_v28  ;;  %4478 = vmatprep.subr.bf16.mxu1 %v4837_v54 }
 0x2e1   : > { %2763 = vperm.xlu1 %4732, %v5535_v44   ;;  %1557 = vrot.lane.b32.xlu0 %v1520_v4, %s4935_s15  ;;  %v2354_v4 = vmul.f32 %v5570_v55, %v5852_v34  ;;  %v5872_v55 = vpop.f32.mrf.mxu1  ;;  %v4838_v34 = vld [vmem:[%s5050_s24 + $0x8] sm:$0xff]  }
 0x2e2   : > { %7262 = vst [vmem:[#allocation132_spill] sm:$0xff] %v5872_v55 }
 0x2e3   : > { %v5850_v33 = vpop.permute.xlu0 %2759  ;;  %4479 = vmatpush3.bf16.msra.mxu1 %v4837_v54  ;;  %v5888_v54 = vpop.f32.mrf.mxu0 }
 0x2e4   : > { %v5854_v8 = vpop.permute.xlu1 %979  ;;  %7266 = vst [vmem:[#allocation136_spill] sm:$0xff] %v5888_v54 }
 0x2e5   : > { %7258 = vst [vmem:[#allocation128_spill] sm:$0xff] %v5854_v8  ;;  %4733 = vset.pattern.permute.xlu1 %v7177_v48  ;;  %1974 = vrot.lane.b32.xlu0 %v1937_v10, %s4935_s15  ;;  %v1109_v48 = vmul.f32 %v5643_v56, %v5700_v0  ;;  %v5885_v0 = vpop.f32.mrf.mxu1 }
 0x2e6   : > { %989 = vperm.xlu1 %4733, %v5544_v39   ;;  %4481 = vmatmul.mubr.bf16.vlgmr.msra.gmra.mxu1 %v4838_v34  ;;  %7265 = vst [vmem:[#allocation135_spill] sm:$0xff] %v5885_v0  ;;  %v1943_v34 = vmul.f32 %v5885_v0, %v5730_v29  ;;  %v4841_v29 = vld [vmem:[%s5050_s24 + $0x20] sm:$0xff]  }
 0x2e8   : > { %v5861_v50 = vpop.permute.xlu0 %984 }
 0x2e9   : > { %7259 = vst [vmem:[#allocation129_spill] sm:$0xff] %v5861_v50  ;;  %v5865_v36 = vpop.permute.xlu1 %1400  ;;  %2391 = vrot.lane.b32.xlu0 %v2354_v4, %s4935_s15  ;;  %v1526_v4 = vmul.f32 %v5657_v45, %v5714_v51 }
 0x2ea   : > { %7261 = vst [vmem:[#allocation131_spill] sm:$0xff] %v5865_v36  ;;  %4735 = vset.pattern.permute.xlu1 %v7181_v17  ;;  %v4839_v17 = vld [vmem:[%s5050_s24 + $0x10] sm:$0xff]  }
 0x2eb   : > { %1408 = vperm.xlu1 %4735, %v5544_v39   ;;  %4484 = vmatprep.mubr.bf16.mxu1 %v4839_v17 }
 0x2ed   : > { %1152 = vrot.lane.b32.xlu0 %v1109_v48, %s4935_s15  ;;  %v5875_v10 = vpop.permute.xlu0 %1404 }
 0x2ee   : > { %7263 = vst [vmem:[#allocation133_spill] sm:$0xff] %v5875_v10  ;;  %v5877_v22 = vpop.permute.xlu1 %1817  ;;  %v7300_v10 = vld [vmem:[#allocation106_spill] sm:$0xff] }
 0x2ef   : > { %7264 = vst [vmem:[#allocation134_spill] sm:$0xff] %v5877_v22  ;;  %4737 = vset.pattern.permute.xlu1 %v7170_v40  ;;  %v5896_v22 = vpop.f32.mrf.mxu0 }
 0x2f0   : > { %1825 = vperm.xlu1 %4737, %v5544_v39   ;;  %7269 = vst [vmem:[#allocation139_spill] sm:$0xff] %v5896_v22 }
 0x2f1   : > { %1569 = vrot.lane.b32.xlu0 %v1526_v4, %s4935_s15  ;;  %v5901_v40 = vpop.f32.mrf.mxu0  ;;  %v4840_v4 = vld [vmem:[%s5050_s24 + $0x18] sm:$0xff]  }
 0x2f2   : > { %v5890_v48 = vpop.permute.xlu0 %1821  ;;  %7270 = vst [vmem:[#allocation140_spill] sm:$0xff] %v5901_v40  ;;  %4485 = vmatmul.mubr.bf16.gmra.mxu1 %v4840_v4  ;;  %v2360_v17 = vmul.f32 %v5901_v40, %v5743_v31  ;;  %v4843_v40 = vld [vmem:[%s5050_s24 + $0x30] sm:$0xff]  }
 0x2f3   : > { %7267 = vst [vmem:[#allocation137_spill] sm:$0xff] %v5890_v48  ;;  %v5894_v51 = vpop.permute.xlu1 %2234  ;;  %4488 = vmatprep.mubr.bf16.mxu1 %v4841_v29  ;;  %v4842_v29 = vld [vmem:[%s5050_s24 + $0x28] sm:$0xff]  }
 0x2f4   : > { %7268 = vst [vmem:[#allocation138_spill] sm:$0xff] %v5894_v51  ;;  %4739 = vset.pattern.permute.xlu1 %v7173_v9  ;;  %v1107_v9 = vmul.f32 %v5754_v35, %v5653_v24  ;;  %v7296_v24 = vld [vmem:[#allocation102_spill] sm:$0xff] }
 0x2f5   : > { %2242 = vperm.xlu1 %4739, %v5544_v39   ;;  %1986 = vrot.lane.b32.xlu0 %v1943_v34, %s4935_s15  ;;  %v1100_v34 = vmul.f32 %v5539_v57, %v5318_v14  ;;  %v1517_v14 = vmul.f32 %v5553_v1, %v5336_v20  ;;  %v5930_v57 = vpop.f32.mrf.mxu1 }
 0x2f6   : > { %7273 = vst [vmem:[#allocation143_spill] sm:$0xff] %v5930_v57 }
 0x2f7   : > { %v5906_v48 = vpop.permute.xlu0 %2238 }
 0x2f8   : > { %7271 = vst [vmem:[#allocation141_spill] sm:$0xff] %v5906_v48  ;;  %v5909_v51 = vpop.permute.xlu1 %2747 }
 0x2f9   : > { %4742 = vset.pattern.permute.xlu1 %v7239_v37  ;;  %2403 = vrot.lane.b32.xlu0 %v2360_v17, %s4935_s15  ;;  %v1524_v17 = vmul.f32 %v5763_v41, %v5667_v59  ;;  %v1941_v41 = vmul.f32 %v5775_v53, %v5930_v57  ;;  %v2351_v53 = vmul.f32 %v5721_v25, %v5370_v30  ;;  %v7279_v30 = vld [vmem:[#allocation19_spill] sm:$0xff]  ;;  %v5973_v25 = vpop.f32.mrf.mxu1 }
 0x2fa   : > { %3172 = vperm.xlu1 %4742, %v5544_v39   ;;  %4489 = vmatmul.mubr.bf16.gmra.mxu1 %v4842_v29  ;;  %v4844_v29 = vld [vmem:[%s5050_s24 + $0x38] sm:$0xff]   ;;  %7281 = vst [vmem:[#allocation19_spill] sm:$0xff] %v5973_v25  ;;  %v7289_v57 = vld [vmem:[#allocation103_spill] sm:$0xff] }
 0x2fb   : > { %4492 = vmatprep.mubr.bf16.mxu1 %v4843_v40  ;;  %v5940_v40 = vpop.f32.mrf.mxu0 }
 0x2fc   : > { %v1096_v31 = vpop.permute.xlu0 %1095  ;;  %7275 = vst [vmem:[#allocation145_spill] sm:$0xff] %v5940_v40 }
 0x2fd   : > { %v5918_v4 = vpop.permute.xlu1 %969  ;;  %1148 = vrot.lane.b32.xlu0 %v1107_v9, %s4935_s15 }
 0x2fe   : > { %7272 = vst [vmem:[#allocation142_spill] sm:$0xff] %v5918_v4  ;;  %1134 = vrot.lane.b32.xlu1 %v1100_v34, %s4935_s15  ;;  %v1934_v34 = vmul.f32 %v5705_v3, %v5354_v26  ;;  %v7283_v3 = vld [vmem:[#allocation62_spill] sm:$0xff] }
 0x2ff   : > { %4743 = vset.pattern.permute.xlu1 %v7176_v28 }
 0x301   : > { %1565 = vrot.lane.b32.xlu0 %v1524_v17, %s4935_s15  ;;  %v1513_v35 = vpop.permute.xlu0 %1512  ;;  %v2358_v17 = vmul.f32 %v5788_v61, %v5940_v40  ;;  %v1515_v61 = vmul.f32 %v5342_v21, %v5563_v60  ;;  %v7280_v21 = vld [vmem:[#allocation21_spill] sm:$0xff]  ;;  %v7288_v40 = vld [vmem:[#allocation67_spill] sm:$0xff] }
 0x302   : > { %v5932_v9 = vpop.permute.xlu1 %1392  ;;  %1551 = vrot.lane.b32.xlu1 %v1517_v14, %s4935_s15  ;;  %4493 = vmatmul.mubr.bf16.gmra.mxu1 %v4844_v29  ;;  %v1098_v14 = vmul.f32 %v5334_v19, %v5549_v16  ;;  %v7284_v16 = vld [vmem:[#allocation98_spill] sm:$0xff]  ;;  %v1530_v48 = vmul.f32 %v7289_v57, %v1513_v35 }
 0x303   : > { %7274 = vst [vmem:[#allocation144_spill] sm:$0xff] %v5932_v9 }
 0x305   : > { %1982 = vrot.lane.b32.xlu0 %v1941_v41, %s4935_s15 }
 0x306   : > { %1968 = vrot.lane.b32.xlu1 %v1934_v34, %s4935_s15  ;;  %v1930_v20 = vpop.permute.xlu0 %1929 }
 0x307   : > { %v5946_v1 = vpop.permute.xlu1 %1809 }
 0x308   : > { %7276 = vst [vmem:[#allocation146_spill] sm:$0xff] %v5946_v1 }
 0x309   : > { %2399 = vrot.lane.b32.xlu0 %v2358_v17, %s4935_s15  ;;  %v1932_v17 = vmul.f32 %v7279_v30, %v5716_v5  ;;  %v7282_v5 = vld [vmem:[#allocation48_spill] sm:$0xff] }
 0x30a   : > { %2385 = vrot.lane.b32.xlu1 %v2351_v53, %s4935_s15  ;;  %v1104_v60 = vmul.f32 %v7283_v3, %v7282_v5 }
 0x30b   : > { %v2347_v26 = vpop.permute.xlu0 %2346 }
 0x30c   : > { %v5954_v41 = vpop.permute.xlu1 %2226 }
 0x30d   : > { %7277 = vst [vmem:[#allocation147_spill] sm:$0xff] %v5954_v41  ;;  %2719 = vperm.xlu0 %4741, %v5280_v43   ;;  %v1113_v41 = vmul.f32 %v7284_v16, %v1096_v31 }
 0x30e   : > { %1130 = vrot.lane.b32.xlu1 %v1098_v14, %s4935_s15  ;;  %v2349_v14 = vmul.f32 %v7280_v21, %v5732_v15  ;;  %v5986_v21 = vpop.f32.mrf.mxu0 }
 0x30f   : > { %7286 = vst [vmem:[#allocation48_spill] sm:$0xff] %v5986_v21 }
 0x310   : > { %v1088_v34 = vpop.permute.xlu0 %1087  ;;  %v5997_v31 = vpop.f32.mrf.mxu0 }
 0x311   : > { %v5960_v29 = vpop.permute.xlu1 %2739  ;;  %2703 = vperm.xlu0 %4741, %v5201_v6   ;;  %7290 = vst [vmem:[#allocation98_spill] sm:$0xff] %v5997_v31 }
 0x312   : > { %7278 = vst [vmem:[#allocation148_spill] sm:$0xff] %v5960_v29  ;;  %1547 = vrot.lane.b32.xlu1 %v1515_v61, %s4935_s15 }
 0x315   : > { %4749 = vset.pattern.permute.xlu0 %v7239_v37  ;;  %v1505_v19 = vpop.permute.xlu0 %1504 }
 0x316   : > { %v5967_v53 = vpop.permute.xlu1 %1091  ;;  %1964 = vrot.lane.b32.xlu1 %v1932_v17, %s4935_s15  ;;  %3180 = vperm.xlu0 %4749, %v5535_v44   ;;  %v5982_v17 = vpop.f32.mrf.mxu1 }
 0x317   : > { %7285 = vst [vmem:[#allocation21_spill] sm:$0xff] %v5982_v17 }
 0x318   : > { %v5995_v5 = vpop.f32.mrf.mxu1 }
 0x319   : > { %v1947_v3 = vmul.f32 %v5995_v5, %v1930_v20  ;;  %v7294_v20 = vld [vmem:[#allocation66_spill] sm:$0xff] }
 0x31a   : > { %2381 = vrot.lane.b32.xlu1 %v2349_v14, %s4935_s15  ;;  %3168 = vperm.xlu0 %4749, %v5527_v47   ;;  %v1922_v61 = vpop.permute.xlu0 %1921  ;;  %v7287_v14 = vld [vmem:[#allocation49_spill] sm:$0xff] }
 0x31b   : > { %v5977_v30 = vpop.permute.xlu1 %1508  ;;  %v1521_v1 = vmul.f32 %v7288_v40, %v7287_v14 }
 0x31e   : > { %1142 = vrot.lane.b32.xlu1 %v1104_v60, %s4935_s15  ;;  %1160 = vrot.lane.b32.xlu0 %v1113_v41, %s4935_s15  ;;  %v7291_v60 = vld [vmem:[#allocation50_spill] sm:$0xff] }
 0x31f   : > { %v2339_v15 = vpop.permute.xlu0 %2338  ;;  %v1938_v41 = vmul.f32 %v5786_v62, %v7291_v60  ;;  %v7295_v62 = vld [vmem:[#allocation57_spill] sm:$0xff] }
 0x320   : > { %v5991_v9 = vpop.permute.xlu1 %1925 }
 0x322   : > { %1559 = vrot.lane.b32.xlu1 %v1521_v1, %s4935_s15  ;;  %1577 = vrot.lane.b32.xlu0 %v1530_v48, %s4935_s15  ;;  %v6008_v1 = vpop.f32.mrf.mxu0  ;;  %v7292_v48 = vld [vmem:[#allocation51_spill] sm:$0xff] }
 0x323   : > { %v2355_v35 = vmul.f32 %v5803_v12, %v7292_v48  ;;  %v2364_v40 = vmul.f32 %v6008_v1, %v2347_v26  ;;  %v6026_v26 = vpop.f32.mrf.mxu1  ;;  %v7299_v12 = vld [vmem:[#allocation61_spill] sm:$0xff] }
 0x324   : > { %v6002_v59 = vpop.permute.xlu0 %2755 }
 0x325   : > { %v6004_v14 = vpop.permute.xlu1 %2342 }
 0x326   : > { %1976 = vrot.lane.b32.xlu1 %v1938_v41, %s4935_s15  ;;  %1994 = vrot.lane.b32.xlu0 %v1947_v3, %s4935_s15  ;;  %v1102_v41 = vmul.f32 %v7295_v62, %v7294_v20  ;;  %v1111_v3 = vmul.f32 %v1088_v34, %v7296_v24  ;;  %v6037_v62 = vpop.f32.mrf.mxu1  ;;  %v7303_v34 = vld [vmem:[#allocation65_spill] sm:$0xff] }
 0x327   : > { %7302 = vst [vmem:[#allocation51_spill] sm:$0xff] %v6037_v62 }
 0x328   : > { %v6013_v4 = vpop.permute.xlu0 %1136 }
 0x329   : > { %7293 = vst [vmem:[#allocation49_spill] sm:$0xff] %v6013_v4  ;;  %v7298_v4 = vld [vmem:[#allocation71_spill] sm:$0xff] }
 0x32a   : > { %v6015_v60 = vpop.permute.xlu1 %3176  ;;  %2393 = vrot.lane.b32.xlu1 %v2355_v35, %s4935_s15  ;;  %2411 = vrot.lane.b32.xlu0 %v2364_v40, %s4935_s15  ;;  %v1519_v35 = vmul.f32 %v7299_v12, %v7298_v4  ;;  %v1528_v40 = vmul.f32 %v1505_v19, %v7300_v10  ;;  %v6046_v12 = vpop.f32.mrf.mxu1  ;;  %v7318_v4 = vld [vmem:[#allocation13_spill] sm:$0xff] }
 0x32b   : > { %7305 = vst [vmem:[#allocation102_spill] sm:$0xff] %v6046_v12  ;;  %v7325_v12 = vld [vmem:[#allocation85_spill] sm:$0xff] }
 0x32c   : > { %v6022_v0 = vpop.permute.xlu0 %1553  ;;  %v6050_v19 = vpop.f32.mrf.mxu1 }
 0x32d   : > { %7297 = vst [vmem:[#allocation103_spill] sm:$0xff] %v6022_v0  ;;  %7306 = vst [vmem:[#allocation61_spill] sm:$0xff] %v6050_v19 }
 0x32e   : > { %1138 = vrot.lane.b32.xlu1 %v1102_v41, %s4935_s15  ;;  %1156 = vrot.lane.b32.xlu0 %v1111_v3, %s4935_s15  ;;  %v1936_v41 = vmul.f32 %v7303_v34, %v5797_v11  ;;  %v1945_v3 = vmul.f32 %v1922_v61, %v6026_v26  ;;  %v6059_v11 = vpop.f32.mrf.mxu1 }
 0x32f   : > { %v6028_v48 = vpop.permute.xlu1 %1083  ;;  %7309 = vst [vmem:[#allocation65_spill] sm:$0xff] %v6059_v11 }
 0x330   : > { %v6033_v45 = vpop.permute.xlu0 %1970  ;;  %v6069_v56 = vpop.f32.mrf.mxu1 }
 0x331   : > { %7301 = vst [vmem:[#allocation50_spill] sm:$0xff] %v6033_v45  ;;  %7312 = vst [vmem:[#allocation149_spill] sm:$0xff] %v6069_v56 }
 0x332   : > { %1555 = vrot.lane.b32.xlu1 %v1519_v35, %s4935_s15  ;;  %1573 = vrot.lane.b32.xlu0 %v1528_v40, %s4935_s15  ;;  %v6052_v35 = vpop.f32.mrf.mxu0  ;;  %v7307_v40 = vld [vmem:[#allocation69_spill] sm:$0xff] }
 0x333   : > { %v2353_v45 = vmul.f32 %v7307_v40, %v5811_v49  ;;  %v2362_v34 = vmul.f32 %v2339_v15, %v6052_v35  ;;  %v7313_v15 = vld [vmem:[#allocation34_spill] sm:$0xff]  ;;  %v7314_v49 = vld [vmem:[#allocation81_spill] sm:$0xff] }
 0x334   : > { %v6042_v0 = vpop.permute.xlu1 %1500  ;;  %v6044_v36 = vpop.permute.xlu0 %2387 }
 0x335   : > { %7304 = vst [vmem:[#allocation57_spill] sm:$0xff] %v6044_v36 }
 0x336   : > { %1972 = vrot.lane.b32.xlu1 %v1936_v41, %s4935_s15  ;;  %1990 = vrot.lane.b32.xlu0 %v1945_v3, %s4935_s15  ;;  %v7310_v41 = vld [vmem:[#allocation76_spill] sm:$0xff] }
 0x337   : > { %v1108_v3 = vmul.f32 %v7310_v41, %v5734_v46  ;;  %v7316_v46 = vld [vmem:[#allocation24_spill] sm:$0xff] }
 0x338   : > { %v6057_v61 = vpop.permute.xlu0 %1132 }
 0x339   : > { %7308 = vst [vmem:[#allocation106_spill] sm:$0xff] %v6057_v61  ;;  %v6061_v36 = vpop.permute.xlu1 %1917  ;;  %v6075_v61 = vpop.f32.mrf.mxu1 }
 0x33a   : > { %2389 = vrot.lane.b32.xlu1 %v2353_v45, %s4935_s15  ;;  %2407 = vrot.lane.b32.xlu0 %v2362_v34, %s4935_s15  ;;  %v1525_v45 = vmul.f32 %v7314_v49, %v5747_v52 }
 0x33b   : > { %v6083_v34 = vpop.f32.mrf.mxu1 }
 0x33c   : > { %v6067_v50 = vpop.permute.xlu0 %1549 }
 0x33d   : > { %7311 = vst [vmem:[#allocation69_spill] sm:$0xff] %v6067_v50  ;;  %v6093_v52 = vpop.f32.mrf.mxu1 }
 0x33e   : > { %v6071_v40 = vpop.permute.xlu1 %2334  ;;  %1150 = vrot.lane.b32.xlu1 %v1108_v3, %s4935_s15  ;;  %3164 = vperm.xlu0 %4749, %v7313_v15   ;;  %v1942_v3 = vmul.f32 %v5863_v13, %v5756_v27  ;;  %7319 = vst [vmem:[#allocation13_spill] sm:$0xff] %v6093_v52 }
 0x33f   : > { %v6103_v27 = vpop.f32.mrf.mxu1 }
 0x340   : > { %v6079_v8 = vpop.permute.xlu0 %1966 }
 0x341   : > { %7315 = vst [vmem:[#allocation34_spill] sm:$0xff] %v6079_v8 }
 0x342   : > { %1567 = vrot.lane.b32.xlu1 %v1525_v45, %s4935_s15  ;;  %3152 = vperm.xlu0 %4749, %v7316_v46   ;;  %v2359_v45 = vmul.f32 %v5888_v54, %v5765_v7  ;;  %v7323_v7 = vld [vmem:[#allocation10_spill] sm:$0xff]  ;;  %v6113_v54 = vpop.f32.mrf.mxu1 }
 0x343   : > { %v6085_v50 = vpop.permute.xlu1 %2751  ;;  %7324 = vst [vmem:[#allocation10_spill] sm:$0xff] %v6113_v54 }
 0x344   : > { %v6089_v41 = vpop.permute.xlu0 %2383  ;;  %v6119_v62 = vpop.f32.mrf.mxu1 }
 0x345   : > { %7317 = vst [vmem:[#allocation24_spill] sm:$0xff] %v6089_v41  ;;  %v7321_v41 = vld [vmem:[#allocation80_spill] sm:$0xff] }
 0x346   : > { %1984 = vrot.lane.b32.xlu1 %v1942_v3, %s4935_s15  ;;  %3148 = vperm.xlu0 %4749, %v7318_v4   ;;  %v1106_v3 = vmul.f32 %v5805_v58, %v7321_v41  ;;  %v7327_v58 = vmov 8   ;;  %v7328_v41 = vld [vmem:[#allocation11_spill] sm:$0xff]  ;;  %v6130_v52 = vpop.f32.mrf.mxu1 }
 0x347   : > { %7330 = vst [vmem:[#allocation153_spill] sm:$0xff] %v6130_v52 }
 0x348   : > { %v6097_v8 = vpop.permute.xlu1 %999  ;;  %v6099_v49 = vpop.permute.xlu0 %1144 }
 0x349   : > { %7320 = vst [vmem:[#allocation150_spill] sm:$0xff] %v6099_v49 }
 0x34a   : > { %2401 = vrot.lane.b32.xlu1 %v2359_v45, %s4935_s15  ;;  %3136 = vperm.xlu0 %4749, %v5280_v43   ;;  %v1523_v45 = vmul.f32 %v5820_v38, %v7325_v12 }
 0x34c   : > { %v6107_v13 = vpop.permute.xlu0 %1561 }
 0x34d   : > { %7322 = vst [vmem:[#allocation151_spill] sm:$0xff] %v6107_v13  ;;  %v6109_v20 = vpop.permute.xlu1 %1416 }
 0x34e   : > { %1146 = vrot.lane.b32.xlu1 %v1106_v3, %s4935_s15  ;;  %3132 = vperm.xlu0 %4749, %v7323_v7   ;;  %v1940_v3 = vmul.f32 %v5830_v63, %v5872_v55  ;;  %v6143_v63 = vpop.f32.mrf.mxu0 }
 0x34f   : > { %7332 = vst [vmem:[#allocation155_spill] sm:$0xff] %v6143_v63 }
 0x350   : > { %v6117_v49 = vpop.permute.xlu0 %1978 }
 0x351   : > { %7326 = vst [vmem:[#allocation152_spill] sm:$0xff] %v6117_v49  ;;  %v6140_v49 = vpop.f32.mrf.mxu1 }
 0x352   : > { %v6121_v32 = vpop.permute.xlu1 %1833  ;;  %1563 = vrot.lane.b32.xlu1 %v1523_v45, %s4935_s15  ;;  %4752 = vset.pattern.permute.xlu0 %v7327_v58  ;;  %v2357_v45 = vmul.f32 %v5841_v42, %v5896_v22  ;;  %v6153_v42 = vpop.f32.mrf.mxu0 }
 0x353   : > { %2611 = vperm.xlu0 %4752, %v7328_v41   ;;  %v6145_v55 = vpop.f32.mrf.mxu1  ;;  %7335 = vst [vmem:[#allocation157_spill] sm:$0xff] %v6153_v42 }
 0x354   : > { %v6128_v13 = vpop.permute.xlu0 %2395 }
 0x355   : > { %7329 = vst [vmem:[#allocation11_spill] sm:$0xff] %v6128_v13  ;;  %v6158_v22 = vpop.f32.mrf.mxu1 }
 0x356   : > { %1980 = vrot.lane.b32.xlu1 %v1940_v3, %s4935_s15  ;;  %v7333_v3 = vld [vmem:[#allocation91_spill] sm:$0xff]  ;;  %7337 = vst [vmem:[#allocation158_spill] sm:$0xff] %v6158_v22 }
 0x357   : > { %v6133_v38 = vpop.permute.xlu1 %2250  ;;  %2623 = vperm.xlu0 %4752, %v5280_v43   ;;  %v1112_v13 = vmul.f32 %v7333_v3, %v5967_v53  ;;  %v6166_v53 = vpop.f32.mrf.mxu0 }
 0x358   : > { %v6138_v12 = vpop.permute.xlu0 %1140  ;;  %7339 = vst [vmem:[#allocation160_spill] sm:$0xff] %v6166_v53 }
 0x359   : > { %7331 = vst [vmem:[#allocation154_spill] sm:$0xff] %v6138_v12 }
 0x35a   : > { %2397 = vrot.lane.b32.xlu1 %v2357_v45, %s4935_s15  ;;  %v7336_v45 = vld [vmem:[#allocation96_spill] sm:$0xff] }
 0x35b   : > { %2663 = vperm.xlu0 %4752, %v5496_v18   ;;  %v1529_v12 = vmul.f32 %v7336_v45, %v5977_v30  ;;  %v6173_v30 = vpop.f32.mrf.mxu1 }
 0x35c   : > { %v2764_v2 = vpop.permute.xlu1 %2763  ;;  %v6150_v11 = vpop.permute.xlu0 %1557 }
 0x35d   : > { %7334 = vst [vmem:[#allocation156_spill] sm:$0xff] %v6150_v11  ;;  %v2781_v19 = vmul.f32 %v6158_v22, %v2764_v2  ;;  %v6178_v2 = vpop.f32.mrf.mxu0 }
 0x35e   : > { %1158 = vrot.lane.b32.xlu1 %v1112_v13, %s4935_s15  ;;  %v1946_v13 = vmul.f32 %v5973_v25, %v5991_v9  ;;  %7341 = vst [vmem:[#allocation162_spill] sm:$0xff] %v6178_v2  ;;  %v2779_v9 = vmul.f32 %v6002_v59, %v6173_v30 }
 0x35f   : > { %2659 = vperm.xlu0 %4752, %v5544_v39  }
 0x360   : > { %v6160_v63 = vpop.permute.xlu0 %1974 }
 0x361   : > { %7338 = vst [vmem:[#allocation159_spill] sm:$0xff] %v6160_v63  ;;  %v6163_v56 = vpop.permute.xlu1 %989  ;;  %v7342_v63 = vld [vmem:[#allocation43_spill] sm:$0xff] }
 0x362   : > { %1575 = vrot.lane.b32.xlu1 %v1529_v12, %s4935_s15  ;;  %v2363_v12 = vmul.f32 %v5986_v21, %v6004_v14 }
 0x363   : > { %2828 = vrot.lane.b32.xlu0 %v2781_v19, %s4935_s15  ;;  %v6188_v19 = vpop.f32.mrf.mxu0 }
 0x364   : > { %v6171_v11 = vpop.permute.xlu0 %2391  ;;  %7344 = vst [vmem:[#allocation163_spill] sm:$0xff] %v6188_v19 }
 0x365   : > { %7340 = vst [vmem:[#allocation161_spill] sm:$0xff] %v6171_v11  ;;  %v6198_v14 = vpop.f32.mrf.mxu0 }
 0x366   : > { %v6175_v42 = vpop.permute.xlu1 %1408  ;;  %1992 = vrot.lane.b32.xlu1 %v1946_v13, %s4935_s15  ;;  %v7345_v13 = vld [vmem:[#allocation94_spill] sm:$0xff]  ;;  %7347 = vst [vmem:[#allocation165_spill] sm:$0xff] %v6198_v14 }
 0x367   : > { %2643 = vperm.xlu0 %4752, %v7342_v63   ;;  %v1110_v2 = vmul.f32 %v6028_v48, %v7345_v13  ;;  %v6207_v45 = vpop.f32.mrf.mxu0  ;;  %v1944_v48 = vmul.f32 %v6061_v36, %v5982_v17 }
 0x368   : > { %v6183_v53 = vpop.permute.xlu0 %1152  ;;  %7350 = vst [vmem:[#allocation167_spill] sm:$0xff] %v6207_v45 }
 0x369   : > { %7343 = vst [vmem:[#allocation43_spill] sm:$0xff] %v6183_v53  ;;  %v7348_v53 = vld [vmem:[#allocation99_spill] sm:$0xff] }
 0x36a   : > { %2409 = vrot.lane.b32.xlu1 %v2363_v12, %s4935_s15  ;;  %v1527_v59 = vmul.f32 %v6042_v0, %v7348_v53  ;;  %v2361_v0 = vmul.f32 %v6071_v40, %v5997_v31 }
 0x36b   : > { %v6190_v11 = vpop.permute.xlu1 %1825  ;;  %2824 = vrot.lane.b32.xlu0 %v2779_v9, %s4935_s15 }
 0x36c   : > { %v6195_v25 = vpop.permute.xlu0 %1569 }
 0x36d   : > { %7346 = vst [vmem:[#allocation164_spill] sm:$0xff] %v6195_v25 }
 0x36e   : > { %1154 = vrot.lane.b32.xlu1 %v1110_v2, %s4935_s15  ;;  %v6216_v2 = vpop.f32.mrf.mxu0 }
 0x36f   : > { %7352 = vst [vmem:[#allocation169_spill] sm:$0xff] %v6216_v2  ;;  %v7373_v2 = vld [vmem:[#allocation9_spill] sm:$0xff] }
 0x370   : > { %v6202_v21 = vpop.permute.xlu1 %2242  ;;  %v6204_v12 = vpop.permute.xlu0 %1986 }
 0x371   : > { %7349 = vst [vmem:[#allocation166_spill] sm:$0xff] %v6204_v12 }
 0x372   : > { %1571 = vrot.lane.b32.xlu1 %v1527_v59, %s4935_s15  ;;  %v6225_v59 = vpop.f32.mrf.mxu0 }
 0x373   : > { %7355 = vst [vmem:[#allocation172_spill] sm:$0xff] %v6225_v59 }
 0x374   : > { %v6211_v9 = vpop.permute.xlu0 %2403  ;;  %v6231_v17 = vpop.f32.mrf.mxu0 }
 0x375   : > { %7351 = vst [vmem:[#allocation168_spill] sm:$0xff] %v6211_v9  ;;  %v6213_v25 = vpop.permute.xlu1 %3172  ;;  %7358 = vst [vmem:[#allocation175_spill] sm:$0xff] %v6231_v17 }
 0x376   : > { %1988 = vrot.lane.b32.xlu1 %v1944_v48, %s4935_s15  ;;  %v6238_v40 = vpop.f32.mrf.mxu0 }
 0x377   : > { %7361 = vst [vmem:[#allocation178_spill] sm:$0xff] %v6238_v40 }
 0x378   : > { %v6220_v53 = vpop.permute.xlu0 %1148 }
 0x379   : > { %7353 = vst [vmem:[#allocation170_spill] sm:$0xff] %v6220_v53  ;;  %v6222_v12 = vpop.permute.xlu1 %1134 }
 0x37a   : > { %7354 = vst [vmem:[#allocation171_spill] sm:$0xff] %v6222_v12  ;;  %2405 = vrot.lane.b32.xlu1 %v2361_v0, %s4935_s15 }
 0x37c   : > { %v6227_v36 = vpop.permute.xlu0 %1565 }
 0x37d   : > { %7356 = vst [vmem:[#allocation173_spill] sm:$0xff] %v6227_v36  ;;  %v6229_v9 = vpop.permute.xlu1 %1551  ;;  %v6246_v36 = vpop.f32.mrf.mxu0 }
 0x37e   : > { %7357 = vst [vmem:[#allocation174_spill] sm:$0xff] %v6229_v9  ;;  %2731 = vperm.xlu1 %4743, %v7318_v4   ;;  %7364 = vst [vmem:[#allocation181_spill] sm:$0xff] %v6246_v36  ;;  %v7365_v9 = vld [vmem:[#allocation14_spill] sm:$0xff] }
 0x380   : > { %v6234_v48 = vpop.permute.xlu0 %1982 }
 0x381   : > { %7359 = vst [vmem:[#allocation176_spill] sm:$0xff] %v6234_v48  ;;  %v6236_v13 = vpop.permute.xlu1 %1968 }
 0x382   : > { %7360 = vst [vmem:[#allocation177_spill] sm:$0xff] %v6236_v13  ;;  %4744 = vset.pattern.permute.xlu1 %v7239_v37  ;;  %v6254_v13 = vpop.f32.mrf.mxu0 }
 0x383   : > { %3156 = vperm.xlu1 %4744, %v7342_v63  }
 0x384   : > { %v6242_v0 = vpop.permute.xlu0 %2399  ;;  %v6256_v53 = vpop.f32.mrf.mxu0 }
 0x385   : > { %7362 = vst [vmem:[#allocation179_spill] sm:$0xff] %v6242_v0  ;;  %v6244_v12 = vpop.permute.xlu1 %2385  ;;  %7367 = vst [vmem:[#allocation182_spill] sm:$0xff] %v6256_v53 }
 0x386   : > { %7363 = vst [vmem:[#allocation180_spill] sm:$0xff] %v6244_v12  ;;  %v7370_v12 = vld [vmem:[#allocation12_spill] sm:$0xff]  ;;  %v6264_v45 = vpop.f32.mrf.mxu0 }
 0x387   : > { %4745 = vset.pattern.permute.xlu1 %v7176_v28  ;;  %7371 = vst [vmem:[#allocation12_spill] sm:$0xff] %v6264_v45 }
 0x388   : > { %2723 = vperm.xlu1 %4745, %v7365_v9   ;;  %v6250_v31 = vpop.permute.xlu0 %2719 }
 0x389   : > { %v6252_v48 = vpop.permute.xlu1 %1130 }
 0x38a   : > { %7366 = vst [vmem:[#allocation14_spill] sm:$0xff] %v6252_v48 }
 0x38c   : > { %4746 = vset.pattern.permute.xlu1 %v7239_v37  ;;  %v6259_v14 = vpop.permute.xlu0 %2703 }
 0x38d   : > { %7368 = vst [vmem:[#allocation183_spill] sm:$0xff] %v6259_v14  ;;  %v6261_v0 = vpop.permute.xlu1 %1547  ;;  %3144 = vperm.xlu1 %4746, %v7370_v12  }
 0x38e   : > { %7369 = vst [vmem:[#allocation184_spill] sm:$0xff] %v6261_v0  ;;  %v1017_v0 = vmul.f32 %v7284_v16, %v6097_v8  ;;  %v1851_v8 = vmul.f32 %v5995_v5, %v6121_v32 }
 0x391   : > { %v6266_v22 = vpop.permute.xlu1 %1964  ;;  %4747 = vset.pattern.permute.xlu1 %v7176_v28  ;;  %v3181_v3 = vpop.permute.xlu0 %3180 }
 0x392   : > { %7372 = vst [vmem:[#allocation185_spill] sm:$0xff] %v6266_v22  ;;  %v3198_v48 = vmul.f32 %v6264_v45, %v3181_v3  ;;  %2711 = vperm.xlu1 %4747, %v7373_v2   ;;  %v1434_v3 = vmul.f32 %v7289_v57, %v6109_v20 }
 0x394   : > { %3245 = vrot.lane.b32.xlu0 %v3198_v48, %s4935_s15  ;;  %v7117_v48 = vmov 10  }
 0x395   : > { %v6272_v17 = vpop.permute.xlu1 %2381  ;;  %v6274_v14 = vpop.permute.xlu0 %3168 }
 0x396   : > { %7374 = vst [vmem:[#allocation9_spill] sm:$0xff] %v6272_v17  ;;  %2715 = vperm.xlu1 %4747, %v7323_v7  }
 0x398   : > { %2635 = vperm.xlu0 %4752, %v7318_v4  }
 0x399   : > { %v6280_v22 = vpop.permute.xlu1 %1142  ;;  %v1161_v40 = vpop.permute.xlu0 %1160 }
 0x39a   : > { %7375 = vst [vmem:[#allocation186_spill] sm:$0xff] %v6280_v22  ;;  %v1193_v45 = vadd.f32 %v1161_v40, %v1017_v0  ;;  %4748 = vset.pattern.permute.xlu1 %v7239_v37 }
 0x39b   : > { %3140 = vperm.xlu1 %4748, %v7365_v9  }
 0x39c   : > { %4762 = vset.pattern.permute.xlu0 %v7117_v48  ;;  %v1450_v17 = vadd.f32 %v1434_v3, %v1193_v45  ;;  %v2268_v45 = vmul.f32 %v6008_v1, %v6133_v38  ;;  %v2777_v3 = vmul.f32 %v6119_v62, %v5909_v51  ;;  %v6301_v48 = vpop.f32.mrf.mxu0  ;;  %v1015_v51 = vmul.f32 %v6163_v56, %v7296_v24 }
 0x39d   : > { %v6287_v29 = vpop.permute.xlu1 %1559  ;;  %3084 = vperm.xlu0 %4762, %v5535_v44   ;;  %v1578_v16 = vpop.permute.xlu0 %1577  ;;  %v3196_v5 = vmul.f32 %v6213_v25, %v6301_v48  ;;  %v1432_v38 = vmul.f32 %v6175_v42, %v7300_v10  ;;  %v1849_v56 = vmul.f32 %v6190_v11, %v6026_v26  ;;  %v3193_v11 = vmul.f32 %v6225_v59, %v5792_v23 }
 0x39e   : > { %7376 = vst [vmem:[#allocation187_spill] sm:$0xff] %v6287_v29  ;;  %v1610_v22 = vadd.f32 %v1578_v16, %v1450_v17 }
 0x39f   : > { %4750 = vset.pattern.permute.xlu1 %v7176_v28 }
 0x3a0   : > { %2707 = vperm.xlu1 %4750, %v7328_v41   ;;  %v1867_v57 = vadd.f32 %v1851_v8, %v1610_v22 }
 0x3a1   : > { %v6294_v20 = vpop.permute.xlu1 %1976  ;;  %3072 = vperm.xlu0 %4762, %v5527_v47   ;;  %v1995_v40 = vpop.permute.xlu0 %1994 }
 0x3a2   : > { %7377 = vst [vmem:[#allocation188_spill] sm:$0xff] %v6294_v20  ;;  %v2027_v0 = vadd.f32 %v1995_v40, %v1867_v57  ;;  %v7379_v40 = vld [vmem:[#allocation100_spill] sm:$0xff] }
 0x3a4   : > { %4751 = vset.pattern.permute.xlu1 %v7239_v37  ;;  %v2284_v28 = vadd.f32 %v2268_v45, %v2027_v0  ;;  %v2774_v45 = vmul.f32 %v7379_v40, %v6113_v54  ;;  %v7388_v54 = vmov 12  }
 0x3a5   : > { %3128 = vperm.xlu1 %4751, %v7373_v2   ;;  %v6305_v32 = vpop.permute.xlu1 %2393  ;;  %2820 = vrot.lane.b32.xlu0 %v2777_v3, %s4935_s15  ;;  %v2412_v22 = vpop.permute.xlu0 %2411  ;;  %v2266_v3 = vmul.f32 %v6202_v21, %v6052_v35  ;;  %v7380_v35 = vmov 10  }
 0x3a6   : > { %7378 = vst [vmem:[#allocation189_spill] sm:$0xff] %v6305_v32  ;;  %v6308_v17 = vadd.f32 %v2412_v22, %v2284_v28 }
 0x3a9   : > { %3120 = vperm.xlu1 %4751, %v5201_v6   ;;  %v6315_v1 = vpop.permute.xlu1 %1138  ;;  %3241 = vrot.lane.b32.xlu0 %v3196_v5, %s4935_s15  ;;  %v1157_v37 = vpop.permute.xlu0 %1156 }
 0x3aa   : > { %v1191_v16 = vadd.f32 %v1157_v37, %v1015_v51 }
 0x3ac   : > { %v1448_v8 = vadd.f32 %v1432_v38, %v1191_v16  ;;  %v7381_v16 = vld [vmem:[#allocation20_spill] sm:$0xff] }
 0x3ad   : > { %3124 = vperm.xlu1 %4751, %v7328_v41   ;;  %v6321_v57 = vpop.permute.xlu1 %1555  ;;  %3052 = vperm.xlu0 %4762, %v7318_v4   ;;  %v1574_v25 = vpop.permute.xlu0 %1573 }
 0x3ae   : > { %v1608_v24 = vadd.f32 %v1574_v25, %v1448_v8 }
 0x3b0   : > { %v1865_v0 = vadd.f32 %v1849_v56, %v1608_v24 }
 0x3b1   : > { %4753 = vset.pattern.permute.xlu1 %v7327_v58  ;;  %v6329_v10 = vpop.permute.xlu1 %1972  ;;  %2814 = vrot.lane.b32.xlu0 %v2774_v45, %s4935_s15  ;;  %v1991_v42 = vpop.permute.xlu0 %1990 }
 0x3b2   : > { %v2025_v28 = vadd.f32 %v1991_v42, %v1865_v0  ;;  %2667 = vperm.xlu1 %4753, %v5535_v44   ;;  %v7119_v0 = vmov 12  }
 0x3b4   : > { %v2282_v26 = vadd.f32 %v2266_v3, %v2025_v28  ;;  %v2780_v28 = vmul.f32 %v6140_v49, %v5850_v33 }
 0x3b5   : > { %v6337_v22 = vpop.permute.xlu1 %2389  ;;  %3235 = vrot.lane.b32.xlu0 %v3193_v11, %s4935_s15  ;;  %v2408_v5 = vpop.permute.xlu0 %2407 }
 0x3b6   : > { %v2442_v51 = vadd.f32 %v2408_v5, %v2282_v26  ;;  %2655 = vperm.xlu1 %4753, %v5527_v47  }
 0x3b9   : > { %v6341_v37 = vpop.permute.xlu1 %1150  ;;  %3040 = vperm.xlu0 %4762, %v5280_v43   ;;  %v6344_v21 = vpop.permute.xlu0 %3164 }
 0x3ba   : > { %4754 = vset.pattern.permute.xlu1 %v7380_v35 }
 0x3bb   : > { %3080 = vperm.xlu1 %4754, %v5496_v18  }
 0x3bd   : > { %v6348_v23 = vpop.permute.xlu1 %1567  ;;  %v6350_v38 = vpop.permute.xlu0 %3152 }
 0x3bf   : > { %4755 = vset.pattern.permute.xlu1 %v7327_v58 }
 0x3c0   : > { %2647 = vperm.xlu1 %4755, %v7381_v16  }
 0x3c1   : > { %v6354_v8 = vpop.permute.xlu1 %1984  ;;  %v6356_v25 = vpop.permute.xlu0 %3148 }
 0x3c4   : > { %2651 = vperm.xlu1 %4755, %v7313_v15  }
 0x3c5   : > { %v6359_v56 = vpop.permute.xlu1 %2401  ;;  %v6361_v24 = vpop.permute.xlu0 %3136 }
 0x3c6   : > { %7382 = vst [vmem:[#allocation100_spill] sm:$0xff] %v6359_v56 }
 0x3c8   : > { %4756 = vset.pattern.permute.xlu1 %v7380_v35 }
 0x3c9   : > { %3076 = vperm.xlu1 %4756, %v5544_v39   ;;  %v6365_v40 = vpop.permute.xlu1 %1146  ;;  %v6367_v45 = vpop.permute.xlu0 %3132 }
 0x3cd   : > { %4757 = vset.pattern.permute.xlu1 %v7119_v0  ;;  %v6370_v42 = vpop.permute.xlu1 %1563 }
 0x3ce   : > { %7383 = vst [vmem:[#allocation20_spill] sm:$0xff] %v6370_v42  ;;  %3501 = vperm.xlu1 %4757, %v5535_v44   ;;  %v6373_v3 = vpop.permute.xlu0 %2611 }
 0x3cf   : > { %7384 = vst [vmem:[#allocation190_spill] sm:$0xff] %v6373_v3 }
 0x3d1   : > { %v6377_v11 = vpop.permute.xlu1 %1980 }
 0x3d2   : > { %7385 = vst [vmem:[#allocation191_spill] sm:$0xff] %v6377_v11  ;;  %2826 = vrot.lane.b32.xlu1 %v2780_v28, %s4935_s15  ;;  %v6380_v26 = vpop.permute.xlu0 %2623 }
 0x3d3   : > { %4758 = vset.pattern.permute.xlu1 %v7327_v58 }
 0x3d5   : > { %v6383_v5 = vpop.permute.xlu1 %2397 }
 0x3d6   : > { %7386 = vst [vmem:[#allocation192_spill] sm:$0xff] %v6383_v5  ;;  %2639 = vperm.xlu1 %4758, %v7316_v46   ;;  %v6386_v0 = vpop.permute.xlu0 %2663 }
 0x3d9   : > { %v6388_v44 = vpop.permute.xlu1 %1158 }
 0x3da   : > { %4759 = vset.pattern.permute.xlu1 %v7380_v35  ;;  %v2660_v3 = vpop.permute.xlu0 %2659 }
 0x3db   : > { %v2683_v33 = vmul.f32 %v2660_v3, %v6173_v30  ;;  %3064 = vperm.xlu1 %4759, %v7381_v16   ;;  %v2778_v30 = vmul.f32 %v6085_v50, %v6145_v55 }
 0x3dd   : > { %v6393_v28 = vpop.permute.xlu1 %1575  ;;  %v2699_v32 = vadd.f32 %v2683_v33, %v2442_v51  ;;  %v3197_v33 = vmul.f32 %v6254_v13, %v6015_v60 }
 0x3de   : > { %v6395_v20 = vpop.permute.xlu0 %2828 }
 0x3df   : > { %3068 = vperm.xlu1 %4759, %v7313_v15  }
 0x3e1   : > { %v6398_v29 = vpop.permute.xlu1 %1992 }
 0x3e2   : > { %v6400_v5 = vpop.permute.xlu0 %2643 }
 0x3e3   : > { %7387 = vst [vmem:[#allocation193_spill] sm:$0xff] %v6400_v5  ;;  %4760 = vset.pattern.permute.xlu1 %v7388_v54 }
 0x3e4   : > { %3493 = vperm.xlu1 %4760, %v5544_v39  }
 0x3e5   : > { %v6404_v11 = vpop.permute.xlu1 %2409 }
 0x3e6   : > { %v2825_v3 = vpop.permute.xlu0 %2824 }
 0x3e7   : > { %v6408_v59 = vadd.f32 %v2825_v3, %v2699_v32  ;;  %v7389_v3 = vld [vmem:[#allocation115_spill] sm:$0xff] }
 0x3e8   : > { %2822 = vrot.lane.b32.xlu1 %v2778_v30, %s4935_s15 }
 0x3e9   : > { %v6411_v51 = vpop.permute.xlu1 %1154  ;;  %4761 = vset.pattern.permute.xlu1 %v7327_v58 }
 0x3ec   : > { %3243 = vrot.lane.b32.xlu1 %v3197_v33, %s4935_s15  ;;  %v2776_v33 = vmul.f32 %v6103_v27, %v7389_v3 }
 0x3ed   : > { %v6417_v39 = vpop.permute.xlu1 %1571 }
 0x3f0   : > { %2631 = vperm.xlu1 %4761, %v7370_v12  }
 0x3f1   : > { %v6420_v5 = vpop.permute.xlu1 %1988 }
 0x3f4   : > { %4763 = vset.pattern.permute.xlu1 %v7380_v35 }
 0x3f5   : > { %v6423_v50 = vpop.permute.xlu1 %2405  ;;  %3056 = vperm.xlu1 %4763, %v7316_v46  }
 0x3f9   : > { %v2732_v32 = vpop.permute.xlu1 %2731  ;;  %3060 = vperm.xlu1 %4763, %v7342_v63  }
 0x3fa   : > { %v2773_v58 = vmul.f32 %v6083_v34, %v2732_v32  ;;  %v3195_v32 = vmul.f32 %v6274_v14, %v6256_v53  ;;  %v6453_v14 = vpop.f32.mrf.mxu1 }
 0x3fb   : > { %7390 = vst [vmem:[#allocation115_spill] sm:$0xff] %v6453_v14 }
 0x3fc   : > { %2812 = vrot.lane.b32.xlu0 %v2773_v58, %s4935_s15 }
 0x3fd   : > { %4764 = vset.pattern.permute.xlu1 %v7388_v54 }
 0x3fe   : > { %v3157_v60 = vpop.permute.xlu1 %3156  ;;  %3485 = vperm.xlu1 %4764, %v7313_v15   ;;  %v2770_v15 = vmul.f32 %v6250_v31, %v6075_v61  ;;  %v6457_v31 = vpop.f32.mrf.mxu1 }
 0x3ff   : > { %v3192_v30 = vmul.f32 %v3157_v60, %v6246_v36  ;;  %7391 = vst [vmem:[#allocation194_spill] sm:$0xff] %v6457_v31  ;;  %v7398_v31 = vld [vmem:[#allocation53_spill] sm:$0xff] }
 0x401   : > { %3233 = vrot.lane.b32.xlu0 %v3192_v30, %s4935_s15 }
 0x402   : > { %2818 = vrot.lane.b32.xlu1 %v2776_v33, %s4935_s15  ;;  %v7392_v33 = vld [vmem:[#allocation148_spill] sm:$0xff] }
 0x403   : > { %v6436_v56 = vpop.permute.xlu1 %2723  ;;  %4765 = vset.pattern.permute.xlu1 %v7380_v35 }
 0x405   : > { %3036 = vperm.xlu0 %4762, %v7323_v7  }
 0x406   : > { %3239 = vrot.lane.b32.xlu1 %v3195_v32, %s4935_s15  ;;  %v2775_v32 = vmul.f32 %v7392_v33, %v6130_v52 }
 0x408   : > { %v3145_v58 = vpop.permute.xlu1 %3144 }
 0x409   : > { %2806 = vrot.lane.b32.xlu0 %v2770_v15, %s4935_s15  ;;  %v3189_v60 = vmul.f32 %v6188_v19, %v3145_v58  ;;  %v7394_v58 = vld [vmem:[#allocation178_spill] sm:$0xff] }
 0x40a   : > { %3048 = vperm.xlu1 %4765, %v7370_v12  }
 0x40d   : > { %v6448_v30 = vpop.permute.xlu1 %2711  ;;  %3227 = vrot.lane.b32.xlu0 %v3189_v60, %s4935_s15  ;;  %v3194_v60 = vmul.f32 %v7394_v58, %v6344_v21 }
 0x40e   : > { %4766 = vset.pattern.permute.xlu1 %v7388_v54 }
 0x40f   : > { %3473 = vperm.xlu1 %4766, %v7316_v46   ;;  %v6464_v46 = vpop.f32.mrf.mxu1 }
 0x410   : > { %7393 = vst [vmem:[#allocation148_spill] sm:$0xff] %v6464_v46  ;;  %v7401_v46 = vld [vmem:[#allocation61_spill] sm:$0xff] }
 0x411   : > { %v2716_v3 = vpop.permute.xlu1 %2715  ;;  %3024 = vperm.xlu0 %4762, %v5201_v6   ;;  %v6471_v33 = vpop.f32.mrf.mxu1 }
 0x412   : > { %7395 = vst [vmem:[#allocation195_spill] sm:$0xff] %v6471_v33  ;;  %v7399_v33 = vld [vmem:[#allocation149_spill] sm:$0xff] }
 0x413   : > { %3477 = vperm.xlu1 %4766, %v7342_v63  }
 0x415   : > { %4771 = vset.pattern.permute.xlu0 %v7388_v54 }
 0x416   : > { %v3141_v15 = vpop.permute.xlu1 %3140  ;;  %3497 = vperm.xlu0 %4771, %v5496_v18   ;;  %v6475_v18 = vpop.f32.mrf.mxu1 }
 0x417   : > { %2816 = vrot.lane.b32.xlu1 %v2775_v32, %s4935_s15  ;;  %7396 = vst [vmem:[#allocation196_spill] sm:$0xff] %v6475_v18  ;;  %v2769_v18 = vmul.f32 %v7401_v46, %v2716_v3  ;;  %v7405_v3 = vld [vmem:[#allocation118_spill] sm:$0xff]  ;;  %v7406_v46 = vld [vmem:[#allocation91_spill] sm:$0xff] }
 0x418   : > { %4767 = vset.pattern.permute.xlu1 %v7380_v35  ;;  %v6481_v21 = vpop.f32.mrf.mxu1  ;;  %v1016_v52 = vmul.f32 %v7406_v46, %v7405_v3 }
 0x419   : > { %7397 = vst [vmem:[#allocation197_spill] sm:$0xff] %v6481_v21  ;;  %v7402_v21 = vld [vmem:[#allocation175_spill] sm:$0xff] }
 0x41a   : > { %3489 = vperm.xlu0 %4771, %v5527_v47   ;;  %v6489_v14 = vpop.f32.mrf.mxu1 }
 0x41b   : > { %v2708_v63 = vpop.permute.xlu1 %2707  ;;  %3237 = vrot.lane.b32.xlu1 %v3194_v60, %s4935_s15  ;;  %v3246_v60 = vpop.permute.xlu0 %3245  ;;  %7400 = vst [vmem:[#allocation53_spill] sm:$0xff] %v6489_v14 }
 0x41c   : > { %v6499_v36 = vpop.f32.mrf.mxu1 }
 0x41d   : > { %7403 = vst [vmem:[#allocation198_spill] sm:$0xff] %v6499_v36  ;;  %v7409_v36 = vld [vmem:[#allocation96_spill] sm:$0xff] }
 0x41e   : > { %3481 = vperm.xlu0 %4771, %v7381_v16   ;;  %v2772_v16 = vmul.f32 %v7399_v33, %v7398_v31  ;;  %v7404_v31 = vld [vmem:[#allocation169_spill] sm:$0xff]  ;;  %v6507_v42 = vpop.f32.mrf.mxu1 }
 0x41f   : > { %3044 = vperm.xlu1 %4767, %v7365_v9   ;;  %v3188_v33 = vmul.f32 %v3141_v15, %v7404_v31 }
 0x420   : > { %v6477_v32 = vpop.permute.xlu1 %3128 }
 0x422   : > { %3465 = vperm.xlu0 %4771, %v7370_v12   ;;  %v6493_v12 = vpop.permute.xlu0 %2635 }
 0x423   : > { %4768 = vset.pattern.permute.xlu1 %v7388_v54 }
 0x424   : > { %v6483_v47 = vpop.permute.xlu1 %3120  ;;  %3469 = vperm.xlu1 %4768, %v7318_v4   ;;  %v3191_v4 = vmul.f32 %v6350_v38, %v7402_v21  ;;  %v1192_v38 = vadd.f32 %v6388_v44, %v1016_v52  ;;  %v7410_v21 = vld [vmem:[#allocation12_spill] sm:$0xff] }
 0x426   : > { %3449 = vperm.xlu0 %4771, %v7373_v2   ;;  %v3085_v58 = vpop.permute.xlu0 %3084 }
 0x427   : > { %v3102_v46 = vmul.f32 %v7410_v21, %v3085_v58  ;;  %v7414_v21 = vld [vmem:[#allocation124_spill] sm:$0xff] }
 0x428   : > { %v3125_v19 = vpop.permute.xlu1 %3124  ;;  %2810 = vrot.lane.b32.xlu1 %v2772_v16, %s4935_s15  ;;  %v7407_v16 = vld [vmem:[#allocation158_spill] sm:$0xff] }
 0x429   : > { %4769 = vset.pattern.permute.xlu1 %v7380_v35 }
 0x42a   : > { %2804 = vrot.lane.b32.xlu0 %v2769_v18, %s4935_s15 }
 0x42c   : > { %3231 = vrot.lane.b32.xlu1 %v3191_v4, %s4935_s15  ;;  %v7408_v4 = vld [vmem:[#allocation123_spill] sm:$0xff] }
 0x42d   : > { %v2668_v14 = vpop.permute.xlu1 %2667  ;;  %v1433_v31 = vmul.f32 %v7409_v36, %v7408_v4 }
 0x42e   : > { %v2685_v53 = vmul.f32 %v7407_v16, %v2668_v14  ;;  %3225 = vrot.lane.b32.xlu0 %v3188_v33, %s4935_s15  ;;  %v6519_v33 = vpop.f32.mrf.mxu1  ;;  %v7412_v16 = vld [vmem:[#allocation65_spill] sm:$0xff] }
 0x42f   : > { %7411 = vst [vmem:[#allocation118_spill] sm:$0xff] %v6519_v33  ;;  %v1449_v3 = vadd.f32 %v1433_v31, %v1192_v38  ;;  %v2767_v52 = vmul.f32 %v2708_v63, %v7412_v16  ;;  %v7415_v63 = vld [vmem:[#allocation19_spill] sm:$0xff]  ;;  %v7416_v38 = vld [vmem:[#allocation13_spill] sm:$0xff]  ;;  %v7478_v33 = vld [vmem:[#allocation166_spill] sm:$0xff] }
 0x430   : > { %v2701_v18 = vadd.f32 %v2685_v53, %v6308_v17  ;;  %3032 = vperm.xlu1 %4769, %v7373_v2   ;;  %v6525_v17 = vpop.f32.mrf.mxu1  ;;  %v1850_v31 = vmul.f32 %v7415_v63, %v7414_v21 }
 0x431   : > { %v6512_v15 = vpop.permute.xlu1 %2655  ;;  %v1609_v58 = vadd.f32 %v6393_v28, %v1449_v3 }
 0x432   : > { %v2861_v14 = vadd.f32 %v6395_v20, %v2701_v18  ;;  %3445 = vperm.xlu0 %4771, %v7328_v41   ;;  %v7413_v20 = vld [vmem:[#allocation160_spill] sm:$0xff] }
 0x433   : > { %v3186_v44 = vmul.f32 %v7413_v20, %v6367_v45  ;;  %v1866_v4 = vadd.f32 %v1850_v31, %v1609_v58 }
 0x434   : > { %4770 = vset.pattern.permute.xlu1 %v7388_v54  ;;  %v3118_v53 = vadd.f32 %v3102_v46, %v2861_v14  ;;  %v7418_v46 = vld [vmem:[#allocation162_spill] sm:$0xff] }
 0x435   : > { %3457 = vperm.xlu1 %4770, %v5280_v43   ;;  %v2771_v43 = vmul.f32 %v6436_v56, %v7416_v38  ;;  %v3184_v14 = vmul.f32 %v3125_v19, %v7418_v46  ;;  %v2026_v56 = vadd.f32 %v6398_v29, %v1866_v4  ;;  %v2684_v4 = vmul.f32 %v6140_v49, %v6386_v0 }
 0x436   : > { %v3081_v2 = vpop.permute.xlu1 %3080  ;;  %2800 = vrot.lane.b32.xlu0 %v2767_v52, %s4935_s15  ;;  %v3278_v36 = vadd.f32 %v3246_v60, %v3118_v53  ;;  %v6538_v60 = vpop.f32.mrf.mxu1  ;;  %v7420_v52 = vld [vmem:[#allocation125_spill] sm:$0xff]  ;;  %v7421_v53 = vld [vmem:[#allocation48_spill] sm:$0xff] }
 0x437   : > { %7417 = vst [vmem:[#allocation91_spill] sm:$0xff] %v6538_v60  ;;  %v2267_v19 = vmul.f32 %v7421_v53, %v7420_v52 }
 0x438   : > { %v6548_v3 = vpop.f32.mrf.mxu1 }
 0x439   : > { %3461 = vperm.xlu1 %4770, %v7365_v9   ;;  %v7419_v9 = vld [vmem:[#allocation167_spill] sm:$0xff]  ;;  %v2283_v58 = vadd.f32 %v2267_v19, %v2026_v56  ;;  %v7425_v19 = vld [vmem:[#allocation70_spill] sm:$0xff] }
 0x43a   : > { %3221 = vrot.lane.b32.xlu0 %v3186_v44, %s4935_s15  ;;  %v3190_v45 = vmul.f32 %v7419_v9, %v6356_v25  ;;  %v6554_v44 = vpop.f32.mrf.mxu1  ;;  %v6558_v25 = vpop.permute.xlu0 %3072 }
 0x43b   : > { %v6536_v18 = vpop.permute.xlu1 %2647  ;;  %v2443_v29 = vadd.f32 %v6404_v11, %v2283_v58  ;;  %v3101_v11 = vmul.f32 %v6254_v13, %v3081_v2  ;;  %v7427_v13 = vld [vmem:[#allocation79_spill] sm:$0xff] }
 0x43c   : > { %v4495_v31 = vpop.f32.mrf.mxu1  ;;  %v7428_v2 = vld [vmem:[#allocation75_spill] sm:$0xff] }
 0x43d   : > { %2808 = vrot.lane.b32.xlu1 %v2771_v43, %s4935_s15 }
 0x43e   : > { %3217 = vrot.lane.b32.xlu0 %v3184_v14, %s4935_s15  ;;  %4772 = vset.pattern.permute.xlu1 %v7380_v35 }
 0x43f   : > { %v6546_v28 = vpop.permute.xlu1 %2651 }
 0x441   : > { %3229 = vrot.lane.b32.xlu1 %v3190_v45, %s4935_s15  ;;  %v6570_v45 = vpop.permute.xlu0 %2820 }
 0x444   : > { %v3077_v21 = vpop.permute.xlu1 %3076 }
 0x445   : > { %v3100_v35 = vmul.f32 %v3077_v21, %v6301_v48  ;;  %3028 = vperm.xlu1 %4772, %v7328_v41   ;;  %v7422_v48 = vld [vmem:[#allocation51_spill] sm:$0xff]  ;;  %v6584_v21 = vpop.permute.xlu0 %3241 }
 0x446   : > { %v2768_v41 = vmul.f32 %v7422_v48, %v6448_v30 }
 0x447   : > { %v6561_v63 = vadd.f32 %v3100_v35, %v6408_v59  ;;  %v2700_v59 = vadd.f32 %v2684_v4, %v2443_v29  ;;  %v7430_v4 = vld [vmem:[#allocation183_spill] sm:$0xff] }
 0x449   : > { %v3502_v43 = vpop.permute.xlu1 %3501  ;;  %4773 = vset.pattern.permute.xlu1 %v7388_v54  ;;  %v7423_v54 = vld [vmem:[#allocation165_spill] sm:$0xff] }
 0x44a   : > { %v3519_v14 = vmul.f32 %v4495_v31, %v3502_v43  ;;  %3453 = vperm.xlu1 %4773, %v7323_v7   ;;  %v3187_v49 = vmul.f32 %v6361_v24, %v7423_v54  ;;  %v7424_v7 = vld [vmem:[#allocation74_spill] sm:$0xff]  ;;  %v1426_v31 = vmul.f32 %v7428_v2, %v7427_v13  ;;  %v7435_v13 = vld [vmem:[#allocation157_spill] sm:$0xff] }
 0x44b   : > { %v1009_v58 = vmul.f32 %v7425_v19, %v7424_v7  ;;  %v7429_v43 = vld [vmem:[#allocation102_spill] sm:$0xff]  ;;  %v7433_v7 = vld [vmem:[#allocation83_spill] sm:$0xff]  ;;  %v7434_v19 = vld [vmem:[#allocation120_spill] sm:$0xff]  ;;  %v3183_v2 = vmul.f32 %v6483_v47, %v7435_v13 }
 0x44c   : > { %v6572_v56 = vadd.f32 %v3519_v14, %v3278_v36  ;;  %v7426_v36 = vld [vmem:[#allocation150_spill] sm:$0xff]  ;;  %v2766_v14 = vmul.f32 %v7430_v4, %v7429_v43  ;;  %v7443_v13 = vld [vmem:[#allocation45_spill] sm:$0xff]  ;;  %v7444_v43 = vld [vmem:[#allocation11_spill] sm:$0xff] }
 0x44d   : > { %v2827_v52 = vpop.permute.xlu1 %2826  ;;  %v1185_v35 = vadd.f32 %v7426_v36, %v1009_v58  ;;  %v1843_v58 = vmul.f32 %v7434_v19, %v7433_v7  ;;  %v7439_v19 = vmov 0.0  }
 0x44e   : > { %v2860_v53 = vadd.f32 %v2827_v52, %v2700_v59  ;;  %2802 = vrot.lane.b32.xlu1 %v2768_v41, %s4935_s15  ;;  %v3053_v41 = vpop.permute.xlu0 %3052  ;;  %v7431_v52 = vld [vmem:[#allocation151_spill] sm:$0xff]  ;;  %4512 = vmatprep.mubr.msk.bf16.mxu0 %vm4938_vm4, %v7439_v19 }
 0x44f   : > { %v1442_v24 = vadd.f32 %v1426_v31, %v1185_v35  ;;  %v7436_v31 = vld [vmem:[#allocation152_spill] sm:$0xff] }
 0x450   : > { %v6578_v0 = vadd.f32 %v3101_v11, %v2860_v53  ;;  %v7432_v53 = vld [vmem:[#allocation155_spill] sm:$0xff] }
 0x451   : > { %v6582_v30 = vpop.permute.xlu1 %2639  ;;  %v1602_v11 = vadd.f32 %v7431_v52, %v1442_v24  ;;  %v7438_v52 = vld [vmem:[#allocation122_spill] sm:$0xff] }
 0x452   : > { %3223 = vrot.lane.b32.xlu1 %v3187_v49, %s4935_s15  ;;  %v3185_v49 = vmul.f32 %v7432_v53, %v6477_v32  ;;  %v6603_v36 = vpop.permute.xlu0 %2814 }
 0x456   : > { %v6590_v29 = vpop.permute.xlu1 %3064  ;;  %3441 = vperm.xlu1 %4773, %v5201_v6   ;;  %v1859_v6 = vadd.f32 %v1843_v58, %v1602_v11  ;;  %v6614_v32 = vpop.permute.xlu0 %3235  ;;  %v7440_v11 = vld [vmem:[#allocation66_spill] sm:$0xff] }
 0x458   : > { %v2019_v24 = vadd.f32 %v7436_v31, %v1859_v6  ;;  %v2677_v6 = vmul.f32 %v6083_v34, %v6493_v12  ;;  %v7442_v31 = vld [vmem:[#allocation71_spill] sm:$0xff]  ;;  %v7447_v34 = vld [vmem:[#allocation128_spill] sm:$0xff] }
 0x459   : > { %v1423_v46 = vmul.f32 %v7443_v13, %v7442_v31  ;;  %v7448_v12 = vld [vmem:[#allocation84_spill] sm:$0xff]  ;;  %v7449_v13 = vld [vmem:[#allocation94_spill] sm:$0xff]  ;;  %v7450_v31 = vld [vmem:[#allocation129_spill] sm:$0xff] }
 0x45a   : > { %v6595_v59 = vpop.permute.xlu1 %3068  ;;  %2798 = vrot.lane.b32.xlu1 %v2766_v14, %s4935_s15  ;;  %v7437_v14 = vld [vmem:[#allocation87_spill] sm:$0xff] }
 0x45b   : > { %v2260_v7 = vmul.f32 %v7438_v52, %v7437_v14 }
 0x45d   : > { %v2276_v53 = vadd.f32 %v2260_v7, %v2019_v24  ;;  %v3094_v24 = vmul.f32 %v7419_v9, %v3053_v41  ;;  %v7455_v9 = vld [vmem:[#allocation43_spill] sm:$0xff] }
 0x45e   : > { %3219 = vrot.lane.b32.xlu1 %v3185_v49, %s4935_s15  ;;  %v7441_v49 = vld [vmem:[#allocation42_spill] sm:$0xff] }
 0x45f   : > { %v6606_v35 = vpop.permute.xlu1 %3493  ;;  %v1006_v58 = vmul.f32 %v7441_v49, %v7440_v11  ;;  %v2436_v14 = vadd.f32 %v7444_v43, %v2276_v53  ;;  %v1014_v43 = vmul.f32 %v7450_v31, %v7449_v13  ;;  %v7451_v53 = vld [vmem:[#allocation117_spill] sm:$0xff]  ;;  %v7460_v31 = vld [vmem:[#allocation68_spill] sm:$0xff] }
 0x461   : > { %v1182_v47 = vadd.f32 %v6315_v1, %v1006_v58  ;;  %v2693_v48 = vadd.f32 %v2677_v6, %v2436_v14  ;;  %v1013_v58 = vmul.f32 %v7448_v12, %v7447_v34  ;;  %v7454_v6 = vld [vmem:[#allocation76_spill] sm:$0xff]  ;;  %v7458_v34 = vld [vmem:[#allocation99_spill] sm:$0xff]  ;;  %v7459_v12 = vld [vmem:[#allocation133_spill] sm:$0xff] }
 0x462   : > { %3215 = vrot.lane.b32.xlu1 %v3183_v2, %s4935_s15  ;;  %v3041_v2 = vpop.permute.xlu0 %3040 }
 0x463   : > { %v6612_v4 = vpop.permute.xlu1 %2822  ;;  %v1439_v16 = vadd.f32 %v1423_v46, %v1182_v47  ;;  %v7453_v47 = vld [vmem:[#allocation64_spill] sm:$0xff] }
 0x464   : > { %v1012_v14 = vmul.f32 %v7454_v6, %v7453_v47 }
 0x465   : > { %v1599_v1 = vadd.f32 %v6321_v57, %v1439_v16  ;;  %v7456_v16 = vld [vmem:[#allocation131_spill] sm:$0xff] }
 0x466   : > { %v1188_v13 = vadd.f32 %v6341_v37, %v1012_v14 }
 0x467   : > { %v6621_v20 = vpop.permute.xlu1 %3243 }
 0x46b   : > { %v6629_v52 = vpop.permute.xlu1 %2631 }
 0x46c   : > { %7445 = vst [vmem:[#allocation158_spill] sm:$0xff] %v6629_v52  ;;  %v7452_v52 = vld [vmem:[#allocation46_spill] sm:$0xff] }
 0x46d   : > { %v1840_v46 = vmul.f32 %v7452_v52, %v7451_v53  ;;  %v7461_v52 = vld [vmem:[#allocation81_spill] sm:$0xff] }
 0x46e   : > { %v2813_v38 = vpop.permute.xlu0 %2812  ;;  %v1429_v53 = vmul.f32 %v7461_v52, %v7460_v31  ;;  %v7466_v31 = vld [vmem:[#allocation135_spill] sm:$0xff] }
 0x46f   : > { %v2853_v7 = vadd.f32 %v2813_v38, %v2693_v48  ;;  %v1189_v38 = vadd.f32 %v7455_v9, %v1013_v58  ;;  %v1190_v48 = vadd.f32 %v6411_v51, %v1014_v43  ;;  %v1856_v57 = vadd.f32 %v1840_v46, %v1599_v1  ;;  %v7462_v43 = vld [vmem:[#allocation121_spill] sm:$0xff]  ;;  %v7463_v1 = vld [vmem:[#allocation47_spill] sm:$0xff]  ;;  %v7464_v9 = vld [vmem:[#allocation164_spill] sm:$0xff] }
 0x470   : > { %v6632_v11 = vpop.permute.xlu1 %3056  ;;  %v1445_v51 = vadd.f32 %v1429_v53, %v1188_v13  ;;  %v2257_v46 = vmul.f32 %v7463_v1, %v7462_v43  ;;  %v7470_v13 = vld [vmem:[#allocation142_spill] sm:$0xff]  ;;  %v7471_v53 = vld [vmem:[#allocation72_spill] sm:$0xff] }
 0x471   : > { %v6635_v49 = vadd.f32 %v3094_v24, %v2853_v7  ;;  %v7457_v24 = vld [vmem:[#allocation89_spill] sm:$0xff]  ;;  %v2016_v58 = vadd.f32 %v6329_v10, %v1856_v57 }
 0x472   : > { %v1430_v7 = vmul.f32 %v7457_v24, %v7456_v16  ;;  %v1605_v57 = vadd.f32 %v6348_v23, %v1445_v51  ;;  %v7474_v51 = vld [vmem:[#allocation80_spill] sm:$0xff] }
 0x473   : > { %7446 = vst [vmem:[#allocation123_spill] sm:$0xff] %v6635_v49  ;;  %v1431_v49 = vmul.f32 %v7459_v12, %v7458_v34  ;;  %v6663_v34 = vpop.permute.xlu0 %3233  ;;  %v2273_v37 = vadd.f32 %v2257_v46, %v2016_v58  ;;  %v7465_v12 = vld [vmem:[#allocation134_spill] sm:$0xff] }
 0x474   : > { %v6647_v41 = vpop.permute.xlu1 %3060  ;;  %v1446_v60 = vadd.f32 %v1430_v7, %v1189_v38  ;;  %v1847_v38 = vmul.f32 %v7466_v31, %v7465_v12  ;;  %v7469_v7 = vld [vmem:[#allocation88_spill] sm:$0xff]  ;;  %v7473_v46 = vld [vmem:[#allocation170_spill] sm:$0xff] }
 0x475   : > { %v1447_v47 = vadd.f32 %v1431_v49, %v1190_v48  ;;  %v7467_v49 = vld [vmem:[#allocation21_spill] sm:$0xff]  ;;  %v1011_v52 = vmul.f32 %v7470_v13, %v7469_v7  ;;  %v2433_v12 = vadd.f32 %v6337_v22, %v2273_v37  ;;  %v7477_v13 = vld [vmem:[#allocation144_spill] sm:$0xff]  ;;  %v3091_v22 = vmul.f32 %v3041_v2, %v7423_v54 }
 0x476   : > { %v1606_v16 = vadd.f32 %v7464_v9, %v1446_v60  ;;  %v7468_v48 = vld [vmem:[#allocation137_spill] sm:$0xff]  ;;  %v2674_v60 = vmul.f32 %v6380_v26, %v6075_v61 }
 0x477   : > { %v1607_v24 = vadd.f32 %v6417_v39, %v1447_v47  ;;  %v1848_v10 = vmul.f32 %v7468_v48, %v7467_v49  ;;  %v7472_v39 = vld [vmem:[#allocation130_spill] sm:$0xff]  ;;  %v1187_v9 = vadd.f32 %v7473_v46, %v1011_v52  ;;  %v7476_v7 = vld [vmem:[#allocation93_spill] sm:$0xff] }
 0x478   : > { %v1846_v47 = vmul.f32 %v7472_v39, %v7471_v53  ;;  %v1863_v43 = vadd.f32 %v1847_v38, %v1606_v16  ;;  %v7475_v49 = vld [vmem:[#allocation82_spill] sm:$0xff]  ;;  %v1428_v61 = vmul.f32 %v7477_v13, %v7476_v7  ;;  %v2690_v26 = vadd.f32 %v2674_v60, %v2433_v12  ;;  %v7480_v39 = vld [vmem:[#allocation141_spill] sm:$0xff] }
 0x479   : > { %v6657_v6 = vpop.permute.xlu1 %3485  ;;  %v1864_v58 = vadd.f32 %v1848_v10, %v1607_v24  ;;  %v1010_v48 = vmul.f32 %v7475_v49, %v7474_v51  ;;  %v7481_v51 = vld [vmem:[#allocation85_spill] sm:$0xff]  ;;  %v7482_v60 = vld [vmem:[#allocation86_spill] sm:$0xff] }
 0x47a   : > { %v1862_v23 = vadd.f32 %v1846_v47, %v1605_v57  ;;  %v2023_v53 = vadd.f32 %v7478_v33, %v1863_v43  ;;  %v1444_v38 = vadd.f32 %v1428_v61, %v1187_v9  ;;  %v7479_v57 = vld [vmem:[#allocation98_spill] sm:$0xff]  ;;  %v1427_v12 = vmul.f32 %v7482_v60, %v7481_v51  ;;  %v7484_v43 = vld [vmem:[#allocation140_spill] sm:$0xff]  ;;  %v7485_v9 = vld [vmem:[#allocation77_spill] sm:$0xff] }
 0x47b   : > { %v2024_v16 = vadd.f32 %v6420_v5, %v1864_v58  ;;  %v1186_v10 = vadd.f32 %v6365_v40, %v1010_v48  ;;  %v2265_v47 = vmul.f32 %v7480_v39, %v7479_v57  ;;  %v7483_v33 = vld [vmem:[#allocation138_spill] sm:$0xff]  ;;  %v7486_v40 = vld [vmem:[#allocation136_spill] sm:$0xff]  ;;  %v7487_v7 = vld [vmem:[#allocation173_spill] sm:$0xff] }
 0x47c   : > { %v2022_v46 = vadd.f32 %v6354_v8, %v1862_v23  ;;  %v2264_v5 = vmul.f32 %v7484_v43, %v7483_v33  ;;  %v2263_v49 = vmul.f32 %v7486_v40, %v7485_v9  ;;  %v1604_v13 = vadd.f32 %v7487_v7, %v1444_v38  ;;  %v7489_v57 = vld [vmem:[#allocation146_spill] sm:$0xff]  ;;  %v7490_v38 = vld [vmem:[#allocation168_spill] sm:$0xff] }
 0x47d   : > { %v2819_v14 = vpop.permute.xlu1 %2818  ;;  %v2281_v54 = vadd.f32 %v2265_v47, %v2024_v16  ;;  %v1443_v61 = vadd.f32 %v1427_v12, %v1186_v10  ;;  %v2682_v8 = vmul.f32 %v6512_v15, %v6145_v55  ;;  %v7492_v15 = vld [vmem:[#allocation100_spill] sm:$0xff]  ;;  %v7494_v43 = vld [vmem:[#allocation90_spill] sm:$0xff] }
 0x47e   : > { %v2280_v48 = vadd.f32 %v2264_v5, %v2023_v53  ;;  %v2680_v53 = vmul.f32 %v6103_v27, %v6536_v18  ;;  %v7493_v33 = vld [vmem:[#allocation132_spill] sm:$0xff]  ;;  %v7496_v40 = vld [vmem:[#allocation178_spill] sm:$0xff] }
 0x47f   : > { %v2441_v16 = vadd.f32 %v6423_v50, %v2281_v54  ;;  %v7495_v27 = vld [vmem:[#allocation176_spill] sm:$0xff]  ;;  %v3428_v54 = vpop.f32.mrf.mxu1  ;;  %v7497_v7 = vld [vmem:[#allocation182_spill] sm:$0xff] }
 0x480   : > { %v6676_v1 = vpop.permute.xlu0 %3036  ;;  %v2440_v10 = vadd.f32 %v7490_v38, %v2280_v48  ;;  %v7502_v38 = vld [vmem:[#allocation172_spill] sm:$0xff] }
 0x481   : > { %v6680_v31 = vpop.permute.xlu1 %3239  ;;  %v2698_v60 = vadd.f32 %v2682_v8, %v2441_v16  ;;  %v7501_v16 = vld [vmem:[#allocation147_spill] sm:$0xff] }
 0x483   : > { %v2858_v50 = vadd.f32 %v6612_v4, %v2698_v60  ;;  %v7498_v4 = vld [vmem:[#allocation33_spill] sm:$0xff] }
 0x484   : > { %v2807_v24 = vpop.permute.xlu0 %2806 }
 0x485   : > { %v2850_v37 = vadd.f32 %v2807_v24, %v2690_v26  ;;  %v6690_v52 = vpop.permute.xlu1 %3048  ;;  %v2279_v26 = vadd.f32 %v2263_v49, %v2022_v46  ;;  %v7488_v24 = vld [vmem:[#allocation143_spill] sm:$0xff]  ;;  %v7491_v46 = vld [vmem:[#allocation20_spill] sm:$0xff]  ;;  %v3098_v49 = vmul.f32 %v7496_v40, %v6595_v59 }
 0x486   : > { %v1603_v55 = vadd.f32 %v7491_v46, %v1443_v61  ;;  %v3277_v61 = vadd.f32 %v6621_v20, %v6578_v0  ;;  %v7503_v0 = vld [vmem:[#allocation191_spill] sm:$0xff]  ;;  %v7509_v40 = vld [vmem:[#allocation36_spill] sm:$0xff] }
 0x487   : > { %v6699_v58 = vadd.f32 %v3091_v22, %v2850_v37  ;;  %v1845_v22 = vmul.f32 %v7489_v57, %v7488_v24  ;;  %v2681_v37 = vmul.f32 %v6119_v62, %v6546_v28  ;;  %v2439_v51 = vadd.f32 %v7492_v15, %v2279_v26  ;;  %v7499_v57 = vld [vmem:[#allocation62_spill] sm:$0xff] }
 0x488   : > { %v6703_v2 = vpop.permute.xlu0 %3227  ;;  %v1844_v62 = vmul.f32 %v7494_v43, %v7493_v33  ;;  %v7504_v43 = vld [vmem:[#allocation139_spill] sm:$0xff] }
 0x489   : > { %v1861_v47 = vadd.f32 %v1845_v22, %v1604_v13  ;;  %v2697_v28 = vadd.f32 %v2681_v37, %v2440_v10  ;;  %v2696_v5 = vadd.f32 %v2680_v53, %v2439_v51  ;;  %v3099_v13 = vmul.f32 %v6558_v25, %v7497_v7  ;;  %v7500_v37 = vld [vmem:[#allocation145_spill] sm:$0xff] }
 0x48a   : > { %v6708_v23 = vpop.permute.xlu1 %3473  ;;  %v1860_v9 = vadd.f32 %v1844_v62, %v1603_v55  ;;  %v1008_v22 = vmul.f32 %v7499_v57, %v7498_v4  ;;  %v2262_v53 = vmul.f32 %v7501_v16, %v7500_v37  ;;  %v3097_v10 = vmul.f32 %v7502_v38, %v6590_v29  ;;  %v7512_v57 = vld [vmem:[#allocation10_spill] sm:$0xff] }
 0x48b   : > { %v2021_v18 = vadd.f32 %v7495_v27, %v1861_v47  ;;  %v2856_v26 = vadd.f32 %v2819_v14, %v2696_v5  ;;  %v2857_v59 = vadd.f32 %v6570_v45, %v2697_v28  ;;  %v3517_v25 = vmul.f32 %v6606_v35, %v3428_v54  ;;  %v7505_v35 = vld [vmem:[#allocation95_spill] sm:$0xff]  ;;  %v7506_v28 = vld [vmem:[#allocation186_spill] sm:$0xff]  ;;  %v7507_v5 = vld [vmem:[#allocation153_spill] sm:$0xff] }
 0x48c   : > { %v6717_v39 = vpop.permute.xlu0 %3024  ;;  %v3115_v47 = vadd.f32 %v3099_v13, %v2858_v50  ;;  %v2020_v14 = vadd.f32 %v7503_v0, %v1860_v9  ;;  %v2261_v62 = vmul.f32 %v7505_v35, %v7504_v43  ;;  %v1184_v50 = vadd.f32 %v7506_v28, %v1008_v22  ;;  %v7508_v27 = vld [vmem:[#allocation193_spill] sm:$0xff]  ;;  %v7511_v54 = vld [vmem:[#allocation179_spill] sm:$0xff] }
 0x48d   : > { %v2278_v20 = vadd.f32 %v2262_v53, %v2021_v18  ;;  %v3114_v15 = vadd.f32 %v3098_v49, %v2857_v59  ;;  %v3113_v51 = vadd.f32 %v3097_v10, %v2856_v26  ;;  %v2679_v18 = vmul.f32 %v7508_v27, %v7507_v5  ;;  %v7510_v49 = vld [vmem:[#allocation67_spill] sm:$0xff]  ;;  %v7513_v59 = vld [vmem:[#allocation192_spill] sm:$0xff]  ;;  %v7523_v5 = vld [vmem:[#allocation78_spill] sm:$0xff] }
 0x48e   : > { %v6722_v12 = vpop.permute.xlu1 %3477  ;;  %v3275_v60 = vadd.f32 %v6680_v31, %v3115_v47  ;;  %v1425_v31 = vmul.f32 %v7510_v49, %v7509_v40  ;;  %v3515_v7 = vmul.f32 %v6525_v17, %v6657_v6  ;;  %v2678_v22 = vmul.f32 %v6582_v30, %v7512_v57  ;;  %v7514_v10 = vld [vmem:[#allocation187_spill] sm:$0xff]  ;;  %v7515_v47 = vld [vmem:[#allocation181_spill] sm:$0xff]  ;;  %v7516_v30 = vld [vmem:[#allocation38_spill] sm:$0xff] }
 0x48f   : > { %v7524_v27 = vld [vmem:[#allocation97_spill] sm:$0xff]  ;;  %v7527_v49 = vld [vmem:[#allocation40_spill] sm:$0xff] }
 0x490   : > { %v1441_v4 = vadd.f32 %v1425_v31, %v1184_v50 }
 0x491   : > { %v3498_v48 = vpop.permute.xlu0 %3497 }
 0x492   : > { %v3518_v8 = vmul.f32 %v6548_v3, %v3498_v48  ;;  %v2817_v24 = vpop.permute.xlu1 %2816  ;;  %v3276_v3 = vadd.f32 %v6584_v21, %v6561_v63  ;;  %v2277_v48 = vadd.f32 %v2261_v62, %v2020_v14  ;;  %v7518_v14 = vld [vmem:[#allocation175_spill] sm:$0xff]  ;;  %v7522_v62 = vld [vmem:[#allocation188_spill] sm:$0xff] }
 0x494   : > { %v3534_v46 = vadd.f32 %v3518_v8, %v3277_v61  ;;  %v3533_v9 = vadd.f32 %v3517_v25, %v3276_v3  ;;  %v3273_v61 = vadd.f32 %v6614_v32, %v3113_v51  ;;  %v2437_v38 = vadd.f32 %v7513_v59, %v2277_v48  ;;  %v7519_v51 = vld [vmem:[#allocation73_spill] sm:$0xff] }
 0x495   : > { %v3490_v55 = vpop.permute.xlu0 %3489  ;;  %v1601_v32 = vadd.f32 %v7514_v10, %v1441_v4  ;;  %v3095_v3 = vmul.f32 %v6632_v11, %v7518_v14  ;;  %v7525_v11 = vld [vmem:[#allocation118_spill] sm:$0xff]  ;;  %v7531_v4 = vld [vmem:[#allocation156_spill] sm:$0xff] }
 0x496   : > { %v3558_v45 = vpack.c.bf16 %v6572_v56, %v3534_v46  ;;  %v3516_v33 = vmul.f32 %v3490_v55, %v6554_v44  ;;  %v3238_v29 = vpop.permute.xlu1 %3237  ;;  %v2438_v56 = vadd.f32 %v7511_v54, %v2278_v20  ;;  %v3096_v46 = vmul.f32 %v6647_v41, %v7515_v47  ;;  %v7517_v20 = vld [vmem:[#allocation116_spill] sm:$0xff] }
 0x497   : > { %v3274_v21 = vadd.f32 %v3238_v29, %v3114_v15  ;;  %v1842_v0 = vmul.f32 %v7517_v20, %v7516_v30  ;;  %v7521_v29 = vld [vmem:[#allocation154_spill] sm:$0xff]  ;;  %v7538_v47 = vld [vmem:[#allocation52_spill] sm:$0xff]  ;;  %v7539_v20 = vld [vmem:[#allocation49_spill] sm:$0xff] }
 0x498   : > { %v3532_v63 = vadd.f32 %v3516_v33, %v3275_v60  ;;  %4497 = vmatpush3.bf16.msra.mxu0 %v3558_v45  ;;  %v2695_v37 = vadd.f32 %v2679_v18, %v2438_v56  ;;  %v7520_v60 = vld [vmem:[#allocation92_spill] sm:$0xff]  ;;  %v1424_v18 = vmul.f32 %v7524_v27, %v7523_v5 }
 0x499   : > { %v3482_v44 = vpop.permute.xlu0 %3481  ;;  %4498 = vmatprep.subr.bf16.mxu0 %v7439_v19  ;;  %v3531_v16 = vadd.f32 %v3515_v7, %v3274_v21  ;;  %v1007_v45 = vmul.f32 %v7520_v60, %v7519_v51  ;;  %v7542_v60 = vld [vmem:[#allocation35_spill] sm:$0xff] }
 0x49a   : > { %v3557_v13 = vpack.c.bf16 %v3533_v9, %v3532_v63  ;;  %v3514_v26 = vmul.f32 %v6507_v42, %v3482_v44  ;;  %v6762_v8 = vpop.permute.xlu1 %3044  ;;  %v2855_v17 = vadd.f32 %v2817_v24, %v2695_v37  ;;  %v2694_v42 = vadd.f32 %v2678_v22, %v2437_v38  ;;  %v7526_v63 = vld [vmem:[#allocation91_spill] sm:$0xff]  ;;  %v7534_v37 = vld [vmem:[#allocation101_spill] sm:$0xff] }
 0x49b   : > { %v1858_v24 = vadd.f32 %v1842_v0, %v1601_v32  ;;  %v1183_v43 = vadd.f32 %v7521_v29, %v1007_v45  ;;  %v3512_v9 = vmul.f32 %v6708_v23, %v7525_v11  ;;  %v3513_v21 = vmul.f32 %v6722_v12, %v7526_v63  ;;  %v7532_v23 = vld [vmem:[#allocation189_spill] sm:$0xff]  ;;  %v7533_v12 = vld [vmem:[#allocation126_spill] sm:$0xff]  ;;  %v7543_v45 = vld [vmem:[#allocation60_spill] sm:$0xff] }
 0x49c   : > { %v3530_v53 = vadd.f32 %v3514_v26, %v3273_v61  ;;  %4499 = vmatpush3.bf16.msra.mxu0 %v3557_v13  ;;  %v3112_v55 = vadd.f32 %v3096_v46, %v2855_v17  ;;  %v2854_v33 = vadd.f32 %v6603_v36, %v2694_v42  ;;  %v7528_v36 = vld [vmem:[#allocation119_spill] sm:$0xff]  ;;  %v7529_v13 = vld [vmem:[#allocation158_spill] sm:$0xff]  ;;  %v7530_v61 = vld [vmem:[#allocation149_spill] sm:$0xff] }
 0x49d   : > { %4500 = vmatprep.subr.bf16.mxu0 %v7439_v19  ;;  %v2018_v28 = vadd.f32 %v7522_v62, %v1858_v24  ;;  %v2259_v31 = vmul.f32 %v7528_v36, %v7527_v49  ;;  %v1440_v54 = vadd.f32 %v1424_v18, %v1183_v43  ;;  %v2676_v26 = vmul.f32 %v7530_v61, %v7529_v13  ;;  %v3466_v59 = vpop.permute.xlu0 %3465  ;;  %v7535_v17 = vld [vmem:[#allocation32_spill] sm:$0xff]  ;;  %v7537_v42 = vld [vmem:[#allocation15_spill] sm:$0xff]  ;;  %v7549_v18 = vld [vmem:[#allocation54_spill] sm:$0xff] }
 0x49e   : > { %v3556_v6 = vpack.c.bf16 %v3531_v16, %v3530_v53  ;;  %v3272_v41 = vadd.f32 %v6663_v34, %v3112_v55  ;;  %v3111_v35 = vadd.f32 %v3095_v3, %v2854_v33  ;;  %v1841_v16 = vmul.f32 %v7534_v37, %v7533_v12  ;;  %v7540_v3 = vld [vmem:[#allocation171_spill] sm:$0xff]  ;;  %v7545_v43 = vld [vmem:[#allocation44_spill] sm:$0xff]  ;;  %v7553_v49 = vld [vmem:[#allocation106_spill] sm:$0xff] }
 0x49f   : > { %v6769_v25 = vpop.permute.xlu1 %3469  ;;  %v2275_v48 = vadd.f32 %v2259_v31, %v2018_v28  ;;  %v1600_v57 = vadd.f32 %v7531_v4, %v1440_v54  ;;  %v1004_v46 = vmul.f32 %v7538_v47, %v7537_v42  ;;  %v7541_v24 = vld [vmem:[#allocation163_spill] sm:$0xff]  ;;  %v1422_v33 = vmul.f32 %v7543_v45, %v7542_v60  ;;  %v7547_v28 = vld [vmem:[#allocation17_spill] sm:$0xff]  ;;  %v7550_v11 = vld [vmem:[#allocation16_spill] sm:$0xff] }
 0x4a0   : > { %4501 = vmatpush3.bf16.msra.mxu0 %v3556_v6  ;;  %v3529_v34 = vadd.f32 %v3513_v21, %v3272_v41  ;;  %v7536_v6 = vld [vmem:[#allocation56_spill] sm:$0xff]  ;;  %v3093_v51 = vmul.f32 %v7541_v24, %v6690_v52  ;;  %v7544_v29 = vld [vmem:[#allocation59_spill] sm:$0xff]  ;;  %v7556_v13 = vld [vmem:[#allocation14_spill] sm:$0xff] }
 0x4a1   : > { %4502 = vmatprep.subr.bf16.mxu0 %v7439_v19  ;;  %v2435_v22 = vadd.f32 %v7532_v23, %v2275_v48  ;;  %v1005_v10 = vmul.f32 %v7536_v6, %v7535_v17  ;;  %v1857_v32 = vadd.f32 %v1841_v16, %v1600_v57  ;;  %v1180_v55 = vadd.f32 %v7540_v3, %v1004_v46  ;;  %v6820_v5 = vpop.permute.xlu0 %3449  ;;  %v7551_v63 = vld [vmem:[#allocation127_spill] sm:$0xff]  ;;  %v7552_v21 = vld [vmem:[#allocation104_spill] sm:$0xff]  ;;  %v7557_v4 = vld [vmem:[#allocation58_spill] sm:$0xff] }
 0x4a2   : > { %v1003_v41 = vmul.f32 %v7545_v43, %v7544_v29  ;;  %v2258_v52 = vmul.f32 %v7552_v21, %v7551_v63  ;;  %v7558_v57 = vld [vmem:[#allocation25_spill] sm:$0xff]  ;;  %v7561_v6 = vld [vmem:[#allocation196_spill] sm:$0xff]  ;;  %v7563_v46 = vld [vmem:[#allocation123_spill] sm:$0xff] }
 0x4a3   : > { %v2811_v15 = vpop.permute.xlu1 %2810  ;;  %v2692_v38 = vadd.f32 %v2676_v26, %v2435_v22  ;;  %v1181_v0 = vadd.f32 %v7539_v20, %v1005_v10  ;;  %v1419_v23 = vmul.f32 %v7558_v57, %v7557_v4  ;;  %v7559_v22 = vld [vmem:[#allocation103_spill] sm:$0xff]  ;;  %v3510_v10 = vmul.f32 %v7561_v6, %v3466_v59  ;;  %v7564_v20 = vld [vmem:[#allocation161_spill] sm:$0xff]  ;;  %v7565_v3 = vld [vmem:[#allocation18_spill] sm:$0xff] }
 0x4a4   : > { %v1179_v36 = vadd.f32 %v7553_v49, %v1003_v41  ;;  %v7568_v60 = vld [vmem:[#allocation110_spill] sm:$0xff]  ;;  %v7569_v43 = vld [vmem:[#allocation13_spill] sm:$0xff]  ;;  %v7570_v41 = vld [vmem:[#allocation108_spill] sm:$0xff] }
 0x4a5   : > { %v2852_v30 = vadd.f32 %v2811_v15, %v2692_v38  ;;  %v7560_v38 = vld [vmem:[#allocation174_spill] sm:$0xff]  ;;  %v2805_v47 = vpop.permute.xlu0 %2804  ;;  %v2675_v59 = vmul.f32 %v7570_v41, %v7569_v43  ;;  %v7574_v63 = vld [vmem:[#allocation29_spill] sm:$0xff] }
 0x4a6   : > { %v7576_v49 = vld [vmem:[#allocation26_spill] sm:$0xff]  ;;  %v7579_v4 = vld [vmem:[#allocation169_spill] sm:$0xff] }
 0x4a7   : > { %v3232_v50 = vpop.permute.xlu1 %3231  ;;  %v3109_v27 = vadd.f32 %v3093_v51, %v2852_v30  ;;  %v7567_v51 = vld [vmem:[#allocation37_spill] sm:$0xff]  ;;  %v3092_v57 = vmul.f32 %v6762_v8, %v7579_v4  ;;  %v7584_v6 = vld [vmem:[#allocation34_spill] sm:$0xff]  ;;  %v7589_v8 = vld [vmem:[#allocation28_spill] sm:$0xff] }
 0x4a8   : > { %v3271_v40 = vadd.f32 %v3232_v50, %v3111_v35  ;;  %v7546_v35 = vld [vmem:[#allocation159_spill] sm:$0xff]  ;;  %v1839_v45 = vmul.f32 %v7568_v60, %v7567_v51  ;;  %v7590_v60 = vld [vmem:[#allocation57_spill] sm:$0xff] }
 0x4a9   : > { %v2017_v62 = vadd.f32 %v7546_v35, %v1857_v32  ;;  %v7548_v50 = vld [vmem:[#allocation55_spill] sm:$0xff]  ;;  %v3269_v26 = vadd.f32 %v6703_v2, %v3109_v27  ;;  %v7562_v32 = vld [vmem:[#allocation53_spill] sm:$0xff]  ;;  %v7572_v27 = vld [vmem:[#allocation184_spill] sm:$0xff] }
 0x4aa   : > { %v3528_v56 = vadd.f32 %v3512_v9, %v3271_v40  ;;  %v1421_v15 = vmul.f32 %v7548_v50, %v7547_v28  ;;  %v1002_v9 = vmul.f32 %v7550_v11, %v7549_v18  ;;  %v1438_v40 = vadd.f32 %v1422_v33, %v1181_v0 }
 0x4ab   : > { %v6792_v44 = vpop.permute.xlu1 %3032  ;;  %v3511_v42 = vmul.f32 %v7562_v32, %v6769_v25  ;;  %v3526_v33 = vadd.f32 %v3510_v10, %v3269_v26  ;;  %v7571_v25 = vld [vmem:[#allocation69_spill] sm:$0xff] }
 0x4ac   : > { %v3555_v7 = vpack.c.bf16 %v3529_v34, %v3528_v56  ;;  %v1437_v54 = vadd.f32 %v1421_v15, %v1180_v55  ;;  %v7554_v56 = vld [vmem:[#allocation63_spill] sm:$0xff]  ;;  %v1178_v61 = vadd.f32 %v7556_v13, %v1002_v9  ;;  %v1598_v12 = vadd.f32 %v7559_v22, %v1438_v40  ;;  %v7566_v55 = vld [vmem:[#allocation105_spill] sm:$0xff] }
 0x4ad   : > { %v7555_v34 = vld [vmem:[#allocation27_spill] sm:$0xff]  ;;  %v1838_v24 = vmul.f32 %v7566_v55, %v7565_v3  ;;  %v7573_v9 = vld [vmem:[#allocation113_spill] sm:$0xff] }
 0x4ae   : > { %4503 = vmatpush3.bf16.msra.mxu0 %v3555_v7  ;;  %v1420_v48 = vmul.f32 %v7555_v34, %v7554_v56  ;;  %v2274_v7 = vadd.f32 %v2258_v52, %v2017_v62  ;;  %v1597_v17 = vadd.f32 %v7560_v38, %v1437_v54  ;;  %v1435_v2 = vadd.f32 %v1419_v23, %v1178_v61  ;;  %v3226_v52 = vpop.permute.xlu0 %3225  ;;  %v7575_v40 = vld [vmem:[#allocation107_spill] sm:$0xff]  ;;  %v7577_v56 = vld [vmem:[#allocation50_spill] sm:$0xff]  ;;  %v7581_v22 = vld [vmem:[#allocation109_spill] sm:$0xff] }
 0x4af   : > { %4504 = vmatprep.subr.bf16.mxu0 %v7439_v19  ;;  %v1855_v62 = vadd.f32 %v1839_v45, %v1598_v12  ;;  %v1837_v21 = vmul.f32 %v7574_v63, %v7573_v9  ;;  %v7580_v23 = vld [vmem:[#allocation22_spill] sm:$0xff]  ;;  %v7588_v55 = vld [vmem:[#allocation111_spill] sm:$0xff] }
 0x4b0   : > { %v6801_v53 = vpop.permute.xlu1 %3457  ;;  %v1436_v37 = vadd.f32 %v1420_v48, %v1179_v36  ;;  %v2434_v0 = vadd.f32 %v7564_v20, %v2274_v7  ;;  %v1854_v50 = vadd.f32 %v1838_v24, %v1597_v17  ;;  %v1595_v18 = vadd.f32 %v7572_v27, %v1435_v2  ;;  %v7578_v7 = vld [vmem:[#allocation177_spill] sm:$0xff]  ;;  %v7587_v2 = vld [vmem:[#allocation31_spill] sm:$0xff] }
 0x4b1   : > { %v1836_v36 = vmul.f32 %v7576_v49, %v7575_v40  ;;  %v2015_v34 = vadd.f32 %v7577_v56, %v1855_v62  ;;  %v2255_v12 = vmul.f32 %v7581_v22, %v7580_v23  ;;  %v2253_v24 = vmul.f32 %v7589_v8, %v7588_v55  ;;  %v7592_v62 = vld [vmem:[#allocation197_spill] sm:$0xff]  ;;  %v7596_v63 = vld [vmem:[#allocation23_spill] sm:$0xff]  ;;  %v7599_v49 = vld [vmem:[#allocation190_spill] sm:$0xff] }
 0x4b2   : > { %v1596_v28 = vadd.f32 %v7571_v25, %v1436_v37  ;;  %v2691_v11 = vadd.f32 %v2675_v59, %v2434_v0  ;;  %v2014_v13 = vadd.f32 %v7578_v7, %v1854_v50  ;;  %v7582_v37 = vld [vmem:[#allocation39_spill] sm:$0xff]  ;;  %v7586_v0 = vld [vmem:[#allocation114_spill] sm:$0xff]  ;;  %v3508_v25 = vmul.f32 %v6801_v53, %v7592_v62  ;;  %v7594_v27 = vld [vmem:[#allocation41_spill] sm:$0xff] }
 0x4b3   : > { %v1852_v26 = vadd.f32 %v1836_v36, %v1595_v18  ;;  %v2254_v3 = vmul.f32 %v7587_v2, %v7586_v0  ;;  %v7595_v18 = vld [vmem:[#allocation61_spill] sm:$0xff]  ;;  %v7600_v53 = vld [vmem:[#allocation24_spill] sm:$0xff]  ;;  %v7603_v23 = vld [vmem:[#allocation30_spill] sm:$0xff] }
 0x4b4   : > { %v6808_v14 = vpop.permute.xlu1 %3461  ;;  %v1853_v48 = vadd.f32 %v1837_v21, %v1596_v28  ;;  %v2271_v32 = vadd.f32 %v2255_v12, %v2014_v13  ;;  %v7593_v28 = vld [vmem:[#allocation198_spill] sm:$0xff]  ;;  %v7597_v21 = vld [vmem:[#allocation51_spill] sm:$0xff]  ;;  %v7598_v40 = vld [vmem:[#allocation65_spill] sm:$0xff] }
 0x4b5   : > { %v3509_v50 = vmul.f32 %v6808_v14, %v7593_v28  ;;  %v2671_v36 = vmul.f32 %v7599_v49, %v7598_v40  ;;  %v7601_v13 = vld [vmem:[#allocation9_spill] sm:$0xff] }
 0x4b6   : > { %v2013_v10 = vadd.f32 %v7584_v6, %v1853_v48 }
 0x4b8   : > { %v2809_v31 = vpop.permute.xlu1 %2808 }
 0x4b9   : > { %v2851_v54 = vadd.f32 %v2809_v31, %v2691_v11  ;;  %v2673_v11 = vmul.f32 %v7595_v18, %v7594_v27  ;;  %v7612_v27 = vld [vmem:[#allocation194_spill] sm:$0xff] }
 0x4bb   : > { %v3108_v17 = vadd.f32 %v3092_v57, %v2851_v54  ;;  %v7602_v57 = vld [vmem:[#allocation102_spill] sm:$0xff] }
 0x4bc   : > { %v3230_v16 = vpop.permute.xlu1 %3229  ;;  %v2670_v22 = vmul.f32 %v7603_v23, %v7602_v57 }
 0x4bd   : > { %v3270_v30 = vadd.f32 %v3230_v16, %v7563_v46  ;;  %v7583_v16 = vld [vmem:[#allocation112_spill] sm:$0xff]  ;;  %v3268_v51 = vadd.f32 %v3226_v52, %v3108_v17  ;;  %v2672_v52 = vmul.f32 %v7597_v21, %v7596_v63 }
 0x4be   : > { %v2256_v38 = vmul.f32 %v7583_v16, %v7582_v37  ;;  %v7604_v37 = vld [vmem:[#allocation162_spill] sm:$0xff]  ;;  %v7605_v17 = vld [vmem:[#allocation160_spill] sm:$0xff] }
 0x4bf   : > { %v3527_v29 = vadd.f32 %v3511_v42, %v3270_v30  ;;  %v3446_v42 = vpop.permute.xlu0 %3445  ;;  %v7585_v30 = vld [vmem:[#allocation185_spill] sm:$0xff]  ;;  %v3525_v56 = vadd.f32 %v3509_v50, %v3268_v51  ;;  %v7611_v50 = vld [vmem:[#allocation195_spill] sm:$0xff] }
 0x4c0   : > { %v3029_v35 = vpop.permute.xlu1 %3028  ;;  %v2272_v31 = vadd.f32 %v2256_v38, %v2015_v34  ;;  %v2012_v20 = vadd.f32 %v7585_v30, %v1852_v26 }
 0x4c1   : > { %v3554_v15 = vpack.c.bf16 %v3527_v29, %v3526_v33  ;;  %v2270_v33 = vadd.f32 %v2254_v3, %v2013_v10  ;;  %v7591_v29 = vld [vmem:[#allocation180_spill] sm:$0xff]  ;;  %v3088_v16 = vmul.f32 %v3029_v35, %v7604_v37 }
 0x4c2   : > { %v2432_v45 = vadd.f32 %v7590_v60, %v2272_v31  ;;  %v2431_v43 = vadd.f32 %v7591_v29, %v2271_v32  ;;  %v2269_v59 = vadd.f32 %v2253_v24, %v2012_v20  ;;  %v3090_v31 = vmul.f32 %v7605_v17, %v6676_v1  ;;  %v7606_v32 = vld [vmem:[#allocation155_spill] sm:$0xff]  ;;  %v7607_v3 = vld [vmem:[#allocation148_spill] sm:$0xff]  ;;  %v7609_v1 = vld [vmem:[#allocation157_spill] sm:$0xff] }
 0x4c3   : > { %4505 = vmatpush3.bf16.msra.mxu0 %v3554_v15  ;;  %v2801_v9 = vpop.permute.xlu0 %2800  ;;  %v2430_v7 = vadd.f32 %v7600_v53, %v2270_v33  ;;  %v3089_v30 = vmul.f32 %v7606_v32, %v6792_v44  ;;  %v7608_v24 = vlaneseq  ;;  %v3087_v60 = vmul.f32 %v6717_v39, %v7609_v1  ;;  %v4089_v39 = vld [vmem:[%s452_s17] ss:$0 sm:$0xff] }
 0x4c4   : > { %4506 = vmatprep.subr.bf16.mxu0 %v7439_v19  ;;  %v2689_v34 = vadd.f32 %v2673_v11, %v2432_v45  ;;  %v2429_v14 = vadd.f32 %v7601_v13, %v2269_v59  ;;  %v2688_v26 = vadd.f32 %v2672_v52, %v2431_v43  ;;  %v7610_v45 = vld [vmem:[#allocation115_spill] sm:$0xff] }
 0x4c5   : > { %v3454_v61 = vpop.permute.xlu1 %3453  ;;  %v2687_v12 = vadd.f32 %v2671_v36, %v2430_v7  ;;  %v6892_v51 = vshrl.u32 %v7608_v24, 7  ;;  %v3506_v33 = vmul.f32 %v7610_v45, %v6820_v5  ;;  %v3549_v52 = vld [vmem:[#allocation2] sm:$0xff] }
 0x4c6   : > { %v2849_v4 = vadd.f32 %v2805_v47, %v2689_v34  ;;  %v2686_v47 = vadd.f32 %v2670_v22, %v2429_v14  ;;  %v3507_v55 = vmul.f32 %v7607_v3, %v3454_v61 }
 0x4c7   : > { %v3222_v6 = vpop.permute.xlu0 %3221  ;;  %v2847_v20 = vadd.f32 %v2801_v9, %v2687_v12  ;;  %v3539_v28 = vadd.s32 8, %v6892_v51  ;;  %vm3544_vm5 = vcmp.eq.s32.totalorder %v6892_v51, %v4089_v39 }
 0x4c8   : > { %v3106_v0 = vadd.f32 %v3090_v31, %v2849_v4 }
 0x4c9   : > { %v2803_v46 = vpop.permute.xlu1 %2802  ;;  %v3104_v2 = vadd.f32 %v3088_v16, %v2847_v20  ;;  %vm3545_vm6 = vcmp.eq.s32.totalorder %v3539_v28, %v4089_v39 }
 0x4ca   : > { %v2848_v38 = vadd.f32 %v2803_v46, %v2688_v26  ;;  %v3266_v44 = vadd.f32 %v3222_v6, %v3106_v0  ;;  %vm4090_vm8 = vmpackc.low %vm3545_vm6, %vm3544_vm5 }
 0x4cb   : > { %v3218_v43 = vpop.permute.xlu0 %3217 }
 0x4cc   : > { %v3105_v35 = vadd.f32 %v3089_v30, %v2848_v38  ;;  %v3523_v59 = vadd.f32 %v3507_v55, %v3266_v44 }
 0x4cd   : > { %v3224_v41 = vpop.permute.xlu1 %3223 }
 0x4ce   : > { %v3267_v15 = vadd.f32 %v3224_v41, %v6699_v58  ;;  %v3264_v41 = vadd.f32 %v3218_v43, %v3104_v2 }
 0x4d0   : > { %v3524_v54 = vadd.f32 %v3508_v25, %v3267_v15  ;;  %v3505_v15 = vmul.f32 %v3446_v42, %v7611_v50  ;;  %v4939_v42 = vmov 1.0|1.0  }
 0x4d1   : > { %v3442_v48 = vpop.permute.xlu1 %3441 }
 0x4d2   : > { %v3553_v58 = vpack.c.bf16 %v3525_v56, %v3524_v54  ;;  %v3504_v18 = vmul.f32 %v3442_v48, %v7612_v27  ;;  %v3521_v63 = vadd.f32 %v3505_v15, %v3264_v41  ;;  %v3550_v54 = vld [vmem:[#allocation2 + $0x8] sm:$0xf] }
 0x4d4   : > { %4507 = vmatpush3.bf16.msra.mxu0 %v3553_v58 }
 0x4d5   : > { %v2799_v10 = vpop.permute.xlu1 %2798  ;;  %4508 = vmatprep.subr.bf16.mxu0 %v7439_v19 }
 0x4d6   : > { %v2846_v8 = vadd.f32 %v2799_v10, %v2686_v47 }
 0x4d8   : > { %v3103_v61 = vadd.f32 %v3087_v60, %v2846_v8 }
 0x4d9   : > { %v3220_v46 = vpop.permute.xlu1 %3219 }
 0x4da   : > { %v3265_v29 = vadd.f32 %v3220_v46, %v3105_v35 }
 0x4dc   : > { %v3522_v62 = vadd.f32 %v3506_v33, %v3265_v29 }
 0x4dd   : > { %v3216_v25 = vpop.permute.xlu1 %3215 }
 0x4de   : > { %v3552_v11 = vpack.c.bf16 %v3523_v59, %v3522_v62  ;;  %v3263_v9 = vadd.f32 %v3216_v25, %v3103_v61 }
 0x4e0   : > { %v3520_v5 = vadd.f32 %v3504_v18, %v3263_v9  ;;  %4509 = vmatpush3.bf16.msra.mxu0 %v3552_v11 }
 0x4e1   : > { %4510 = vmatprep.subr.bf16.mxu0 %v7439_v19 }
 0x4e2   : > { %v3551_v21 = vpack.c.bf16 %v3521_v63, %v3520_v5 }
 0x4e4   : > { %4511 = vmatpush3.bf16.msra.mxu0 %v3551_v21 }
 0x4e7   : > { %4513 = vmatmul.mubr.msk.bf16.vlgmr.msra.gmra.mxu0 %vm4090_vm8, %v4939_v42 }
 0x5a7   : > { %v3593_v40 = vpop.f32.mrf.mxu0 }
 0x5a8   : > { %v3600_v49 = vadd.f32 %v3593_v40, %v3549_v52 }
 0x5a9   : > { %v4514_v36 = vpop.f32.mrf.mxu0 }
 0x5aa   : > { %3603 = vst.msk [vmem:[#allocation2] sm:$0xff] %vm3602_vm9, %v3600_v49  ;;  %3609 = sbr.rel (%p4092_p3) target bundleno = 2231 (0x8b7), region = 80 }
 0x5ab   : > { %v3596_v56 = vpop.f32.mrf.mxu0 }
 0x5ac   : > { %v3601_v34 = vadd.f32 %v3596_v56, %v3550_v54 }
 0x5ad   : > { %v4515_v19 = vpop.f32.mrf.mxu0 }
 0x5ae   : > { %3605 = vst.msk [vmem:[#allocation2 + $0x8] sm:$0xf] %vm3604_vm10, %v3601_v34 }
 0x5af   : > { %v3629_v48 = vld [vmem:[%s6987_s5 + $0x8] sm:$0x1f]  ;;  %vm3637_vm11 = vcmask 1044480   ;;  %v3628_v53 = vld [vmem:[%s6987_s5] sm:$0xff]  ;;  %vm3630_vm12 = vcmask 105472   ;;  %v4940_v26 = vmov 0  }
 0x5b0   : > { %v3610_v7 = vld [vmem:[%s6985_s3] sm:$0xff]  ;;  %4516 = vmatprep.subr.msk.mxu1 %vm3637_vm11, %v3629_v48  ;;  %v3615_v13 = vld [vmem:[%s6989_s7 + $0x8] sm:$0xf]  ;;  %4845 = vset.pattern.permute.xlu0 %v4940_v26  ;;  %v4941_v4 = vmov 0.0   ;;  %vm4942_vm13 = vmmov 0   ;;  %v3837_v23 = vld [vmem:[%s6992_s10 + $0x38] sm:$0xff] }
 0x5b1   : > { %4520 = vmatprep.mubr.msk.f32.mxu1 %vm3630_vm12, %v3610_v7  ;;  %4517 = vmatpush3.msk.msra.mxu1 %vm3637_vm11, %v3629_v48  ;;  %v3611_v14 = vld [vmem:[%s6985_s3 + $0x8] sm:$0xf]  ;;  %v3614_v58 = vld [vmem:[%s6989_s7] sm:$0xff]  ;;  %v3836_v22 = vld [vmem:[%s6992_s10 + $0x30] sm:$0xff]  ;;  %vm3749_vm14 = vcmask 1043456   ;;  %vm3919_vm2 = vcmask 17408  }
 0x5b2   : > { %4518 = vmatprep.subr.mxu1 %v3628_v53  ;;  %3623 = vperm.xlu0 %4845, %v3615_v13   ;;  %v3823_v57 = vld [vmem:[%s6991_s9] sm:$0x3]  ;;  %v3835_v12 = vld [vmem:[%s6992_s10 + $0x28] sm:$0xff]  ;;  %v3833_v16 = vld [vmem:[%s6992_s10 + $0x18] sm:$0xff] }
 0x5b3   : > { %4519 = vmatpush3.msra.mxu1 %v3628_v53  ;;  %4846 = vset.pattern.permute.xlu1 %v4940_v26  ;;  %v3834_v37 = vld [vmem:[%s6992_s10 + $0x20] sm:$0xff]  ;;  %v3832_v38 = vld [vmem:[%s6992_s10 + $0x10] sm:$0xff]  ;;  %v3831_v17 = vld [vmem:[%s6992_s10 + $0x8] sm:$0xff] }
 0x5b4   : > { %4521 = vmatmul.mubr.msk.f32.vlgmr.msra.gmra.mxu1 %vm3630_vm12, %v3611_v14  ;;  %4523 = vmatprep.subr.mxu1 %v4941_v4  ;;  %v3612_v32 = vld [vmem:[#allocation2] sm:$0xff] }
 0x5b5   : > { %4530 = vmatprep.subr.mxu0 %v4941_v4  ;;  %4527 = vmatprep.mubr.msk.f32.mxu1 %vm4942_vm13, %v4941_v4  ;;  %v3613_v6 = vld [vmem:[#allocation2 + $0x8] sm:$0xf]  ;;  %v4096_v47 = vld [vmem:[%s6988_s6] ss:$0 sm:$0xff] }
 0x5b6   : > { %3618 = vperm.xlu0 %4845, %v3614_v58   ;;  %4546 = vmatprep.mubr.msk.f32.mxu0 %vm4942_vm13, %v4941_v4  ;;  %v4099_v45 = vld [vmem:[%s6990_s8] ss:$0 sm:$0xff] }
 0x5b7   : > { %3826 = vperm.xlu1 %4846, %v3823_v57   ;;  %4531 = vmatpush3.msra.mxu0 %v3837_v23  ;;  %vm3744_vm15 = vcmp.eq.s32.totalorder %v6892_v51, %v4099_v45  ;;  %v3830_v61 = vld [vmem:[%s6992_s10] sm:$0xff] }
 0x5b8   : > { %4532 = vmatprep.subr.mxu0 %v4941_v4  ;;  %v3745_v59 = vsel %vm3744_vm15, 1.0, %v4941_v4  ;;  %v4102_v15 = vld [vmem:[%s6993_s11] ss:$0 sm:$0xff] }
 0x5b9   : > { %4533 = vmatpush3.msra.mxu0 %v3836_v22 }
 0x5ba   : > { %4534 = vmatprep.subr.mxu0 %v4941_v4 }
 0x5bb   : > { %4535 = vmatpush3.msra.mxu0 %v3835_v12 }
 0x5bc   : > { %4536 = vmatprep.subr.mxu0 %v4941_v4 }
 0x5bd   : > { %4537 = vmatpush3.msra.mxu0 %v3834_v37 }
 0x5be   : > { %4538 = vmatprep.subr.mxu0 %v4941_v4 }
 0x5bf   : > { %4539 = vmatpush3.msra.mxu0 %v3833_v16 }
 0x5c0   : > { %4540 = vmatprep.subr.mxu0 %v4941_v4 }
 0x5c1   : > { %4541 = vmatpush3.msra.mxu0 %v3832_v38 }
 0x5c2   : > { %4542 = vmatprep.subr.mxu0 %v4941_v4 }
 0x5c3   : > { %4543 = vmatpush3.msra.mxu0 %v3831_v17 }
 0x5c4   : > { %4544 = vmatprep.subr.mxu0 %v4941_v4 }
 0x5c5   : > { %4545 = vmatpush3.msra.mxu0 %v3830_v61 }
 0x62d   : > { %v3624_v31 = vpop.permute.xlu0 %3623 }
 0x62e   : > { %v3627_v30 = vmul.f32 %v3624_v31, %v3613_v6 }
 0x631   : > { %v3619_v10 = vpop.permute.xlu0 %3618 }
 0x632   : > { %v3626_v0 = vmul.f32 %v3619_v10, %v3612_v32  ;;  %v3827_v25 = vpop.permute.xlu1 %3826 }
 0x674   : > { %v4522_v20 = vpop.f32.mrf.mxu1 }
 0x675   : > { %v3717_v2 = vadd.f32 %v4522_v20, %v3627_v30 }
 0x676   : > { %v3707_v3 = vpop.f32.mrf.mxu1 }
 0x677   : > { %v3726_v55 = vadd.f32 %v4096_v47, %v3717_v2  ;;  %v3716_v8 = vadd.f32 %v3707_v3, %v3626_v0 }
 0x679   : > { %v3730_v35 = vmin.f32 %v3726_v55, 0.0  ;;  %v3725_v46 = vadd.f32 %v4096_v47, %v3716_v8  ;;  %vm3728_vm0 = vcmp.gt.f32.partialorder %v3726_v55, 0.0 }
 0x67b   : > { %v3733_v24 = vmul.f32 1.442695, %v3730_v35  ;;  %v3729_v1 = vmin.f32 %v3725_v46, 0.0  ;;  %vm3727_vm1 = vcmp.gt.f32.partialorder %v3725_v46, 0.0 }
 0x67d   : > { %4847 = vpow2.f32 %v3733_v24  ;;  %v3731_v60 = vmul.f32 1.442695, %v3729_v1 }
 0x67f   : > { %4849 = vpow2.f32 %v3731_v60 }
 0x68a   : > { %v4848_v33 = vpop.eup %4847 }
 0x68b   : > { %v4098_v44 = vadd.f32 -1.0, %v4848_v33 }
 0x68c   : > { %v4850_v29 = vpop.eup %4849 }
 0x68d   : > { %v3738_v43 = vsel %vm3728_vm0, %v3726_v55, %v4098_v44  ;;  %v4097_v41 = vadd.f32 -1.0, %v4850_v29 }
 0x68e   : > { %4524 = vmatpush3.msk.msra.mxu1 %vm3749_vm14, %v3738_v43 }
 0x68f   : > { %4525 = vmatprep.subr.mxu1 %v4941_v4  ;;  %v3737_v62 = vsel %vm3727_vm1, %v3725_v46, %v4097_v41 }
 0x690   : > { %4526 = vmatpush3.msra.mxu1 %v3737_v62 }
 0x691   : > { %4528 = vmatmul.mubr.msk.f32.vlgmr.msra.gmra.mxu1 %vm571_vm7, %v3745_v59 }
 0x751   : > { %v3819_v28 = vpop.f32.mrf.mxu1 }
 0x752   : > { %v3829_v51 = vmul.f32 %v3827_v25, %v3819_v28 }
 0x753   : > { %v4529_v50 = vpop.f32.mrf.mxu1 }
 0x754   : > { %4547 = vmatmul.mubr.msk.f32.vlgmr.msra.gmra.mxu0 %vm3602_vm9, %v3829_v51 }
 0x814   : > { %v3914_v27 = vpop.f32.mrf.mxu0 }
 0x815   : > { %v3915_v18 = vadd.f32 %v4102_v15, %v3914_v27 }
 0x816   : > { %v4548_v11 = vpop.f32.mrf.mxu0 }
 0x817   : > { %v3918_v9 = vmul.f32 %v3915_v18, %v3915_v18 }
 0x819   : > { %v3920_v39 = vsel %vm3919_vm2, %v3918_v9, 0.0 }
 0x81a   : > { %3921 = vadd.xlane.f32.xlu1 %v3920_v39 }
 0x8a3   : > { %v3922_v5 = vpop.xlane.xlu1 %3921 }
 0x8a4   : > { %v3923_v63 = vmax.f32 %v3922_v5, 1e-24 }
 0x8a6   : > { %4851 = vrsqrt.f32 %v3923_v63 }
 0x8b3   : > { %v4852_v21 = vpop.eup %4851 }
 0x8b4   : > { %v3925_v42 = vmul.f32 %v4852_v21, %v3915_v18 }
 0x8b6   : > { %3926 = vst.msk [vmem:[#allocation6] sm:$0x3] %vm3919_vm2, %v3925_v42 }
 0x8b7 PF: > { %p4564_p4 = scmp.eq.s32.totalorder %s5015_s22, 1  ;;  %s4943_s23 = smov [#allocation6]  }
 0x8b8   : > { %s3934_s24 = sshll.u32 %s4943_s23, 4  ;;  %s3935_s24 = int_to_ptr.vmem [resolvable:$true] %s3934_s24 }
 0x8b9   : > { %s4879_s25 = scalar_lea.vmem %s3935_s24, 32  ;;  %p4886_p8 = scmp.lt.s32.totalorder %s3935_s24, %s3935_s24 }
 0x8ba   : > { %p4880_p5 = scmp.ne.s32.totalorder %s3935_s24, %s4879_s25  ;;  %p4887_p9 = scmp.lt.s32.totalorder %s4879_s25, %s4879_s25 }
 0x8bc   : > { %p4881_p6 = pnand %p4880_p5, %p4564_p4  ;;  %p4888_p10 = por %p4887_p9, %p4886_p8 }
 0x8be   : > { %p4882_p7 = pneg %p4881_p6 }
 0x8c0   : > { %p4889_p11 = pnand %p4888_p10, %p4882_p7 }
 0x8c2   : > { %4892 = shalt.err (!%p4889_p11)
}
 0x8c3   : > { %4555 = dma.vmem_to_hbm [thread:$0]  (%p4564_p4), %s3935_s24, 32, %s6994_s12, [#allocation5]  }
 0x8c4   : > { %4912 = dma.done.wait (%p4564_p4), [#allocation5], 32  }
 0x8c5   : > { %4914 = vsyncadd (%p4564_p4), [#allocation5], 4294967264 }
 0x8c6 PF: > { %s24_s21 = sadd.s32 1, %s4917_s21  }
 0x8c7   : > { %p21_p12 = scmp.ge.s32.totalorder %s24_s21, 4  }
 0x8c9   :  { %23 = sbr.rel (!%p21_p12) target bundleno = 2 (0x2), region = 114 }
 0x8ce   :  { %3947 = vsyncpa [#allocation4], 1 }
 0x8cf   :  { %3949 = vsyncpa [#allocation4 + $0x1], 1 }
 0x8d0   :  { %3950 = vsyncpa [#allocation5], 1 }
 0x8d1   :  { %3952 = vsyncpa [#allocation5 + $0x1], 1 }

</bundles_post_ra>
